<compile_context>
chip_gen: v6e
topology: v6e:2x2x1
jax: 0.10.0
libtpu: 0.0.40
codegen_flags: <defaults>
</compile_context>

<pallas_src>
import jax
import jax.numpy as jnp
import numpy as np
from jax.experimental import pallas as pl
from jax.experimental.pallas import tpu as pltpu

LANE = 128
SUBLANE = 8


# ---------------------------------------------------------------------------
# Fused kernel: conv1+BN1+ReLU -> conv2+BN2 -> (+ shortcut 1x1 conv+BN) -> ReLU
#   x_ref   : (1, H, W, Cin)        bf16 channel-padded input (one batch elem)
#   w1_ref  : (9, Cin, Cout)        bf16 conv1 weight, tap-major (dh*3+dw)
#   w2_ref  : (9, Cout, Cout)       bf16 conv2 weight, tap-major
#   wsc_ref : (Cin, Cout)           bf16 1x1 shortcut conv weight
#   sb_ref  : (8, Cout)             f32  rows: s1, b1, s2, b2, ssc, bsc, 0, 0
#   o_ref   : (1, H, W, Cout)       bf16 output
# scratch:
#   xpad_ref  : (H+2, Wpad, Cin)    bf16 spatially padded x
#   y1pad_ref : (H+2, Wpad, Cout)   bf16 spatially padded relu(BN1(conv1(x)))
#   acc_ref   : (H*W, Cout)         f32  per-tap matmul accumulator
# ---------------------------------------------------------------------------
def fused_res_kernel(x_ref, w1_ref, w2_ref, wsc_ref, sb_ref, o_ref,
                     xpad_ref, y1pad_ref, acc_ref):
    _, H, W, Cout = o_ref.shape
    Cin = x_ref.shape[3]
    Hp = xpad_ref.shape[0]          # H + 2
    Wpad_in = xpad_ref.shape[1:]    # (Wpad, Cin)
    Wpad_out = y1pad_ref.shape[1:]  # (Wpad, Cout)

    # ---- zero ONLY the halo rows / cols (interior fully overwritten) -------
    xpad_ref[0:1] = jnp.zeros((1,) + Wpad_in, xpad_ref.dtype)
    xpad_ref[H + 1:H + 2] = jnp.zeros((1,) + Wpad_in, xpad_ref.dtype)
    xpad_ref[:, 0:1] = jnp.zeros((Hp, 1, Cin), xpad_ref.dtype)
    xpad_ref[:, W + 1:W + 2] = jnp.zeros((Hp, 1, Cin), xpad_ref.dtype)
    y1pad_ref[0:1] = jnp.zeros((1,) + Wpad_out, y1pad_ref.dtype)
    y1pad_ref[H + 1:H + 2] = jnp.zeros((1,) + Wpad_out, y1pad_ref.dtype)
    y1pad_ref[:, 0:1] = jnp.zeros((Hp, 1, Cout), y1pad_ref.dtype)
    y1pad_ref[:, W + 1:W + 2] = jnp.zeros((Hp, 1, Cout), y1pad_ref.dtype)

    # ---- padded input interior (no HBM jnp.pad round trip) -----------------
    xpad_ref[1:H + 1, 1:W + 1, :] = x_ref[0]

    # ---- conv1: 9 per-tap matmuls accumulated in f32 (no im2col buffer) ----
    acc_ref[...] = jnp.zeros_like(acc_ref)
    for tap in range(9):
        dh, dw = tap // 3, tap % 3
        win = xpad_ref[dh:dh + H, dw:dw + W, :].reshape(H * W, Cin)
        acc_ref[...] += jnp.dot(win, w1_ref[tap],
                                preferred_element_type=jnp.float32)

    # folded BN1 + ReLU (f32)
    y1 = jnp.maximum(acc_ref[...] * sb_ref[0:1, :] + sb_ref[1:2, :], 0.0)
    # TODO(synk): Dropout(p=0.1) is an eval-mode no-op; training not impl.

    # intermediate stays resident in VMEM (never written to HBM)
    y1pad_ref[1:H + 1, 1:W + 1, :] = (
        y1.reshape(H, W, Cout).astype(y1pad_ref.dtype))

    # ---- conv2: 9 per-tap matmuls accumulated in f32 -----------------------
    acc_ref[...] = jnp.zeros_like(acc_ref)
    for tap in range(9):
        dh, dw = tap // 3, tap % 3
        win = y1pad_ref[dh:dh + H, dw:dw + W, :].reshape(H * W, Cout)
        acc_ref[...] += jnp.dot(win, w2_ref[tap],
                                preferred_element_type=jnp.float32)

    # shortcut: 1x1 conv + folded BN on the already-resident x
    sc = jnp.dot(x_ref[0].reshape(H * W, Cin), wsc_ref[...],
                 preferred_element_type=jnp.float32)

    out = jnp.maximum(acc_ref[...] * sb_ref[2:3, :] + sb_ref[3:4, :]
                      + sc * sb_ref[4:5, :] + sb_ref[5:6, :], 0.0)
    o_ref[...] = out.reshape(1, H, W, Cout).astype(o_ref.dtype)


# ---------------------------------------------------------------------------
# Wrapper
# ---------------------------------------------------------------------------
def _round_up(x, m):
    return ((x + m - 1) // m) * m


def _pad_axis(a, axis, target):
    pad = target - a.shape[axis]
    if pad <= 0:
        return a
    widths = [(0, 0)] * a.ndim
    widths[axis] = (0, pad)
    return jnp.pad(a, widths)


def fold_bn(gamma, beta, mean, var, eps=1e-5):
    scale = gamma / jnp.sqrt(var + eps)
    bias = beta - mean * scale
    return scale, bias


def res_layer_forward(x_nchw, params):
    """x_nchw: (N, Cin, H, W) float32. Returns (N, Cout, H, W) float32."""
    # TODO(synk): for stacked layers keep activations NHWC / channel-padded
    # end-to-end and drop these transposes, pads and slices.
    x = jnp.transpose(x_nchw, (0, 2, 3, 1))          # NHWC
    N, H, W, Cin = x.shape
    Cout = params["w1"].shape[-1]
    Cp_in, Cp_out = _round_up(Cin, LANE), _round_up(Cout, LANE)
    Wpad = _round_up(W + 2, SUBLANE)                 # sublane-rounded extent

    # pad channels to lane width -> unmasked lane-dense loads/stores
    xb = _pad_axis(x, 3, Cp_in).astype(jnp.bfloat16)

    # fold BN (eval mode) into per-channel scale/bias; pack 6 vectors into one
    def prep_sb(p):
        s, b = fold_bn(*p)
        return (_pad_axis(s, 0, Cp_out).astype(jnp.float32),
                _pad_axis(b, 0, Cp_out).astype(jnp.float32))

    s1, b1 = prep_sb(params["bn1"])
    s2, b2 = prep_sb(params["bn2"])
    ssc, bsc = prep_sb(params["bn_sc"])
    zero = jnp.zeros((Cp_out,), jnp.float32)
    sb = jnp.stack([s1, b1, s2, b2, ssc, bsc, zero, zero], axis=0)

    # conv weights: pad channels, tap-major (9, Cin, Cout)
    w1 = _pad_axis(_pad_axis(params["w1"], 2, Cp_in), 3, Cp_out)
    w1 = w1.reshape(9, Cp_in, Cp_out).astype(jnp.bfloat16)
    w2 = _pad_axis(_pad_axis(params["w2"], 2, Cp_out), 3, Cp_out)
    w2 = w2.reshape(9, Cp_out, Cp_out).astype(jnp.bfloat16)
    wsc = _pad_axis(_pad_axis(params["w_sc"], 0, Cp_in), 1, Cp_out)
    wsc = wsc.astype(jnp.bfloat16)

    out = pl.pallas_call(
        fused_res_kernel,
        out_shape=jax.ShapeDtypeStruct((N, H, W, Cp_out), jnp.bfloat16),
        grid=(N,),
        in_specs=[
            pl.BlockSpec((1, H, W, Cp_in), lambda n: (n, 0, 0, 0)),
            pl.BlockSpec((9, Cp_in, Cp_out), lambda n: (0, 0, 0)),
            pl.BlockSpec((9, Cp_out, Cp_out), lambda n: (0, 0, 0)),
            pl.BlockSpec((Cp_in, Cp_out), lambda n: (0, 0)),
            pl.BlockSpec((8, Cp_out), lambda n: (0, 0)),
        ],
        out_specs=pl.BlockSpec((1, H, W, Cp_out), lambda n: (n, 0, 0, 0)),
        scratch_shapes=[
            pltpu.VMEM((H + 2, Wpad, Cp_in), jnp.bfloat16),
            pltpu.VMEM((H + 2, Wpad, Cp_out), jnp.bfloat16),
            pltpu.VMEM((H * W, Cp_out), jnp.float32),
        ],
        compiler_params=pltpu.CompilerParams(
            dimension_semantics=("parallel",),
            vmem_limit_bytes=48 * 1024 * 1024),
    )(xb, w1, w2, wsc, sb)

    out = out[..., :Cout].astype(jnp.float32)        # drop padded channels
    return jnp.transpose(out, (0, 3, 1, 2))          # back to NCHW


# ---------------------------------------------------------------------------
# Pure-JAX reference (same bf16 matmul inputs / f32 accumulation)
# ---------------------------------------------------------------------------
def _ref_forward(x_nchw, params):
    x = jnp.transpose(x_nchw, (0, 2, 3, 1))
    xb = x.astype(jnp.bfloat16)
    dn = ("NHWC", "HWIO", "NHWC")

    def bnf(y, p, eps=1e-5):
        g, b, m, v = p
        s = g / jnp.sqrt(v + eps)
        return y * s + (b - m * s)

    y = jax.lax.conv_general_dilated(
        xb, params["w1"].astype(jnp.bfloat16), (1, 1), "SAME",
        dimension_numbers=dn, preferred_element_type=jnp.float32)
    y = jnp.maximum(bnf(y, params["bn1"]), 0.0)
    y = jax.lax.conv_general_dilated(
        y.astype(jnp.bfloat16), params["w2"].astype(jnp.bfloat16), (1, 1),
        "SAME", dimension_numbers=dn, preferred_element_type=jnp.float32)
    y = bnf(y, params["bn2"])
    sc = jnp.einsum("nhwc,cd->nhwd", xb, params["w_sc"].astype(jnp.bfloat16),
                    preferred_element_type=jnp.float32)
    sc = bnf(sc, params["bn_sc"])
    out = jnp.maximum(y + sc, 0.0)
    return jnp.transpose(out, (0, 3, 1, 2))


if __name__ == "__main__":
    key = jax.random.PRNGKey(0)
    N, Cin, Cout, H, W = 2, 4, 8, 16, 16

    ks = jax.random.split(key, 16)
    params = {
        # conv weights stored HWIO (3,3,Cin,Cout); shortcut (Cin,Cout)
        "w1": jax.random.normal(ks[0], (3, 3, Cin, Cout), jnp.float32) * 0.1,
        "w2": jax.random.normal(ks[1], (3, 3, Cout, Cout), jnp.float32) * 0.1,
        "w_sc": jax.random.normal(ks[2], (Cin, Cout), jnp.float32) * 0.1,
        # BN params: (gamma, beta, running_mean, running_var)
        "bn1": (jax.random.normal(ks[3], (Cout,)) * 0.1 + 1.0,
                jax.random.normal(ks[4], (Cout,)) * 0.1,
                jax.random.normal(ks[5], (Cout,)) * 0.1,
                jax.random.uniform(ks[6], (Cout,), minval=0.5, maxval=1.5)),
        "bn2": (jax.random.normal(ks[7], (Cout,)) * 0.1 + 1.0,
                jax.random.normal(ks[8], (Cout,)) * 0.1,
                jax.random.normal(ks[9], (Cout,)) * 0.1,
                jax.random.uniform(ks[10], (Cout,), minval=0.5, maxval=1.5)),
        "bn_sc": (jax.random.normal(ks[11], (Cout,)) * 0.1 + 1.0,
                  jax.random.normal(ks[12], (Cout,)) * 0.1,
                  jax.random.normal(ks[13], (Cout,)) * 0.1,
                  jax.random.uniform(ks[14], (Cout,), minval=0.5, maxval=1.5)),
    }

    x = jax.random.normal(ks[15], (N, Cin, H, W), jnp.float32)

    out = jax.block_until_ready(res_layer_forward(x, params))
    ref = jax.block_until_ready(_ref_forward(x, params))

    assert out.shape == (N, Cout, H, W), out.shape
    # kernel output goes through one extra bf16 rounding at the HBM writeback
    np.testing.assert_allclose(np.asarray(out), np.asarray(ref),
                               rtol=2e-2, atol=2e-2)
    print("KERNEL_OK")
</pallas_src>

<mosaic_0001>
module attributes {stable_mosaic.version = 11 : i64} {
  func.func @fused_res_kernel(%arg0: i32, %arg1: memref<1x16x16x128xbf16, #tpu.memory_space<vmem>>, %arg2: memref<9x128x128xbf16, #tpu.memory_space<vmem>>, %arg3: memref<9x128x128xbf16, #tpu.memory_space<vmem>>, %arg4: memref<128x128xbf16, #tpu.memory_space<vmem>>, %arg5: memref<8x128xf32, #tpu.memory_space<vmem>>, %arg6: memref<1x16x16x128xbf16, #tpu.memory_space<vmem>>, %arg7: memref<18x24x128xbf16, #tpu.memory_space<vmem>>, %arg8: memref<18x24x128xbf16, #tpu.memory_space<vmem>>, %arg9: memref<256x128xf32, #tpu.memory_space<vmem>>) attributes {dimension_semantics = [#tpu.dimension_semantics<parallel>], iteration_bounds = array<i64: 2>, scalar_prefetch = 0 : i64, scratch_operands = 3 : i64, tpu.core_type = #tpu.core_type<tc>, window_params = [{transform_indices = @transform_0, window_bounds = array<i64: 1, 16, 16, 128>}, {pipeline_mode = #tpu.pipeline_mode<synchronous>, transform_indices = @transform_1, window_bounds = array<i64: 9, 128, 128>}, {pipeline_mode = #tpu.pipeline_mode<synchronous>, transform_indices = @transform_2, window_bounds = array<i64: 9, 128, 128>}, {pipeline_mode = #tpu.pipeline_mode<synchronous>, transform_indices = @transform_3, window_bounds = array<i64: 128, 128>}, {pipeline_mode = #tpu.pipeline_mode<synchronous>, transform_indices = @transform_4, window_bounds = array<i64: 8, 128>}, {transform_indices = @transform_5, window_bounds = array<i64: 1, 16, 16, 128>}]} {
    %cst = arith.constant 0.000000e+00 : bf16
    %0 = vector.broadcast %cst : bf16 to vector<1x24x128xbf16>
    %c0 = arith.constant 0 : index
    %c0_0 = arith.constant 0 : index
    %c0_1 = arith.constant 0 : index
    %1 = vector.load %arg7[%c0, %c0_0, %c0_1] : memref<18x24x128xbf16, #tpu.memory_space<vmem>>, vector<1x24x128xbf16>
    tpu.vector_store %arg7[%c0, %c0_0, %c0_1], %0 {strides = array<i32>} : memref<18x24x128xbf16, #tpu.memory_space<vmem>>, vector<1x24x128xbf16>,
    %cst_2 = arith.constant 0.000000e+00 : bf16
    %2 = vector.broadcast %cst_2 : bf16 to vector<1x24x128xbf16>
    %c17 = arith.constant 17 : index
    %c0_3 = arith.constant 0 : index
    %c0_4 = arith.constant 0 : index
    %3 = vector.load %arg7[%c17, %c0_3, %c0_4] : memref<18x24x128xbf16, #tpu.memory_space<vmem>>, vector<1x24x128xbf16>
    tpu.vector_store %arg7[%c17, %c0_3, %c0_4], %2 {strides = array<i32>} : memref<18x24x128xbf16, #tpu.memory_space<vmem>>, vector<1x24x128xbf16>,
    %cst_5 = arith.constant 0.000000e+00 : bf16
    %4 = vector.broadcast %cst_5 : bf16 to vector<18x1x128xbf16>
    %c0_6 = arith.constant 0 : index
    %c0_7 = arith.constant 0 : index
    %c0_8 = arith.constant 0 : index
    %5 = vector.load %arg7[%c0_6, %c0_7, %c0_8] : memref<18x24x128xbf16, #tpu.memory_space<vmem>>, vector<18x1x128xbf16>
    tpu.vector_store %arg7[%c0_6, %c0_7, %c0_8], %4 {strides = array<i32>} : memref<18x24x128xbf16, #tpu.memory_space<vmem>>, vector<18x1x128xbf16>,
    %cst_9 = arith.constant 0.000000e+00 : bf16
    %6 = vector.broadcast %cst_9 : bf16 to vector<18x1x128xbf16>
    %c0_10 = arith.constant 0 : index
    %c17_11 = arith.constant 17 : index
    %c0_12 = arith.constant 0 : index
    %7 = vector.load %arg7[%c0_10, %c17_11, %c0_12] : memref<18x24x128xbf16, #tpu.memory_space<vmem>>, vector<18x1x128xbf16>
    tpu.vector_store %arg7[%c0_10, %c17_11, %c0_12], %6 {strides = array<i32>} : memref<18x24x128xbf16, #tpu.memory_space<vmem>>, vector<18x1x128xbf16>,
    %cst_13 = arith.constant 0.000000e+00 : bf16
    %8 = vector.broadcast %cst_13 : bf16 to vector<1x24x128xbf16>
    %c0_14 = arith.constant 0 : index
    %c0_15 = arith.constant 0 : index
    %c0_16 = arith.constant 0 : index
    %9 = vector.load %arg8[%c0_14, %c0_15, %c0_16] : memref<18x24x128xbf16, #tpu.memory_space<vmem>>, vector<1x24x128xbf16>
    tpu.vector_store %arg8[%c0_14, %c0_15, %c0_16], %8 {strides = array<i32>} : memref<18x24x128xbf16, #tpu.memory_space<vmem>>, vector<1x24x128xbf16>,
    %cst_17 = arith.constant 0.000000e+00 : bf16
    %10 = vector.broadcast %cst_17 : bf16 to vector<1x24x128xbf16>
    %c17_18 = arith.constant 17 : index
    %c0_19 = arith.constant 0 : index
    %c0_20 = arith.constant 0 : index
    %11 = vector.load %arg8[%c17_18, %c0_19, %c0_20] : memref<18x24x128xbf16, #tpu.memory_space<vmem>>, vector<1x24x128xbf16>
    tpu.vector_store %arg8[%c17_18, %c0_19, %c0_20], %10 {strides = array<i32>} : memref<18x24x128xbf16, #tpu.memory_space<vmem>>, vector<1x24x128xbf16>,
    %cst_21 = arith.constant 0.000000e+00 : bf16
    %12 = vector.broadcast %cst_21 : bf16 to vector<18x1x128xbf16>
    %c0_22 = arith.constant 0 : index
    %c0_23 = arith.constant 0 : index
    %c0_24 = arith.constant 0 : index
    %13 = vector.load %arg8[%c0_22, %c0_23, %c0_24] : memref<18x24x128xbf16, #tpu.memory_space<vmem>>, vector<18x1x128xbf16>
    tpu.vector_store %arg8[%c0_22, %c0_23, %c0_24], %12 {strides = array<i32>} : memref<18x24x128xbf16, #tpu.memory_space<vmem>>, vector<18x1x128xbf16>,
    %cst_25 = arith.constant 0.000000e+00 : bf16
    %14 = vector.broadcast %cst_25 : bf16 to vector<18x1x128xbf16>
    %c0_26 = arith.constant 0 : index
    %c17_27 = arith.constant 17 : index
    %c0_28 = arith.constant 0 : index
    %15 = vector.load %arg8[%c0_26, %c17_27, %c0_28] : memref<18x24x128xbf16, #tpu.memory_space<vmem>>, vector<18x1x128xbf16>
    tpu.vector_store %arg8[%c0_26, %c17_27, %c0_28], %14 {strides = array<i32>} : memref<18x24x128xbf16, #tpu.memory_space<vmem>>, vector<18x1x128xbf16>,
    %c0_29 = arith.constant 0 : index
    %c0_30 = arith.constant 0 : index
    %c0_31 = arith.constant 0 : index
    %c0_32 = arith.constant 0 : index
    %16 = vector.load %arg1[%c0_29, %c0_30, %c0_31, %c0_32] : memref<1x16x16x128xbf16, #tpu.memory_space<vmem>>, vector<1x16x16x128xbf16>
    %17 = vector.shape_cast %16 : vector<1x16x16x128xbf16> to vector<16x16x128xbf16>
    %c1 = arith.constant 1 : index
    %c1_33 = arith.constant 1 : index
    %c0_34 = arith.constant 0 : index
    %18 = vector.load %arg7[%c1, %c1_33, %c0_34] : memref<18x24x128xbf16, #tpu.memory_space<vmem>>, vector<16x16x128xbf16>
    tpu.vector_store %arg7[%c1, %c1_33, %c0_34], %17 {strides = array<i32>} : memref<18x24x128xbf16, #tpu.memory_space<vmem>>, vector<16x16x128xbf16>,
    %cst_35 = arith.constant 0.000000e+00 : f32
    %19 = vector.broadcast %cst_35 : f32 to vector<256x128xf32>
    %c0_36 = arith.constant 0 : index
    %c0_37 = arith.constant 0 : index
    %20 = vector.load %arg9[%c0_36, %c0_37] : memref<256x128xf32, #tpu.memory_space<vmem>>, vector<256x128xf32>
    tpu.vector_store %arg9[%c0_36, %c0_37], %19 {strides = array<i32>} : memref<256x128xf32, #tpu.memory_space<vmem>>, vector<256x128xf32>,
    %c0_38 = arith.constant 0 : index
    %c0_39 = arith.constant 0 : index
    %c0_40 = arith.constant 0 : index
    %21 = vector.load %arg7[%c0_38, %c0_39, %c0_40] : memref<18x24x128xbf16, #tpu.memory_space<vmem>>, vector<16x16x128xbf16>
    %22 = vector.shape_cast %21 : vector<16x16x128xbf16> to vector<256x128xbf16>
    %c0_41 = arith.constant 0 : index
    %c0_42 = arith.constant 0 : index
    %23 = vector.load %arg9[%c0_41, %c0_42] : memref<256x128xf32, #tpu.memory_space<vmem>>, vector<256x128xf32>
    %c0_43 = arith.constant 0 : index
    %c0_44 = arith.constant 0 : index
    %c0_45 = arith.constant 0 : index
    %24 = vector.load %arg2[%c0_43, %c0_44, %c0_45] : memref<9x128x128xbf16, #tpu.memory_space<vmem>>, vector<1x128x128xbf16>
    %25 = vector.shape_cast %24 : vector<1x128x128xbf16> to vector<128x128xbf16>
    %cst_46 = arith.constant dense<0.000000e+00> : vector<256x128xf32>
    %26 = tpu.matmul %22, %25, %cst_46 {dimension_numbers = #tpu.dot_dimension_numbers<[1], [0], [0], [1], [0, 0, 1, 1], [], []>} : vector<256x128xbf16>, vector<128x128xbf16>, vector<256x128xf32> -> vector<256x128xf32>
    %27 = arith.addf %23, %26 : vector<256x128xf32>
    %c0_47 = arith.constant 0 : index
    %c0_48 = arith.constant 0 : index
    %28 = vector.load %arg9[%c0_47, %c0_48] : memref<256x128xf32, #tpu.memory_space<vmem>>, vector<256x128xf32>
    tpu.vector_store %arg9[%c0_47, %c0_48], %27 {strides = array<i32>} : memref<256x128xf32, #tpu.memory_space<vmem>>, vector<256x128xf32>,
    %c0_49 = arith.constant 0 : index
    %c1_50 = arith.constant 1 : index
    %c0_51 = arith.constant 0 : index
    %29 = vector.load %arg7[%c0_49, %c1_50, %c0_51] : memref<18x24x128xbf16, #tpu.memory_space<vmem>>, vector<16x16x128xbf16>
    %30 = vector.shape_cast %29 : vector<16x16x128xbf16> to vector<256x128xbf16>
    %c0_52 = arith.constant 0 : index
    %c0_53 = arith.constant 0 : index
    %31 = vector.load %arg9[%c0_52, %c0_53] : memref<256x128xf32, #tpu.memory_space<vmem>>, vector<256x128xf32>
    %c1_54 = arith.constant 1 : index
    %c0_55 = arith.constant 0 : index
    %c0_56 = arith.constant 0 : index
    %32 = vector.load %arg2[%c1_54, %c0_55, %c0_56] : memref<9x128x128xbf16, #tpu.memory_space<vmem>>, vector<1x128x128xbf16>
    %33 = vector.shape_cast %32 : vector<1x128x128xbf16> to vector<128x128xbf16>
    %cst_57 = arith.constant dense<0.000000e+00> : vector<256x128xf32>
    %34 = tpu.matmul %30, %33, %cst_57 {dimension_numbers = #tpu.dot_dimension_numbers<[1], [0], [0], [1], [0, 0, 1, 1], [], []>} : vector<256x128xbf16>, vector<128x128xbf16>, vector<256x128xf32> -> vector<256x128xf32>
    %35 = arith.addf %31, %34 : vector<256x128xf32>
    %c0_58 = arith.constant 0 : index
    %c0_59 = arith.constant 0 : index
    %36 = vector.load %arg9[%c0_58, %c0_59] : memref<256x128xf32, #tpu.memory_space<vmem>>, vector<256x128xf32>
    tpu.vector_store %arg9[%c0_58, %c0_59], %35 {strides = array<i32>} : memref<256x128xf32, #tpu.memory_space<vmem>>, vector<256x128xf32>,
    %c0_60 = arith.constant 0 : index
    %c2 = arith.constant 2 : index
    %c0_61 = arith.constant 0 : index
    %37 = vector.load %arg7[%c0_60, %c2, %c0_61] : memref<18x24x128xbf16, #tpu.memory_space<vmem>>, vector<16x16x128xbf16>
    %38 = vector.shape_cast %37 : vector<16x16x128xbf16> to vector<256x128xbf16>
    %c0_62 = arith.constant 0 : index
    %c0_63 = arith.constant 0 : index
    %39 = vector.load %arg9[%c0_62, %c0_63] : memref<256x128xf32, #tpu.memory_space<vmem>>, vector<256x128xf32>
    %c2_64 = arith.constant 2 : index
    %c0_65 = arith.constant 0 : index
    %c0_66 = arith.constant 0 : index
    %40 = vector.load %arg2[%c2_64, %c0_65, %c0_66] : memref<9x128x128xbf16, #tpu.memory_space<vmem>>, vector<1x128x128xbf16>
    %41 = vector.shape_cast %40 : vector<1x128x128xbf16> to vector<128x128xbf16>
    %cst_67 = arith.constant dense<0.000000e+00> : vector<256x128xf32>
    %42 = tpu.matmul %38, %41, %cst_67 {dimension_numbers = #tpu.dot_dimension_numbers<[1], [0], [0], [1], [0, 0, 1, 1], [], []>} : vector<256x128xbf16>, vector<128x128xbf16>, vector<256x128xf32> -> vector<256x128xf32>
    %43 = arith.addf %39, %42 : vector<256x128xf32>
    %c0_68 = arith.constant 0 : index
    %c0_69 = arith.constant 0 : index
    %44 = vector.load %arg9[%c0_68, %c0_69] : memref<256x128xf32, #tpu.memory_space<vmem>>, vector<256x128xf32>
    tpu.vector_store %arg9[%c0_68, %c0_69], %43 {strides = array<i32>} : memref<256x128xf32, #tpu.memory_space<vmem>>, vector<256x128xf32>,
    %c1_70 = arith.constant 1 : index
    %c0_71 = arith.constant 0 : index
    %c0_72 = arith.constant 0 : index
    %45 = vector.load %arg7[%c1_70, %c0_71, %c0_72] : memref<18x24x128xbf16, #tpu.memory_space<vmem>>, vector<16x16x128xbf16>
    %46 = vector.shape_cast %45 : vector<16x16x128xbf16> to vector<256x128xbf16>
    %c0_73 = arith.constant 0 : index
    %c0_74 = arith.constant 0 : index
    %47 = vector.load %arg9[%c0_73, %c0_74] : memref<256x128xf32, #tpu.memory_space<vmem>>, vector<256x128xf32>
    %c3 = arith.constant 3 : index
    %c0_75 = arith.constant 0 : index
    %c0_76 = arith.constant 0 : index
    %48 = vector.load %arg2[%c3, %c0_75, %c0_76] : memref<9x128x128xbf16, #tpu.memory_space<vmem>>, vector<1x128x128xbf16>
    %49 = vector.shape_cast %48 : vector<1x128x128xbf16> to vector<128x128xbf16>
    %cst_77 = arith.constant dense<0.000000e+00> : vector<256x128xf32>
    %50 = tpu.matmul %46, %49, %cst_77 {dimension_numbers = #tpu.dot_dimension_numbers<[1], [0], [0], [1], [0, 0, 1, 1], [], []>} : vector<256x128xbf16>, vector<128x128xbf16>, vector<256x128xf32> -> vector<256x128xf32>
    %51 = arith.addf %47, %50 : vector<256x128xf32>
    %c0_78 = arith.constant 0 : index
    %c0_79 = arith.constant 0 : index
    %52 = vector.load %arg9[%c0_78, %c0_79] : memref<256x128xf32, #tpu.memory_space<vmem>>, vector<256x128xf32>
    tpu.vector_store %arg9[%c0_78, %c0_79], %51 {strides = array<i32>} : memref<256x128xf32, #tpu.memory_space<vmem>>, vector<256x128xf32>,
    %c1_80 = arith.constant 1 : index
    %c1_81 = arith.constant 1 : index
    %c0_82 = arith.constant 0 : index
    %53 = vector.load %arg7[%c1_80, %c1_81, %c0_82] : memref<18x24x128xbf16, #tpu.memory_space<vmem>>, vector<16x16x128xbf16>
    %54 = vector.shape_cast %53 : vector<16x16x128xbf16> to vector<256x128xbf16>
    %c0_83 = arith.constant 0 : index
    %c0_84 = arith.constant 0 : index
    %55 = vector.load %arg9[%c0_83, %c0_84] : memref<256x128xf32, #tpu.memory_space<vmem>>, vector<256x128xf32>
    %c4 = arith.constant 4 : index
    %c0_85 = arith.constant 0 : index
    %c0_86 = arith.constant 0 : index
    %56 = vector.load %arg2[%c4, %c0_85, %c0_86] : memref<9x128x128xbf16, #tpu.memory_space<vmem>>, vector<1x128x128xbf16>
    %57 = vector.shape_cast %56 : vector<1x128x128xbf16> to vector<128x128xbf16>
    %cst_87 = arith.constant dense<0.000000e+00> : vector<256x128xf32>
    %58 = tpu.matmul %54, %57, %cst_87 {dimension_numbers = #tpu.dot_dimension_numbers<[1], [0], [0], [1], [0, 0, 1, 1], [], []>} : vector<256x128xbf16>, vector<128x128xbf16>, vector<256x128xf32> -> vector<256x128xf32>
    %59 = arith.addf %55, %58 : vector<256x128xf32>
    %c0_88 = arith.constant 0 : index
    %c0_89 = arith.constant 0 : index
    %60 = vector.load %arg9[%c0_88, %c0_89] : memref<256x128xf32, #tpu.memory_space<vmem>>, vector<256x128xf32>
    tpu.vector_store %arg9[%c0_88, %c0_89], %59 {strides = array<i32>} : memref<256x128xf32, #tpu.memory_space<vmem>>, vector<256x128xf32>,
    %c1_90 = arith.constant 1 : index
    %c2_91 = arith.constant 2 : index
    %c0_92 = arith.constant 0 : index
    %61 = vector.load %arg7[%c1_90, %c2_91, %c0_92] : memref<18x24x128xbf16, #tpu.memory_space<vmem>>, vector<16x16x128xbf16>
    %62 = vector.shape_cast %61 : vector<16x16x128xbf16> to vector<256x128xbf16>
    %c0_93 = arith.constant 0 : index
    %c0_94 = arith.constant 0 : index
    %63 = vector.load %arg9[%c0_93, %c0_94] : memref<256x128xf32, #tpu.memory_space<vmem>>, vector<256x128xf32>
    %c5 = arith.constant 5 : index
    %c0_95 = arith.constant 0 : index
    %c0_96 = arith.constant 0 : index
    %64 = vector.load %arg2[%c5, %c0_95, %c0_96] : memref<9x128x128xbf16, #tpu.memory_space<vmem>>, vector<1x128x128xbf16>
    %65 = vector.shape_cast %64 : vector<1x128x128xbf16> to vector<128x128xbf16>
    %cst_97 = arith.constant dense<0.000000e+00> : vector<256x128xf32>
    %66 = tpu.matmul %62, %65, %cst_97 {dimension_numbers = #tpu.dot_dimension_numbers<[1], [0], [0], [1], [0, 0, 1, 1], [], []>} : vector<256x128xbf16>, vector<128x128xbf16>, vector<256x128xf32> -> vector<256x128xf32>
    %67 = arith.addf %63, %66 : vector<256x128xf32>
    %c0_98 = arith.constant 0 : index
    %c0_99 = arith.constant 0 : index
    %68 = vector.load %arg9[%c0_98, %c0_99] : memref<256x128xf32, #tpu.memory_space<vmem>>, vector<256x128xf32>
    tpu.vector_store %arg9[%c0_98, %c0_99], %67 {strides = array<i32>} : memref<256x128xf32, #tpu.memory_space<vmem>>, vector<256x128xf32>,
    %c2_100 = arith.constant 2 : index
    %c0_101 = arith.constant 0 : index
    %c0_102 = arith.constant 0 : index
    %69 = vector.load %arg7[%c2_100, %c0_101, %c0_102] : memref<18x24x128xbf16, #tpu.memory_space<vmem>>, vector<16x16x128xbf16>
    %70 = vector.shape_cast %69 : vector<16x16x128xbf16> to vector<256x128xbf16>
    %c0_103 = arith.constant 0 : index
    %c0_104 = arith.constant 0 : index
    %71 = vector.load %arg9[%c0_103, %c0_104] : memref<256x128xf32, #tpu.memory_space<vmem>>, vector<256x128xf32>
    %c6 = arith.constant 6 : index
    %c0_105 = arith.constant 0 : index
    %c0_106 = arith.constant 0 : index
    %72 = vector.load %arg2[%c6, %c0_105, %c0_106] : memref<9x128x128xbf16, #tpu.memory_space<vmem>>, vector<1x128x128xbf16>
    %73 = vector.shape_cast %72 : vector<1x128x128xbf16> to vector<128x128xbf16>
    %cst_107 = arith.constant dense<0.000000e+00> : vector<256x128xf32>
    %74 = tpu.matmul %70, %73, %cst_107 {dimension_numbers = #tpu.dot_dimension_numbers<[1], [0], [0], [1], [0, 0, 1, 1], [], []>} : vector<256x128xbf16>, vector<128x128xbf16>, vector<256x128xf32> -> vector<256x128xf32>
    %75 = arith.addf %71, %74 : vector<256x128xf32>
    %c0_108 = arith.constant 0 : index
    %c0_109 = arith.constant 0 : index
    %76 = vector.load %arg9[%c0_108, %c0_109] : memref<256x128xf32, #tpu.memory_space<vmem>>, vector<256x128xf32>
    tpu.vector_store %arg9[%c0_108, %c0_109], %75 {strides = array<i32>} : memref<256x128xf32, #tpu.memory_space<vmem>>, vector<256x128xf32>,
    %c2_110 = arith.constant 2 : index
    %c1_111 = arith.constant 1 : index
    %c0_112 = arith.constant 0 : index
    %77 = vector.load %arg7[%c2_110, %c1_111, %c0_112] : memref<18x24x128xbf16, #tpu.memory_space<vmem>>, vector<16x16x128xbf16>
    %78 = vector.shape_cast %77 : vector<16x16x128xbf16> to vector<256x128xbf16>
    %c0_113 = arith.constant 0 : index
    %c0_114 = arith.constant 0 : index
    %79 = vector.load %arg9[%c0_113, %c0_114] : memref<256x128xf32, #tpu.memory_space<vmem>>, vector<256x128xf32>
    %c7 = arith.constant 7 : index
    %c0_115 = arith.constant 0 : index
    %c0_116 = arith.constant 0 : index
    %80 = vector.load %arg2[%c7, %c0_115, %c0_116] : memref<9x128x128xbf16, #tpu.memory_space<vmem>>, vector<1x128x128xbf16>
    %81 = vector.shape_cast %80 : vector<1x128x128xbf16> to vector<128x128xbf16>
    %cst_117 = arith.constant dense<0.000000e+00> : vector<256x128xf32>
    %82 = tpu.matmul %78, %81, %cst_117 {dimension_numbers = #tpu.dot_dimension_numbers<[1], [0], [0], [1], [0, 0, 1, 1], [], []>} : vector<256x128xbf16>, vector<128x128xbf16>, vector<256x128xf32> -> vector<256x128xf32>
    %83 = arith.addf %79, %82 : vector<256x128xf32>
    %c0_118 = arith.constant 0 : index
    %c0_119 = arith.constant 0 : index
    %84 = vector.load %arg9[%c0_118, %c0_119] : memref<256x128xf32, #tpu.memory_space<vmem>>, vector<256x128xf32>
    tpu.vector_store %arg9[%c0_118, %c0_119], %83 {strides = array<i32>} : memref<256x128xf32, #tpu.memory_space<vmem>>, vector<256x128xf32>,
    %c2_120 = arith.constant 2 : index
    %c2_121 = arith.constant 2 : index
    %c0_122 = arith.constant 0 : index
    %85 = vector.load %arg7[%c2_120, %c2_121, %c0_122] : memref<18x24x128xbf16, #tpu.memory_space<vmem>>, vector<16x16x128xbf16>
    %86 = vector.shape_cast %85 : vector<16x16x128xbf16> to vector<256x128xbf16>
    %c0_123 = arith.constant 0 : index
    %c0_124 = arith.constant 0 : index
    %87 = vector.load %arg9[%c0_123, %c0_124] : memref<256x128xf32, #tpu.memory_space<vmem>>, vector<256x128xf32>
    %c8 = arith.constant 8 : index
    %c0_125 = arith.constant 0 : index
    %c0_126 = arith.constant 0 : index
    %88 = vector.load %arg2[%c8, %c0_125, %c0_126] : memref<9x128x128xbf16, #tpu.memory_space<vmem>>, vector<1x128x128xbf16>
    %89 = vector.shape_cast %88 : vector<1x128x128xbf16> to vector<128x128xbf16>
    %cst_127 = arith.constant dense<0.000000e+00> : vector<256x128xf32>
    %90 = tpu.matmul %86, %89, %cst_127 {dimension_numbers = #tpu.dot_dimension_numbers<[1], [0], [0], [1], [0, 0, 1, 1], [], []>} : vector<256x128xbf16>, vector<128x128xbf16>, vector<256x128xf32> -> vector<256x128xf32>
    %91 = arith.addf %87, %90 : vector<256x128xf32>
    %c0_128 = arith.constant 0 : index
    %c0_129 = arith.constant 0 : index
    %92 = vector.load %arg9[%c0_128, %c0_129] : memref<256x128xf32, #tpu.memory_space<vmem>>, vector<256x128xf32>
    tpu.vector_store %arg9[%c0_128, %c0_129], %91 {strides = array<i32>} : memref<256x128xf32, #tpu.memory_space<vmem>>, vector<256x128xf32>,
    %c0_130 = arith.constant 0 : index
    %c0_131 = arith.constant 0 : index
    %93 = vector.load %arg9[%c0_130, %c0_131] : memref<256x128xf32, #tpu.memory_space<vmem>>, vector<256x128xf32>
    %c0_132 = arith.constant 0 : index
    %c0_133 = arith.constant 0 : index
    %94 = vector.load %arg5[%c0_132, %c0_133] : memref<8x128xf32, #tpu.memory_space<vmem>>, vector<1x128xf32>
    %95 = vector.broadcast %94 : vector<1x128xf32> to vector<256x128xf32>
    %96 = arith.mulf %93, %95 : vector<256x128xf32>
    %c1_134 = arith.constant 1 : index
    %c0_135 = arith.constant 0 : index
    %97 = vector.load %arg5[%c1_134, %c0_135] : memref<8x128xf32, #tpu.memory_space<vmem>>, vector<1x128xf32>
    %98 = vector.broadcast %97 : vector<1x128xf32> to vector<256x128xf32>
    %99 = arith.addf %96, %98 : vector<256x128xf32>
    %cst_136 = arith.constant 0.000000e+00 : f32
    %100 = vector.broadcast %cst_136 : f32 to vector<256x128xf32>
    %101 = arith.maximumf %99, %100 : vector<256x128xf32>
    %102 = vector.shape_cast %101 : vector<256x128xf32> to vector<16x16x128xf32>
    %103 = arith.truncf %102 : vector<16x16x128xf32> to vector<16x16x128xbf16>
    %c1_137 = arith.constant 1 : index
    %c1_138 = arith.constant 1 : index
    %c0_139 = arith.constant 0 : index
    %104 = vector.load %arg8[%c1_137, %c1_138, %c0_139] : memref<18x24x128xbf16, #tpu.memory_space<vmem>>, vector<16x16x128xbf16>
    tpu.vector_store %arg8[%c1_137, %c1_138, %c0_139], %103 {strides = array<i32>} : memref<18x24x128xbf16, #tpu.memory_space<vmem>>, vector<16x16x128xbf16>,
    %cst_140 = arith.constant 0.000000e+00 : f32
    %105 = vector.broadcast %cst_140 : f32 to vector<256x128xf32>
    %c0_141 = arith.constant 0 : index
    %c0_142 = arith.constant 0 : index
    %106 = vector.load %arg9[%c0_141, %c0_142] : memref<256x128xf32, #tpu.memory_space<vmem>>, vector<256x128xf32>
    tpu.vector_store %arg9[%c0_141, %c0_142], %105 {strides = array<i32>} : memref<256x128xf32, #tpu.memory_space<vmem>>, vector<256x128xf32>,
    %c0_143 = arith.constant 0 : index
    %c0_144 = arith.constant 0 : index
    %c0_145 = arith.constant 0 : index
    %107 = vector.load %arg8[%c0_143, %c0_144, %c0_145] : memref<18x24x128xbf16, #tpu.memory_space<vmem>>, vector<16x16x128xbf16>
    %108 = vector.shape_cast %107 : vector<16x16x128xbf16> to vector<256x128xbf16>
    %c0_146 = arith.constant 0 : index
    %c0_147 = arith.constant 0 : index
    %109 = vector.load %arg9[%c0_146, %c0_147] : memref<256x128xf32, #tpu.memory_space<vmem>>, vector<256x128xf32>
    %c0_148 = arith.constant 0 : index
    %c0_149 = arith.constant 0 : index
    %c0_150 = arith.constant 0 : index
    %110 = vector.load %arg3[%c0_148, %c0_149, %c0_150] : memref<9x128x128xbf16, #tpu.memory_space<vmem>>, vector<1x128x128xbf16>
    %111 = vector.shape_cast %110 : vector<1x128x128xbf16> to vector<128x128xbf16>
    %cst_151 = arith.constant dense<0.000000e+00> : vector<256x128xf32>
    %112 = tpu.matmul %108, %111, %cst_151 {dimension_numbers = #tpu.dot_dimension_numbers<[1], [0], [0], [1], [0, 0, 1, 1], [], []>} : vector<256x128xbf16>, vector<128x128xbf16>, vector<256x128xf32> -> vector<256x128xf32>
    %113 = arith.addf %109, %112 : vector<256x128xf32>
    %c0_152 = arith.constant 0 : index
    %c0_153 = arith.constant 0 : index
    %114 = vector.load %arg9[%c0_152, %c0_153] : memref<256x128xf32, #tpu.memory_space<vmem>>, vector<256x128xf32>
    tpu.vector_store %arg9[%c0_152, %c0_153], %113 {strides = array<i32>} : memref<256x128xf32, #tpu.memory_space<vmem>>, vector<256x128xf32>,
    %c0_154 = arith.constant 0 : index
    %c1_155 = arith.constant 1 : index
    %c0_156 = arith.constant 0 : index
    %115 = vector.load %arg8[%c0_154, %c1_155, %c0_156] : memref<18x24x128xbf16, #tpu.memory_space<vmem>>, vector<16x16x128xbf16>
    %116 = vector.shape_cast %115 : vector<16x16x128xbf16> to vector<256x128xbf16>
    %c0_157 = arith.constant 0 : index
    %c0_158 = arith.constant 0 : index
    %117 = vector.load %arg9[%c0_157, %c0_158] : memref<256x128xf32, #tpu.memory_space<vmem>>, vector<256x128xf32>
    %c1_159 = arith.constant 1 : index
    %c0_160 = arith.constant 0 : index
    %c0_161 = arith.constant 0 : index
    %118 = vector.load %arg3[%c1_159, %c0_160, %c0_161] : memref<9x128x128xbf16, #tpu.memory_space<vmem>>, vector<1x128x128xbf16>
    %119 = vector.shape_cast %118 : vector<1x128x128xbf16> to vector<128x128xbf16>
    %cst_162 = arith.constant dense<0.000000e+00> : vector<256x128xf32>
    %120 = tpu.matmul %116, %119, %cst_162 {dimension_numbers = #tpu.dot_dimension_numbers<[1], [0], [0], [1], [0, 0, 1, 1], [], []>} : vector<256x128xbf16>, vector<128x128xbf16>, vector<256x128xf32> -> vector<256x128xf32>
    %121 = arith.addf %117, %120 : vector<256x128xf32>
    %c0_163 = arith.constant 0 : index
    %c0_164 = arith.constant 0 : index
    %122 = vector.load %arg9[%c0_163, %c0_164] : memref<256x128xf32, #tpu.memory_space<vmem>>, vector<256x128xf32>
    tpu.vector_store %arg9[%c0_163, %c0_164], %121 {strides = array<i32>} : memref<256x128xf32, #tpu.memory_space<vmem>>, vector<256x128xf32>,
    %c0_165 = arith.constant 0 : index
    %c2_166 = arith.constant 2 : index
    %c0_167 = arith.constant 0 : index
    %123 = vector.load %arg8[%c0_165, %c2_166, %c0_167] : memref<18x24x128xbf16, #tpu.memory_space<vmem>>, vector<16x16x128xbf16>
    %124 = vector.shape_cast %123 : vector<16x16x128xbf16> to vector<256x128xbf16>
    %c0_168 = arith.constant 0 : index
    %c0_169 = arith.constant 0 : index
    %125 = vector.load %arg9[%c0_168, %c0_169] : memref<256x128xf32, #tpu.memory_space<vmem>>, vector<256x128xf32>
    %c2_170 = arith.constant 2 : index
    %c0_171 = arith.constant 0 : index
    %c0_172 = arith.constant 0 : index
    %126 = vector.load %arg3[%c2_170, %c0_171, %c0_172] : memref<9x128x128xbf16, #tpu.memory_space<vmem>>, vector<1x128x128xbf16>
    %127 = vector.shape_cast %126 : vector<1x128x128xbf16> to vector<128x128xbf16>
    %cst_173 = arith.constant dense<0.000000e+00> : vector<256x128xf32>
    %128 = tpu.matmul %124, %127, %cst_173 {dimension_numbers = #tpu.dot_dimension_numbers<[1], [0], [0], [1], [0, 0, 1, 1], [], []>} : vector<256x128xbf16>, vector<128x128xbf16>, vector<256x128xf32> -> vector<256x128xf32>
    %129 = arith.addf %125, %128 : vector<256x128xf32>
    %c0_174 = arith.constant 0 : index
    %c0_175 = arith.constant 0 : index
    %130 = vector.load %arg9[%c0_174, %c0_175] : memref<256x128xf32, #tpu.memory_space<vmem>>, vector<256x128xf32>
    tpu.vector_store %arg9[%c0_174, %c0_175], %129 {strides = array<i32>} : memref<256x128xf32, #tpu.memory_space<vmem>>, vector<256x128xf32>,
    %c1_176 = arith.constant 1 : index
    %c0_177 = arith.constant 0 : index
    %c0_178 = arith.constant 0 : index
    %131 = vector.load %arg8[%c1_176, %c0_177, %c0_178] : memref<18x24x128xbf16, #tpu.memory_space<vmem>>, vector<16x16x128xbf16>
    %132 = vector.shape_cast %131 : vector<16x16x128xbf16> to vector<256x128xbf16>
    %c0_179 = arith.constant 0 : index
    %c0_180 = arith.constant 0 : index
    %133 = vector.load %arg9[%c0_179, %c0_180] : memref<256x128xf32, #tpu.memory_space<vmem>>, vector<256x128xf32>
    %c3_181 = arith.constant 3 : index
    %c0_182 = arith.constant 0 : index
    %c0_183 = arith.constant 0 : index
    %134 = vector.load %arg3[%c3_181, %c0_182, %c0_183] : memref<9x128x128xbf16, #tpu.memory_space<vmem>>, vector<1x128x128xbf16>
    %135 = vector.shape_cast %134 : vector<1x128x128xbf16> to vector<128x128xbf16>
    %cst_184 = arith.constant dense<0.000000e+00> : vector<256x128xf32>
    %136 = tpu.matmul %132, %135, %cst_184 {dimension_numbers = #tpu.dot_dimension_numbers<[1], [0], [0], [1], [0, 0, 1, 1], [], []>} : vector<256x128xbf16>, vector<128x128xbf16>, vector<256x128xf32> -> vector<256x128xf32>
    %137 = arith.addf %133, %136 : vector<256x128xf32>
    %c0_185 = arith.constant 0 : index
    %c0_186 = arith.constant 0 : index
    %138 = vector.load %arg9[%c0_185, %c0_186] : memref<256x128xf32, #tpu.memory_space<vmem>>, vector<256x128xf32>
    tpu.vector_store %arg9[%c0_185, %c0_186], %137 {strides = array<i32>} : memref<256x128xf32, #tpu.memory_space<vmem>>, vector<256x128xf32>,
    %c1_187 = arith.constant 1 : index
    %c1_188 = arith.constant 1 : index
    %c0_189 = arith.constant 0 : index
    %139 = vector.load %arg8[%c1_187, %c1_188, %c0_189] : memref<18x24x128xbf16, #tpu.memory_space<vmem>>, vector<16x16x128xbf16>
    %140 = vector.shape_cast %139 : vector<16x16x128xbf16> to vector<256x128xbf16>
    %c0_190 = arith.constant 0 : index
    %c0_191 = arith.constant 0 : index
    %141 = vector.load %arg9[%c0_190, %c0_191] : memref<256x128xf32, #tpu.memory_space<vmem>>, vector<256x128xf32>
    %c4_192 = arith.constant 4 : index
    %c0_193 = arith.constant 0 : index
    %c0_194 = arith.constant 0 : index
    %142 = vector.load %arg3[%c4_192, %c0_193, %c0_194] : memref<9x128x128xbf16, #tpu.memory_space<vmem>>, vector<1x128x128xbf16>
    %143 = vector.shape_cast %142 : vector<1x128x128xbf16> to vector<128x128xbf16>
    %cst_195 = arith.constant dense<0.000000e+00> : vector<256x128xf32>
    %144 = tpu.matmul %140, %143, %cst_195 {dimension_numbers = #tpu.dot_dimension_numbers<[1], [0], [0], [1], [0, 0, 1, 1], [], []>} : vector<256x128xbf16>, vector<128x128xbf16>, vector<256x128xf32> -> vector<256x128xf32>
    %145 = arith.addf %141, %144 : vector<256x128xf32>
    %c0_196 = arith.constant 0 : index
    %c0_197 = arith.constant 0 : index
    %146 = vector.load %arg9[%c0_196, %c0_197] : memref<256x128xf32, #tpu.memory_space<vmem>>, vector<256x128xf32>
    tpu.vector_store %arg9[%c0_196, %c0_197], %145 {strides = array<i32>} : memref<256x128xf32, #tpu.memory_space<vmem>>, vector<256x128xf32>,
    %c1_198 = arith.constant 1 : index
    %c2_199 = arith.constant 2 : index
    %c0_200 = arith.constant 0 : index
    %147 = vector.load %arg8[%c1_198, %c2_199, %c0_200] : memref<18x24x128xbf16, #tpu.memory_space<vmem>>, vector<16x16x128xbf16>
    %148 = vector.shape_cast %147 : vector<16x16x128xbf16> to vector<256x128xbf16>
    %c0_201 = arith.constant 0 : index
    %c0_202 = arith.constant 0 : index
    %149 = vector.load %arg9[%c0_201, %c0_202] : memref<256x128xf32, #tpu.memory_space<vmem>>, vector<256x128xf32>
    %c5_203 = arith.constant 5 : index
    %c0_204 = arith.constant 0 : index
    %c0_205 = arith.constant 0 : index
    %150 = vector.load %arg3[%c5_203, %c0_204, %c0_205] : memref<9x128x128xbf16, #tpu.memory_space<vmem>>, vector<1x128x128xbf16>
    %151 = vector.shape_cast %150 : vector<1x128x128xbf16> to vector<128x128xbf16>
    %cst_206 = arith.constant dense<0.000000e+00> : vector<256x128xf32>
    %152 = tpu.matmul %148, %151, %cst_206 {dimension_numbers = #tpu.dot_dimension_numbers<[1], [0], [0], [1], [0, 0, 1, 1], [], []>} : vector<256x128xbf16>, vector<128x128xbf16>, vector<256x128xf32> -> vector<256x128xf32>
    %153 = arith.addf %149, %152 : vector<256x128xf32>
    %c0_207 = arith.constant 0 : index
    %c0_208 = arith.constant 0 : index
    %154 = vector.load %arg9[%c0_207, %c0_208] : memref<256x128xf32, #tpu.memory_space<vmem>>, vector<256x128xf32>
    tpu.vector_store %arg9[%c0_207, %c0_208], %153 {strides = array<i32>} : memref<256x128xf32, #tpu.memory_space<vmem>>, vector<256x128xf32>,
    %c2_209 = arith.constant 2 : index
    %c0_210 = arith.constant 0 : index
    %c0_211 = arith.constant 0 : index
    %155 = vector.load %arg8[%c2_209, %c0_210, %c0_211] : memref<18x24x128xbf16, #tpu.memory_space<vmem>>, vector<16x16x128xbf16>
    %156 = vector.shape_cast %155 : vector<16x16x128xbf16> to vector<256x128xbf16>
    %c0_212 = arith.constant 0 : index
    %c0_213 = arith.constant 0 : index
    %157 = vector.load %arg9[%c0_212, %c0_213] : memref<256x128xf32, #tpu.memory_space<vmem>>, vector<256x128xf32>
    %c6_214 = arith.constant 6 : index
    %c0_215 = arith.constant 0 : index
    %c0_216 = arith.constant 0 : index
    %158 = vector.load %arg3[%c6_214, %c0_215, %c0_216] : memref<9x128x128xbf16, #tpu.memory_space<vmem>>, vector<1x128x128xbf16>
    %159 = vector.shape_cast %158 : vector<1x128x128xbf16> to vector<128x128xbf16>
    %cst_217 = arith.constant dense<0.000000e+00> : vector<256x128xf32>
    %160 = tpu.matmul %156, %159, %cst_217 {dimension_numbers = #tpu.dot_dimension_numbers<[1], [0], [0], [1], [0, 0, 1, 1], [], []>} : vector<256x128xbf16>, vector<128x128xbf16>, vector<256x128xf32> -> vector<256x128xf32>
    %161 = arith.addf %157, %160 : vector<256x128xf32>
    %c0_218 = arith.constant 0 : index
    %c0_219 = arith.constant 0 : index
    %162 = vector.load %arg9[%c0_218, %c0_219] : memref<256x128xf32, #tpu.memory_space<vmem>>, vector<256x128xf32>
    tpu.vector_store %arg9[%c0_218, %c0_219], %161 {strides = array<i32>} : memref<256x128xf32, #tpu.memory_space<vmem>>, vector<256x128xf32>,
    %c2_220 = arith.constant 2 : index
    %c1_221 = arith.constant 1 : index
    %c0_222 = arith.constant 0 : index
    %163 = vector.load %arg8[%c2_220, %c1_221, %c0_222] : memref<18x24x128xbf16, #tpu.memory_space<vmem>>, vector<16x16x128xbf16>
    %164 = vector.shape_cast %163 : vector<16x16x128xbf16> to vector<256x128xbf16>
    %c0_223 = arith.constant 0 : index
    %c0_224 = arith.constant 0 : index
    %165 = vector.load %arg9[%c0_223, %c0_224] : memref<256x128xf32, #tpu.memory_space<vmem>>, vector<256x128xf32>
    %c7_225 = arith.constant 7 : index
    %c0_226 = arith.constant 0 : index
    %c0_227 = arith.constant 0 : index
    %166 = vector.load %arg3[%c7_225, %c0_226, %c0_227] : memref<9x128x128xbf16, #tpu.memory_space<vmem>>, vector<1x128x128xbf16>
    %167 = vector.shape_cast %166 : vector<1x128x128xbf16> to vector<128x128xbf16>
    %cst_228 = arith.constant dense<0.000000e+00> : vector<256x128xf32>
    %168 = tpu.matmul %164, %167, %cst_228 {dimension_numbers = #tpu.dot_dimension_numbers<[1], [0], [0], [1], [0, 0, 1, 1], [], []>} : vector<256x128xbf16>, vector<128x128xbf16>, vector<256x128xf32> -> vector<256x128xf32>
    %169 = arith.addf %165, %168 : vector<256x128xf32>
    %c0_229 = arith.constant 0 : index
    %c0_230 = arith.constant 0 : index
    %170 = vector.load %arg9[%c0_229, %c0_230] : memref<256x128xf32, #tpu.memory_space<vmem>>, vector<256x128xf32>
    tpu.vector_store %arg9[%c0_229, %c0_230], %169 {strides = array<i32>} : memref<256x128xf32, #tpu.memory_space<vmem>>, vector<256x128xf32>,
    %c2_231 = arith.constant 2 : index
    %c2_232 = arith.constant 2 : index
    %c0_233 = arith.constant 0 : index
    %171 = vector.load %arg8[%c2_231, %c2_232, %c0_233] : memref<18x24x128xbf16, #tpu.memory_space<vmem>>, vector<16x16x128xbf16>
    %172 = vector.shape_cast %171 : vector<16x16x128xbf16> to vector<256x128xbf16>
    %c0_234 = arith.constant 0 : index
    %c0_235 = arith.constant 0 : index
    %173 = vector.load %arg9[%c0_234, %c0_235] : memref<256x128xf32, #tpu.memory_space<vmem>>, vector<256x128xf32>
    %c8_236 = arith.constant 8 : index
    %c0_237 = arith.constant 0 : index
    %c0_238 = arith.constant 0 : index
    %174 = vector.load %arg3[%c8_236, %c0_237, %c0_238] : memref<9x128x128xbf16, #tpu.memory_space<vmem>>, vector<1x128x128xbf16>
    %175 = vector.shape_cast %174 : vector<1x128x128xbf16> to vector<128x128xbf16>
    %cst_239 = arith.constant dense<0.000000e+00> : vector<256x128xf32>
    %176 = tpu.matmul %172, %175, %cst_239 {dimension_numbers = #tpu.dot_dimension_numbers<[1], [0], [0], [1], [0, 0, 1, 1], [], []>} : vector<256x128xbf16>, vector<128x128xbf16>, vector<256x128xf32> -> vector<256x128xf32>
    %177 = arith.addf %173, %176 : vector<256x128xf32>
    %c0_240 = arith.constant 0 : index
    %c0_241 = arith.constant 0 : index
    %178 = vector.load %arg9[%c0_240, %c0_241] : memref<256x128xf32, #tpu.memory_space<vmem>>, vector<256x128xf32>
    tpu.vector_store %arg9[%c0_240, %c0_241], %177 {strides = array<i32>} : memref<256x128xf32, #tpu.memory_space<vmem>>, vector<256x128xf32>,
    %c0_242 = arith.constant 0 : index
    %c0_243 = arith.constant 0 : index
    %c0_244 = arith.constant 0 : index
    %c0_245 = arith.constant 0 : index
    %179 = vector.load %arg1[%c0_242, %c0_243, %c0_244, %c0_245] : memref<1x16x16x128xbf16, #tpu.memory_space<vmem>>, vector<1x16x16x128xbf16>
    %180 = vector.shape_cast %179 : vector<1x16x16x128xbf16> to vector<16x16x128xbf16>
    %181 = vector.shape_cast %180 : vector<16x16x128xbf16> to vector<256x128xbf16>
    %c0_246 = arith.constant 0 : index
    %c0_247 = arith.constant 0 : index
    %182 = vector.load %arg4[%c0_246, %c0_247] : memref<128x128xbf16, #tpu.memory_space<vmem>>, vector<128x128xbf16>
    %cst_248 = arith.constant dense<0.000000e+00> : vector<256x128xf32>
    %183 = tpu.matmul %181, %182, %cst_248 {dimension_numbers = #tpu.dot_dimension_numbers<[1], [0], [0], [1], [0, 0, 1, 1], [], []>} : vector<256x128xbf16>, vector<128x128xbf16>, vector<256x128xf32> -> vector<256x128xf32>
    %c0_249 = arith.constant 0 : index
    %c0_250 = arith.constant 0 : index
    %184 = vector.load %arg9[%c0_249, %c0_250] : memref<256x128xf32, #tpu.memory_space<vmem>>, vector<256x128xf32>
    %c2_251 = arith.constant 2 : index
    %c0_252 = arith.constant 0 : index
    %185 = vector.load %arg5[%c2_251, %c0_252] : memref<8x128xf32, #tpu.memory_space<vmem>>, vector<1x128xf32>
    %186 = vector.broadcast %185 : vector<1x128xf32> to vector<256x128xf32>
    %187 = arith.mulf %184, %186 : vector<256x128xf32>
    %c3_253 = arith.constant 3 : index
    %c0_254 = arith.constant 0 : index
    %188 = vector.load %arg5[%c3_253, %c0_254] : memref<8x128xf32, #tpu.memory_space<vmem>>, vector<1x128xf32>
    %189 = vector.broadcast %188 : vector<1x128xf32> to vector<256x128xf32>
    %190 = arith.addf %187, %189 : vector<256x128xf32>
    %c4_255 = arith.constant 4 : index
    %c0_256 = arith.constant 0 : index
    %191 = vector.load %arg5[%c4_255, %c0_256] : memref<8x128xf32, #tpu.memory_space<vmem>>, vector<1x128xf32>
    %192 = vector.broadcast %191 : vector<1x128xf32> to vector<256x128xf32>
    %193 = arith.mulf %183, %192 : vector<256x128xf32>
    %194 = arith.addf %190, %193 : vector<256x128xf32>
    %c5_257 = arith.constant 5 : index
    %c0_258 = arith.constant 0 : index
    %195 = vector.load %arg5[%c5_257, %c0_258] : memref<8x128xf32, #tpu.memory_space<vmem>>, vector<1x128xf32>
    %196 = vector.broadcast %195 : vector<1x128xf32> to vector<256x128xf32>
    %197 = arith.addf %194, %196 : vector<256x128xf32>
    %cst_259 = arith.constant 0.000000e+00 : f32
    %198 = vector.broadcast %cst_259 : f32 to vector<256x128xf32>
    %199 = arith.maximumf %197, %198 : vector<256x128xf32>
    %200 = vector.shape_cast %199 : vector<256x128xf32> to vector<1x16x16x128xf32>
    %201 = arith.truncf %200 : vector<1x16x16x128xf32> to vector<1x16x16x128xbf16>
    %c0_260 = arith.constant 0 : index
    %c0_261 = arith.constant 0 : index
    %c0_262 = arith.constant 0 : index
    %c0_263 = arith.constant 0 : index
    %202 = vector.load %arg6[%c0_260, %c0_261, %c0_262, %c0_263] : memref<1x16x16x128xbf16, #tpu.memory_space<vmem>>, vector<1x16x16x128xbf16>
    tpu.vector_store %arg6[%c0_260, %c0_261, %c0_262, %c0_263], %201 {strides = array<i32>} : memref<1x16x16x128xbf16, #tpu.memory_space<vmem>>, vector<1x16x16x128xbf16>,
    return
  }
  func.func @transform_0(%arg0: i32) -> (i32, i32, i32, i32) {
    %c0_i32 = arith.constant 0 : i32
    %c0_i32_0 = arith.constant 0 : i32
    %c0_i32_1 = arith.constant 0 : i32
    %c0_i32_2 = arith.constant 0 : i32
    return %arg0, %c0_i32, %c0_i32_0, %c0_i32_1 : i32, i32, i32, i32
  }
  func.func @transform_1(%arg0: i32) -> (i32, i32, i32) {
    %c0_i32 = arith.constant 0 : i32
    %c0_i32_0 = arith.constant 0 : i32
    %c0_i32_1 = arith.constant 0 : i32
    %c0_i32_2 = arith.constant 0 : i32
    return %c0_i32, %c0_i32_0, %c0_i32_1 : i32, i32, i32
  }
  func.func @transform_2(%arg0: i32) -> (i32, i32, i32) {
    %c0_i32 = arith.constant 0 : i32
    %c0_i32_0 = arith.constant 0 : i32
    %c0_i32_1 = arith.constant 0 : i32
    %c0_i32_2 = arith.constant 0 : i32
    return %c0_i32, %c0_i32_0, %c0_i32_1 : i32, i32, i32
  }
  func.func @transform_3(%arg0: i32) -> (i32, i32) {
    %c0_i32 = arith.constant 0 : i32
    %c0_i32_0 = arith.constant 0 : i32
    %c0_i32_1 = arith.constant 0 : i32
    return %c0_i32, %c0_i32_0 : i32, i32
  }
  func.func @transform_4(%arg0: i32) -> (i32, i32) {
    %c0_i32 = arith.constant 0 : i32
    %c0_i32_0 = arith.constant 0 : i32
    %c0_i32_1 = arith.constant 0 : i32
    return %c0_i32, %c0_i32_0 : i32, i32
  }
  func.func @transform_5(%arg0: i32) -> (i32, i32, i32, i32) {
    %c0_i32 = arith.constant 0 : i32
    %c0_i32_0 = arith.constant 0 : i32
    %c0_i32_1 = arith.constant 0 : i32
    %c0_i32_2 = arith.constant 0 : i32
    return %arg0, %c0_i32, %c0_i32_0, %c0_i32_1 : i32, i32, i32, i32
  }
}

</mosaic_0001>

<bundles_post_ra>
// kernel: tpu_custom_call.1
= control target key start
LH: loop header
LB: loop body
LE: loop exit
PB: predicated region body
PF: predicated region fallthrough
CT: control target
= control target key end

     0   :  { %10 = vsyncpa [#allocation6], 0  ;;  %s20644_s0 = inlined_call_operand.hbm [shape: bf16[2,16,16,128], index: 0, kind: input, shape index: {}]   ;;  %s20645_s1 = inlined_call_operand.hbm [shape: bf16[9,128,128], index: 1, kind: input, shape index: {}]   ;;  %s20646_s2 = inlined_call_operand.hbm [shape: bf16[9,128,128], index: 2, kind: input, shape index: {}]   ;;  %s20647_s3 = inlined_call_operand.hbm [shape: bf16[128,128], index: 3, kind: input, shape index: {}]   ;;  %s20648_s4 = inlined_call_operand.hbm [shape: f32[8,128], index: 4, kind: input, shape index: {}]   ;;  %s20649_s5 = inlined_call_operand.hbm [shape: bf16[2,16,16,128], index: 5, kind: output, shape index: {}]  }
   0x1   :  { %12 = vsyncpa [#allocation6 + $0x1], 0 }
   0x2   :  { %13 = vsyncpa [#allocation9], 0 }
   0x3   :  { %14 = vsyncpa [#allocation12], 0 }
   0x4   :  { %15 = vsyncpa [#allocation7], 0 }
   0x5   :  { %17 = vsyncpa [#allocation7 + $0x1], 0  ;;  %s16592_s18 = smov 0   ;;  %s16594_s19 = smov 0  }
   0x6   :  { %s16596_s20 = smov 0   ;;  %s16598_s21 = smov 0  }
   0x7 LB: > { %s16613_s22 = sadd.s32 4294967295, %s16549_s21   ;;  %s13795_s23 = sadd.s32 4294967294, %s16549_s21   ;;  %s16549_s21 = sphi %s16598_s21, %s20930_s21   ;;  %s16545_s20 = sphi %s16596_s20, %s20929_s20   ;;  %s16541_s19 = sphi %s16594_s19, %s20928_s19   ;;  %s16537_s18 = sphi %s16592_s18, %s20927_s18  }
   0x8   : > { %p43_p0 = scmp.ne.s32.totalorder %s16541_s19, %s16537_s18  ;;  %p20650_p1 = scmp.eq.s32.totalorder %s16613_s22, 0 }
   0x9   : > { %p151_p2 = scmp.eq.s32.totalorder %s16613_s22, 1  ;;  %p157_p3 = scmp.eq.s32.totalorder %s13795_s23, 1 }
   0xa   : > { %p16622_p4 = por %p20650_p1, %p43_p0  ;;  %p13796_p5 = scmp.ge.s32.totalorder %s16549_s21, 1 }
   0xb   : > { %p16627_p6 = por %p157_p3, %p43_p0  ;;  %p164_p7 = scmp.lt.s32.totalorder %s16549_s21, 3 }
   0xc   : > { %s20669_s24 = scalar_select %p16622_p4, 1, 0 }
   0xd   : > { %s20670_s25 = scalar_select %p16627_p6, 1, 0 }
   0xe   : > { %p16632_p8 = pnand %p13796_p5, %p164_p7  ;;  %s16551_s27 = smov [#allocation8]  }
   0xf   : > { %s176_s28 = sshll.u32 %s16551_s27, 4  ;;  %s16552_s30 = smov [#allocation11]   ;;  %s177_s28 = int_to_ptr.vmem [resolvable:$true] %s176_s28 }
  0x10   : > { %s20671_s26 = scalar_select %p16632_p8, 1, 0 }
  0x11   : > { %p16004_p9 = pneg %p16632_p8  ;;  %s202_s6 = sshll.u32 %s16552_s30, 4  ;;  %s203_s6 = int_to_ptr.vmem [resolvable:$true] %s202_s6 }
  0x12   : > { %s16553_s7 = smov [#allocation10]   ;;  %s16356_s9 = scalar_lea.vmem %s177_s28, 9216 }
  0x13   : > { %p16641_p11 = pnand %p16004_p9, %p20650_p1  ;;  %s189_s8 = sshll.u32 %s16553_s7, 4  ;;  %s190_s8 = int_to_ptr.vmem [resolvable:$true] %s189_s8 }
  0x14   : > { %p16357_p13 = scmp.ne.s32.totalorder %s177_s28, %s16356_s9  ;;  %p16364_p5 = scmp.lt.s32.totalorder %s177_s28, %s177_s28 }
  0x15   : > { %p16347_p12 = pneg %p16641_p11  ;;  %p16365_p7 = scmp.lt.s32.totalorder %s16356_s9, %s16356_s9 }
  0x17   : > { %p16359_p0 = pnand %p16357_p13, %p16347_p12  ;;  %p16366_p9 = por %p16365_p7, %p16364_p5 }
  0x19   : > { %p16360_p3 = pneg %p16359_p0 }
  0x1b   : > { %p16367_p10 = pnand %p16366_p9, %p16360_p3 }
  0x1d   : > { %16370 = shalt.err (!%p16367_p10)
}
  0x1e   : > { %s20651_s10 = smov 64   ;;  %s16555_s11 = smov 4  }
  0x1f   : > { %16007 = dma.hbm_to_vmem [thread:$0]  (!%p16641_p11), %s20645_s1, 9216, %s177_s28, [#allocation9], %s20651_s10, %s20651_s10, %s16555_s11  }
  0x20   : > { %s16382_s14 = scalar_lea.vmem %s203_s6, 1024  ;;  %p16390_p3 = scmp.lt.s32.totalorder %s203_s6, %s203_s6 }
  0x21   : > { %p16383_p13 = scmp.ne.s32.totalorder %s203_s6, %s16382_s14  ;;  %p16391_p10 = scmp.lt.s32.totalorder %s16382_s14, %s16382_s14 }
  0x23   : > { %p16385_p0 = pnand %p16383_p13, %p16347_p12  ;;  %p16392_p7 = por %p16391_p10, %p16390_p3 }
  0x25   : > { %p16386_p5 = pneg %p16385_p0 }
  0x27   : > { %p16393_p9 = pnand %p16392_p7, %p16386_p5 }
  0x29   : > { %16396 = shalt.err (!%p16393_p9)
}
  0x2a   : > { %16013 = dma.hbm_to_vmem [thread:$0]  (!%p16641_p11), %s20647_s3, 1024, %s203_s6, [#allocation12], %s20651_s10, %s20651_s10, %s16555_s11  }
  0x2b   : > { %s16408_s17 = scalar_lea.vmem %s190_s8, 9216  ;;  %p16416_p3 = scmp.lt.s32.totalorder %s190_s8, %s190_s8 }
  0x2c   : > { %p16409_p1 = scmp.ne.s32.totalorder %s190_s8, %s16408_s17  ;;  %p16417_p5 = scmp.lt.s32.totalorder %s16408_s17, %s16408_s17 }
  0x2e   : > { %p16411_p13 = pnand %p16409_p1, %p16347_p12  ;;  %p16418_p10 = por %p16417_p5, %p16416_p3 }
  0x30   : > { %p16412_p0 = pneg %p16411_p13 }
  0x32   : > { %p16419_p7 = pnand %p16418_p10, %p16412_p0 }
  0x34   : > { %16422 = shalt.err (!%p16419_p7)
}
  0x35   : > { %16010 = dma.hbm_to_vmem [thread:$0]  (!%p16641_p11), %s20646_s2, 9216, %s190_s8, [#allocation9], %s20651_s10, %s20651_s10, %s16555_s11  }
  0x36   : > { %s16556_s28 = smov [#allocation13]  }
  0x37   : > { %s216_s30 = sshll.u32 %s16556_s28, 4  ;;  %s217_s30 = int_to_ptr.vmem [resolvable:$true] %s216_s30 }
  0x38   : > { %s16434_s6 = scalar_lea.vmem %s217_s30, 128  ;;  %p16442_p0 = scmp.lt.s32.totalorder %s217_s30, %s217_s30 }
  0x39   : > { %p16435_p1 = scmp.ne.s32.totalorder %s217_s30, %s16434_s6  ;;  %p16443_p3 = scmp.lt.s32.totalorder %s16434_s6, %s16434_s6 }
  0x3b   : > { %p16437_p9 = pnand %p16435_p1, %p16347_p12  ;;  %p16444_p5 = por %p16443_p3, %p16442_p0 }
  0x3d   : > { %p16438_p13 = pneg %p16437_p9 }
  0x3f   : > { %p16445_p10 = pnand %p16444_p5, %p16438_p13 }
  0x41   : > { %16448 = shalt.err (!%p16445_p10)
}
  0x42   : > { %16016 = dma.hbm_to_vmem [thread:$0]  (!%p16641_p11), %s20648_s4, 128, %s217_s30, [#allocation12]  }
  0x43   : > { %s16689_s8 = sadd.s32 1, %s16549_s21   ;;  %s30_s12 = sadd.s32 1, %s16545_s20 }
  0x44   : > { %s27_s29 = ssub.s32 %s16549_s21, %s16689_s8  ;;  %p37_p12 = scmp.ne.s32.totalorder %s16545_s20, %s16541_s19 }
  0x45   : > { %p28_p7 = scmp.eq.s32.totalorder %s27_s29, 0  ;;  %p38_p1 = scmp.eq.s32.totalorder %s16549_s21, 0 }
  0x46   : > { %p16699_p9 = por %p151_p2, %p37_p12  ;;  %p16029_p13 = scmp.lt.s32.totalorder %s16549_s21, 2 }
  0x47   : > { %s16705_s14 = scalar_select %p28_p7, %s16545_s20, %s30_s12  }
  0x48   : > { %s20673_s13 = scalar_select %p16699_p9, 1, 0 }
  0x49   : > { %p39_p0 = por %p38_p1, %p37_p12  ;;  %s227_s15 = sand.u32 1, %s16545_s20  }
  0x4a   : > { %s13802_s16 = sshll.u32 %s227_s15, 7  ;;  %s14439_s17 = sshll.u32 %s16549_s21, 11 }
  0x4b   : > { %s16712_s28 = scalar_lea.hbm %s20644_s0, %s14439_s17  ;;  %s231_s30 = scalar_lea.vmem [#allocation5], %s13802_s16 }
  0x4c   : > { %s238_s6 = sshll.u32 %s231_s30, 4  ;;  %p16716_p2 = pnand %p16029_p13, %p39_p0  ;;  %s16714_s6 = int_to_ptr.vmem [resolvable:$true] %s238_s6 }
  0x4d   : > { %s16720_s9 = scalar_lea.sflag [#allocation6], %s227_s15  ;;  %s16449_s12 = scalar_lea.hbm %s16712_s28, 2048 }
  0x4e   : > { %p16450_p11 = scmp.ne.s32.totalorder %s16712_s28, %s16449_s12  ;;  %p16451_p3 = pneg %p16716_p2 }
  0x4f   : > { %s16454_s16 = scalar_lea.hbm %s20644_s0, 4096  ;;  %p16455_p12 = scmp.lt.s32.totalorder %s16712_s28, %s20644_s0 }
  0x50   : > { %p16452_p5 = pnand %p16451_p3, %p16450_p11  ;;  %p16456_p7 = scmp.lt.s32.totalorder %s16454_s16, %s16449_s12 }
  0x52   : > { %p16453_p10 = pneg %p16452_p5  ;;  %p16457_p1 = por %p16456_p7, %p16455_p12 }
  0x54   : > { %p16458_p13 = pnand %p16457_p1, %p16453_p10 }
  0x56   : > { %16461 = shalt.err (!%p16458_p13)
}
  0x57   : > { %s16462_s15 = scalar_lea.vmem %s16714_s6, 2048  ;;  %s16557_s30 = smov [#allocation5]  }
  0x58   : > { %p16463_p0 = scmp.ne.s32.totalorder %s16714_s6, %s16462_s15  ;;  %s16467_s10 = sshll.u32 %s16557_s30, 4  ;;  %s16468_s10 = int_to_ptr.vmem [resolvable:$false] %s16467_s10 }
  0x59   : > { %s16469_s29 = scalar_lea.vmem %s16468_s10, 4096  ;;  %p16470_p5 = scmp.lt.s32.totalorder %s16714_s6, %s16468_s10 }
  0x5a   : > { %p16465_p6 = pnand %p16463_p0, %p16451_p3  ;;  %p16471_p9 = scmp.lt.s32.totalorder %s16469_s29, %s16462_s15 }
  0x5c   : > { %p16466_p11 = pneg %p16465_p6  ;;  %p16472_p4 = por %p16471_p9, %p16470_p5 }
  0x5e   : > { %p16473_p8 = pnand %p16472_p4, %p16466_p11 }
  0x60   : > { %16476 = shalt.err (!%p16473_p8)
}
  0x61   : > { %s20675_s12 = smov 64   ;;  %p20676_p6 = scmp.ne.s32.totalorder %s20671_s26, 0 }
  0x62   : > { %16020 = dma.hbm_to_vmem [thread:$0]  (!%p16716_p2), %s16712_s28, 2048, %s16714_s6, %s16720_s9, %s20675_s12, %s20675_s12, %s16555_s11  }
  0x63   : > { %250 = sbr.rel (%p20676_p6) target bundleno = 1321 (0x529), region = 40 }
  0x68   : > { %s16747_s17 = sand.u32 1, %s16541_s19   ;;  %p20677_p4 = scmp.ne.s32.totalorder %s20669_s24, 0 }
  0x69   : > { %s13806_s10 = sshll.u32 %s16747_s17, 7  ;;  %s253_s16 = scalar_lea.sflag [#allocation6], %s16747_s17 }
  0x6a   : > { %s16753_s7 = scalar_lea.vmem [#allocation5], %s13806_s10 }
  0x6b   : > { %16520 = dma.done.wait (%p20677_p4), %s253_s16, 2048  }
  0x6c   : > { %16522 = vsyncadd (%p20677_p4), %s253_s16, 4294965248  ;;  %p20678_p8 = scmp.eq.s32.totalorder %s16613_s22, 0 }
  0x6e   : > { %16524 = dma.done.wait (%p20678_p8), [#allocation9], 18432   ;;  %p20679_p9 = pmov %p20678_p8 }
  0x6f   : > { %p20680_p2 = pmov %p20678_p8 }
  0x70   : > { %16526 = vsyncadd (%p20679_p9), [#allocation9], 4294948864 }
  0x71   : > { %16528 = dma.done.wait (%p20680_p2), [#allocation12], 1152   ;;  %p20681_p3 = pmov %p20680_p2 }
  0x72   : > { %v16558_v0 = vmov 0   ;;  %v16076_v1 = vld [vmem:[#allocation8 + $0x38] sm:$0xff]   ;;  %v16077_v2 = vld [vmem:[#allocation8 + $0x30] sm:$0xff]   ;;  %vm307_vm0 = vcmask 1040384   ;;  %vm308_vm1 = vsmask.f32 256 }
  0x73   : > { %16530 = vsyncadd (%p20681_p3), [#allocation12], 4294966144  ;;  %300 = vst [vmem:[#allocation2] sm:$0xf] %v16558_v0  ;;  %15056 = vmatprep.subr.bf16.mxu0 %v16076_v1  ;;  %15968 = vmatprep.subr.bf16.mxu1 %v16076_v1  ;;  %v16078_v3 = vld [vmem:[#allocation8 + $0x28] sm:$0xff]   ;;  %v20682_v4 = vmov 0 }
  0x74   : > { %301 = vst [vmem:[#allocation2 + $0x4] sm:$0xf] %v16558_v0  ;;  %302 = vst [vmem:[#allocation2 + $0x8] sm:$0xf] %v16558_v0  ;;  %15057 = vmatpush3.bf16.msra.mxu0 %v16076_v1  ;;  %15976 = vmatpush3.bf16.msra.mxu1 %v16076_v1  ;;  %vm364_vm2 = vsmask.f32 7938 }
  0x75   : > { %304 = vst [vmem:[#allocation2 + $0xcc] sm:$0xf] %v16558_v0  ;;  %305 = vst [vmem:[#allocation2 + $0xd0] sm:$0xf] %v16558_v0  ;;  %15058 = vmatprep.subr.bf16.mxu0 %v16077_v2  ;;  %15969 = vmatprep.subr.bf16.mxu1 %v16077_v2  ;;  %vm567_vm4 = vsmask.f32 4368 }
  0x76   : > { %306 = vst [vmem:[#allocation2 + $0xd4] sm:$0xf] %v16558_v0  ;;  %420 = vst [vmem:[#allocation3] sm:$0xf] %v16558_v0  ;;  %v16079_v5 = vld [vmem:[#allocation8 + $0x20] sm:$0xff]   ;;  %v20685_v10 = vmov 0 }
  0x77   : > { %421 = vst [vmem:[#allocation3 + $0x4] sm:$0xf] %v16558_v0  ;;  %422 = vst [vmem:[#allocation3 + $0x8] sm:$0xf] %v16558_v0  ;;  %v334_v7 = vld [vmem:[#allocation2 + $0x60] sm:$0x1] }
  0x78   : > { %424 = vst [vmem:[#allocation3 + $0xcc] sm:$0xf] %v16558_v0  ;;  %425 = vst [vmem:[#allocation3 + $0xd0] sm:$0xf] %v16558_v0  ;;  %15059 = vmatpush3.bf16.msra.mxu0 %v16077_v2  ;;  %15977 = vmatpush3.bf16.msra.mxu1 %v16077_v2  ;;  %v390_v11 = vld [vmem:[#allocation2 + $0x68] sm:$0x1] }
  0x79   : > { %426 = vst [vmem:[#allocation3 + $0xd4] sm:$0xf] %v16558_v0  ;;  %vm16769_vm3 = vmand %vm307_vm0, %vm308_vm1  ;;  %15060 = vmatprep.subr.bf16.mxu0 %v16078_v3  ;;  %15970 = vmatprep.subr.bf16.mxu1 %v16078_v3  ;;  %v549_v12 = vld [vmem:[%s16753_s7 + $0x38] sm:$0xf]  ;;  %v550_v14 = vld [vmem:[%s16753_s7 + $0x3c] sm:$0xf] }
  0x7a   : > { %v20683_v4 = vsel %vm16769_vm3, 4294967295, %v20682_v4  ;;  %v310_v6 = vld [vmem:[#allocation2] sm:$0x1]  ;;  %v335_v9 = vsel %vm16769_vm3, 0, %v334_v7  ;;  %vm16779_vm5 = vmand %vm307_vm0, %vm364_vm2  ;;  %v689_v15 = vshrl.u32 %v549_v12, 16  ;;  %v692_v16 = vshll.u32 %v549_v12, 16 }
  0x7b   : > { %20684 = vst [vmem:[#allocation19_spill] sm:$0xff] %v20683_v4  ;;  %v311_v8 = vsel %vm16769_vm3, 0, %v310_v6  ;;  %v20686_v10 = vsel %vm16779_vm5, 4294967295, %v20685_v10  ;;  %336 = vst [vmem:[#allocation2 + $0x60] sm:$0x1] %v335_v9  ;;  %v391_v13 = vsel %vm16779_vm5, 0, %v390_v11 }
  0x7c   : > { %20687 = vst [vmem:[#allocation20_spill] sm:$0xff] %v20686_v10  ;;  %312 = vst [vmem:[#allocation2] sm:$0x1] %v311_v8  ;;  %vm890_vm6 = vcmask 1043456   ;;  %15061 = vmatpush3.bf16.msra.mxu0 %v16078_v3  ;;  %15978 = vmatpush3.bf16.msra.mxu1 %v16078_v3  ;;  %v697_v17 = vshrl.u32 %v550_v14, 16  ;;  %v700_v18 = vshll.u32 %v550_v14, 16 }
  0x7d   : > { %392 = vst [vmem:[#allocation2 + $0x68] sm:$0x1] %v391_v13  ;;  %v313_v19 = vld [vmem:[#allocation2 + $0xc] sm:$0x1]  ;;  %v369_v20 = vld [vmem:[#allocation2 + $0x14] sm:$0x1]  ;;  %15062 = vmatprep.subr.bf16.mxu0 %v16079_v5  ;;  %15971 = vmatprep.subr.bf16.mxu1 %v16079_v5  ;;  %vm16795_vm7 = vmor %vm308_vm1, %vm567_vm4 }
  0x7e   : > { %v16080_v21 = vld [vmem:[#allocation8 + $0x18] sm:$0xff]   ;;  %v691_v22 = vrot.slane %v689_v15, 7  ;;  %v314_v23 = vsel %vm16769_vm3, 0, %v313_v19  ;;  %v370_v24 = vsel %vm16779_vm5, 0, %v369_v20  ;;  %v535_v25 = vld [vmem:[%s16753_s7] sm:$0xf]  ;;  %vm16801_vm8 = vmand %vm890_vm6, %vm364_vm2 }
  0x7f   : > { %v699_v26 = vrot.slane %v697_v17, 7  ;;  %315 = vst [vmem:[#allocation2 + $0xc] sm:$0x1] %v314_v23  ;;  %371 = vst [vmem:[#allocation2 + $0x14] sm:$0x1] %v370_v24  ;;  %v570_v28 = vshrl.u32 %v535_v25, 16 }
  0x80   : > { %v536_v27 = vld [vmem:[%s16753_s7 + $0x4] sm:$0xf]  ;;  %v573_v29 = vshll.u32 %v535_v25, 16  ;;  %v20688_v30 = vmov 0  ;;  %v694_v31 = vor.u32 %v692_v16, %v691_v22  ;;  %v695_v32 = vrot.slane %v691_v22, 4  ;;  %15063 = vmatpush3.bf16.msra.mxu0 %v16079_v5  ;;  %15979 = vmatpush3.bf16.msra.mxu1 %v16079_v5  ;;  %v16081_v42 = vld [vmem:[#allocation8 + $0x10] sm:$0xff]  }
  0x81   : > { %v20689_v30 = vsel %vm16795_vm7, 4294967295, %v20688_v30  ;;  %v578_v33 = vshrl.u32 %v536_v27, 16  ;;  %v581_v34 = vshll.u32 %v536_v27, 16  ;;  %v337_v35 = vld [vmem:[#allocation2 + $0x6c] sm:$0x1]  ;;  %v702_v36 = vor.u32 %v700_v18, %v699_v26  ;;  %15064 = vmatprep.subr.bf16.mxu0 %v16080_v21  ;;  %15972 = vmatprep.subr.bf16.mxu1 %v16080_v21  ;;  %v16082_v60 = vld [vmem:[#allocation8 + $0x8] sm:$0xff]  }
  0x82   : > { %20690 = vst [vmem:[#allocation21_spill] sm:$0xff] %v20689_v30  ;;  %v704_v37 = vrot.slane %v699_v26, 4  ;;  %v20691_v38 = vmov 0  ;;  %v572_v39 = vrot.slane %v570_v28, 7  ;;  %v338_v40 = vsel %vm16769_vm3, 0, %v337_v35  ;;  %v16083_v9 = vld [vmem:[#allocation8] sm:$0xff]  }
  0x83   : > { %v20692_v38 = vsel %vm16801_vm8, 4294967295, %v20691_v38  ;;  %v551_v41 = vld [vmem:[%s16753_s7 + $0x40] sm:$0xf]  ;;  %v580_v43 = vrot.slane %v578_v33, 7  ;;  %339 = vst [vmem:[#allocation2 + $0x6c] sm:$0x1] %v338_v40  ;;  %v703_v48 = vsel %vm16795_vm7, %v695_v32, %v702_v36 }
  0x84   : > { %20693 = vst [vmem:[#allocation22_spill] sm:$0xff] %v20692_v38  ;;  %v552_v44 = vld [vmem:[%s16753_s7 + $0x44] sm:$0xf]  ;;  %v706_v45 = vshrl.u32 %v551_v41, 16  ;;  %v709_v46 = vshll.u32 %v551_v41, 16  ;;  %v16084_v47 = vld [vmem:[#allocation2] sm:$0xff]   ;;  %v575_v50 = vor.u32 %v573_v29, %v572_v39  ;;  %15065 = vmatpush3.bf16.msra.mxu0 %v16080_v21  ;;  %15980 = vmatpush3.bf16.msra.mxu1 %v16080_v21 }
  0x85   : > { %v941_v49 = vld [vmem:[#allocation2 + $0x60] sm:$0xf]  ;;  %v576_v51 = vrot.slane %v572_v39, 4  ;;  %944 = vst [vmem:[#allocation2 + $0x64] sm:$0xf] %v703_v48  ;;  %v583_v54 = vor.u32 %v581_v34, %v580_v43  ;;  %v585_v55 = vrot.slane %v580_v43, 4  ;;  %15066 = vmatprep.subr.bf16.mxu0 %v16081_v42  ;;  %15973 = vmatprep.subr.bf16.mxu1 %v16081_v42 }
  0x86   : > { %v942_v52 = vsel %vm16801_vm8, %v694_v31, %v941_v49  ;;  %v945_v53 = vld [vmem:[#allocation2 + $0x68] sm:$0x1]  ;;  %v708_v56 = vrot.slane %v706_v45, 7  ;;  %v714_v58 = vshrl.u32 %v552_v44, 16  ;;  %v717_v59 = vshll.u32 %v552_v44, 16  ;;  %15072 = vmatprep.mubr.bf16.mxu0 %v16084_v47  ;;  %v16090_v41 = vld [vmem:[#allocation8 + $0x70] sm:$0xff]  }
  0x87   : > { %943 = vst [vmem:[#allocation2 + $0x60] sm:$0xf] %v942_v52  ;;  %v946_v57 = vsel %vm16769_vm3, %v704_v37, %v945_v53  ;;  %v584_v61 = vsel %vm16795_vm7, %v576_v51, %v583_v54  ;;  %v892_v62 = vld [vmem:[#allocation2 + $0xc] sm:$0xf]  ;;  %v896_v63 = vld [vmem:[#allocation2 + $0x14] sm:$0x1] }
  0x88   : > { %947 = vst [vmem:[#allocation2 + $0x68] sm:$0x1] %v946_v57  ;;  %v711_v0 = vor.u32 %v709_v46, %v708_v56  ;;  %v893_v1 = vsel %vm16801_vm8, %v575_v50, %v892_v62  ;;  %895 = vst [vmem:[#allocation2 + $0x10] sm:$0xf] %v584_v61  ;;  %v897_v2 = vsel %vm16769_vm3, %v585_v55, %v896_v63  ;;  %v712_v3 = vrot.slane %v708_v56, 4  ;;  %v16088_v20 = vld [vmem:[#allocation8 + $0x78] sm:$0xff]  }
  0x89   : > { %v16821_v5 = vrot.slane %v714_v58, 7  ;;  %894 = vst [vmem:[#allocation2 + $0xc] sm:$0xf] %v893_v1  ;;  %898 = vst [vmem:[#allocation2 + $0x14] sm:$0x1] %v897_v2  ;;  %15067 = vmatpush3.bf16.msra.mxu0 %v16081_v42  ;;  %15981 = vmatpush3.bf16.msra.mxu1 %v16081_v42  ;;  %v16089_v23 = vld [vmem:[#allocation8 + $0xb8] sm:$0xff]  }
  0x8a   : > { %v948_v7 = vld [vmem:[#allocation2 + $0x6c] sm:$0xf]  ;;  %v316_v8 = vld [vmem:[#allocation2 + $0x18] sm:$0x1]  ;;  %15068 = vmatprep.subr.bf16.mxu0 %v16082_v60  ;;  %15974 = vmatprep.subr.bf16.mxu1 %v16082_v60  ;;  %v538_v14 = vld [vmem:[%s16753_s7 + $0xc] sm:$0xf] }
  0x8b   : > { %v719_v6 = vor.u32 %v717_v59, %v16821_v5  ;;  %v949_v11 = vsel %vm16801_vm8, %v711_v0, %v948_v7  ;;  %v317_v12 = vsel %vm16769_vm3, 0, %v316_v8  ;;  %v537_v13 = vld [vmem:[%s16753_s7 + $0x8] sm:$0xf]  ;;  %v595_v18 = vshrl.u32 %v538_v14, 16  ;;  %v554_v28 = vld [vmem:[%s16753_s7 + $0x4c] sm:$0xf] }
  0x8c   : > { %950 = vst [vmem:[#allocation2 + $0x6c] sm:$0xf] %v949_v11  ;;  %318 = vst [vmem:[#allocation2 + $0x18] sm:$0x1] %v317_v12  ;;  %v587_v16 = vshrl.u32 %v537_v13, 16  ;;  %v590_v17 = vshll.u32 %v537_v13, 16 }
  0x8d   : > { %v720_v15 = vsel %vm16795_vm7, %v712_v3, %v719_v6  ;;  %v598_v21 = vshll.u32 %v538_v14, 16  ;;  %v340_v22 = vld [vmem:[#allocation2 + $0x78] sm:$0x1]  ;;  %15069 = vmatpush3.bf16.msra.mxu0 %v16082_v60  ;;  %15982 = vmatpush3.bf16.msra.mxu1 %v16082_v60  ;;  %v16832_v25 = vrot.slane %v595_v18, 7  ;;  %v731_v37 = vshrl.u32 %v554_v28, 16  ;;  %v16091_v42 = vld [vmem:[#allocation8 + $0xb0] sm:$0xff]  }
  0x8e   : > { %v16085_v19 = vld [vmem:[#allocation2 + $0x60] sm:$0xff]   ;;  %951 = vst [vmem:[#allocation2 + $0x70] sm:$0xf] %v720_v15  ;;  %v589_v24 = vrot.slane %v587_v16, 7  ;;  %v341_v26 = vsel %vm16769_vm3, 0, %v340_v22  ;;  %15070 = vmatprep.subr.bf16.mxu0 %v16083_v9  ;;  %15975 = vmatprep.subr.bf16.mxu1 %v16083_v9  ;;  %v734_v39 = vshll.u32 %v554_v28, 16 }
  0x8f   : > { %v553_v27 = vld [vmem:[%s16753_s7 + $0x48] sm:$0xf]  ;;  %342 = vst [vmem:[#allocation2 + $0x78] sm:$0x1] %v341_v26  ;;  %15088 = vmatprep.mubr.bf16.mxu1 %v16085_v19  ;;  %v600_v34 = vor.u32 %v598_v21, %v16832_v25  ;;  %v319_v40 = vld [vmem:[#allocation2 + $0x24] sm:$0x1] }
  0x90   : > { %v723_v29 = vshrl.u32 %v553_v27, 16  ;;  %v726_v31 = vshll.u32 %v553_v27, 16  ;;  %v592_v32 = vor.u32 %v590_v17, %v589_v24  ;;  %v593_v33 = vrot.slane %v589_v24, 4  ;;  %v16086_v35 = vld [vmem:[#allocation2 + $0xc] sm:$0xff]   ;;  %v539_v45 = vld [vmem:[%s16753_s7 + $0x10] sm:$0xf] }
  0x91   : > { %15071 = vmatpush3.bf16.msra.mxu0 %v16083_v9  ;;  %15983 = vmatpush3.bf16.msra.mxu1 %v16083_v9  ;;  %v320_v44 = vsel %vm16769_vm3, 0, %v319_v40  ;;  %v540_v46 = vld [vmem:[%s16753_s7 + $0x14] sm:$0xf]  ;;  %v16845_v50 = vrot.slane %v731_v37, 7  ;;  %v604_v53 = vshrl.u32 %v539_v45, 16  ;;  %v607_v54 = vshll.u32 %v539_v45, 16 }
  0x92   : > { %v725_v36 = vrot.slane %v723_v29, 7  ;;  %v601_v43 = vsel %vm16795_vm7, %v593_v33, %v600_v34  ;;  %15104 = vmatprep.subr.bf16.mxu1 %v16088_v20  ;;  %15152 = vmatprep.subr.bf16.mxu0 %v16089_v23  ;;  %321 = vst [vmem:[#allocation2 + $0x24] sm:$0x1] %v320_v44  ;;  %v612_v55 = vshrl.u32 %v540_v46, 16  ;;  %v615_v57 = vshll.u32 %v540_v46, 16  ;;  %v16097_v7 = vld [vmem:[#allocation8 + $0xa8] sm:$0xff]  }
  0x93   : > { %v899_v47 = vld [vmem:[#allocation2 + $0x18] sm:$0xf]  ;;  %902 = vst [vmem:[#allocation2 + $0x1c] sm:$0xf] %v601_v43  ;;  %v736_v56 = vor.u32 %v734_v39, %v16845_v50  ;;  %v343_v58 = vld [vmem:[#allocation2 + $0x84] sm:$0x1] }
  0x94   : > { %v728_v48 = vor.u32 %v726_v31, %v725_v36  ;;  %v729_v49 = vrot.slane %v725_v36, 4  ;;  %v900_v52 = vsel %vm16801_vm8, %v592_v32, %v899_v47  ;;  %15073 = vmatmul.mubr.bf16.vlgmr.msra.gmra.mxu0 %v16086_v35  ;;  %v555_v59 = vld [vmem:[%s16753_s7 + $0x50] sm:$0xf]  ;;  %v606_v61 = vrot.slane %v604_v53, 7  ;;  %v556_v3 = vld [vmem:[%s16753_s7 + $0x54] sm:$0xf] }
  0x95   : > { %v16087_v51 = vld [vmem:[#allocation2 + $0x6c] sm:$0xff]   ;;  %901 = vst [vmem:[#allocation2 + $0x18] sm:$0xf] %v900_v52  ;;  %15153 = vmatpush3.bf16.msra.mxu0 %v16089_v23  ;;  %v16851_v62 = vrot.slane %v612_v55, 7  ;;  %v344_v63 = vsel %vm16769_vm3, 0, %v343_v58  ;;  %v740_v0 = vshrl.u32 %v555_v59, 16 }
  0x96   : > { %15089 = vmatmul.mubr.bf16.vlgmr.msra.gmra.mxu1 %v16087_v51  ;;  %v955_v60 = vld [vmem:[#allocation2 + $0x78] sm:$0xf]  ;;  %15154 = vmatprep.subr.bf16.mxu0 %v16091_v42  ;;  %v737_v1 = vsel %vm16795_vm7, %v729_v49, %v736_v56  ;;  %345 = vst [vmem:[#allocation2 + $0x84] sm:$0x1] %v344_v63  ;;  %v743_v6 = vshll.u32 %v555_v59, 16  ;;  %v609_v8 = vor.u32 %v607_v54, %v606_v61  ;;  %v610_v9 = vrot.slane %v606_v61, 4 }
  0x97   : > { %15105 = vmatpush3.bf16.msra.mxu1 %v16088_v20  ;;  %v956_v2 = vsel %vm16801_vm8, %v728_v48, %v955_v60  ;;  %958 = vst [vmem:[#allocation2 + $0x7c] sm:$0xf] %v737_v1  ;;  %v617_v11 = vor.u32 %v615_v57, %v16851_v62  ;;  %v16096_v12 = vld [vmem:[#allocation8 + $0x68] sm:$0xff]   ;;  %v742_v13 = vrot.slane %v740_v0, 7  ;;  %v748_v14 = vshrl.u32 %v556_v3, 16  ;;  %v16099_v16 = vld [vmem:[#allocation8 + $0xa0] sm:$0xff]  }
  0x98   : > { %15106 = vmatprep.subr.bf16.mxu1 %v16090_v41  ;;  %957 = vst [vmem:[#allocation2 + $0x78] sm:$0xf] %v956_v2  ;;  %v751_v15 = vshll.u32 %v556_v3, 16  ;;  %v16098_v19 = vld [vmem:[#allocation8 + $0x60] sm:$0xff]   ;;  %v541_v28 = vld [vmem:[%s16753_s7 + $0x18] sm:$0xf] }
  0x99   : > { %15155 = vmatpush3.bf16.msra.mxu0 %v16091_v42  ;;  %v618_v17 = vsel %vm16795_vm7, %v610_v9, %v617_v11  ;;  %v906_v18 = vld [vmem:[#allocation2 + $0x24] sm:$0xf]  ;;  %v745_v21 = vor.u32 %v743_v6, %v742_v13  ;;  %v746_v22 = vrot.slane %v742_v13, 4  ;;  %v16865_v23 = vrot.slane %v748_v14, 7  ;;  %v322_v27 = vld [vmem:[#allocation2 + $0x30] sm:$0x1] }
  0x9a   : > { %v907_v20 = vsel %vm16801_vm8, %v609_v8, %v906_v18  ;;  %909 = vst [vmem:[#allocation2 + $0x28] sm:$0xf] %v618_v17  ;;  %15156 = vmatprep.subr.bf16.mxu0 %v16097_v7  ;;  %v16105_v29 = vld [vmem:[#allocation8 + $0x98] sm:$0xff]   ;;  %v323_v32 = vsel %vm16769_vm3, 0, %v322_v27  ;;  %v621_v34 = vshrl.u32 %v541_v28, 16  ;;  %v624_v39 = vshll.u32 %v541_v28, 16 }
  0x9b   : > { %15107 = vmatpush3.bf16.msra.mxu1 %v16090_v41  ;;  %908 = vst [vmem:[#allocation2 + $0x24] sm:$0xf] %v907_v20  ;;  %v753_v26 = vor.u32 %v751_v15, %v16865_v23  ;;  %v542_v33 = vld [vmem:[%s16753_s7 + $0x1c] sm:$0xf]  ;;  %324 = vst [vmem:[#allocation2 + $0x30] sm:$0x1] %v323_v32 }
  0x9c   : > { %v16092_v24 = vld [vmem:[#allocation2 + $0x18] sm:$0xff]   ;;  %15108 = vmatprep.subr.bf16.mxu1 %v16096_v12  ;;  %v623_v40 = vrot.slane %v621_v34, 7  ;;  %v629_v41 = vshrl.u32 %v542_v33, 16  ;;  %v632_v42 = vshll.u32 %v542_v33, 16  ;;  %v346_v43 = vld [vmem:[#allocation2 + $0x90] sm:$0x1] }
  0x9d   : > { %15076 = vmatprep.mubr.bf16.mxu0 %v16092_v24  ;;  %v962_v31 = vld [vmem:[#allocation2 + $0x84] sm:$0xf]  ;;  %15157 = vmatpush3.bf16.msra.mxu0 %v16097_v7  ;;  %v754_v36 = vsel %vm16795_vm7, %v746_v22, %v753_v26  ;;  %v16104_v44 = vld [vmem:[#allocation8 + $0x58] sm:$0xff]   ;;  %v347_v45 = vsel %vm16769_vm3, 0, %v346_v43  ;;  %v325_v60 = vld [vmem:[#allocation2 + $0x3c] sm:$0x1] }
  0x9e   : > { %v963_v37 = vsel %vm16801_vm8, %v745_v21, %v962_v31  ;;  %15158 = vmatprep.subr.bf16.mxu0 %v16099_v16  ;;  %965 = vst [vmem:[#allocation2 + $0x88] sm:$0xf] %v754_v36  ;;  %v557_v46 = vld [vmem:[%s16753_s7 + $0x58] sm:$0xf]  ;;  %v558_v47 = vld [vmem:[%s16753_s7 + $0x5c] sm:$0xf]  ;;  %v626_v54 = vor.u32 %v624_v39, %v623_v40 }
  0x9f   : > { %v16093_v35 = vld [vmem:[#allocation2 + $0x78] sm:$0xff]   ;;  %15109 = vmatpush3.bf16.msra.mxu1 %v16096_v12  ;;  %964 = vst [vmem:[#allocation2 + $0x84] sm:$0xf] %v963_v37  ;;  %v627_v48 = vrot.slane %v623_v40, 4  ;;  %v16880_v49 = vrot.slane %v629_v41, 7  ;;  %v757_v51 = vshrl.u32 %v557_v46, 16 }
  0xa0   : > { %15110 = vmatprep.subr.bf16.mxu1 %v16098_v19  ;;  %15092 = vmatprep.mubr.bf16.mxu1 %v16093_v35  ;;  %348 = vst [vmem:[#allocation2 + $0x90] sm:$0x1] %v347_v45  ;;  %v16107_v52 = vld [vmem:[#allocation8 + $0x90] sm:$0xff]   ;;  %v760_v55 = vshll.u32 %v557_v46, 16  ;;  %v765_v56 = vshrl.u32 %v558_v47, 16  ;;  %v768_v57 = vshll.u32 %v558_v47, 16 }
  0xa1   : > { %15159 = vmatpush3.bf16.msra.mxu0 %v16099_v16  ;;  %v634_v58 = vor.u32 %v632_v42, %v16880_v49  ;;  %v759_v59 = vrot.slane %v757_v51, 7  ;;  %v543_v61 = vld [vmem:[%s16753_s7 + $0x20] sm:$0xf]  ;;  %v16106_v63 = vld [vmem:[#allocation8 + $0x50] sm:$0xff]   ;;  %v326_v1 = vsel %vm16769_vm3, 0, %v325_v60  ;;  %v16113_v7 = vld [vmem:[#allocation8 + $0x88] sm:$0xff]  }
  0xa2   : > { %v16094_v53 = vld [vmem:[#allocation2 + $0x24] sm:$0xff]   ;;  %15160 = vmatprep.subr.bf16.mxu0 %v16105_v29  ;;  %v16884_v0 = vrot.slane %v765_v56, 7  ;;  %v544_v2 = vld [vmem:[%s16753_s7 + $0x24] sm:$0xf]  ;;  %v638_v3 = vshrl.u32 %v543_v61, 16  ;;  %v641_v6 = vshll.u32 %v543_v61, 16 }
  0xa3   : > { %15111 = vmatpush3.bf16.msra.mxu1 %v16098_v19  ;;  %15077 = vmatmul.mubr.bf16.gmra.mxu0 %v16094_v53  ;;  %v635_v8 = vsel %vm16795_vm7, %v627_v48, %v634_v58  ;;  %v913_v9 = vld [vmem:[#allocation2 + $0x30] sm:$0xf]  ;;  %v762_v11 = vor.u32 %v760_v55, %v759_v59  ;;  %v763_v12 = vrot.slane %v759_v59, 4  ;;  %327 = vst [vmem:[#allocation2 + $0x3c] sm:$0x1] %v326_v1  ;;  %v646_v13 = vshrl.u32 %v544_v2, 16 }
  0xa4   : > { %15112 = vmatprep.subr.bf16.mxu1 %v16104_v44  ;;  %v349_v14 = vld [vmem:[#allocation2 + $0x9c] sm:$0x1]  ;;  %v914_v17 = vsel %vm16801_vm8, %v626_v54, %v913_v9  ;;  %916 = vst [vmem:[#allocation2 + $0x34] sm:$0xf] %v635_v8  ;;  %v770_v18 = vor.u32 %v768_v57, %v16884_v0  ;;  %v640_v19 = vrot.slane %v638_v3, 7  ;;  %v649_v21 = vshll.u32 %v544_v2, 16 }
  0xa5   : > { %15161 = vmatpush3.bf16.msra.mxu0 %v16105_v29  ;;  %v16112_v15 = vld [vmem:[#allocation8 + $0x48] sm:$0xff]   ;;  %915 = vst [vmem:[#allocation2 + $0x30] sm:$0xf] %v914_v17  ;;  %v16894_v20 = vrot.slane %v646_v13, 7  ;;  %v350_v22 = vsel %vm16769_vm3, 0, %v349_v14  ;;  %v16114_v36 = vld [vmem:[#allocation8 + $0x40] sm:$0xff]  }
  0xa6   : > { %v16095_v16 = vld [vmem:[#allocation2 + $0x84] sm:$0xff]   ;;  %15162 = vmatprep.subr.bf16.mxu0 %v16107_v52  ;;  %v559_v24 = vld [vmem:[%s16753_s7 + $0x60] sm:$0xf]  ;;  %v771_v26 = vsel %vm16795_vm7, %v763_v12, %v770_v18  ;;  %351 = vst [vmem:[#allocation2 + $0x9c] sm:$0x1] %v350_v22  ;;  %v643_v33 = vor.u32 %v641_v6, %v640_v19  ;;  %v644_v34 = vrot.slane %v640_v19, 4 }
  0xa7   : > { %15113 = vmatpush3.bf16.msra.mxu1 %v16104_v44  ;;  %v969_v27 = vld [vmem:[#allocation2 + $0x90] sm:$0xf]  ;;  %v560_v28 = vld [vmem:[%s16753_s7 + $0x64] sm:$0xf]  ;;  %v774_v29 = vshrl.u32 %v559_v24, 16  ;;  %v777_v31 = vshll.u32 %v559_v24, 16  ;;  %v651_v35 = vor.u32 %v649_v21, %v16894_v20 }
  0xa8   : > { %15114 = vmatprep.subr.bf16.mxu1 %v16106_v63  ;;  %15093 = vmatmul.mubr.bf16.gmra.mxu1 %v16095_v16  ;;  %v970_v32 = vsel %vm16801_vm8, %v762_v11, %v969_v27  ;;  %972 = vst [vmem:[#allocation2 + $0x94] sm:$0xf] %v771_v26  ;;  %v782_v39 = vshrl.u32 %v560_v28, 16  ;;  %v785_v40 = vshll.u32 %v560_v28, 16  ;;  %v16115_v41 = vld [vmem:[#allocation8 + $0x80] sm:$0xff]   ;;  %v16911_v51 = vld [vmem:[#allocation8 + $0xf8] sm:$0xff]  }
  0xa9   : > { %15163 = vmatpush3.bf16.msra.mxu0 %v16107_v52  ;;  %971 = vst [vmem:[#allocation2 + $0x90] sm:$0xf] %v970_v32  ;;  %v776_v37 = vrot.slane %v774_v29, 7  ;;  %v652_v42 = vsel %vm16795_vm7, %v644_v34, %v651_v35  ;;  %v328_v48 = vld [vmem:[#allocation2 + $0x48] sm:$0x1]  ;;  %v721_v22 = vrot.slane %v16821_v5, 4 }
  0xaa   : > { %15164 = vmatprep.subr.bf16.mxu0 %v16113_v7  ;;  %v920_v43 = vld [vmem:[#allocation2 + $0x3c] sm:$0xf]  ;;  %923 = vst [vmem:[#allocation2 + $0x40] sm:$0xf] %v652_v42  ;;  %v16907_v46 = vrot.slane %v782_v39, 7  ;;  %v329_v54 = vsel %vm16769_vm3, 0, %v328_v48 }
  0xab   : > { %15115 = vmatpush3.bf16.msra.mxu1 %v16106_v63  ;;  %v779_v44 = vor.u32 %v777_v31, %v776_v37  ;;  %v780_v45 = vrot.slane %v776_v37, 4  ;;  %v921_v47 = vsel %vm16801_vm8, %v643_v33, %v920_v43  ;;  %v16916_v55 = vld [vmem:[#allocation8 + $0x138] sm:$0xff]   ;;  %330 = vst [vmem:[#allocation2 + $0x48] sm:$0x1] %v329_v54  ;;  %v545_v57 = vld [vmem:[%s16753_s7 + $0x28] sm:$0xf] }
  0xac   : > { %15116 = vmatprep.subr.bf16.mxu1 %v16112_v15  ;;  %v16100_v52 = vld [vmem:[#allocation2 + $0x30] sm:$0xff]   ;;  %922 = vst [vmem:[#allocation2 + $0x3c] sm:$0xf] %v921_v47  ;;  %v787_v53 = vor.u32 %v785_v40, %v16907_v46  ;;  %v546_v58 = vld [vmem:[%s16753_s7 + $0x2c] sm:$0xf]  ;;  %v655_v61 = vshrl.u32 %v545_v57, 16 }
  0xad   : > { %15165 = vmatpush3.bf16.msra.mxu0 %v16113_v7  ;;  %v976_v56 = vld [vmem:[#allocation2 + $0x9c] sm:$0xf]  ;;  %15080 = vmatprep.mubr.bf16.mxu0 %v16100_v52  ;;  %v658_v63 = vshll.u32 %v545_v57, 16  ;;  %v352_v1 = vld [vmem:[#allocation2 + $0xa8] sm:$0x1]  ;;  %v663_v3 = vshrl.u32 %v546_v58, 16 }
  0xae   : > { %15166 = vmatprep.subr.bf16.mxu0 %v16115_v41  ;;  %v788_v59 = vsel %vm16795_vm7, %v780_v45, %v787_v53  ;;  %v977_v60 = vsel %vm16801_vm8, %v779_v44, %v976_v56  ;;  %v666_v6 = vshll.u32 %v546_v58, 16  ;;  %v353_v7 = vsel %vm16769_vm3, 0, %v352_v1  ;;  %v561_v9 = vld [vmem:[%s16753_s7 + $0x68] sm:$0xf]  ;;  %v562_v11 = vld [vmem:[%s16753_s7 + $0x6c] sm:$0xf] }
  0xaf   : > { %15117 = vmatpush3.bf16.msra.mxu1 %v16112_v15  ;;  %978 = vst [vmem:[#allocation2 + $0x9c] sm:$0xf] %v977_v60  ;;  %979 = vst [vmem:[#allocation2 + $0xa0] sm:$0xf] %v788_v59  ;;  %v657_v8 = vrot.slane %v655_v61, 7  ;;  %v16929_v12 = vrot.slane %v663_v3, 7 }
  0xb0   : > { %15118 = vmatprep.subr.bf16.mxu1 %v16114_v36  ;;  %v16101_v2 = vld [vmem:[#allocation2 + $0x90] sm:$0xff]   ;;  %354 = vst [vmem:[#allocation2 + $0xa8] sm:$0x1] %v353_v7  ;;  %v791_v13 = vshrl.u32 %v561_v9, 16  ;;  %v794_v14 = vshll.u32 %v561_v9, 16  ;;  %v799_v15 = vshrl.u32 %v562_v11, 16 }
  0xb1   : > { %15167 = vmatpush3.bf16.msra.mxu0 %v16115_v41  ;;  %15096 = vmatprep.mubr.bf16.mxu1 %v16101_v2  ;;  %v660_v16 = vor.u32 %v658_v63, %v657_v8  ;;  %v661_v17 = vrot.slane %v657_v8, 4  ;;  %v802_v18 = vshll.u32 %v562_v11, 16  ;;  %v331_v19 = vld [vmem:[#allocation2 + $0x54] sm:$0x1]  ;;  %v547_v21 = vld [vmem:[%s16753_s7 + $0x30] sm:$0xf]  ;;  %v668_v26 = vor.u32 %v666_v6, %v16929_v12 }
  0xb2   : > { %15248 = vmatprep.subr.bf16.mxu0 %v16916_v55  ;;  %v793_v27 = vrot.slane %v791_v13, 7  ;;  %v16935_v28 = vrot.slane %v799_v15, 7  ;;  %v927_v29 = vld [vmem:[#allocation2 + $0x48] sm:$0xf]  ;;  %v332_v31 = vsel %vm16769_vm3, 0, %v331_v19  ;;  %v672_v33 = vshrl.u32 %v547_v21, 16 }
  0xb3   : > { %15119 = vmatpush3.bf16.msra.mxu1 %v16114_v36  ;;  %v16102_v24 = vld [vmem:[#allocation2 + $0x3c] sm:$0xff]   ;;  %v548_v32 = vld [vmem:[%s16753_s7 + $0x34] sm:$0xf]  ;;  %v669_v34 = vsel %vm16795_vm7, %v661_v17, %v668_v26  ;;  %v928_v35 = vsel %vm16801_vm8, %v660_v16, %v927_v29  ;;  %333 = vst [vmem:[#allocation2 + $0x54] sm:$0x1] %v332_v31  ;;  %v602_v41 = vrot.slane %v16832_v25, 4 }
  0xb4   : > { %15200 = vmatprep.subr.bf16.mxu1 %v16911_v51  ;;  %15081 = vmatmul.mubr.bf16.gmra.mxu0 %v16102_v24  ;;  %v796_v36 = vor.u32 %v794_v14, %v793_v27  ;;  %v797_v37 = vrot.slane %v793_v27, 4  ;;  %v355_v39 = vld [vmem:[#allocation2 + $0xb4] sm:$0x1]  ;;  %v563_v40 = vld [vmem:[%s16753_s7 + $0x70] sm:$0xf]  ;;  %v804_v43 = vor.u32 %v802_v18, %v16935_v28  ;;  %v674_v45 = vrot.slane %v672_v33, 7 }
  0xb5   : > { %929 = vst [vmem:[#allocation2 + $0x48] sm:$0xf] %v928_v35  ;;  %930 = vst [vmem:[#allocation2 + $0x4c] sm:$0xf] %v669_v34  ;;  %v675_v47 = vshll.u32 %v547_v21, 16  ;;  %v680_v48 = vshrl.u32 %v548_v32, 16 }
  0xb6   : > { %v16103_v42 = vld [vmem:[#allocation2 + $0x9c] sm:$0xff]   ;;  %v683_v52 = vshll.u32 %v548_v32, 16  ;;  %v805_v53 = vsel %vm16795_vm7, %v797_v37, %v804_v43  ;;  %v356_v56 = vsel %vm16769_vm3, 0, %v355_v39  ;;  %v564_v57 = vld [vmem:[%s16753_s7 + $0x74] sm:$0xf]  ;;  %v808_v58 = vshrl.u32 %v563_v40, 16 }
  0xb7   : > { %v983_v44 = vld [vmem:[#allocation2 + $0xa8] sm:$0xf]  ;;  %15097 = vmatmul.mubr.bf16.gmra.mxu1 %v16103_v42  ;;  %v738_v59 = vrot.slane %v16845_v50, 4  ;;  %986 = vst [vmem:[#allocation2 + $0xac] sm:$0xf] %v805_v53  ;;  %v677_v60 = vor.u32 %v675_v47, %v674_v45  ;;  %v678_v61 = vrot.slane %v674_v45, 4 }
  0xb8   : > { %v984_v54 = vsel %vm16801_vm8, %v796_v36, %v983_v44  ;;  %v16955_v63 = vrot.slane %v680_v48, 7  ;;  %357 = vst [vmem:[#allocation2 + $0xb4] sm:$0x1] %v356_v56  ;;  %vm2402_vm9 = vcmask 1042432   ;;  %vm2403_vm10 = vcmask 1046532   ;;  %v16123_v25 = vld [vmem:[#allocation8 + $0x120] sm:$0xff]  }
  0xb9   : > { %985 = vst [vmem:[#allocation2 + $0xa8] sm:$0xf] %v984_v54  ;;  %v810_v1 = vrot.slane %v808_v58, 7  ;;  %v811_v2 = vshll.u32 %v563_v40, 16  ;;  %v816_v3 = vshrl.u32 %v564_v57, 16  ;;  %v819_v6 = vshll.u32 %v564_v57, 16  ;;  %vm16978_vm13 = vmor %vm2402_vm9, %vm2403_vm10 }
  0xba   : > { %v619_v7 = vrot.slane %v16851_v62, 4  ;;  %v685_v9 = vor.u32 %v683_v52, %v16955_v63  ;;  %v934_v11 = vld [vmem:[#allocation2 + $0x54] sm:$0xf]  ;;  %vm1533_vm11 = vsmask.f32 3328  ;;  %v636_v15 = vrot.slane %v16880_v49, 4 }
  0xbb   : > { %v814_v13 = vrot.slane %v810_v1, 4  ;;  %v16960_v14 = vrot.slane %v816_v3, 7  ;;  %vm1534_vm12 = vsmask.f32 7440  ;;  %v935_v18 = vsel %vm16801_vm8, %v677_v60, %v934_v11  ;;  %v366_v27 = vld [vmem:[#allocation2 + $0x8] sm:$0x1] }
  0xbc   : > { %v16108_v16 = vld [vmem:[#allocation2 + $0x48] sm:$0xff]   ;;  %v686_v17 = vsel %vm16795_vm7, %v678_v61, %v685_v9  ;;  %v653_v21 = vrot.slane %v16894_v20, 4  ;;  %936 = vst [vmem:[#allocation2 + $0x54] sm:$0xf] %v935_v18  ;;  %v813_v24 = vor.u32 %v811_v2, %v810_v1  ;;  %v1485_v29 = vld [vmem:[#allocation2] sm:$0xf]  ;;  %vm16984_vm14 = vmor %vm1533_vm11, %vm1534_vm12 }
  0xbd   : > { %937 = vst [vmem:[#allocation2 + $0x58] sm:$0xf] %v686_v17  ;;  %v821_v26 = vor.u32 %v819_v6, %v16960_v14  ;;  %15084 = vmatprep.mubr.bf16.mxu0 %v16108_v16  ;;  %v1486_v31 = vld [vmem:[#allocation2 + $0x4] sm:$0xf]  ;;  %v367_v34 = vsel %vm16779_vm5, 0, %v366_v27  ;;  %v1537_v36 = vshrl.u32 %v1485_v29, 16 }
  0xbe   : > { %368 = vst [vmem:[#allocation2 + $0x8] sm:$0x1] %v367_v34  ;;  %v1540_v37 = vshll.u32 %v1485_v29, 16  ;;  %v1546_v39 = vshll.u32 %v1486_v31, 16  ;;  %v1550_v40 = vshrl.u32 %v1486_v31, 16  ;;  %v20694_v56 = vmov 0 }
  0xbf   : > { %v822_v33 = vsel %vm16795_vm7, %v814_v13, %v821_v26  ;;  %v990_v35 = vld [vmem:[#allocation2 + $0xb4] sm:$0xf]  ;;  %v2306_v43 = vld [vmem:[#allocation2] sm:$0xe]  ;;  %v2307_v44 = vld [vmem:[#allocation2 + $0x4] sm:$0xf] }
  0xc0   : > { %v16109_v32 = vld [vmem:[#allocation2 + $0xa8] sm:$0xff]   ;;  %993 = vst [vmem:[#allocation2 + $0xb8] sm:$0xf] %v822_v33  ;;  %v991_v42 = vsel %vm16801_vm8, %v813_v24, %v990_v35  ;;  %v1539_v47 = vrot.slane %v1537_v36, 4  ;;  %v1542_v48 = vrot.slane %v1540_v37, 5  ;;  %v1548_v52 = vrot.slane %v1546_v39, 5 }
  0xc1   : > { %15100 = vmatprep.mubr.bf16.mxu1 %v16109_v32  ;;  %v1488_v45 = vld [vmem:[#allocation2 + $0xc] sm:$0xf]  ;;  %992 = vst [vmem:[#allocation2 + $0xb4] sm:$0xf] %v991_v42  ;;  %v1552_v53 = vrot.slane %v1550_v40, 4  ;;  %v20695_v56 = vsel %vm16978_vm13, 4294967295, %v20694_v56 }
  0xc2   : > { %v1489_v54 = vld [vmem:[#allocation2 + $0x10] sm:$0xf]  ;;  %20696 = vst [vmem:[#allocation23_spill] sm:$0xff] %v20695_v56  ;;  %v13860_v57 = vrot.slane %v2306_v43, 9  ;;  %v2407_v58 = vrot.slane %v2307_v44, 5  ;;  %v1561_v60 = vshrl.u32 %v1488_v45, 16  ;;  %v1543_v2 = vor.u32 %v1542_v48, %v1539_v47 }
  0xc3   : > { %v1564_v61 = vshll.u32 %v1488_v45, 16  ;;  %v1553_v3 = vor.u32 %v1552_v53, %v1548_v52  ;;  %v1570_v6 = vshll.u32 %v1489_v54, 16  ;;  %v1490_v9 = vld [vmem:[#allocation2 + $0x14] sm:$0x1]  ;;  %v2309_v16 = vld [vmem:[#allocation2 + $0xc] sm:$0xe] }
  0xc4   : > { %v16110_v1 = vld [vmem:[#allocation2 + $0x54] sm:$0xff]   ;;  %v1563_v11 = vrot.slane %v1561_v60, 4  ;;  %v20697_v17 = vmov 0  ;;  %v1544_v18 = vrot.slane %v1543_v2, 4  ;;  %v2409_v24 = vrot.slane %v2407_v58, 4  ;;  %s20434_s24 = scalar_lea.vmem [#allocation14], %s13806_s10 }
  0xc5   : > { %v1566_v13 = vrot.slane %v1564_v61, 5  ;;  %15085 = vmatmul.mubr.bf16.gmra.mxu0 %v16110_v1  ;;  %v20698_v17 = vsel %vm16984_vm14, 4294967295, %v20697_v17  ;;  %v1572_v26 = vrot.slane %v1570_v6, 5  ;;  %v1574_v27 = vshrl.u32 %v1489_v54, 16  ;;  %v2310_v29 = vld [vmem:[#allocation2 + $0x10] sm:$0xf] }
  0xc6   : > { %20699 = vst [vmem:[#allocation24_spill] sm:$0xff] %v20698_v17  ;;  %v1487_v31 = vld [vmem:[#allocation2 + $0x8] sm:$0x1]  ;;  %v2408_v33 = vsel %vm16978_vm13, %v13860_v57, %v2407_v58  ;;  %v1554_v35 = vrot.slane %v1553_v3, 4  ;;  %v2311_v40 = vld [vmem:[#allocation2 + $0x14] sm:$0x1]  ;;  %v1549_v43 = vsel %vm16984_vm14, %v1544_v18, %v1548_v52 }
  0xc7   : > { %v2308_v32 = vld [vmem:[#allocation2 + $0x8] sm:$0x1]  ;;  %v1567_v34 = vor.u32 %v1566_v13, %v1563_v11  ;;  %v1556_v36 = vshll.u32 %v1487_v31, 16  ;;  %v1576_v39 = vrot.slane %v1574_v27, 4  ;;  %v1580_v45 = vshll.u32 %v1490_v9, 16  ;;  %s14504_s26 = sshll.u32 %s16613_s22, 11 }
  0xc8   : > { %v2410_v37 = vrot.slane %v2308_v32, 5  ;;  %v16111_v42 = vld [vmem:[#allocation2 + $0xb4] sm:$0xff]   ;;  %v13861_v47 = vrot.slane %v2309_v16, 9  ;;  %v2414_v60 = vrot.slane %v2310_v29, 5  ;;  %v2417_v1 = vrot.slane %v2311_v40, 5  ;;  %s13684_s11 = sshll.u32 %s20434_s24, 4  ;;  %s20597_s9 = scalar_lea.hbm %s20649_s5, %s14504_s26  ;;  %s20599_s11 = int_to_ptr.vmem [resolvable:$true] %s13684_s11 }
  0xc9   : > { %v1568_v44 = vrot.slane %v1567_v34, 4  ;;  %v1558_v48 = vrot.slane %v1556_v36, 5  ;;  %v1577_v54 = vor.u32 %v1576_v39, %v1572_v26  ;;  %15101 = vmatmul.mubr.bf16.gmra.mxu1 %v16111_v42  ;;  %v1582_v61 = vrot.slane %v1580_v45, 5  ;;  %v372_v9 = vld [vmem:[#allocation2 + $0x20] sm:$0x1]  ;;  %s13671_s22 = scalar_lea.sflag [#allocation7], %s16747_s17 }
  0xca   : > { %v2411_v53 = vsel %vm16978_vm13, %v2409_v24, %v2410_v37  ;;  %v2415_v3 = vsel %vm16978_vm13, %v13861_v47, %v2414_v60  ;;  %v2416_v6 = vrot.slane %v2414_v60, 4  ;;  %v1491_v11 = vld [vmem:[#allocation2 + $0x18] sm:$0xf]  ;;  %v373_v16 = vsel %vm16779_vm5, 0, %v372_v9  ;;  %v1492_v18 = vld [vmem:[#allocation2 + $0x1c] sm:$0xf] }
  0xcb   : > { %v13876_v57 = vcombine.low %v2408_v33, %v2411_v53  ;;  %v1573_v58 = vsel %vm16984_vm14, %v1568_v44, %v1572_v26  ;;  %v1559_v2 = vsel %vm16984_vm14, %v1554_v35, %v1558_v48  ;;  %v1578_v52 = vrot.slane %v1577_v54, 4  ;;  %374 = vst [vmem:[#allocation2 + $0x20] sm:$0x1] %v373_v16  ;;  %v17006_v33 = vld [vmem:[#allocation2 + $0x1c] sm:$0xf]  ;;  %v16119_v34 = vld [vmem:[#allocation8 + $0x130] sm:$0xff]  }
  0xcc   : > { %v13836_v13 = vcombine.low %v1549_v43, %v1559_v2  ;;  %v1585_v24 = vshrl.u32 %v1491_v11, 16  ;;  %v1588_v26 = vshll.u32 %v1491_v11, 16  ;;  %v2418_v29 = vsel %vm16978_vm13, %v2416_v6, %v2417_v1  ;;  %v375_v40 = vld [vmem:[#allocation2 + $0x2c] sm:$0x1]  ;;  %v1494_v42 = vld [vmem:[#allocation2 + $0x24] sm:$0xf] }
  0xcd   : > { %15168 = vmatprep.mubr.bf16.mxu0 %v13876_v57  ;;  %v1583_v27 = vsel %vm16984_vm14, %v1578_v52, %v1582_v61  ;;  %v1594_v31 = vshll.u32 %v1492_v18, 16  ;;  %v1598_v32 = vshrl.u32 %v1492_v18, 16  ;;  %v13877_v36 = vcombine.low %v2415_v3, %v2418_v29  ;;  %v16118_v43 = vld [vmem:[#allocation8 + $0xf0] sm:$0xff]   ;;  %v1495_v53 = vld [vmem:[#allocation2 + $0x28] sm:$0xf]  ;;  %v16121_v6 = vld [vmem:[#allocation8 + $0x128] sm:$0xff]  }
  0xce   : > { %15120 = vmatprep.mubr.bf16.mxu1 %v13836_v13  ;;  %v13837_v35 = vcombine.low %v1573_v58, %v1583_v27  ;;  %v1587_v37 = vrot.slane %v1585_v24, 4  ;;  %v1590_v39 = vrot.slane %v1588_v26, 5  ;;  %v670_v45 = vrot.slane %v16929_v12, 4  ;;  %v17012_v54 = vld [vmem:[#allocation2 + $0x18] sm:$0xe]  ;;  %v17070_v1 = vld [vmem:[#allocation8 + $0x110] sm:$0xff]  }
  0xcf   : > { %v17010_v47 = vrot.slane %v1594_v31, 5  ;;  %v1600_v48 = vrot.slane %v1598_v32, 4  ;;  %15169 = vmatmul.mubr.bf16.vlgmr.msra.gmra.mxu0 %v13877_v36  ;;  %v2421_v60 = vrot.slane %v17006_v33, 5  ;;  %v376_v57 = vsel %vm16779_vm5, 0, %v375_v40  ;;  %v16120_v18 = vld [vmem:[#allocation8 + $0xe8] sm:$0xff]   ;;  %s16477_s23 = scalar_lea.vmem %s20599_s11, 2048 }
  0xd0   : > { %v1609_v58 = vshrl.u32 %v1494_v42, 16  ;;  %v1612_v61 = vshll.u32 %v1494_v42, 16  ;;  %15249 = vmatpush3.bf16.msra.mxu0 %v16916_v55  ;;  %v1591_v2 = vor.u32 %v1590_v39, %v1587_v37  ;;  %377 = vst [vmem:[#allocation2 + $0x2c] sm:$0x1] %v376_v57  ;;  %v1618_v3 = vshll.u32 %v1495_v53, 16  ;;  %p16478_p10 = scmp.ne.s32.totalorder %s20599_s11, %s16477_s23  ;;  %p20924_p12 = scmp.ne.s32.totalorder %s20673_s13, 0 }
  0xd1   : > { %v1601_v52 = vor.u32 %v1600_v48, %v17010_v47  ;;  %v687_v9 = vrot.slane %v16955_v63, 4  ;;  %15121 = vmatmul.mubr.bf16.vlgmr.msra.gmra.mxu1 %v13837_v35  ;;  %v1622_v16 = vshrl.u32 %v1495_v53, 16  ;;  %15250 = vmatprep.subr.bf16.mxu0 %v16119_v34  ;;  %v13862_v24 = vrot.slane %v17012_v54, 9  ;;  %v17025_v55 = vld [vmem:[#allocation2 + $0x24] sm:$0xe]  ;;  %s16559_s27 = smov [#allocation14]  }
  0xd2   : > { %v1611_v11 = vrot.slane %v1609_v58, 4  ;;  %v1614_v13 = vrot.slane %v1612_v61, 5  ;;  %15201 = vmatpush3.bf16.msra.mxu1 %v16911_v51  ;;  %v17023_v26 = vrot.slane %v1618_v3, 5  ;;  %v17027_v27 = vld [vmem:[#allocation2 + $0x28] sm:$0xf]  ;;  %v17031_v31 = vrot.slane %v2421_v60, 4  ;;  %p16479_p7 = pnand %p16478_p10, %p20924_p12 }
  0xd3   : > { %v903_v29 = vld [vmem:[#allocation2 + $0x20] sm:$0x1]  ;;  %v1624_v32 = vrot.slane %v1622_v16, 4  ;;  %15202 = vmatprep.subr.bf16.mxu1 %v16118_v43  ;;  %v17037_v35 = vrot.slane %v1591_v2, 4  ;;  %v17039_v36 = vrot.slane %v1601_v52, 4  ;;  %v2428_v42 = vrot.slane %v17027_v27, 5 }
  0xd4   : > { %v904_v51 = vsel %vm16769_vm3, %v602_v41, %v903_v29  ;;  %15251 = vmatpush3.bf16.msra.mxu0 %v16119_v34  ;;  %v378_v37 = vld [vmem:[#allocation2 + $0x38] sm:$0x1]  ;;  %v1497_v39 = vld [vmem:[#allocation2 + $0x30] sm:$0xf]  ;;  %v1615_v40 = vor.u32 %v1614_v13, %v1611_v11  ;;  %v1498_v53 = vld [vmem:[#allocation2 + $0x34] sm:$0xf]  ;;  %p16480_p1 = pneg %p16479_p7 }
  0xd5   : > { %905 = vst [vmem:[#allocation2 + $0x20] sm:$0x1] %v904_v51  ;;  %v379_v48 = vsel %vm16779_vm5, 0, %v378_v37  ;;  %v1633_v57 = vshrl.u32 %v1497_v39, 16  ;;  %15252 = vmatprep.subr.bf16.mxu0 %v16121_v6  ;;  %v1625_v41 = vor.u32 %v1624_v32, %v17023_v26  ;;  %v1636_v58 = vshll.u32 %v1497_v39, 16  ;;  %v16122_v52 = vld [vmem:[#allocation8 + $0xe0] sm:$0xff]  }
  0xd6   : > { %15203 = vmatpush3.bf16.msra.mxu1 %v16118_v43  ;;  %380 = vst [vmem:[#allocation2 + $0x38] sm:$0x1] %v379_v48  ;;  %v1642_v61 = vshll.u32 %v1498_v53, 16  ;;  %v1646_v34 = vshrl.u32 %v1498_v53, 16  ;;  %v17045_v2 = vld [vmem:[#allocation2 + $0x30] sm:$0xe] }
  0xd7   : > { %v910_v3 = vld [vmem:[#allocation2 + $0x2c] sm:$0x1]  ;;  %v13863_v11 = vrot.slane %v17025_v55, 9  ;;  %v1635_v13 = vrot.slane %v1633_v57, 4  ;;  %v17048_v16 = vld [vmem:[#allocation2 + $0x34] sm:$0xf]  ;;  %15204 = vmatprep.subr.bf16.mxu1 %v16120_v18 }
  0xd8   : > { %v911_v27 = vsel %vm16769_vm3, %v619_v7, %v910_v3  ;;  %v1638_v43 = vrot.slane %v1636_v58, 5  ;;  %v17054_v29 = vrot.slane %v1642_v61, 5  ;;  %v1648_v32 = vrot.slane %v1646_v34, 4  ;;  %v381_v51 = vld [vmem:[#allocation2 + $0x44] sm:$0x1]  ;;  %15253 = vmatpush3.bf16.msra.mxu0 %v16121_v6  ;;  %v16125_v37 = vld [vmem:[#allocation8 + $0x118] sm:$0xff]  }
  0xd9   : > { %912 = vst [vmem:[#allocation2 + $0x2c] sm:$0x1] %v911_v27  ;;  %v17056_v39 = vrot.slane %v1615_v40, 4  ;;  %v17058_v55 = vrot.slane %v2428_v42, 4  ;;  %v2435_v48 = vrot.slane %v17048_v16, 5  ;;  %v382_v62 = vsel %vm16779_vm5, 0, %v381_v51  ;;  %15254 = vmatprep.subr.bf16.mxu0 %v16123_v25 }
  0xda   : > { %v1500_v53 = vld [vmem:[#allocation2 + $0x3c] sm:$0xf]  ;;  %v17063_v7 = vrot.slane %v1625_v41, 4  ;;  %v13864_v57 = vrot.slane %v17045_v2, 9  ;;  %383 = vst [vmem:[#allocation2 + $0x44] sm:$0x1] %v382_v62  ;;  %15205 = vmatpush3.bf16.msra.mxu1 %v16120_v18  ;;  %v1639_v40 = vor.u32 %v1638_v43, %v1635_v13  ;;  %v1597_v62 = vsel %vm16984_vm14, %v17037_v35, %v17010_v47 }
  0xdb   : > { %v1501_v58 = vld [vmem:[#allocation2 + $0x40] sm:$0xf]  ;;  %v1657_v6 = vshrl.u32 %v1500_v53, 16  ;;  %v1660_v61 = vshll.u32 %v1500_v53, 16  ;;  %v17068_v34 = vrot.slane %v2435_v48, 4  ;;  %15206 = vmatprep.subr.bf16.mxu1 %v16122_v52  ;;  %v16124_v51 = vld [vmem:[#allocation8 + $0xd8] sm:$0xff]   ;;  %v2422_v18 = vsel %vm16978_vm13, %v13862_v24, %v2421_v60 }
  0xdc   : > { %v1666_v3 = vshll.u32 %v1501_v58, 16  ;;  %v1670_v27 = vshrl.u32 %v1501_v58, 16  ;;  %v1493_v41 = vld [vmem:[#allocation2 + $0x20] sm:$0x1]  ;;  %v17084_v13 = vsel %vm16978_vm13, %v13863_v11, %v2428_v42  ;;  %v1649_v43 = vor.u32 %v1648_v32, %v17054_v29  ;;  %v17087_v53 = vld [vmem:[#allocation2 + $0x3c] sm:$0xe]  ;;  %15255 = vmatpush3.bf16.msra.mxu0 %v16123_v25 }
  0xdd   : > { %v2314_v44 = vld [vmem:[#allocation2 + $0x20] sm:$0x1]  ;;  %v1604_v47 = vshll.u32 %v1493_v41, 16  ;;  %v917_v19 = vld [vmem:[#allocation2 + $0x38] sm:$0x1]  ;;  %v1659_v33 = vrot.slane %v1657_v6, 4  ;;  %15256 = vmatprep.subr.bf16.mxu0 %v16125_v37  ;;  %v1621_v60 = vsel %vm16984_vm14, %v17056_v39, %v17023_v26  ;;  %v17136_v20 = vsel %vm16978_vm13, %v13864_v57, %v2435_v48 }
  0xde   : > { %v17089_v58 = vld [vmem:[#allocation2 + $0x40] sm:$0xf]  ;;  %v2424_v35 = vrot.slane %v2314_v44, 5  ;;  %v1662_v8 = vrot.slane %v1660_v61, 5  ;;  %v918_v24 = vsel %vm16769_vm3, %v636_v15, %v917_v19  ;;  %v17101_v42 = vrot.slane %v1666_v3, 5  ;;  %15207 = vmatpush3.bf16.msra.mxu1 %v16122_v52  ;;  %v16129_v41 = vld [vmem:[#allocation8 + $0x108] sm:$0xff]  }
  0xdf   : > { %v17091_v54 = vld [vmem:[#allocation8 + $0xd0] sm:$0xff]   ;;  %v1672_v25 = vrot.slane %v1670_v27, 4  ;;  %v1606_v44 = vrot.slane %v1604_v47, 5  ;;  %919 = vst [vmem:[#allocation2 + $0x38] sm:$0x1] %v918_v24  ;;  %v17106_v32 = vrot.slane %v1639_v40, 4  ;;  %15208 = vmatprep.subr.bf16.mxu1 %v16124_v51 }
  0xe0   : > { %v2425_v11 = vsel %vm16978_vm13, %v17031_v31, %v2424_v35  ;;  %v1663_v6 = vor.u32 %v1662_v8, %v1659_v33  ;;  %v1496_v39 = vld [vmem:[#allocation2 + $0x2c] sm:$0x1]  ;;  %v17108_v61 = vrot.slane %v1649_v43, 4  ;;  %v2442_v19 = vrot.slane %v17089_v58, 5  ;;  %15257 = vmatpush3.bf16.msra.mxu0 %v16125_v37  ;;  %v17117_v27 = vld [vmem:[#allocation8 + $0xc8] sm:$0xff]   ;;  %s16481_s15 = sshll.u32 %s16559_s27, 4  ;;  %s16482_s15 = int_to_ptr.vmem [resolvable:$false] %s16481_s15 }
  0xe1   : > { %v13878_v26 = vcombine.low %v2422_v18, %v2425_v11  ;;  %v2317_v49 = vld [vmem:[#allocation2 + $0x2c] sm:$0x1]  ;;  %v1673_v15 = vor.u32 %v1672_v25, %v17101_v42  ;;  %v1607_v52 = vsel %vm16984_vm14, %v17039_v36, %v1606_v44  ;;  %v1628_v31 = vshll.u32 %v1496_v39, 16  ;;  %v924_v40 = vld [vmem:[#allocation2 + $0x44] sm:$0x1]  ;;  %15258 = vmatprep.subr.bf16.mxu0 %v17070_v1  ;;  %v16131_v39 = vld [vmem:[#allocation8 + $0x100] sm:$0xff]   ;;  %p16484_p13 = scmp.lt.s32.totalorder %s20599_s11, %s16482_s15 }
  0xe2   : > { %v2431_v3 = vrot.slane %v2317_v49, 5  ;;  %v13865_v8 = vrot.slane %v17087_v53, 9  ;;  %v13838_v18 = vcombine.low %v1597_v62, %v1607_v52  ;;  %v925_v37 = vsel %vm16769_vm3, %v653_v21, %v924_v40  ;;  %v384_v47 = vld [vmem:[#allocation2 + $0x50] sm:$0x1]  ;;  %v1503_v35 = vld [vmem:[#allocation2 + $0x48] sm:$0xf]  ;;  %15209 = vmatpush3.bf16.msra.mxu1 %v16124_v51 }
  0xe3   : > { %15172 = vmatprep.mubr.bf16.mxu0 %v13878_v26  ;;  %v17123_v43 = vrot.slane %v1663_v6, 4  ;;  %v17125_v36 = vrot.slane %v1673_v15, 4  ;;  %v1630_v33 = vrot.slane %v1628_v31, 5  ;;  %926 = vst [vmem:[#allocation2 + $0x44] sm:$0x1] %v925_v37  ;;  %v17140_v21 = vrot.slane %v2442_v19, 4  ;;  %15210 = vmatprep.subr.bf16.mxu1 %v17091_v54 }
  0xe4   : > { %v2432_v24 = vsel %vm16978_vm13, %v17058_v55, %v2431_v3  ;;  %v1504_v62 = vld [vmem:[#allocation2 + $0x4c] sm:$0xf]  ;;  %v17142_v51 = vld [vmem:[#allocation2 + $0x48] sm:$0xe]  ;;  %15124 = vmatprep.mubr.bf16.mxu1 %v13838_v18  ;;  %v385_v2 = vsel %vm16779_vm5, 0, %v384_v47  ;;  %v1681_v16 = vshrl.u32 %v1503_v35, 16  ;;  %15259 = vmatpush3.bf16.msra.mxu0 %v17070_v1  ;;  %v1645_v1 = vsel %vm16984_vm14, %v17106_v32, %v17054_v29 }
  0xe5   : > { %v13879_v55 = vcombine.low %v17084_v13, %v2432_v24  ;;  %v1684_v25 = vshll.u32 %v1503_v35, 16  ;;  %v17148_v48 = vld [vmem:[#allocation2 + $0x4c] sm:$0xf]  ;;  %v1631_v57 = vsel %vm16984_vm14, %v17063_v7, %v1630_v33  ;;  %386 = vst [vmem:[#allocation2 + $0x50] sm:$0x1] %v385_v2  ;;  %v1690_v44 = vshll.u32 %v1504_v62, 16  ;;  %15260 = vmatprep.subr.bf16.mxu0 %v16129_v41 }
  0xe6   : > { %v1694_v11 = vshrl.u32 %v1504_v62, 16  ;;  %v13866_v6 = vrot.slane %v17142_v51, 9  ;;  %v387_v26 = vld [vmem:[#allocation2 + $0x5c] sm:$0x1]  ;;  %v17155_v13 = vld [vmem:[#allocation8 + $0xc0] sm:$0xff]   ;;  %v13839_v49 = vcombine.low %v1621_v60, %v1631_v57  ;;  %v1683_v7 = vrot.slane %v1681_v16, 4  ;;  %15211 = vmatpush3.bf16.msra.mxu1 %v17091_v54 }
  0xe7   : > { %15173 = vmatmul.mubr.bf16.gmra.mxu0 %v13879_v55  ;;  %v1499_v15 = vld [vmem:[#allocation2 + $0x38] sm:$0x1]  ;;  %v1686_v31 = vrot.slane %v1684_v25, 5  ;;  %v17162_v18 = vrot.slane %v1690_v44, 5  ;;  %v1506_v47 = vld [vmem:[#allocation2 + $0x54] sm:$0xf]  ;;  %15212 = vmatprep.subr.bf16.mxu1 %v17117_v27 }
  0xe8   : > { %v2320_v52 = vld [vmem:[#allocation2 + $0x38] sm:$0x1]  ;;  %v1652_v3 = vshll.u32 %v1499_v15, 16  ;;  %v1696_v37 = vrot.slane %v1694_v11, 4  ;;  %15125 = vmatmul.mubr.bf16.gmra.mxu1 %v13839_v49  ;;  %v2449_v35 = vrot.slane %v17148_v48, 5  ;;  %v388_v29 = vsel %vm16779_vm5, 0, %v387_v26  ;;  %15261 = vmatpush3.bf16.msra.mxu0 %v16129_v41 }
  0xe9   : > { %v2438_v40 = vrot.slane %v2320_v52, 5  ;;  %v1687_v60 = vor.u32 %v1686_v31, %v1683_v7  ;;  %v1705_v32 = vshrl.u32 %v1506_v47, 16  ;;  %v16135_v33 = vld [vmem:[#allocation8 + $0x1b8] sm:$0xff]   ;;  %389 = vst [vmem:[#allocation2 + $0x5c] sm:$0x1] %v388_v29  ;;  %v1708_v2 = vshll.u32 %v1506_v47, 16  ;;  %15262 = vmatprep.subr.bf16.mxu0 %v16131_v39 }
  0xea   : > { %v1654_v24 = vrot.slane %v1652_v3, 5  ;;  %v1697_v62 = vor.u32 %v1696_v37, %v17162_v18  ;;  %v1507_v55 = vld [vmem:[#allocation2 + $0x58] sm:$0xf]  ;;  %v17172_v16 = vld [vmem:[#allocation2 + $0x54] sm:$0xe]  ;;  %v2443_v41 = vsel %vm16978_vm13, %v13865_v8, %v2442_v19  ;;  %v17183_v44 = vrot.slane %v2449_v35, 4  ;;  %15213 = vmatpush3.bf16.msra.mxu1 %v17117_v27 }
  0xeb   : > { %v2439_v54 = vsel %vm16978_vm13, %v17068_v34, %v2438_v40  ;;  %v1502_v48 = vld [vmem:[#allocation2 + $0x44] sm:$0x1]  ;;  %v17181_v34 = vrot.slane %v1687_v60, 4  ;;  %v17185_v11 = vld [vmem:[#allocation2 + $0x58] sm:$0xf]  ;;  %15214 = vmatprep.subr.bf16.mxu1 %v17155_v13  ;;  %v17194_v53 = vld [vmem:[#allocation8 + $0x178] sm:$0xff]   ;;  %v1669_v8 = vsel %vm16984_vm14, %v17123_v43, %v17101_v42  ;;  %v2450_v29 = vsel %vm16978_vm13, %v13866_v6, %v2449_v35 }
  0xec   : > { %v13880_v25 = vcombine.low %v17136_v20, %v2439_v54  ;;  %v2323_v57 = vld [vmem:[#allocation2 + $0x44] sm:$0x1]  ;;  %v1655_v20 = vsel %vm16984_vm14, %v17108_v61, %v1654_v24  ;;  %v1676_v26 = vshll.u32 %v1502_v48, 16  ;;  %v17191_v58 = vrot.slane %v1697_v62, 4  ;;  %v931_v27 = vld [vmem:[#allocation2 + $0x50] sm:$0x1]  ;;  %15263 = vmatpush3.bf16.msra.mxu0 %v16131_v39 }
  0xed   : > { %v2445_v49 = vrot.slane %v2323_v57, 5  ;;  %v13840_v19 = vcombine.low %v1645_v1, %v1655_v20  ;;  %v1707_v15 = vrot.slane %v1705_v32, 4  ;;  %v1710_v52 = vrot.slane %v1708_v2, 5  ;;  %15344 = vmatprep.subr.bf16.mxu0 %v16135_v33  ;;  %v1509_v39 = vld [vmem:[#allocation2 + $0x60] sm:$0xf]  ;;  %s16483_s30 = scalar_lea.vmem %s16482_s15, 4096 }
  0xee   : > { %15176 = vmatprep.mubr.bf16.mxu0 %v13880_v25  ;;  %v1678_v61 = vrot.slane %v1676_v26, 5  ;;  %v932_v1 = vsel %vm16769_vm3, %v670_v45, %v931_v27  ;;  %v1714_v31 = vshll.u32 %v1507_v55, 16  ;;  %v1718_v43 = vshrl.u32 %v1507_v55, 16  ;;  %15215 = vmatpush3.bf16.msra.mxu1 %v17155_v13  ;;  %v1510_v37 = vld [vmem:[#allocation2 + $0x64] sm:$0xf]  ;;  %p16485_p0 = scmp.lt.s32.totalorder %s16483_s30, %s16477_s23 }
  0xef   : > { %v2446_v7 = vsel %vm16978_vm13, %v17140_v21, %v2445_v49  ;;  %15128 = vmatprep.mubr.bf16.mxu1 %v13840_v19  ;;  %933 = vst [vmem:[#allocation2 + $0x50] sm:$0x1] %v932_v1  ;;  %v1711_v42 = vor.u32 %v1710_v52, %v1707_v15  ;;  %v13867_v40 = vrot.slane %v17172_v16, 9  ;;  %v2456_v45 = vrot.slane %v17185_v11, 5  ;;  %15296 = vmatprep.subr.bf16.mxu1 %v17194_v53  ;;  %v1511_v33 = vld [vmem:[#allocation2 + $0x68] sm:$0x1] }
  0xf0   : > { %v13881_v3 = vcombine.low %v2443_v41, %v2446_v7  ;;  %v1679_v21 = vsel %vm16984_vm14, %v17125_v36, %v1678_v61  ;;  %v17212_v12 = vrot.slane %v1714_v31, 5  ;;  %v1729_v47 = vshrl.u32 %v1509_v39, 16  ;;  %v938_v13 = vld [vmem:[#allocation2 + $0x5c] sm:$0x1]  ;;  %v2330_v55 = vld [vmem:[#allocation2 + $0x60] sm:$0xe]  ;;  %p16486_p11 = por %p16485_p0, %p16484_p13 }
  0xf1   : > { %v13841_v60 = vcombine.low %v1669_v8, %v1679_v21  ;;  %v1720_v32 = vrot.slane %v1718_v43, 4  ;;  %v1732_v24 = vshll.u32 %v1509_v39, 16  ;;  %v1693_v36 = vsel %vm16984_vm14, %v17181_v34, %v17162_v18  ;;  %v2331_v2 = vld [vmem:[#allocation2 + $0x64] sm:$0xf]  ;;  %v2332_v48 = vld [vmem:[#allocation2 + $0x68] sm:$0x1] }
  0xf2   : > { %15177 = vmatmul.mubr.bf16.gmra.mxu0 %v13881_v3  ;;  %v939_v54 = vsel %vm16769_vm3, %v687_v9, %v938_v13  ;;  %v17228_v62 = vrot.slane %v1711_v42, 4  ;;  %v1731_v51 = vrot.slane %v1729_v47, 4  ;;  %v2458_v35 = vrot.slane %v2456_v45, 4  ;;  %v393_v34 = vld [vmem:[#allocation2 + $0x74] sm:$0x1]  ;;  %p16487_p5 = pnand %p16486_p11, %p16480_p1 }
  0xf3   : > { %15129 = vmatmul.mubr.bf16.gmra.mxu1 %v13841_v60  ;;  %940 = vst [vmem:[#allocation2 + $0x5c] sm:$0x1] %v939_v54  ;;  %v1721_v6 = vor.u32 %v1720_v32, %v17212_v12  ;;  %v1734_v16 = vrot.slane %v1732_v24, 5  ;;  %v1738_v25 = vshll.u32 %v1510_v37, 16  ;;  %v1742_v57 = vshrl.u32 %v1510_v37, 16 }
  0xf4   : > { %v1748_v18 = vshll.u32 %v1511_v33, 16  ;;  %v13868_v41 = vrot.slane %v2330_v55, 9  ;;  %v2463_v63 = vrot.slane %v2331_v2, 5  ;;  %v2466_v26 = vrot.slane %v2332_v48, 5  ;;  %v1512_v49 = vld [vmem:[#allocation2 + $0x6c] sm:$0xf] }
  0xf5   : > { %v1722_v11 = vrot.slane %v1721_v6, 4  ;;  %v1735_v9 = vor.u32 %v1734_v16, %v1731_v51  ;;  %v1740_v20 = vrot.slane %v1738_v25, 5  ;;  %v1717_v27 = vsel %vm16984_vm14, %v17228_v62, %v17212_v12  ;;  %v1513_v39 = vld [vmem:[#allocation2 + $0x70] sm:$0xf]  ;;  %v396_v48 = vld [vmem:[#allocation2 + $0x80] sm:$0x1] }
  0xf6   : > { %v1505_v19 = vld [vmem:[#allocation2 + $0x50] sm:$0x1]  ;;  %v2457_v15 = vsel %vm16978_vm13, %v13867_v40, %v2456_v45  ;;  %v1744_v52 = vrot.slane %v1742_v57, 4  ;;  %v1750_v61 = vrot.slane %v1748_v18, 5  ;;  %v2465_v3 = vrot.slane %v2463_v63, 4 }
  0xf7   : > { %v2326_v8 = vld [vmem:[#allocation2 + $0x50] sm:$0x1]  ;;  %v1700_v7 = vshll.u32 %v1505_v19, 16  ;;  %v1736_v31 = vrot.slane %v1735_v9, 4  ;;  %v394_v43 = vsel %vm16779_vm5, 0, %v393_v34  ;;  %v1753_v21 = vshrl.u32 %v1512_v49, 16 }
  0xf8   : > { %v2452_v1 = vrot.slane %v2326_v8, 5  ;;  %v1745_v42 = vor.u32 %v1744_v52, %v1740_v20  ;;  %v1756_v37 = vshll.u32 %v1512_v49, 16  ;;  %v2464_v45 = vsel %vm16978_vm13, %v13868_v41, %v2463_v63  ;;  %395 = vst [vmem:[#allocation2 + $0x74] sm:$0x1] %v394_v43  ;;  %v17248_v62 = vld [vmem:[#allocation2 + $0x70] sm:$0xf] }
  0xf9   : > { %v1702_v47 = vrot.slane %v1700_v7, 5  ;;  %v1741_v40 = vsel %vm16984_vm14, %v1736_v31, %v1740_v20  ;;  %v2467_v24 = vsel %vm16978_vm13, %v2465_v3, %v2466_v26  ;;  %v1755_v54 = vrot.slane %v1753_v21, 4  ;;  %v1515_v34 = vld [vmem:[#allocation2 + $0x78] sm:$0xf]  ;;  %v2333_v26 = vld [vmem:[#allocation2 + $0x6c] sm:$0xe] }
  0xfa   : > { %v2453_v12 = vsel %vm16978_vm13, %v17183_v44, %v2452_v1  ;;  %v1508_v13 = vld [vmem:[#allocation2 + $0x5c] sm:$0x1]  ;;  %v1746_v33 = vrot.slane %v1745_v42, 4  ;;  %v1758_v2 = vrot.slane %v1756_v37, 5  ;;  %v1762_v16 = vshll.u32 %v1513_v39, 16 }
  0xfb   : > { %v13882_v60 = vcombine.low %v2450_v29, %v2453_v12  ;;  %v2329_v32 = vld [vmem:[#allocation2 + $0x5c] sm:$0x1]  ;;  %v1703_v44 = vsel %vm16984_vm14, %v17191_v58, %v1702_v47  ;;  %v1724_v51 = vshll.u32 %v1508_v13, 16  ;;  %v1766_v25 = vshrl.u32 %v1513_v39, 16  ;;  %v399_v42 = vld [vmem:[#allocation2 + $0x8c] sm:$0x1] }
  0xfc   : > { %v2459_v55 = vrot.slane %v2329_v32, 5  ;;  %v13842_v6 = vcombine.low %v1693_v36, %v1703_v44  ;;  %v1751_v29 = vsel %vm16984_vm14, %v1746_v33, %v1750_v61  ;;  %v13884_v41 = vcombine.low %v2464_v45, %v2467_v24  ;;  %v1516_v52 = vld [vmem:[#allocation2 + $0x7c] sm:$0xf]  ;;  %v2336_v21 = vld [vmem:[#allocation2 + $0x78] sm:$0xe] }
  0xfd   : > { %15180 = vmatprep.mubr.bf16.mxu0 %v13882_v60  ;;  %v1726_v57 = vrot.slane %v1724_v51, 5  ;;  %v1759_v63 = vor.u32 %v1758_v2, %v1755_v54  ;;  %v823_v58 = vrot.slane %v16960_v14, 4  ;;  %v17258_v20 = vrot.slane %v1762_v16, 5  ;;  %v17265_v61 = vld [vmem:[#allocation2 + $0x7c] sm:$0xf] }
  0xfe   : > { %v2460_v18 = vsel %vm16978_vm13, %v2458_v35, %v2459_v55  ;;  %15132 = vmatprep.mubr.bf16.mxu1 %v13842_v6  ;;  %v1768_v36 = vrot.slane %v1766_v25, 4  ;;  %v13844_v19 = vcombine.low %v1741_v40, %v1751_v29  ;;  %v2470_v8 = vrot.slane %v17248_v62, 5  ;;  %v1518_v37 = vld [vmem:[#allocation2 + $0x84] sm:$0xf]  ;;  %v1519_v45 = vld [vmem:[#allocation2 + $0x88] sm:$0xf] }
  0xff   : > { %v13883_v9 = vcombine.low %v2457_v15, %v2460_v18  ;;  %v1727_v49 = vsel %vm16984_vm14, %v1722_v11, %v1726_v57  ;;  %v397_v35 = vsel %vm16779_vm5, 0, %v396_v48  ;;  %v952_v1 = vld [vmem:[#allocation2 + $0x74] sm:$0x1]  ;;  %v1777_v31 = vshrl.u32 %v1515_v34, 16  ;;  %v17277_v32 = vld [vmem:[#allocation2 + $0x88] sm:$0xf] }
 0x100   : > { %v13843_v7 = vcombine.low %v1717_v27, %v1727_v49  ;;  %v1769_v15 = vor.u32 %v1768_v36, %v17258_v20  ;;  %398 = vst [vmem:[#allocation2 + $0x80] sm:$0x1] %v397_v35  ;;  %v1780_v3 = vshll.u32 %v1515_v34, 16  ;;  %v953_v11 = vsel %vm16769_vm3, %v721_v22, %v952_v1  ;;  %v2339_v55 = vld [vmem:[#allocation2 + $0x84] sm:$0xe] }
 0x101   : > { %15181 = vmatmul.mubr.bf16.gmra.mxu0 %v13883_v9  ;;  %v17272_v43 = vrot.slane %v1759_v63, 4  ;;  %v13869_v39 = vrot.slane %v2333_v26, 9  ;;  %954 = vst [vmem:[#allocation2 + $0x74] sm:$0x1] %v953_v11  ;;  %v2472_v27 = vrot.slane %v2470_v8, 4  ;;  %v1779_v47 = vrot.slane %v1777_v31, 4 }
 0x102   : > { %15184 = vmatprep.mubr.bf16.mxu0 %v13884_v41  ;;  %15133 = vmatmul.mubr.bf16.gmra.mxu1 %v13843_v7  ;;  %v1782_v12 = vrot.slane %v1780_v3, 5  ;;  %v1786_v40 = vshll.u32 %v1516_v52, 16  ;;  %v1770_v60 = vrot.slane %v1769_v15, 4  ;;  %v1790_v13 = vshrl.u32 %v1516_v52, 16  ;;  %v402_v26 = vld [vmem:[#allocation2 + $0x98] sm:$0x1] }
 0x103   : > { %15136 = vmatprep.mubr.bf16.mxu1 %v13844_v19  ;;  %v2477_v5 = vrot.slane %v17265_v61, 5  ;;  %v400_v22 = vsel %vm16779_vm5, 0, %v399_v42  ;;  %v1801_v54 = vshrl.u32 %v1518_v37, 16  ;;  %v1804_v62 = vshll.u32 %v1518_v37, 16  ;;  %v1522_v42 = vld [vmem:[#allocation2 + $0x94] sm:$0xf] }
 0x104   : > { %v1783_v33 = vor.u32 %v1782_v12, %v1779_v47  ;;  %v17279_v24 = vrot.slane %v1786_v40, 5  ;;  %401 = vst [vmem:[#allocation2 + $0x8c] sm:$0x1] %v400_v22  ;;  %v1792_v44 = vrot.slane %v1790_v13, 4  ;;  %v1810_v51 = vshll.u32 %v1519_v45, 16 }
 0x105   : > { %v13870_v2 = vrot.slane %v2336_v21, 9  ;;  %v1803_v6 = vrot.slane %v1801_v54, 4  ;;  %v1806_v29 = vrot.slane %v1804_v62, 5  ;;  %v1814_v16 = vshrl.u32 %v1519_v45, 16  ;;  %v17314_v40 = vld [vmem:[#allocation2 + $0x94] sm:$0xf] }
 0x106   : > { %v1793_v48 = vor.u32 %v1792_v44, %v17279_v24  ;;  %v17282_v57 = vrot.slane %v2477_v5, 4  ;;  %v17284_v18 = vrot.slane %v1810_v51, 5  ;;  %v2484_v41 = vrot.slane %v17277_v32, 5  ;;  %v17318_v22 = vld [vmem:[#allocation2 + $0x90] sm:$0xe] }
 0x107   : > { %v959_v25 = vld [vmem:[#allocation2 + $0x80] sm:$0x1]  ;;  %v17291_v34 = vrot.slane %v1783_v33, 4  ;;  %v1807_v9 = vor.u32 %v1806_v29, %v1803_v6  ;;  %v1816_v36 = vrot.slane %v1814_v16, 4  ;;  %v2471_v35 = vsel %vm16978_vm13, %v13869_v39, %v2470_v8  ;;  %v1524_v62 = vld [vmem:[#allocation2 + $0x9c] sm:$0xf] }
 0x108   : > { %v960_v63 = vsel %vm16769_vm3, %v738_v59, %v959_v25  ;;  %v1514_v49 = vld [vmem:[#allocation2 + $0x74] sm:$0x1]  ;;  %v17295_v52 = vrot.slane %v1793_v48, 4  ;;  %v13871_v61 = vrot.slane %v2339_v55, 9  ;;  %v17298_v15 = vrot.slane %v2484_v41, 4 }
 0x109   : > { %v2335_v19 = vld [vmem:[#allocation2 + $0x74] sm:$0x1]  ;;  %961 = vst [vmem:[#allocation2 + $0x80] sm:$0x1] %v960_v63  ;;  %v1772_v7 = vshll.u32 %v1514_v49, 16  ;;  %v1817_v50 = vor.u32 %v1816_v36, %v17284_v18  ;;  %v1765_v31 = vsel %vm16984_vm14, %v17272_v43, %v17258_v20  ;;  %v403_v8 = vsel %vm16779_vm5, 0, %v402_v26 }
 0x10a   : > { %v2473_v1 = vrot.slane %v2335_v19, 5  ;;  %v1521_v59 = vld [vmem:[#allocation2 + $0x90] sm:$0xf]  ;;  %v20700_v37 = vrot.slane %v16865_v23, 4  ;;  %v17312_v12 = vrot.slane %v1807_v9, 4  ;;  %v2478_v43 = vsel %vm16978_vm13, %v13870_v2, %v2477_v5 }
 0x10b   : > { %v966_v3 = vld [vmem:[#allocation2 + $0x8c] sm:$0x1]  ;;  %v1825_v11 = vshrl.u32 %v1521_v59, 16  ;;  %v1774_v39 = vrot.slane %v1772_v7, 5  ;;  %404 = vst [vmem:[#allocation2 + $0x98] sm:$0x1] %v403_v8  ;;  %v2485_v16 = vsel %vm16978_vm13, %v13871_v61, %v2484_v41 }
 0x10c   : > { %v2474_v21 = vsel %vm16978_vm13, %v2472_v27, %v2473_v1  ;;  %v967_v47 = vsel %vm16769_vm3, %v20700_v37, %v966_v3  ;;  %v1828_v13 = vshll.u32 %v1521_v59, 16  ;;  %v405_v27 = vld [vmem:[#allocation2 + $0xa4] sm:$0x1]  ;;  %v17322_v32 = vrot.slane %v1817_v50, 4  ;;  %v1525_v2 = vld [vmem:[#allocation2 + $0xa0] sm:$0xf] }
 0x10d   : > { %v13885_v20 = vcombine.low %v2471_v35, %v2474_v21  ;;  %968 = vst [vmem:[#allocation2 + $0x8c] sm:$0x1] %v967_v47  ;;  %v1827_v45 = vrot.slane %v1825_v11, 4  ;;  %v1775_v23 = vsel %vm16984_vm14, %v1770_v60, %v1774_v39  ;;  %v1834_v33 = vshll.u32 %v1522_v42, 16  ;;  %v17341_v35 = vld [vmem:[#allocation2 + $0x9c] sm:$0xe] }
 0x10e   : > { %v1838_v54 = vshrl.u32 %v1522_v42, 16  ;;  %v13845_v44 = vcombine.low %v1765_v31, %v1775_v23  ;;  %v1830_v51 = vrot.slane %v1828_v13, 5  ;;  %v2491_v55 = vrot.slane %v17314_v40, 5  ;;  %v17343_v41 = vld [vmem:[#allocation2 + $0xa0] sm:$0xf] }
 0x10f   : > { %15185 = vmatmul.mubr.bf16.gmra.mxu0 %v13885_v20  ;;  %v406_v5 = vsel %vm16779_vm5, 0, %v405_v27  ;;  %v1789_v60 = vsel %vm16984_vm14, %v17291_v34, %v17279_v24  ;;  %v17333_v25 = vrot.slane %v1834_v33, 5  ;;  %v13872_v26 = vrot.slane %v17318_v22, 9 }
 0x110   : > { %v1517_v6 = vld [vmem:[#allocation2 + $0x80] sm:$0x1]  ;;  %v1840_v48 = vrot.slane %v1838_v54, 4  ;;  %407 = vst [vmem:[#allocation2 + $0xa4] sm:$0x1] %v406_v5  ;;  %15137 = vmatmul.mubr.bf16.gmra.mxu1 %v13845_v44  ;;  %v1831_v36 = vor.u32 %v1830_v51, %v1827_v45  ;;  %v17339_v19 = vrot.slane %v2491_v55, 4 }
 0x111   : > { %v2338_v29 = vld [vmem:[#allocation2 + $0x80] sm:$0x1]  ;;  %v1796_v63 = vshll.u32 %v1517_v6, 16  ;;  %v1849_v24 = vshrl.u32 %v1524_v62, 16  ;;  %v1852_v34 = vshll.u32 %v1524_v62, 16  ;;  %v1858_v59 = vshll.u32 %v1525_v2, 16 }
 0x112   : > { %v2480_v9 = vrot.slane %v2338_v29, 5  ;;  %v1841_v49 = vor.u32 %v1840_v48, %v17333_v25  ;;  %v973_v1 = vld [vmem:[#allocation2 + $0x98] sm:$0x1]  ;;  %v17348_v50 = vrot.slane %v1831_v36, 4  ;;  %v20701_v42 = vrot.slane %v16884_v0, 4 }
 0x113   : > { %v1798_v61 = vrot.slane %v1796_v63, 5  ;;  %v1851_v21 = vrot.slane %v1849_v24, 4  ;;  %v1854_v0 = vrot.slane %v1852_v34, 5  ;;  %v17363_v45 = vrot.slane %v1858_v59, 5  ;;  %v408_v5 = vld [vmem:[#allocation2 + $0xb0] sm:$0x1] }
 0x114   : > { %v2481_v7 = vsel %vm16978_vm13, %v17282_v57, %v2480_v9  ;;  %v1520_v3 = vld [vmem:[#allocation2 + $0x8c] sm:$0x1]  ;;  %v974_v11 = vsel %vm16769_vm3, %v20701_v42, %v973_v1  ;;  %v17354_v39 = vrot.slane %v1841_v49, 4  ;;  %v1813_v57 = vsel %vm16984_vm14, %v17312_v12, %v17284_v18  ;;  %v411_v49 = vld [vmem:[#allocation2 + $0xbc] sm:$0x1] }
 0x115   : > { %v13886_v31 = vcombine.low %v2478_v43, %v2481_v7  ;;  %v2341_v8 = vld [vmem:[#allocation2 + $0x8c] sm:$0x1]  ;;  %v1799_v37 = vsel %vm16984_vm14, %v17295_v52, %v1798_v61  ;;  %v1820_v47 = vshll.u32 %v1520_v3, 16  ;;  %975 = vst [vmem:[#allocation2 + $0x98] sm:$0x1] %v974_v11  ;;  %v1862_v13 = vshrl.u32 %v1525_v2, 16 }
 0x116   : > { %v2487_v20 = vrot.slane %v2341_v8, 5  ;;  %v13846_v43 = vcombine.low %v1789_v60, %v1799_v37  ;;  %v13873_v33 = vrot.slane %v17341_v35, 9  ;;  %v2498_v54 = vrot.slane %v17343_v41, 5  ;;  %v1527_v2 = vld [vmem:[#allocation2 + $0xa8] sm:$0xf] }
 0x117   : > { %15188 = vmatprep.mubr.bf16.mxu0 %v13886_v31  ;;  %v1822_v27 = vrot.slane %v1820_v47, 5  ;;  %v980_v52 = vld [vmem:[#allocation2 + $0xa4] sm:$0x1]  ;;  %v20702_v12 = vrot.slane %v16907_v46, 4  ;;  %v1855_v44 = vor.u32 %v1854_v0, %v1851_v21  ;;  %v1864_v51 = vrot.slane %v1862_v13, 4 }
 0x118   : > { %v2488_v23 = vsel %vm16978_vm13, %v17298_v15, %v2487_v20  ;;  %15140 = vmatprep.mubr.bf16.mxu1 %v13846_v43  ;;  %v2500_v6 = vrot.slane %v2498_v54, 4  ;;  %v409_v60 = vsel %vm16779_vm5, 0, %v408_v5  ;;  %v1528_v29 = vld [vmem:[#allocation2 + $0xac] sm:$0xf]  ;;  %v1873_v9 = vshrl.u32 %v1527_v2, 16 }
 0x119   : > { %v13887_v18 = vcombine.low %v2485_v16, %v2488_v23  ;;  %v981_v62 = vsel %vm16769_vm3, %v20702_v12, %v980_v52  ;;  %v1823_v15 = vsel %vm16984_vm14, %v17322_v32, %v1822_v27  ;;  %v17379_v16 = vld [vmem:[#allocation2 + $0xa8] sm:$0xe]  ;;  %v17381_v48 = vrot.slane %v1855_v44, 4  ;;  %410 = vst [vmem:[#allocation2 + $0xb0] sm:$0x1] %v409_v60 }
 0x11a   : > { %982 = vst [vmem:[#allocation2 + $0xa4] sm:$0x1] %v981_v62  ;;  %v13847_v46 = vcombine.low %v1813_v57, %v1823_v15  ;;  %v1865_v63 = vor.u32 %v1864_v51, %v17363_v45  ;;  %v17384_v36 = vld [vmem:[#allocation2 + $0xac] sm:$0xf]  ;;  %v1876_v32 = vshll.u32 %v1527_v2, 16  ;;  %v1882_v24 = vshll.u32 %v1528_v29, 16 }
 0x11b   : > { %15189 = vmatmul.mubr.bf16.gmra.mxu0 %v13887_v18  ;;  %v1886_v34 = vshrl.u32 %v1528_v29, 16  ;;  %v13874_v35 = vrot.slane %v17379_v16, 9  ;;  %v1530_v41 = vld [vmem:[#allocation2 + $0xb4] sm:$0xf]  ;;  %v1837_v7 = vsel %vm16984_vm14, %v17348_v50, %v17333_v25  ;;  %v2492_v59 = vsel %vm16978_vm13, %v13872_v26, %v2491_v55  ;;  %v1531_v26 = vld [vmem:[#allocation2 + $0xb8] sm:$0xf] }
 0x11c   : > { %15141 = vmatmul.mubr.bf16.gmra.mxu1 %v13847_v46  ;;  %v1523_v61 = vld [vmem:[#allocation2 + $0x98] sm:$0x1]  ;;  %v1866_v31 = vrot.slane %v1865_v63, 4  ;;  %v1875_v3 = vrot.slane %v1873_v9, 4  ;;  %v1878_v11 = vrot.slane %v1876_v32, 5  ;;  %v17397_v21 = vrot.slane %v1882_v24, 5 }
 0x11d   : > { %v2344_v1 = vld [vmem:[#allocation2 + $0x98] sm:$0x1]  ;;  %v1844_v8 = vshll.u32 %v1523_v61, 16  ;;  %v1888_v37 = vrot.slane %v1886_v34, 4  ;;  %v2505_v57 = vrot.slane %v17384_v36, 5  ;;  %v412_v25 = vsel %vm16779_vm5, 0, %v411_v49 }
 0x11e   : > { %v2494_v42 = vrot.slane %v2344_v1, 5  ;;  %v1897_v50 = vshrl.u32 %v1530_v41, 16  ;;  %v1879_v55 = vor.u32 %v1878_v11, %v1875_v3  ;;  %413 = vst [vmem:[#allocation2 + $0xbc] sm:$0x1] %v412_v25  ;;  %v1900_v47 = vshll.u32 %v1530_v41, 16 }
 0x11f   : > { %v1846_v40 = vrot.slane %v1844_v8, 5  ;;  %v2499_v13 = vsel %vm16978_vm13, %v13873_v33, %v2498_v54  ;;  %v1889_v27 = vor.u32 %v1888_v37, %v17397_v21  ;;  %v2351_v23 = vld [vmem:[#allocation2 + $0xb4] sm:$0xe]  ;;  %v2352_v52 = vld [vmem:[#allocation2 + $0xb8] sm:$0xf]  ;;  %v2507_v44 = vrot.slane %v2505_v57, 4 }
 0x120   : > { %v2495_v22 = vsel %vm16978_vm13, %v17339_v19, %v2494_v42  ;;  %v987_v62 = vld [vmem:[#allocation2 + $0xb0] sm:$0x1]  ;;  %v20703_v5 = vrot.slane %v16935_v28, 4  ;;  %v17415_v33 = vrot.slane %v1879_v55, 4  ;;  %v1899_v54 = vrot.slane %v1897_v50, 4 }
 0x121   : > { %v13888_v20 = vcombine.low %v2492_v59, %v2495_v22  ;;  %v1526_v43 = vld [vmem:[#allocation2 + $0xa4] sm:$0x1]  ;;  %v1847_v18 = vsel %vm16984_vm14, %v17354_v39, %v1846_v40  ;;  %v1861_v15 = vsel %vm16984_vm14, %v17381_v48, %v17363_v45  ;;  %v1902_v29 = vrot.slane %v1900_v47, 5  ;;  %v3353_v34 = vld [vmem:[#allocation2 + $0xc] sm:$0xf] }
 0x122   : > { %v2347_v0 = vld [vmem:[#allocation2 + $0xa4] sm:$0x1]  ;;  %v1868_v12 = vshll.u32 %v1526_v43, 16  ;;  %v13848_v51 = vcombine.low %v1837_v7, %v1847_v18  ;;  %v988_v2 = vsel %vm16769_vm3, %v20703_v5, %v987_v62  ;;  %v1890_v28 = vrot.slane %v1889_v27, 4  ;;  %v3354_v41 = vld [vmem:[#allocation2 + $0x10] sm:$0xf] }
 0x123   : > { %v2501_v19 = vrot.slane %v2347_v0, 5  ;;  %15192 = vmatprep.mubr.bf16.mxu0 %v13888_v20  ;;  %989 = vst [vmem:[#allocation2 + $0xb0] sm:$0x1] %v988_v2  ;;  %v1906_v63 = vshll.u32 %v1531_v26, 16  ;;  %v1910_v9 = vshrl.u32 %v1531_v26, 16  ;;  %v1903_v49 = vor.u32 %v1902_v29, %v1899_v54 }
 0x124   : > { %v1870_v39 = vrot.slane %v1868_v12, 5  ;;  %15144 = vmatprep.mubr.bf16.mxu1 %v13848_v51  ;;  %v13875_v32 = vrot.slane %v2351_v23, 9  ;;  %v2512_v24 = vrot.slane %v2352_v52, 5  ;;  %v3355_v7 = vld [vmem:[#allocation2 + $0x14] sm:$0x1]  ;;  %v3402_v8 = vshrl.u32 %v3353_v34, 16 }
 0x125   : > { %v2502_v60 = vsel %vm16978_vm13, %v2500_v6, %v2501_v19  ;;  %v994_v48 = vld [vmem:[#allocation2 + $0xbc] sm:$0x1]  ;;  %v17425_v61 = vrot.slane %v1906_v63, 5  ;;  %v1912_v6 = vrot.slane %v1910_v9, 4  ;;  %v17431_v59 = vrot.slane %v1903_v49, 4 }
 0x126   : > { %v13889_v46 = vcombine.low %v2499_v13, %v2502_v60  ;;  %v1871_v36 = vsel %vm16984_vm14, %v1866_v31, %v1870_v39  ;;  %v995_v1 = vsel %vm16769_vm3, %v823_v58, %v994_v48  ;;  %v2514_v31 = vrot.slane %v2512_v24, 4  ;;  %v3356_v50 = vld [vmem:[#allocation2 + $0x18] sm:$0xf]  ;;  %v3357_v40 = vld [vmem:[#allocation2 + $0x1c] sm:$0xf] }
 0x127   : > { %v13849_v45 = vcombine.low %v1861_v15, %v1871_v36  ;;  %996 = vst [vmem:[#allocation2 + $0xbc] sm:$0x1] %v995_v1  ;;  %v1913_v3 = vor.u32 %v1912_v6, %v17425_v61  ;;  %v3405_v42 = vshll.u32 %v3353_v34, 16  ;;  %v3411_v11 = vshll.u32 %v3354_v41, 16  ;;  %v3358_v27 = vld [vmem:[#allocation2 + $0x20] sm:$0x1] }
 0x128   : > { %15193 = vmatmul.mubr.bf16.gmra.mxu0 %v13889_v46  ;;  %v2506_v37 = vsel %vm16978_vm13, %v13874_v35, %v2505_v57  ;;  %v3415_v25 = vshrl.u32 %v3354_v41, 16  ;;  %v3421_v14 = vshll.u32 %v3355_v7, 16  ;;  %v1885_v22 = vsel %vm16984_vm14, %v17415_v33, %v17397_v21  ;;  %v3359_v36 = vld [vmem:[#allocation2 + $0x24] sm:$0xf]  ;;  %v3360_v34 = vld [vmem:[#allocation2 + $0x28] sm:$0xf] }
 0x129   : > { %15145 = vmatmul.mubr.bf16.gmra.mxu1 %v13849_v45  ;;  %v1914_v26 = vrot.slane %v1913_v3, 4  ;;  %v2513_v47 = vsel %vm16978_vm13, %v13875_v32, %v2512_v24  ;;  %v3404_v20 = vrot.slane %v3402_v8, 4  ;;  %v3407_v0 = vrot.slane %v3405_v42, 5  ;;  %v3361_v3 = vld [vmem:[#allocation2 + $0x2c] sm:$0x1] }
 0x12a   : > { %v1529_v58 = vld [vmem:[#allocation2 + $0xb0] sm:$0x1]  ;;  %v3413_v35 = vrot.slane %v3411_v11, 5  ;;  %v3417_v57 = vrot.slane %v3415_v25, 4  ;;  %v3423_v13 = vrot.slane %v3421_v14, 5  ;;  %v3426_v23 = vshrl.u32 %v3356_v50, 16 }
 0x12b   : > { %v2350_v55 = vld [vmem:[#allocation2 + $0xb0] sm:$0x1]  ;;  %v1892_v16 = vshll.u32 %v1529_v58, 16  ;;  %v3429_v52 = vshll.u32 %v3356_v50, 16  ;;  %v3408_v21 = vor.u32 %v3407_v0, %v3404_v20  ;;  %v3435_v19 = vshll.u32 %v3357_v40, 16 }
 0x12c   : > { %v2508_v43 = vrot.slane %v2350_v55, 5  ;;  %v3418_v51 = vor.u32 %v3417_v57, %v3413_v35  ;;  %v3428_v5 = vrot.slane %v3426_v23, 4  ;;  %v1909_v15 = vsel %vm16984_vm14, %v17431_v59, %v17425_v61  ;;  %v3362_v8 = vld [vmem:[#allocation2 + $0x30] sm:$0xf]  ;;  %v3363_v50 = vld [vmem:[#allocation2 + $0x34] sm:$0xf] }
 0x12d   : > { %v1894_v18 = vrot.slane %v1892_v16, 5  ;;  %v3431_v2 = vrot.slane %v3429_v52, 5  ;;  %v3409_v60 = vrot.slane %v3408_v21, 4  ;;  %v3437_v29 = vrot.slane %v3435_v19, 5  ;;  %v16132_v11 = vld [vmem:[#allocation2 + $0xc] sm:$0xff]  }
 0x12e   : > { %v2509_v12 = vsel %vm16978_vm13, %v2507_v44, %v2508_v43  ;;  %v1532_v54 = vld [vmem:[#allocation2 + $0xbc] sm:$0x1]  ;;  %v3419_v9 = vrot.slane %v3418_v51, 4  ;;  %v3445_v24 = vshll.u32 %v3358_v27, 16  ;;  %v3450_v61 = vshrl.u32 %v3359_v36, 16 }
 0x12f   : > { %v13890_v62 = vcombine.low %v2506_v37, %v2509_v12  ;;  %v1895_v33 = vsel %vm16984_vm14, %v1890_v28, %v1894_v18  ;;  %v2353_v39 = vld [vmem:[#allocation2 + $0xbc] sm:$0x1]  ;;  %v1916_v44 = vshll.u32 %v1532_v54, 16  ;;  %v3414_v49 = vsel %vm16984_vm14, %v3409_v60, %v3413_v35  ;;  %v3364_v55 = vld [vmem:[#allocation2 + $0x38] sm:$0x1] }
 0x130   : > { %v13850_v46 = vcombine.low %v1885_v22, %v1895_v33  ;;  %v2515_v63 = vrot.slane %v2353_v39, 5  ;;  %v3432_v32 = vor.u32 %v3431_v2, %v3428_v5  ;;  %v3439_v28 = vshrl.u32 %v3357_v40, 16  ;;  %v16133_v18 = vld [vmem:[#allocation2 + $0x18] sm:$0xff]  }
 0x131   : > { %15196 = vmatprep.mubr.bf16.mxu0 %v13890_v62  ;;  %v1918_v41 = vrot.slane %v1916_v44, 5  ;;  %v3424_v48 = vsel %vm16984_vm14, %v3419_v9, %v3423_v13  ;;  %v3447_v37 = vrot.slane %v3445_v24, 5  ;;  %v3452_v25 = vrot.slane %v3450_v61, 4  ;;  %v3365_v54 = vld [vmem:[#allocation2 + $0x3c] sm:$0xf]  ;;  %v16136_v9 = vld [vmem:[#allocation2 + $0x24] sm:$0xff]  }
 0x132   : > { %15148 = vmatprep.mubr.bf16.mxu1 %v13850_v46  ;;  %v2516_v45 = vsel %vm16978_vm13, %v2514_v31, %v2515_v63  ;;  %v13924_v7 = vcombine.low %v3414_v49, %v3424_v48  ;;  %v3433_v1 = vrot.slane %v3432_v32, 4  ;;  %v3441_v59 = vrot.slane %v3439_v28, 4  ;;  %v3367_v46 = vld [vmem:[#allocation2 + $0x44] sm:$0x1]  ;;  %v16340_v61 = vld [vmem:[#allocation8 + $0x1b8] sm:$0xff]  }
 0x133   : > { %v13891_v6 = vcombine.low %v2513_v47, %v2516_v45  ;;  %v1919_v42 = vsel %vm16984_vm14, %v1914_v26, %v1918_v41  ;;  %v3453_v14 = vshll.u32 %v3359_v36, 16  ;;  %v3459_v22 = vshll.u32 %v3360_v34, 16  ;;  %v16138_v41 = vld [vmem:[#allocation8 + $0x170] sm:$0xff]  }
 0x134   : > { %v13851_v40 = vcombine.low %v1909_v15, %v1919_v42  ;;  %v3438_v31 = vsel %vm16984_vm14, %v3433_v1, %v3437_v29  ;;  %v3442_v58 = vor.u32 %v3441_v59, %v3437_v29  ;;  %v3463_v20 = vshrl.u32 %v3360_v34, 16  ;;  %v3366_v15 = vld [vmem:[#allocation2 + $0x40] sm:$0xf] }
 0x135   : > { %15197 = vmatmul.mubr.bf16.gmra.mxu0 %v13891_v6  ;;  %v3455_v47 = vrot.slane %v3453_v14, 5  ;;  %v3469_v16 = vshll.u32 %v3361_v3, 16  ;;  %v3474_v43 = vshrl.u32 %v3362_v8, 16  ;;  %v3461_v0 = vrot.slane %v3459_v22, 5  ;;  %v16139_v29 = vld [vmem:[#allocation8 + $0x1b0] sm:$0xff]  }
 0x136   : > { %15264 = vmatprep.mubr.bf16.mxu0 %v13924_v7  ;;  %15149 = vmatmul.mubr.bf16.gmra.mxu1 %v13851_v40  ;;  %v3443_v26 = vrot.slane %v3442_v58, 4  ;;  %v3477_v35 = vshll.u32 %v3362_v8, 16  ;;  %v3483_v57 = vshll.u32 %v3363_v50, 16  ;;  %v3465_v27 = vrot.slane %v3463_v20, 4  ;;  %v3368_v3 = vld [vmem:[#allocation2 + $0x48] sm:$0xf] }
 0x137   : > { %15216 = vmatprep.mubr.bf16.mxu1 %v16132_v11  ;;  %v3456_v13 = vor.u32 %v3455_v47, %v3452_v25  ;;  %v3471_v23 = vrot.slane %v3469_v16, 5  ;;  %v3476_v52 = vrot.slane %v3474_v43, 4  ;;  %v3487_v62 = vshrl.u32 %v3363_v50, 16  ;;  %v3369_v25 = vld [vmem:[#allocation2 + $0x4c] sm:$0xf]  ;;  %v16143_v50 = vld [vmem:[#allocation8 + $0x1a8] sm:$0xff]  }
 0x138   : > { %v3448_v12 = vsel %vm16984_vm14, %v3443_v26, %v3447_v37  ;;  %v3479_v21 = vrot.slane %v3477_v35, 5  ;;  %v3485_v19 = vrot.slane %v3483_v57, 5  ;;  %v3466_v2 = vor.u32 %v3465_v27, %v3461_v0  ;;  %v3370_v14 = vld [vmem:[#allocation2 + $0x50] sm:$0x1]  ;;  %v16142_v26 = vld [vmem:[#allocation8 + $0x168] sm:$0xff]  }
 0x139   : > { %v13925_v51 = vcombine.low %v3438_v31, %v3448_v12  ;;  %v3457_v5 = vrot.slane %v3456_v13, 4  ;;  %v3493_v33 = vshll.u32 %v3364_v55, 16  ;;  %v3489_v60 = vrot.slane %v3487_v62, 4  ;;  %v16137_v55 = vld [vmem:[#allocation2 + $0x30] sm:$0xff]   ;;  %v16140_v35 = vld [vmem:[#allocation2 + $0x3c] sm:$0xff]  }
 0x13a   : > { %v3480_v39 = vor.u32 %v3479_v21, %v3476_v52  ;;  %v3498_v44 = vshrl.u32 %v3365_v54, 16  ;;  %v3501_v63 = vshll.u32 %v3365_v54, 16  ;;  %v3467_v49 = vrot.slane %v3466_v2, 4  ;;  %v3371_v62 = vld [vmem:[#allocation2 + $0x54] sm:$0xf] }
 0x13b   : > { %v3462_v36 = vsel %vm16984_vm14, %v3457_v5, %v3461_v0  ;;  %v3495_v32 = vrot.slane %v3493_v33, 5  ;;  %v3507_v28 = vshll.u32 %v3366_v15, 16  ;;  %v3490_v34 = vor.u32 %v3489_v60, %v3485_v19  ;;  %v3372_v33 = vld [vmem:[#allocation2 + $0x58] sm:$0xf]  ;;  %v3373_v54 = vld [vmem:[#allocation2 + $0x5c] sm:$0x1] }
 0x13c   : > { %v3481_v24 = vrot.slane %v3480_v39, 4  ;;  %v3500_v45 = vrot.slane %v3498_v44, 4  ;;  %v3503_v48 = vrot.slane %v3501_v63, 5  ;;  %v3472_v6 = vsel %vm16984_vm14, %v3467_v49, %v3471_v23  ;;  %v16151_v49 = vld [vmem:[#allocation8 + $0x198] sm:$0xff]  }
 0x13d   : > { %15265 = vmatmul.mubr.bf16.vlgmr.msra.gmra.mxu0 %v13925_v51  ;;  %v3509_v7 = vrot.slane %v3507_v28, 5  ;;  %v3511_v1 = vshrl.u32 %v3366_v15, 16  ;;  %v3517_v59 = vshll.u32 %v3367_v46, 16  ;;  %v13926_v8 = vcombine.low %v3462_v36, %v3472_v6  ;;  %v16146_v51 = vld [vmem:[#allocation8 + $0x160] sm:$0xff]  }
 0x13e   : > { %15345 = vmatpush3.bf16.msra.mxu0 %v16340_v61  ;;  %15217 = vmatmul.mubr.bf16.vlgmr.msra.gmra.mxu1 %v16133_v18  ;;  %v3486_v42 = vsel %vm16984_vm14, %v3481_v24, %v3485_v19  ;;  %v3491_v11 = vrot.slane %v3490_v34, 4  ;;  %v3504_v37 = vor.u32 %v3503_v48, %v3500_v45  ;;  %v3522_v58 = vshrl.u32 %v3368_v3, 16  ;;  %v16147_v18 = vld [vmem:[#allocation8 + $0x1a0] sm:$0xff]   ;;  %v16150_v45 = vld [vmem:[#allocation8 + $0x158] sm:$0xff]  }
 0x13f   : > { %15346 = vmatprep.subr.bf16.mxu0 %v16139_v29  ;;  %15297 = vmatpush3.bf16.msra.mxu1 %v17194_v53  ;;  %v3513_v40 = vrot.slane %v3511_v1, 4  ;;  %v3519_v31 = vrot.slane %v3517_v59, 5  ;;  %v3525_v22 = vshll.u32 %v3368_v3, 16  ;;  %v3531_v16 = vshll.u32 %v3369_v25, 16  ;;  %v16141_v48 = vld [vmem:[#allocation2 + $0x48] sm:$0xff]  }
 0x140   : > { %15220 = vmatprep.mubr.bf16.mxu1 %v16136_v9  ;;  %15268 = vmatprep.mubr.bf16.mxu0 %v13926_v8  ;;  %v3496_v47 = vsel %vm16984_vm14, %v3491_v11, %v3495_v32  ;;  %v3505_v20 = vrot.slane %v3504_v37, 4  ;;  %v3535_v43 = vshrl.u32 %v3369_v25, 16  ;;  %v3524_v53 = vrot.slane %v3522_v58, 4  ;;  %v3376_v1 = vld [vmem:[#allocation2 + $0x68] sm:$0x1] }
 0x141   : > { %15298 = vmatprep.subr.bf16.mxu1 %v16138_v41  ;;  %v13927_v0 = vcombine.low %v3486_v42, %v3496_v47  ;;  %v3514_v57 = vor.u32 %v3513_v40, %v3509_v7  ;;  %v3527_v13 = vrot.slane %v3525_v22, 5  ;;  %v3533_v27 = vrot.slane %v3531_v16, 5  ;;  %v16155_v40 = vld [vmem:[#allocation8 + $0x190] sm:$0xff]  }
 0x142   : > { %15347 = vmatpush3.bf16.msra.mxu0 %v16139_v29  ;;  %v3537_v23 = vrot.slane %v3535_v43, 4  ;;  %v3541_v52 = vshll.u32 %v3370_v14, 16  ;;  %v3510_v12 = vsel %vm16984_vm14, %v3505_v20, %v3509_v7  ;;  %v3546_v15 = vshrl.u32 %v3371_v62, 16  ;;  %v3375_v7 = vld [vmem:[#allocation2 + $0x64] sm:$0xf] }
 0x143   : > { %15348 = vmatprep.subr.bf16.mxu0 %v16143_v50  ;;  %15299 = vmatpush3.bf16.msra.mxu1 %v16138_v41  ;;  %v3515_v21 = vrot.slane %v3514_v57, 4  ;;  %v3528_v19 = vor.u32 %v3527_v13, %v3524_v53  ;;  %v3549_v29 = vshll.u32 %v3371_v62, 16  ;;  %v3555_v46 = vshll.u32 %v3372_v33, 16  ;;  %v3374_v41 = vld [vmem:[#allocation2 + $0x60] sm:$0xf]  ;;  %v16159_v53 = vld [vmem:[#allocation8 + $0x188] sm:$0xff]  }
 0x144   : > { %v3538_v5 = vor.u32 %v3537_v23, %v3533_v27  ;;  %v3543_v2 = vrot.slane %v3541_v52, 5  ;;  %15300 = vmatprep.subr.bf16.mxu1 %v16142_v26  ;;  %v3548_v9 = vrot.slane %v3546_v15, 4  ;;  %v3559_v36 = vshrl.u32 %v3372_v33, 16  ;;  %v16154_v43 = vld [vmem:[#allocation8 + $0x150] sm:$0xff]   ;;  %v3377_v57 = vld [vmem:[#allocation2 + $0x6c] sm:$0xf] }
 0x145   : > { %15269 = vmatmul.mubr.bf16.gmra.mxu0 %v13927_v0  ;;  %v3520_v39 = vsel %vm16984_vm14, %v3515_v21, %v3519_v31  ;;  %v3529_v60 = vrot.slane %v3528_v19, 4  ;;  %v3551_v28 = vrot.slane %v3549_v29, 5  ;;  %v3557_v24 = vrot.slane %v3555_v46, 5  ;;  %v16144_v31 = vld [vmem:[#allocation2 + $0x54] sm:$0xff]   ;;  %v3378_v23 = vld [vmem:[#allocation2 + $0x70] sm:$0xf] }
 0x146   : > { %15349 = vmatpush3.bf16.msra.mxu0 %v16143_v50  ;;  %15221 = vmatmul.mubr.bf16.gmra.mxu1 %v16137_v55  ;;  %v13928_v44 = vcombine.low %v3510_v12, %v3520_v39  ;;  %v3539_v63 = vrot.slane %v3538_v5, 4  ;;  %v3565_v34 = vshll.u32 %v3373_v54, 16  ;;  %v3561_v6 = vrot.slane %v3559_v36, 4  ;;  %v3379_v52 = vld [vmem:[#allocation2 + $0x74] sm:$0x1]  ;;  %v16158_v5 = vld [vmem:[#allocation8 + $0x148] sm:$0xff]  }
 0x147   : > { %15350 = vmatprep.subr.bf16.mxu0 %v16147_v18  ;;  %15224 = vmatprep.mubr.bf16.mxu1 %v16140_v35  ;;  %v3534_v32 = vsel %vm16984_vm14, %v3529_v60, %v3533_v27  ;;  %v3570_v59 = vshrl.u32 %v3374_v41, 16  ;;  %v3552_v8 = vor.u32 %v3551_v28, %v3548_v9  ;;  %v3573_v11 = vshll.u32 %v3374_v41, 16  ;;  %v16148_v29 = vld [vmem:[#allocation2 + $0x6c] sm:$0xff]   ;;  %v3381_v9 = vld [vmem:[#allocation2 + $0x7c] sm:$0xf] }
 0x148   : > { %15301 = vmatpush3.bf16.msra.mxu1 %v16142_v26  ;;  %15272 = vmatprep.mubr.bf16.mxu0 %v13928_v44  ;;  %v3544_v61 = vsel %vm16984_vm14, %v3539_v63, %v3543_v2  ;;  %v3567_v42 = vrot.slane %v3565_v34, 5  ;;  %v3562_v37 = vor.u32 %v3561_v6, %v3557_v24  ;;  %v3579_v14 = vshll.u32 %v3375_v7, 16  ;;  %v16145_v2 = vld [vmem:[#allocation2 + $0x60] sm:$0xff]   ;;  %v3380_v63 = vld [vmem:[#allocation2 + $0x78] sm:$0xf]  ;;  %v16162_v34 = vld [vmem:[#allocation8 + $0x140] sm:$0xff]  }
 0x149   : > { %15302 = vmatprep.subr.bf16.mxu1 %v16146_v51  ;;  %v13929_v3 = vcombine.low %v3534_v32, %v3544_v61  ;;  %v3572_v25 = vrot.slane %v3570_v59, 4  ;;  %v3583_v50 = vshrl.u32 %v3375_v7, 16  ;;  %v3553_v58 = vrot.slane %v3552_v8, 4  ;;  %v3382_v28 = vld [vmem:[#allocation2 + $0x80] sm:$0x1]  ;;  %v16163_v41 = vld [vmem:[#allocation8 + $0x180] sm:$0xff]  }
 0x14a   : > { %15351 = vmatpush3.bf16.msra.mxu0 %v16147_v18  ;;  %v3575_v22 = vrot.slane %v3573_v11, 5  ;;  %v3589_v55 = vshll.u32 %v3376_v1, 16  ;;  %v3563_v47 = vrot.slane %v3562_v37, 4  ;;  %v3581_v20 = vrot.slane %v3579_v14, 5 }
 0x14b   : > { %15352 = vmatprep.subr.bf16.mxu0 %v16151_v49  ;;  %v3585_v16 = vrot.slane %v3583_v50, 4  ;;  %v3558_v26 = vsel %vm16984_vm14, %v3553_v58, %v3557_v24  ;;  %v3594_v18 = vshrl.u32 %v3377_v57, 16  ;;  %v3597_v12 = vshll.u32 %v3377_v57, 16  ;;  %v17495_v58 = vld [vmem:[#allocation8 + $0x1f8] sm:$0xff]  }
 0x14c   : > { %15303 = vmatpush3.bf16.msra.mxu1 %v16146_v51  ;;  %v3576_v0 = vor.u32 %v3575_v22, %v3572_v25  ;;  %v3591_v35 = vrot.slane %v3589_v55, 5  ;;  %v3568_v13 = vsel %vm16984_vm14, %v3563_v47, %v3567_v42  ;;  %v3603_v62 = vshll.u32 %v3378_v23, 16  ;;  %v17491_v25 = vld [vmem:[#allocation8 + $0x238] sm:$0xff]  }
 0x14d   : > { %15273 = vmatmul.mubr.bf16.gmra.mxu0 %v13929_v3  ;;  %15304 = vmatprep.subr.bf16.mxu1 %v16150_v45  ;;  %v3586_v27 = vor.u32 %v3585_v16, %v3581_v20  ;;  %v13930_v21 = vcombine.low %v3558_v26, %v3568_v13  ;;  %v3607_v51 = vshrl.u32 %v3378_v23, 16  ;;  %v3596_v54 = vrot.slane %v3594_v18, 4  ;;  %v3384_v47 = vld [vmem:[#allocation2 + $0x88] sm:$0xf] }
 0x14e   : > { %15353 = vmatpush3.bf16.msra.mxu0 %v16151_v49  ;;  %15225 = vmatmul.mubr.bf16.gmra.mxu1 %v16141_v48  ;;  %v3577_v19 = vrot.slane %v3576_v0, 4  ;;  %v3599_v15 = vrot.slane %v3597_v12, 5  ;;  %v3613_v39 = vshll.u32 %v3379_v52, 16  ;;  %v3605_v46 = vrot.slane %v3603_v62, 5  ;;  %v16149_v0 = vld [vmem:[#allocation2 + $0x78] sm:$0xff]   ;;  %v16152_v23 = vld [vmem:[#allocation2 + $0x84] sm:$0xff]  }
 0x14f   : > { %15354 = vmatprep.subr.bf16.mxu0 %v16155_v40  ;;  %15228 = vmatprep.mubr.bf16.mxu1 %v16144_v31  ;;  %v3587_v33 = vrot.slane %v3586_v27, 4  ;;  %v3609_v44 = vrot.slane %v3607_v51, 4  ;;  %v3618_v24 = vshrl.u32 %v3380_v63, 16  ;;  %v3621_v61 = vshll.u32 %v3380_v63, 16  ;;  %v3383_v31 = vld [vmem:[#allocation2 + $0x84] sm:$0xf] }
 0x150   : > { %15305 = vmatpush3.bf16.msra.mxu1 %v16150_v45  ;;  %15276 = vmatprep.mubr.bf16.mxu0 %v13930_v21  ;;  %v3582_v60 = vsel %vm16984_vm14, %v3577_v19, %v3581_v20  ;;  %v3600_v49 = vor.u32 %v3599_v15, %v3596_v54  ;;  %v3615_v32 = vrot.slane %v3613_v39, 5  ;;  %v3627_v6 = vshll.u32 %v3381_v9, 16  ;;  %v3385_v20 = vld [vmem:[#allocation2 + $0x8c] sm:$0x1]  ;;  %v3386_v21 = vld [vmem:[#allocation2 + $0x90] sm:$0xf] }
 0x151   : > { %15306 = vmatprep.subr.bf16.mxu1 %v16154_v43  ;;  %v3592_v36 = vsel %vm16984_vm14, %v3587_v33, %v3591_v35  ;;  %v3610_v48 = vor.u32 %v3609_v44, %v3605_v46  ;;  %v3620_v1 = vrot.slane %v3618_v24, 4  ;;  %v3631_v59 = vshrl.u32 %v3381_v9, 16 }
 0x152   : > { %15355 = vmatpush3.bf16.msra.mxu0 %v16155_v40  ;;  %v13931_v45 = vcombine.low %v3582_v60, %v3592_v36  ;;  %v3601_v7 = vrot.slane %v3600_v49, 4  ;;  %v3637_v3 = vshll.u32 %v3382_v28, 16  ;;  %v3623_v11 = vrot.slane %v3621_v61, 5  ;;  %v3388_v60 = vld [vmem:[#allocation2 + $0x98] sm:$0x1] }
 0x153   : > { %15356 = vmatprep.subr.bf16.mxu0 %v16159_v53  ;;  %v3611_v42 = vrot.slane %v3610_v48, 4  ;;  %v3629_v37 = vrot.slane %v3627_v6, 5  ;;  %v3633_v50 = vrot.slane %v3631_v59, 4  ;;  %v3642_v16 = vshrl.u32 %v3383_v31, 16 }
 0x154   : > { %15307 = vmatpush3.bf16.msra.mxu1 %v16154_v43  ;;  %v17489_v8 = vpop.f32.mrf.mxu0  ;;  %v3606_v14 = vsel %vm16984_vm14, %v3601_v7, %v3605_v46  ;;  %v3639_v40 = vrot.slane %v3637_v3, 5  ;;  %v3624_v55 = vor.u32 %v3623_v11, %v3620_v1  ;;  %v3645_v43 = vshll.u32 %v3383_v31, 16  ;;  %v3389_v1 = vld [vmem:[#allocation2 + $0x9c] sm:$0xf]  ;;  %v16153_v3 = vld [vmem:[#allocation2 + $0x90] sm:$0xff]  }
 0x155   : > { %15308 = vmatprep.subr.bf16.mxu1 %v16158_v5  ;;  %15277 = vmatmul.mubr.bf16.gmra.mxu0 %v13931_v45  ;;  %v3616_v22 = vsel %vm16984_vm14, %v3611_v42, %v3615_v32  ;;  %v3634_v35 = vor.u32 %v3633_v50, %v3629_v37  ;;  %v3651_v57 = vshll.u32 %v3384_v47, 16  ;;  %v3655_v13 = vshrl.u32 %v3384_v47, 16  ;;  %v3390_v11 = vld [vmem:[#allocation2 + $0xa0] sm:$0xf] }
 0x156   : > { %15229 = vmatmul.mubr.bf16.gmra.mxu1 %v16145_v2  ;;  %15357 = vmatpush3.bf16.msra.mxu0 %v16159_v53  ;;  %v13932_v26 = vcombine.low %v3606_v14, %v3616_v22  ;;  %v17499_v53 = vpop.f32.mrf.mxu0  ;;  %v3625_v27 = vrot.slane %v3624_v55, 4  ;;  %v3644_v52 = vrot.slane %v3642_v16, 4  ;;  %v3647_v18 = vrot.slane %v3645_v43, 5  ;;  %v17501_v19 = vpop.f32.mrf.mxu1  ;;  %v3387_v2 = vld [vmem:[#allocation2 + $0x94] sm:$0xf]  ;;  %v16156_v55 = vld [vmem:[#allocation2 + $0x9c] sm:$0xff]  }
 0x157   : > { %15232 = vmatprep.mubr.bf16.mxu1 %v16148_v29  ;;  %15358 = vmatprep.subr.bf16.mxu0 %v16163_v41  ;;  %v3661_v12 = vshll.u32 %v3385_v20, 16  ;;  %v3635_v62 = vrot.slane %v3634_v35, 4  ;;  %v3653_v51 = vrot.slane %v3651_v57, 5  ;;  %v3666_v33 = vshrl.u32 %v3386_v21, 16  ;;  %v3392_v35 = vld [vmem:[#allocation2 + $0xa8] sm:$0xf] }
 0x158   : > { %15309 = vmatpush3.bf16.msra.mxu1 %v16158_v5  ;;  %15280 = vmatprep.mubr.bf16.mxu0 %v13932_v26  ;;  %v3657_v5 = vrot.slane %v3655_v13, 4  ;;  %v3630_v54 = vsel %vm16984_vm14, %v3625_v27, %v3629_v37  ;;  %v3648_v15 = vor.u32 %v3647_v18, %v3644_v52  ;;  %v3669_v29 = vshll.u32 %v3386_v21, 16  ;;  %v17509_v36 = vpop.f32.mrf.mxu0  ;;  %v3391_v37 = vld [vmem:[#allocation2 + $0xa4] sm:$0x1]  ;;  %v3394_v52 = vld [vmem:[#allocation2 + $0xb0] sm:$0x1] }
 0x159   : > { %15310 = vmatprep.subr.bf16.mxu1 %v16162_v34  ;;  %v3663_v39 = vrot.slane %v3661_v12, 5  ;;  %v3640_v46 = vsel %vm16984_vm14, %v3635_v62, %v3639_v40  ;;  %v3668_v63 = vrot.slane %v3666_v33, 4  ;;  %v3675_v9 = vshll.u32 %v3387_v2, 16 }
 0x15a   : > { %15359 = vmatpush3.bf16.msra.mxu0 %v16163_v41  ;;  %v3658_v44 = vor.u32 %v3657_v5, %v3653_v51  ;;  %v13933_v49 = vcombine.low %v3630_v54, %v3640_v46  ;;  %v3649_v32 = vrot.slane %v3648_v15, 4  ;;  %v3671_v28 = vrot.slane %v3669_v29, 5  ;;  %v17511_v41 = vpop.f32.mrf.mxu1  ;;  %v17517_v50 = vpop.f32.mrf.mxu0 }
 0x15b   : > { %15440 = vmatprep.subr.bf16.mxu0 %v17491_v25  ;;  %v3679_v24 = vshrl.u32 %v3387_v2, 16  ;;  %v3677_v45 = vrot.slane %v3675_v9, 5  ;;  %v3685_v48 = vshll.u32 %v3388_v60, 16  ;;  %v3690_v14 = vshrl.u32 %v3389_v1, 16  ;;  %20704 = vst [vmem:[#allocation25_spill] sm:$0xff] %v17517_v50 }
 0x15c   : > { %15311 = vmatpush3.bf16.msra.mxu1 %v16162_v34  ;;  %v3659_v34 = vrot.slane %v3658_v44, 4  ;;  %v3654_v61 = vsel %vm16984_vm14, %v3649_v32, %v3653_v51  ;;  %v3672_v6 = vor.u32 %v3671_v28, %v3668_v63  ;;  %v3693_v47 = vshll.u32 %v3389_v1, 16  ;;  %v17519_v20 = vpop.f32.mrf.mxu1  ;;  %v16157_v28 = vld [vmem:[#allocation2 + $0xa8] sm:$0xff]   ;;  %v3397_v1 = vld [vmem:[#allocation2 + $0xbc] sm:$0x1] }
 0x15d   : > { %15392 = vmatprep.subr.bf16.mxu1 %v17495_v58  ;;  %15281 = vmatmul.mubr.bf16.gmra.mxu0 %v13933_v49  ;;  %v3681_v7 = vrot.slane %v3679_v24, 4  ;;  %v3687_v42 = vrot.slane %v3685_v48, 5  ;;  %v3692_v16 = vrot.slane %v3690_v14, 4  ;;  %v3699_v43 = vshll.u32 %v3390_v11, 16 }
 0x15e   : > { %15233 = vmatmul.mubr.bf16.gmra.mxu1 %v16149_v0  ;;  %v3664_v59 = vsel %vm16984_vm14, %v3659_v34, %v3663_v39  ;;  %v3673_v31 = vrot.slane %v3672_v6, 4  ;;  %v3703_v26 = vshrl.u32 %v3390_v11, 16  ;;  %v3709_v0 = vshll.u32 %v3391_v37, 16  ;;  %v17527_v15 = vpop.f32.mrf.mxu1  ;;  %v3395_v34 = vld [vmem:[#allocation2 + $0xb4] sm:$0xf] }
 0x15f   : > { %15236 = vmatprep.mubr.bf16.mxu1 %v16152_v23  ;;  %v13934_v40 = vcombine.low %v3654_v61, %v3664_v59  ;;  %v3682_v22 = vor.u32 %v3681_v7, %v3677_v45  ;;  %v3695_v27 = vrot.slane %v3693_v47, 5  ;;  %v3393_v23 = vld [vmem:[#allocation2 + $0xac] sm:$0xf]  ;;  %v3701_v18 = vrot.slane %v3699_v43, 5  ;;  %20705 = vst [vmem:[#allocation26_spill] sm:$0xff] %v17527_v15 }
 0x160   : > { %v3678_v57 = vsel %vm16984_vm14, %v3673_v31, %v3677_v45  ;;  %v3705_v12 = vrot.slane %v3703_v26, 4  ;;  %v3711_v21 = vrot.slane %v3709_v0, 5  ;;  %v3714_v62 = vshrl.u32 %v3392_v35, 16  ;;  %v3396_v45 = vld [vmem:[#allocation2 + $0xb8] sm:$0xf] }
 0x161   : > { %15284 = vmatprep.mubr.bf16.mxu0 %v13934_v40  ;;  %v3683_v13 = vrot.slane %v3682_v22, 4  ;;  %v3696_v2 = vor.u32 %v3695_v27, %v3692_v16  ;;  %v3717_v33 = vshll.u32 %v3392_v35, 16  ;;  %v3723_v54 = vshll.u32 %v3393_v23, 16  ;;  %v565_v31 = vld [vmem:[%s16753_s7 + $0x78] sm:$0xf]  ;;  %v16160_v16 = vld [vmem:[#allocation2 + $0xb4] sm:$0xff]  }
 0x162   : > { %v3706_v60 = vor.u32 %v3705_v12, %v3701_v18  ;;  %v3716_v29 = vrot.slane %v3714_v62, 4  ;;  %v3727_v46 = vshrl.u32 %v3393_v23, 16  ;;  %v3733_v49 = vshll.u32 %v3394_v52, 16  ;;  %v566_v22 = vld [vmem:[%s16753_s7 + $0x7c] sm:$0xf] }
 0x163   : > { %v17523_v51 = vpop.f32.mrf.mxu0  ;;  %v3688_v5 = vsel %vm16984_vm14, %v3683_v13, %v3687_v42  ;;  %v3697_v44 = vrot.slane %v3696_v2, 4  ;;  %v3719_v63 = vrot.slane %v3717_v33, 5  ;;  %v3725_v9 = vrot.slane %v3723_v54, 5  ;;  %v414_v0 = vld [vmem:[#allocation2 + $0xc8] sm:$0x1] }
 0x164   : > { %v13935_v39 = vcombine.low %v3678_v57, %v3688_v5  ;;  %v3707_v32 = vrot.slane %v3706_v60, 4  ;;  %v3729_v24 = vrot.slane %v3727_v46, 4  ;;  %v3735_v7 = vrot.slane %v3733_v49, 5  ;;  %v17658_v15 = vld [vmem:[#allocation2 + $0x88] sm:$0xf] }
 0x165   : > { %v17529_v48 = vpop.f32.mrf.mxu0  ;;  %v3702_v61 = vsel %vm16984_vm14, %v3697_v44, %v3701_v18  ;;  %v3720_v6 = vor.u32 %v3719_v63, %v3716_v29  ;;  %v3738_v59 = vshrl.u32 %v3395_v34, 16  ;;  %v3741_v14 = vshll.u32 %v3395_v34, 16  ;;  %v4172_v44 = vld [vmem:[#allocation2 + $0x10] sm:$0xf] }
 0x166   : > { %15237 = vmatmul.mubr.bf16.gmra.mxu1 %v16153_v3  ;;  %15285 = vmatmul.mubr.bf16.gmra.mxu0 %v13935_v39  ;;  %v358_v3 = vld [vmem:[#allocation2 + $0xc0] sm:$0x1]  ;;  %v3712_v11 = vsel %vm16984_vm14, %v3707_v32, %v3711_v21  ;;  %v3730_v37 = vor.u32 %v3729_v24, %v3725_v9  ;;  %v3747_v40 = vshll.u32 %v3396_v45, 16  ;;  %v3751_v26 = vshrl.u32 %v3396_v45, 16 }
 0x167   : > { %15240 = vmatprep.mubr.bf16.mxu1 %v16156_v55  ;;  %v13936_v55 = vcombine.low %v3702_v61, %v3712_v11  ;;  %v3721_v47 = vrot.slane %v3720_v6, 4  ;;  %v3740_v43 = vrot.slane %v3738_v59, 4  ;;  %v3743_v57 = vrot.slane %v3741_v14, 5  ;;  %v17539_v23 = vpop.f32.mrf.mxu0  ;;  %v4173_v11 = vld [vmem:[#allocation2 + $0x14] sm:$0x1] }
 0x168   : > { %v17533_v42 = vpop.f32.mrf.mxu1  ;;  %v3731_v35 = vrot.slane %v3730_v37, 4  ;;  %v3749_v13 = vrot.slane %v3747_v40, 5  ;;  %v3757_v27 = vshll.u32 %v3397_v1, 16  ;;  %v3753_v18 = vrot.slane %v3751_v26, 4  ;;  %v4175_v14 = vld [vmem:[#allocation2 + $0x1c] sm:$0xf] }
 0x169   : > { %15288 = vmatprep.mubr.bf16.mxu0 %v13936_v55  ;;  %v3726_v52 = vsel %vm16984_vm14, %v3721_v47, %v3725_v9  ;;  %v359_v12 = vsel %vm16769_vm3, 0, %v358_v3  ;;  %v825_v21 = vshrl.u32 %v565_v31, 16  ;;  %v3744_v2 = vor.u32 %v3743_v57, %v3740_v43  ;;  %v17551_v32 = vpop.f32.mrf.mxu0  ;;  %v4176_v57 = vld [vmem:[#allocation2 + $0x20] sm:$0x1] }
 0x16a   : > { %v17545_v62 = vpop.f32.mrf.mxu1  ;;  %v3736_v5 = vsel %vm16984_vm14, %v3731_v35, %v3735_v7  ;;  %v3759_v33 = vrot.slane %v3757_v27, 5  ;;  %360 = vst [vmem:[#allocation2 + $0xc0] sm:$0x1] %v359_v12  ;;  %v828_v54 = vshll.u32 %v565_v31, 16  ;;  %v3754_v60 = vor.u32 %v3753_v18, %v3749_v13  ;;  %20706 = vst [vmem:[#allocation27_spill] sm:$0xff] %v17551_v32 }
 0x16b   : > { %v13937_v39 = vcombine.low %v3726_v52, %v3736_v5  ;;  %v827_v29 = vrot.slane %v825_v21, 7  ;;  %v833_v46 = vshrl.u32 %v566_v22, 16  ;;  %v3745_v63 = vrot.slane %v3744_v2, 4  ;;  %v4171_v7 = vld [vmem:[#allocation2 + $0xc] sm:$0xe] }
 0x16c   : > { %v836_v9 = vshll.u32 %v566_v22, 16  ;;  %v415_v49 = vsel %vm16779_vm5, 0, %v414_v0  ;;  %v17553_v45 = vpop.f32.mrf.mxu1  ;;  %v4269_v1 = vrot.slane %v4172_v44, 5  ;;  %v13948_v47 = vrot.slane %v4171_v7, 9  ;;  %v4174_v35 = vld [vmem:[#allocation2 + $0x18] sm:$0xe] }
 0x16d   : > { %v831_v24 = vrot.slane %v827_v29, 4  ;;  %v835_v34 = vrot.slane %v833_v46, 7  ;;  %416 = vst [vmem:[#allocation2 + $0xc8] sm:$0x1] %v415_v49  ;;  %20707 = vst [vmem:[#allocation28_spill] sm:$0xff] %v17553_v45  ;;  %v3750_v61 = vsel %vm16984_vm14, %v3745_v63, %v3749_v13  ;;  %v830_v6 = vor.u32 %v828_v54, %v827_v29 }
 0x16e   : > { %15241 = vmatmul.mubr.bf16.gmra.mxu1 %v16157_v28  ;;  %15289 = vmatmul.mubr.bf16.gmra.mxu0 %v13937_v39  ;;  %v3755_v28 = vrot.slane %v3754_v60, 4  ;;  %v4271_v26 = vrot.slane %v4269_v1, 4  ;;  %v4272_v0 = vrot.slane %v4173_v11, 5  ;;  %v4276_v13 = vrot.slane %v4175_v14, 5  ;;  %v4178_v27 = vld [vmem:[#allocation2 + $0x28] sm:$0xf] }
 0x16f   : > { %15244 = vmatprep.mubr.bf16.mxu1 %v16160_v16  ;;  %v838_v3 = vor.u32 %v836_v9, %v835_v34  ;;  %v840_v22 = vrot.slane %v835_v34, 4  ;;  %v17563_v16 = vpop.f32.mrf.mxu1  ;;  %v4177_v18 = vld [vmem:[#allocation2 + $0x24] sm:$0xe]  ;;  %v4283_v12 = vrot.slane %v4178_v27, 5  ;;  %v4179_v2 = vld [vmem:[#allocation2 + $0x2c] sm:$0x1]  ;;  %v4270_v54 = vsel %vm16978_vm13, %v13948_v47, %v4269_v1 }
 0x170   : > { %v3760_v59 = vsel %vm16984_vm14, %v3755_v28, %v3759_v33  ;;  %20708 = vst [vmem:[#allocation29_spill] sm:$0xff] %v17563_v16  ;;  %v4273_v39 = vsel %vm16978_vm13, %v4271_v26, %v4272_v0  ;;  %v13949_v60 = vrot.slane %v4174_v35, 9  ;;  %v4278_v29 = vrot.slane %v4276_v13, 4  ;;  %v4181_v34 = vld [vmem:[#allocation2 + $0x34] sm:$0xf] }
 0x171   : > { %v13938_v37 = vcombine.low %v3750_v61, %v3760_v59  ;;  %v839_v31 = vsel %vm16795_vm7, %v831_v24, %v838_v3  ;;  %v997_v55 = vld [vmem:[#allocation2 + $0xc0] sm:$0xf]  ;;  %v4279_v46 = vrot.slane %v4176_v57, 5  ;;  %v13950_v44 = vrot.slane %v4177_v18, 9  ;;  %v4180_v14 = vld [vmem:[#allocation2 + $0x30] sm:$0xe] }
 0x172   : > { %v998_v43 = vsel %vm16801_vm8, %v830_v6, %v997_v55  ;;  %1000 = vst [vmem:[#allocation2 + $0xc4] sm:$0xf] %v839_v31  ;;  %v4285_v63 = vrot.slane %v4283_v12, 4  ;;  %v4286_v9 = vrot.slane %v4179_v2, 5  ;;  %v13964_v24 = vcombine.low %v4270_v54, %v4273_v39  ;;  %v4182_v31 = vld [vmem:[#allocation2 + $0x38] sm:$0x1] }
 0x173   : > { %15292 = vmatprep.mubr.bf16.mxu0 %v13938_v37  ;;  %999 = vst [vmem:[#allocation2 + $0xc0] sm:$0xf] %v998_v43  ;;  %v4277_v37 = vsel %vm16978_vm13, %v13949_v60, %v4276_v13  ;;  %v4280_v55 = vsel %vm16978_vm13, %v4278_v29, %v4279_v46  ;;  %v4284_v47 = vsel %vm16978_vm13, %v13950_v44, %v4283_v12  ;;  %v4290_v43 = vrot.slane %v4181_v34, 5  ;;  %v4184_v2 = vld [vmem:[#allocation2 + $0x40] sm:$0xf] }
 0x174   : > { %v17559_v40 = vpop.f32.mrf.mxu0  ;;  %v1001_v52 = vld [vmem:[#allocation2 + $0xc8] sm:$0x1]  ;;  %v4287_v13 = vsel %vm16978_vm13, %v4285_v63, %v4286_v9  ;;  %v13965_v60 = vcombine.low %v4277_v37, %v4280_v55  ;;  %v4185_v12 = vld [vmem:[#allocation2 + $0x44] sm:$0x1]  ;;  %v4297_v29 = vrot.slane %v4184_v2, 5  ;;  %v4293_v34 = vrot.slane %v4182_v31, 5 }
 0x175   : > { %v1002_v5 = vsel %vm16769_vm3, %v840_v22, %v1001_v52  ;;  %v13966_v44 = vcombine.low %v4284_v47, %v4287_v13  ;;  %v4292_v63 = vrot.slane %v4290_v43, 4  ;;  %v16164_v31 = vld [vmem:[#allocation2 + $0x18] sm:$0xff]  }
 0x176   : > { %v17567_v21 = vpop.f32.mrf.mxu0  ;;  %1003 = vst [vmem:[#allocation2 + $0xc8] sm:$0x1] %v1002_v5  ;;  %v4183_v5 = vld [vmem:[#allocation2 + $0x3c] sm:$0xe]  ;;  %v4190_v2 = vld [vmem:[#allocation2 + $0x58] sm:$0xf] }
 0x177   : > { %v17571_v33 = vpop.f32.mrf.mxu1  ;;  %v13952_v9 = vrot.slane %v4183_v5, 9  ;;  %v4294_v5 = vsel %vm16978_vm13, %v4292_v63, %v4293_v34 }
 0x178   : > { %20709 = vst [vmem:[#allocation30_spill] sm:$0xff] %v17571_v33  ;;  %v17577_v49 = vpop.f32.mrf.mxu0 }
 0x179   : > { %v3399_v28 = vld [vmem:[#allocation2 + $0xc4] sm:$0xf]  ;;  %v17579_v61 = vpop.f32.mrf.mxu1 }
 0x17a   : > { %20710 = vst [vmem:[#allocation31_spill] sm:$0xff] %v17579_v61  ;;  %v16161_v6 = vld [vmem:[#allocation2 + $0xc0] sm:$0xff]   ;;  %v3771_v59 = vshll.u32 %v3399_v28, 16  ;;  %v3775_v11 = vshrl.u32 %v3399_v28, 16  ;;  %v17587_v26 = vpop.f32.mrf.mxu0  ;;  %v13951_v28 = vrot.slane %v4180_v14, 9 }
 0x17b   : > { %v3398_v7 = vld [vmem:[#allocation2 + $0xc0] sm:$0xf]  ;;  %15245 = vmatmul.mubr.bf16.gmra.mxu1 %v16161_v6  ;;  %20711 = vst [vmem:[#allocation32_spill] sm:$0xff] %v17587_v26  ;;  %v17591_v52 = vpop.f32.mrf.mxu1 }
 0x17c   : > { %v3762_v1 = vshrl.u32 %v3398_v7, 16  ;;  %v3765_v3 = vshll.u32 %v3398_v7, 16  ;;  %v3773_v22 = vrot.slane %v3771_v59, 5  ;;  %v3777_v27 = vrot.slane %v3775_v11, 4  ;;  %15312 = vmatprep.mubr.bf16.mxu1 %v13964_v24  ;;  %20712 = vst [vmem:[#allocation33_spill] sm:$0xff] %v17591_v52  ;;  %v16170_v6 = vld [vmem:[#allocation8 + $0x1f0] sm:$0xff]  }
 0x17d   : > { %v3400_v0 = vld [vmem:[#allocation2 + $0xc8] sm:$0x1]  ;;  %v4299_v11 = vrot.slane %v4297_v29, 4 }
 0x17e   : > { %v3764_v35 = vrot.slane %v3762_v1, 4  ;;  %v3767_v57 = vrot.slane %v3765_v3, 5  ;;  %v3781_v18 = vshll.u32 %v3400_v0, 16  ;;  %v3778_v39 = vor.u32 %v3777_v27, %v3773_v22  ;;  %v4187_v1 = vld [vmem:[#allocation2 + $0x4c] sm:$0xf]  ;;  %v17595_v3 = vpop.f32.mrf.mxu1 }
 0x17f   : > { %20713 = vst [vmem:[#allocation34_spill] sm:$0xff] %v17595_v3  ;;  %v4300_v0 = vrot.slane %v4185_v12, 5  ;;  %v4304_v47 = vrot.slane %v4187_v1, 5  ;;  %v4188_v27 = vld [vmem:[#allocation2 + $0x50] sm:$0x1] }
 0x180   : > { %v3768_v54 = vor.u32 %v3767_v57, %v3764_v35  ;;  %v3783_v46 = vrot.slane %v3781_v18, 5  ;;  %v3779_v59 = vrot.slane %v3778_v39, 4  ;;  %v4186_v35 = vld [vmem:[#allocation2 + $0x48] sm:$0xe]  ;;  %v4291_v18 = vsel %vm16978_vm13, %v13951_v28, %v4290_v43  ;;  %v4191_v12 = vld [vmem:[#allocation2 + $0x5c] sm:$0x1] }
 0x181   : > { %v4298_v39 = vsel %vm16978_vm13, %v13952_v9, %v4297_v29  ;;  %v13953_v43 = vrot.slane %v4186_v35, 9  ;;  %v4307_v28 = vrot.slane %v4188_v27, 5  ;;  %v13967_v63 = vcombine.low %v4291_v18, %v4294_v5  ;;  %v4193_v29 = vld [vmem:[#allocation2 + $0x64] sm:$0xf]  ;;  %v16178_v9 = vld [vmem:[#allocation8 + $0x1e0] sm:$0xff]  }
 0x182   : > { %v3769_v24 = vrot.slane %v3768_v54, 4  ;;  %v3784_v14 = vsel %vm16984_vm14, %v3779_v59, %v3783_v46  ;;  %v4311_v46 = vrot.slane %v4190_v2, 5  ;;  %v16165_v59 = vld [vmem:[#allocation2 + $0x24] sm:$0xff]   ;;  %v17628_v5 = vld [vmem:[#allocation2 + $0x6c] sm:$0xe] }
 0x183   : > { %15313 = vmatmul.mubr.bf16.vlgmr.msra.gmra.mxu1 %v13965_v60  ;;  %v4301_v60 = vsel %vm16978_vm13, %v4299_v11, %v4300_v0  ;;  %v16168_v11 = vld [vmem:[#allocation2 + $0x30] sm:$0xff]   ;;  %v16171_v27 = vld [vmem:[#allocation8 + $0x230] sm:$0xff]   ;;  %v4194_v2 = vld [vmem:[#allocation2 + $0x68] sm:$0x1]  ;;  %v4305_v18 = vsel %vm16978_vm13, %v13953_v43, %v4304_v47 }
 0x184   : > { %v3774_v55 = vsel %vm16984_vm14, %v3769_v24, %v3773_v22  ;;  %15393 = vmatpush3.bf16.msra.mxu1 %v17495_v58  ;;  %15316 = vmatprep.mubr.bf16.mxu1 %v13966_v44  ;;  %v4189_v22 = vld [vmem:[#allocation2 + $0x54] sm:$0xe]  ;;  %v16174_v58 = vld [vmem:[#allocation8 + $0x1e8] sm:$0xff]   ;;  %v4306_v44 = vrot.slane %v4304_v47, 4  ;;  %v13968_v0 = vcombine.low %v4298_v39, %v4301_v60  ;;  %v4321_v3 = vrot.slane %v4194_v2, 5 }
 0x185   : > { %v17593_v7 = vpop.f32.mrf.mxu0  ;;  %v13939_v57 = vcombine.low %v3774_v55, %v3784_v14  ;;  %15394 = vmatprep.subr.bf16.mxu1 %v16170_v6  ;;  %v13954_v1 = vrot.slane %v4189_v22, 9  ;;  %v4314_v55 = vrot.slane %v4191_v12, 5  ;;  %v17620_v14 = vld [vmem:[#allocation2 + $0x60] sm:$0xe]  ;;  %v17630_v22 = vld [vmem:[#allocation2 + $0x70] sm:$0xf] }
 0x186   : > { %v4308_v39 = vsel %vm16978_vm13, %v4306_v44, %v4307_v28  ;;  %v13955_v12 = vrot.slane %v17620_v14, 9  ;;  %v16175_v47 = vld [vmem:[#allocation8 + $0x228] sm:$0xff]   ;;  %v16182_v44 = vld [vmem:[#allocation8 + $0x1d8] sm:$0xff]   ;;  %v17650_v2 = vld [vmem:[#allocation2 + $0x80] sm:$0x1] }
 0x187   : > { %v17597_v37 = vpop.f32.mrf.mxu0  ;;  %15293 = vmatmul.mubr.bf16.gmra.mxu0 %v13939_v57  ;;  %v4313_v57 = vrot.slane %v4311_v46, 4  ;;  %v4312_v60 = vsel %vm16978_vm13, %v13954_v1, %v4311_v46  ;;  %v13956_v46 = vrot.slane %v17628_v5, 9 }
 0x188   : > { %15360 = vmatprep.mubr.bf16.mxu0 %v16164_v31  ;;  %15395 = vmatpush3.bf16.msra.mxu1 %v16170_v6  ;;  %v4318_v31 = vrot.slane %v4193_v29, 5  ;;  %v17632_v6 = vld [vmem:[#allocation2 + $0x74] sm:$0x1] }
 0x189   : > { %v17603_v13 = vpop.f32.mrf.mxu0  ;;  %v17610_v54 = vpop.f32.mrf.mxu1  ;;  %15396 = vmatprep.subr.bf16.mxu1 %v16174_v58  ;;  %v4315_v43 = vsel %vm16978_vm13, %v4313_v57, %v4314_v55  ;;  %v4328_v28 = vrot.slane %v17632_v6, 5  ;;  %v16169_v55 = vld [vmem:[#allocation2 + $0x3c] sm:$0xff]   ;;  %v13969_v57 = vcombine.low %v4305_v18, %v4308_v39  ;;  %v16179_v39 = vld [vmem:[#allocation8 + $0x220] sm:$0xff]  }
 0x18a   : > { %20714 = vst [vmem:[#allocation35_spill] sm:$0xff] %v17610_v54 }
 0x18b   : > { %v17616_v34 = vpop.f32.mrf.mxu1  ;;  %v17618_v24 = vpop.f32.mrf.mxu0  ;;  %15317 = vmatmul.mubr.bf16.gmra.mxu1 %v13967_v63  ;;  %v4325_v63 = vrot.slane %v17630_v22, 5  ;;  %v16186_v22 = vld [vmem:[#allocation8 + $0x1d0] sm:$0xff]  }
 0x18c   : > { %20715 = vst [vmem:[#allocation36_spill] sm:$0xff] %v17616_v34  ;;  %20716 = vst [vmem:[#allocation37_spill] sm:$0xff] %v17618_v24  ;;  %15320 = vmatprep.mubr.bf16.mxu1 %v13968_v0  ;;  %15397 = vmatpush3.bf16.msra.mxu1 %v16174_v58  ;;  %v17642_v0 = vld [vmem:[#allocation2 + $0x7c] sm:$0xf] }
 0x18d   : > { %v17622_v35 = vpop.f32.mrf.mxu1  ;;  %15398 = vmatprep.subr.bf16.mxu1 %v16178_v9  ;;  %v20659_v5 = vrot.slane %v17642_v0, 5 }
 0x18e   : > { %20717 = vst [vmem:[#allocation38_spill] sm:$0xff] %v17622_v35 }
 0x18f   : > { %v17624_v30 = vpop.f32.mrf.mxu1  ;;  %v15170_v38 = vpop.f32.mrf.mxu0  ;;  %15361 = vmatmul.mubr.bf16.vlgmr.msra.gmra.mxu0 %v16165_v59  ;;  %v17648_v59 = vld [vmem:[#allocation2 + $0x78] sm:$0xe] }
 0x190   : > { %20718 = vst [vmem:[#allocation39_spill] sm:$0xff] %v17624_v30  ;;  %v4320_v30 = vrot.slane %v4318_v31, 4  ;;  %15441 = vmatpush3.bf16.msra.mxu0 %v17491_v25  ;;  %15364 = vmatprep.mubr.bf16.mxu0 %v16168_v11  ;;  %v13970_v25 = vcombine.low %v4312_v60, %v4315_v43  ;;  %v4327_v11 = vrot.slane %v4325_v63, 4 }
 0x191   : > { %v15122_v29 = vpop.f32.mrf.mxu1  ;;  %v2712_v14 = vpop.f32.mrf.mxu0  ;;  %15442 = vmatprep.subr.bf16.mxu0 %v16171_v27  ;;  %15399 = vmatpush3.bf16.msra.mxu1 %v16178_v9  ;;  %v13957_v9 = vrot.slane %v17648_v59, 9  ;;  %v17675_v59 = vld [vmem:[#allocation2 + $0x90] sm:$0xe] }
 0x192   : > { %v2244_v58 = vadd.f32 %v15122_v29, %v17489_v8  ;;  %15400 = vmatprep.subr.bf16.mxu1 %v16182_v44  ;;  %v17656_v29 = vld [vmem:[#allocation2 + $0x84] sm:$0xe]  ;;  %v4322_v43 = vsel %vm16978_vm13, %v4320_v30, %v4321_v3  ;;  %v4326_v30 = vsel %vm16978_vm13, %v13956_v46, %v4325_v63  ;;  %v16183_v3 = vld [vmem:[#allocation8 + $0x218] sm:$0xff]  }
 0x193   : > { %v2115_v1 = vpop.f32.mrf.mxu1  ;;  %v15171_v60 = vpop.f32.mrf.mxu0  ;;  %15321 = vmatmul.mubr.bf16.gmra.mxu1 %v13969_v57  ;;  %v17677_v57 = vld [vmem:[#allocation2 + $0x94] sm:$0xf]  ;;  %v16176_v63 = vld [vmem:[#allocation2 + $0x60] sm:$0xff]  }
 0x194   : > { %v17652_v16 = vadd.f32 %v15170_v38, %v2244_v58  ;;  %v2242_v8 = vadd.f32 %v2115_v1, %v17499_v53  ;;  %15443 = vmatpush3.bf16.msra.mxu0 %v16171_v27  ;;  %v16172_v38 = vld [vmem:[#allocation2 + $0x48] sm:$0xff]   ;;  %v4319_v53 = vsel %vm16978_vm13, %v13955_v12, %v4318_v31  ;;  %v4335_v58 = vrot.slane %v17650_v2, 5  ;;  %15324 = vmatprep.mubr.bf16.mxu1 %v13970_v25  ;;  %v17683_v2 = vld [vmem:[#allocation2 + $0x98] sm:$0x1] }
 0x195   : > { %v15123_v6 = vpop.f32.mrf.mxu1  ;;  %15444 = vmatprep.subr.bf16.mxu0 %v16175_v47  ;;  %v4203_v1 = vld [vmem:[#allocation2 + $0x8c] sm:$0x1]  ;;  %v4334_v31 = vrot.slane %v20659_v5, 4  ;;  %15401 = vmatpush3.bf16.msra.mxu1 %v16182_v44  ;;  %v13958_v12 = vrot.slane %v17656_v29, 9  ;;  %v13971_v44 = vcombine.low %v4319_v53, %v4322_v43  ;;  %v13959_v29 = vrot.slane %v17675_v59, 9 }
 0x196   : > { %20719 = vst [vmem:[#allocation40_spill] sm:$0xff] %v17652_v16  ;;  %v17660_v24 = vadd.f32 %v2712_v14, %v2242_v8  ;;  %v2245_v18 = vadd.f32 %v15123_v6, %v17509_v36  ;;  %v4339_v14 = vrot.slane %v17658_v15, 5  ;;  %v16190_v36 = vld [vmem:[#allocation8 + $0x1c8] sm:$0xff]   ;;  %v4329_v15 = vsel %vm16978_vm13, %v4327_v11, %v4328_v28  ;;  %15402 = vmatprep.subr.bf16.mxu1 %v16186_v22  ;;  %v4208_v11 = vld [vmem:[#allocation2 + $0xa0] sm:$0xf] }
 0x197   : > { %15365 = vmatmul.mubr.bf16.gmra.mxu0 %v16169_v55  ;;  %v16173_v8 = vld [vmem:[#allocation2 + $0x54] sm:$0xff]   ;;  %v4342_v6 = vrot.slane %v4203_v1, 5  ;;  %v4346_v55 = vrot.slane %v17677_v57, 5  ;;  %v13972_v46 = vcombine.low %v4326_v30, %v4329_v15  ;;  %v4207_v28 = vld [vmem:[#allocation2 + $0x9c] sm:$0xe]  ;;  %v4349_v5 = vrot.slane %v17683_v2, 5 }
 0x198   : > { %20720 = vst [vmem:[#allocation41_spill] sm:$0xff] %v17660_v24  ;;  %v17670_v27 = vadd.f32 %v15171_v60, %v2245_v18  ;;  %15368 = vmatprep.mubr.bf16.mxu0 %v16172_v38  ;;  %15445 = vmatpush3.bf16.msra.mxu0 %v16175_v47  ;;  %v4341_v25 = vrot.slane %v4339_v14, 4  ;;  %v16194_v18 = vld [vmem:[#allocation8 + $0x1c0] sm:$0xff]   ;;  %v4209_v60 = vld [vmem:[#allocation2 + $0xa4] sm:$0x1]  ;;  %v4353_v47 = vrot.slane %v4208_v11, 5  ;;  %v4336_v15 = vsel %vm16978_vm13, %v4334_v31, %v4335_v58 }
 0x199   : > { %15446 = vmatprep.subr.bf16.mxu0 %v16179_v39  ;;  %15403 = vmatpush3.bf16.msra.mxu1 %v16186_v22  ;;  %v16187_v38 = vld [vmem:[#allocation8 + $0x210] sm:$0xff]   ;;  %v4210_v53 = vld [vmem:[#allocation2 + $0xa8] sm:$0xe]  ;;  %v4211_v43 = vld [vmem:[#allocation2 + $0xac] sm:$0xf]  ;;  %v4348_v59 = vrot.slane %v4346_v55, 4 }
 0x19a   : > { %20721 = vst [vmem:[#allocation42_spill] sm:$0xff] %v17670_v27  ;;  %15404 = vmatprep.subr.bf16.mxu1 %v16190_v36  ;;  %v4212_v1 = vld [vmem:[#allocation2 + $0xb0] sm:$0x1]  ;;  %v13960_v57 = vrot.slane %v4207_v28, 9  ;;  %v4356_v26 = vrot.slane %v4209_v60, 5  ;;  %v4360_v32 = vrot.slane %v4211_v43, 5  ;;  %v4343_v28 = vsel %vm16978_vm13, %v4341_v25, %v4342_v6  ;;  %v17700_v43 = vpop.f32.mrf.mxu1 }
 0x19b   : > { %15325 = vmatmul.mubr.bf16.gmra.mxu1 %v13971_v44  ;;  %v20722_v22 = vrot.slane %v17642_v0, 5  ;;  %v4355_v2 = vrot.slane %v4353_v47, 4  ;;  %v4340_v44 = vsel %vm16978_vm13, %v13958_v12, %v4339_v14  ;;  %v17698_v0 = vpop.f32.mrf.mxu0  ;;  %v4214_v60 = vld [vmem:[#allocation2 + $0xb8] sm:$0xf]  ;;  %v16177_v58 = vld [vmem:[#allocation2 + $0x6c] sm:$0xff]   ;;  %20724 = vst [vmem:[#allocation44_spill] sm:$0xff] %v17700_v43  ;;  %v17704_v25 = vsel %vm16978_vm13, %v13959_v29, %v4346_v55 }
 0x19c   : > { %15447 = vmatpush3.bf16.msra.mxu0 %v16179_v39  ;;  %15328 = vmatprep.mubr.bf16.mxu1 %v13972_v46  ;;  %v13961_v39 = vrot.slane %v4210_v53, 9  ;;  %v4362_v11 = vrot.slane %v4360_v32, 4  ;;  %v4363_v46 = vrot.slane %v4212_v1, 5  ;;  %20723 = vst [vmem:[#allocation43_spill] sm:$0xff] %v17698_v0  ;;  %v4367_v53 = vrot.slane %v4214_v60, 5  ;;  %v16180_v14 = vld [vmem:[#allocation2 + $0x78] sm:$0xff]  }
 0x19d   : > { %15448 = vmatprep.subr.bf16.mxu0 %v16183_v3  ;;  %v4333_v30 = vsel %vm16978_vm13, %v13957_v9, %v20722_v22  ;;  %15405 = vmatpush3.bf16.msra.mxu1 %v16190_v36  ;;  %v4213_v9 = vld [vmem:[#allocation2 + $0xb4] sm:$0xe]  ;;  %v16191_v36 = vld [vmem:[#allocation8 + $0x208] sm:$0xff]   ;;  %v13974_v12 = vcombine.low %v4340_v44, %v4343_v28  ;;  %v4216_v6 = vld [vmem:[#allocation2 + $0xc0] sm:$0xe]  ;;  %v17716_v1 = vsel %vm16978_vm13, %v4355_v2, %v4356_v26 }
 0x19e   : > { %15406 = vmatprep.subr.bf16.mxu1 %v16194_v18  ;;  %v13973_v31 = vcombine.low %v4333_v30, %v4336_v15  ;;  %v13962_v22 = vrot.slane %v4213_v9, 9  ;;  %v4217_v30 = vld [vmem:[#allocation2 + $0xc4] sm:$0xf]  ;;  %v17718_v15 = vld [vmem:[#allocation2 + $0xc8] sm:$0x1]  ;;  %v16195_v29 = vld [vmem:[#allocation8 + $0x200] sm:$0xff]  }
 0x19f   : > { %15369 = vmatmul.mubr.bf16.gmra.mxu0 %v16173_v8  ;;  %v4215_v8 = vld [vmem:[#allocation2 + $0xbc] sm:$0x1]  ;;  %v13963_v26 = vrot.slane %v4216_v6, 9  ;;  %v5219_v0 = vld [vmem:[#allocation2 + $0x24] sm:$0xf] }
 0x1a0   : > { %15372 = vmatprep.mubr.bf16.mxu0 %v16176_v63  ;;  %15449 = vmatpush3.bf16.msra.mxu0 %v16183_v3  ;;  %v17708_v3 = vsel %vm16978_vm13, %v4348_v59, %v4349_v5  ;;  %v17712_v63 = vsel %vm16978_vm13, %v13960_v57, %v4353_v47  ;;  %v17726_v5 = vsel %vm16978_vm13, %v4362_v11, %v4363_v46  ;;  %v4369_v47 = vrot.slane %v4367_v53, 4  ;;  %v361_v57 = vld [vmem:[#allocation2 + $0xcc] sm:$0x1]  ;;  %v5220_v27 = vld [vmem:[#allocation2 + $0x28] sm:$0xf] }
 0x1a1   : > { %15450 = vmatprep.subr.bf16.mxu0 %v16187_v38  ;;  %15407 = vmatpush3.bf16.msra.mxu1 %v16194_v18  ;;  %v17722_v18 = vsel %vm16978_vm13, %v13961_v39, %v4360_v32  ;;  %v4370_v59 = vrot.slane %v4215_v8, 5  ;;  %v362_v2 = vsel %vm16769_vm3, 0, %v361_v57  ;;  %v4377_v32 = vrot.slane %v17718_v15, 5  ;;  %v5217_v8 = vld [vmem:[#allocation2 + $0x1c] sm:$0xf] }
 0x1a2   : > { %363 = vst [vmem:[#allocation2 + $0xcc] sm:$0x1] %v362_v2  ;;  %v13975_v11 = vcombine.low %v17704_v25, %v17708_v3  ;;  %v13976_v46 = vcombine.low %v17712_v63, %v17716_v1  ;;  %v17742_v60 = vsel %vm16978_vm13, %v13962_v22, %v4367_v53  ;;  %v5274_v63 = vshll.u32 %v5217_v8, 16  ;;  %v6034_v1 = vld [vmem:[#allocation2 + $0x18] sm:$0xe] }
 0x1a3   : > { %15329 = vmatmul.mubr.bf16.gmra.mxu1 %v13973_v31  ;;  %v5216_v31 = vld [vmem:[#allocation2 + $0x18] sm:$0xf]  ;;  %v5278_v22 = vshrl.u32 %v5217_v8, 16  ;;  %v6035_v57 = vld [vmem:[#allocation2 + $0x1c] sm:$0xf]  ;;  %v14036_v50 = vrot.slane %v6034_v1, 9 }
 0x1a4   : > { %15451 = vmatpush3.bf16.msra.mxu0 %v16187_v38  ;;  %15332 = vmatprep.mubr.bf16.mxu1 %v13974_v12  ;;  %v4374_v38 = vrot.slane %v4217_v30, 5  ;;  %v5218_v12 = vld [vmem:[#allocation2 + $0x20] sm:$0x1]  ;;  %v5265_v25 = vshrl.u32 %v5216_v31, 16  ;;  %v5268_v3 = vshll.u32 %v5216_v31, 16  ;;  %v16181_v30 = vld [vmem:[#allocation2 + $0x84] sm:$0xff]  }
 0x1a5   : > { %15452 = vmatprep.subr.bf16.mxu0 %v16191_v36  ;;  %v5284_v15 = vshll.u32 %v5218_v12, 16  ;;  %v6036_v2 = vld [vmem:[#allocation2 + $0x20] sm:$0x1]  ;;  %v5276_v9 = vrot.slane %v5274_v63, 5  ;;  %v5280_v43 = vrot.slane %v5278_v22, 4  ;;  %v16184_v12 = vld [vmem:[#allocation2 + $0x90] sm:$0xff]  }
 0x1a6   : > { %v17754_v53 = vsel %vm16978_vm13, %v13963_v26, %v4374_v38  ;;  %v5270_v31 = vrot.slane %v5268_v3, 5  ;;  %v6132_v26 = vrot.slane %v6035_v57, 5  ;;  %v6135_v4 = vrot.slane %v6036_v2, 5 }
 0x1a7   : > { %v15174_v55 = vpop.f32.mrf.mxu0  ;;  %15373 = vmatmul.mubr.bf16.gmra.mxu0 %v16177_v58  ;;  %v17750_v58 = vsel %vm16978_vm13, %v4369_v47, %v4370_v59  ;;  %v4376_v59 = vrot.slane %v4374_v38, 4  ;;  %v5292_v24 = vshll.u32 %v5219_v0, 16  ;;  %v5298_v16 = vshll.u32 %v5220_v27, 16 }
 0x1a8   : > { %v15126_v44 = vpop.f32.mrf.mxu1  ;;  %15376 = vmatprep.mubr.bf16.mxu0 %v16180_v14  ;;  %15453 = vmatpush3.bf16.msra.mxu0 %v16191_v36  ;;  %v5281_v38 = vor.u32 %v5280_v43, %v5276_v9  ;;  %v6134_v3 = vrot.slane %v6132_v26, 4  ;;  %v5302_v63 = vshrl.u32 %v5220_v27, 16  ;;  %v13978_v27 = vcombine.low %v17742_v60, %v17750_v58  ;;  %v6039_v58 = vld [vmem:[#allocation2 + $0x2c] sm:$0x1] }
 0x1a9   : > { %v17730_v28 = vpop.f32.mrf.mxu0  ;;  %v2248_v39 = vadd.f32 %v15126_v44, %v17523_v51  ;;  %15454 = vmatprep.subr.bf16.mxu0 %v16195_v29  ;;  %v5267_v44 = vrot.slane %v5265_v25, 4  ;;  %v5286_v25 = vrot.slane %v5284_v15, 5  ;;  %v5294_v57 = vrot.slane %v5292_v24, 5  ;;  %v6038_v15 = vld [vmem:[#allocation2 + $0x28] sm:$0xf] }
 0x1aa   : > { %v17744_v6 = vpop.f32.mrf.mxu1  ;;  %v17766_v2 = vrot.slane %v5298_v16, 5  ;;  %v17778_v16 = vsel %vm16978_vm13, %v14036_v50, %v6132_v26  ;;  %v17782_v24 = vsel %vm16978_vm13, %v6134_v3, %v6135_v4  ;;  %v5223_v50 = vld [vmem:[#allocation2 + $0x34] sm:$0xf]  ;;  %v16185_v3 = vld [vmem:[#allocation2 + $0x9c] sm:$0xff]   ;;  %v6142_v10 = vrot.slane %v6039_v58, 5 }
 0x1ab   : > { %v17746_v51 = vpop.f32.mrf.mxu0  ;;  %v17756_v14 = vadd.f32 %v15174_v55, %v2248_v39  ;;  %v5271_v55 = vor.u32 %v5270_v31, %v5267_v44  ;;  %v5221_v39 = vld [vmem:[#allocation2 + $0x2c] sm:$0x1]  ;;  %15333 = vmatmul.mubr.bf16.gmra.mxu1 %v13975_v11  ;;  %v5304_v11 = vrot.slane %v5302_v63, 4  ;;  %v6139_v31 = vrot.slane %v6038_v15, 5  ;;  %v6041_v26 = vld [vmem:[#allocation2 + $0x34] sm:$0xf] }
 0x1ac   : > { %v17758_v36 = vpop.f32.mrf.mxu1  ;;  %15455 = vmatpush3.bf16.msra.mxu0 %v16195_v29  ;;  %15336 = vmatprep.mubr.bf16.mxu1 %v13976_v46  ;;  %v17770_v29 = vsel %vm16978_vm13, %v4376_v59, %v4377_v32  ;;  %v5308_v43 = vshll.u32 %v5221_v39, 16  ;;  %v5222_v46 = vld [vmem:[#allocation2 + $0x30] sm:$0xf]  ;;  %v5322_v15 = vshll.u32 %v5223_v50, 16  ;;  %v5326_v35 = vshrl.u32 %v5223_v50, 16 }
 0x1ad   : > { %20725 = vst [vmem:[#allocation45_spill] sm:$0xff] %v17756_v14  ;;  %v17760_v47 = vpop.f32.mrf.mxu0  ;;  %v5289_v14 = vshrl.u32 %v5219_v0, 16  ;;  %v5272_v1 = vrot.slane %v5271_v55, 4  ;;  %v5282_v0 = vrot.slane %v5281_v38, 4  ;;  %v5305_v60 = vor.u32 %v5304_v11, %v17766_v2  ;;  %v5224_v55 = vld [vmem:[#allocation2 + $0x38] sm:$0x1] }
 0x1ae   : > { %20726 = vst [vmem:[#allocation46_spill] sm:$0xff] %v17760_v47  ;;  %v17762_v8 = vpop.f32.mrf.mxu1  ;;  %v5313_v39 = vshrl.u32 %v5222_v46, 16  ;;  %v6141_v34 = vrot.slane %v6139_v31, 4  ;;  %v6042_v50 = vld [vmem:[#allocation2 + $0x38] sm:$0x1] }
 0x1af   : > { %20727 = vst [vmem:[#allocation47_spill] sm:$0xff] %v17762_v8  ;;  %v5291_v22 = vrot.slane %v5289_v14, 4  ;;  %v6037_v8 = vld [vmem:[#allocation2 + $0x24] sm:$0xe]  ;;  %15377 = vmatmul.mubr.bf16.gmra.mxu0 %v16181_v30  ;;  %v5277_v14 = vsel %vm16984_vm14, %v5272_v1, %v5276_v9  ;;  %v5287_v59 = vsel %vm16984_vm14, %v5282_v0, %v5286_v25  ;;  %v5306_v63 = vrot.slane %v5305_v60, 4 }
 0x1b0   : > { %15380 = vmatprep.mubr.bf16.mxu0 %v16184_v12  ;;  %v14037_v12 = vrot.slane %v6037_v8, 9  ;;  %v5310_v25 = vrot.slane %v5308_v43, 5  ;;  %v5316_v1 = vshll.u32 %v5222_v46, 16  ;;  %v14012_v0 = vcombine.low %v5277_v14, %v5287_v59  ;;  %v5225_v60 = vld [vmem:[#allocation2 + $0x3c] sm:$0xf] }
 0x1b1   : > { %v5295_v32 = vor.u32 %v5294_v57, %v5291_v22  ;;  %v6040_v22 = vld [vmem:[#allocation2 + $0x30] sm:$0xe]  ;;  %v16188_v57 = vld [vmem:[#allocation2 + $0xa8] sm:$0xff]   ;;  %v5315_v11 = vrot.slane %v5313_v39, 4  ;;  %v20728_v8 = vcombine.low %v17722_v18, %v17726_v5  ;;  %v5332_v9 = vshll.u32 %v5224_v55, 16 }
 0x1b2   : > { %v17764_v47 = vpop.f32.mrf.mxu0  ;;  %v5318_v54 = vrot.slane %v5316_v1, 5  ;;  %v17807_v46 = vsel %vm16978_vm13, %v14037_v12, %v6139_v31  ;;  %v17809_v14 = vrot.slane %v5322_v15, 5  ;;  %v5328_v59 = vrot.slane %v5326_v35, 4  ;;  %v5226_v18 = vld [vmem:[#allocation2 + $0x40] sm:$0xf] }
 0x1b3   : > { %v17772_v44 = vpop.f32.mrf.mxu1  ;;  %v5296_v4 = vrot.slane %v5295_v32, 4  ;;  %15337 = vmatmul.mubr.bf16.gmra.mxu1 %v20728_v8  ;;  %v5311_v58 = vsel %vm16984_vm14, %v5306_v63, %v5310_v25  ;;  %v5334_v55 = vrot.slane %v5332_v9, 5  ;;  %v6146_v39 = vrot.slane %v6041_v26, 5  ;;  %v5227_v31 = vld [vmem:[#allocation2 + $0x44] sm:$0x1]  ;;  %v16189_v26 = vld [vmem:[#allocation2 + $0xb4] sm:$0xff]  }
 0x1b4   : > { %v17784_v30 = vpop.f32.mrf.mxu0  ;;  %15340 = vmatprep.mubr.bf16.mxu1 %v13978_v27  ;;  %v5319_v27 = vor.u32 %v5318_v54, %v5315_v11  ;;  %v5337_v12 = vshrl.u32 %v5225_v60, 16  ;;  %v5340_v1 = vshll.u32 %v5225_v60, 16  ;;  %v6149_v52 = vrot.slane %v6042_v50, 5  ;;  %v6044_v54 = vld [vmem:[#allocation2 + $0x40] sm:$0xf] }
 0x1b5   : > { %v17793_v38 = vpop.f32.mrf.mxu1  ;;  %v5301_v43 = vsel %vm16984_vm14, %v5296_v4, %v17766_v2  ;;  %v5329_v2 = vor.u32 %v5328_v59, %v17809_v14  ;;  %v14038_v4 = vrot.slane %v6040_v22, 9  ;;  %v6148_v8 = vrot.slane %v6146_v39, 4  ;;  %v6043_v60 = vld [vmem:[#allocation2 + $0x3c] sm:$0xe]  ;;  %v16192_v59 = vld [vmem:[#allocation2 + $0xc0] sm:$0xff]  }
 0x1b6   : > { %v17797_v32 = vpop.f32.mrf.mxu0  ;;  %v5320_v35 = vrot.slane %v5319_v27, 4  ;;  %v5346_v61 = vshll.u32 %v5226_v18, 16  ;;  %v5339_v33 = vrot.slane %v5337_v12, 4  ;;  %v5342_v45 = vrot.slane %v5340_v1, 5  ;;  %v6045_v12 = vld [vmem:[#allocation2 + $0x44] sm:$0x1] }
 0x1b7   : > { %v17811_v5 = vpop.f32.mrf.mxu1  ;;  %15381 = vmatmul.mubr.bf16.gmra.mxu0 %v16185_v3  ;;  %v5330_v3 = vrot.slane %v5329_v2, 4  ;;  %v5350_v63 = vshrl.u32 %v5226_v18, 16  ;;  %v14013_v25 = vcombine.low %v5301_v43, %v5311_v58  ;;  %v17822_v22 = vsel %vm16978_vm13, %v6141_v34, %v6142_v10 }
 0x1b8   : > { %15384 = vmatprep.mubr.bf16.mxu0 %v16188_v57  ;;  %v17816_v15 = vpop.f32.mrf.mxu0  ;;  %v5348_v57 = vrot.slane %v5346_v61, 5  ;;  %v5356_v11 = vshll.u32 %v5227_v31, 16  ;;  %v5325_v50 = vsel %vm16984_vm14, %v5320_v35, %v17809_v14  ;;  %v17829_v18 = vsel %vm16978_vm13, %v14038_v4, %v6146_v39  ;;  %v5228_v39 = vld [vmem:[#allocation2 + $0x48] sm:$0xf]  ;;  %v5229_v35 = vld [vmem:[#allocation2 + $0x4c] sm:$0xf] }
 0x1b9   : > { %20729 = vst [vmem:[#allocation48_spill] sm:$0xff] %v17816_v15  ;;  %v17818_v9 = vpop.f32.mrf.mxu1  ;;  %v5343_v27 = vor.u32 %v5342_v45, %v5339_v33  ;;  %v5352_v2 = vrot.slane %v5350_v63, 4  ;;  %v20731_v10 = vcombine.low %v17754_v53, %v17770_v29  ;;  %v5335_v61 = vsel %vm16984_vm14, %v5330_v3, %v5334_v55 }
 0x1ba   : > { %20730 = vst [vmem:[#allocation49_spill] sm:$0xff] %v17818_v9  ;;  %v17840_v34 = vsel %vm16978_vm13, %v6148_v8, %v6149_v52  ;;  %v5358_v14 = vrot.slane %v5356_v11, 5  ;;  %v6153_v58 = vrot.slane %v6044_v54, 5  ;;  %v14039_v4 = vrot.slane %v6043_v60, 9  ;;  %v6047_v60 = vld [vmem:[#allocation2 + $0x4c] sm:$0xf] }
 0x1bb   : > { %15341 = vmatmul.mubr.bf16.gmra.mxu1 %v20731_v10  ;;  %v5344_v45 = vrot.slane %v5343_v27, 4  ;;  %v5353_v33 = vor.u32 %v5352_v2, %v5348_v57  ;;  %v2246_v31 = vadd.f32 %v17744_v6, %v17529_v48  ;;  %v6156_v55 = vrot.slane %v6045_v12, 5  ;;  %v5230_v6 = vld [vmem:[#allocation2 + $0x50] sm:$0x1] }
 0x1bc   : > { %15408 = vmatprep.mubr.bf16.mxu1 %v14012_v0  ;;  %v6155_v29 = vrot.slane %v6153_v58, 4  ;;  %v2249_v52 = vadd.f32 %v17758_v36, %v17539_v23  ;;  %v5361_v63 = vshrl.u32 %v5228_v39, 16  ;;  %v14014_v54 = vcombine.low %v5325_v50, %v5335_v61  ;;  %v6046_v36 = vld [vmem:[#allocation2 + $0x48] sm:$0xe]  ;;  %v6048_v12 = vld [vmem:[#allocation2 + $0x50] sm:$0x1] }
 0x1bd   : > { %v5354_v3 = vrot.slane %v5353_v33, 4  ;;  %v17855_v48 = vadd.f32 %v17730_v28, %v2246_v31  ;;  %v5364_v23 = vshll.u32 %v5228_v39, 16  ;;  %v17868_v28 = vsel %vm16978_vm13, %v14039_v4, %v6153_v58  ;;  %v16193_v10 = vld [vmem:[#allocation2 + $0xcc] sm:$0xff]   ;;  %v5232_v58 = vld [vmem:[#allocation2 + $0x58] sm:$0xf] }
 0x1be   : > { %v17860_v11 = vadd.f32 %v17746_v51, %v2249_v52  ;;  %v5363_v2 = vrot.slane %v5361_v63, 4  ;;  %v5370_v50 = vshll.u32 %v5229_v35, 16  ;;  %v17872_v51 = vsel %vm16978_vm13, %v6155_v29, %v6156_v55 }
 0x1bf   : > { %15385 = vmatmul.mubr.bf16.gmra.mxu0 %v16189_v26  ;;  %v5349_v26 = vsel %vm16984_vm14, %v5344_v45, %v5348_v57  ;;  %v5359_v27 = vsel %vm16984_vm14, %v5354_v3, %v5358_v14  ;;  %v5366_v57 = vrot.slane %v5364_v23, 5  ;;  %v5374_v61 = vshrl.u32 %v5229_v35, 16  ;;  %v5231_v45 = vld [vmem:[#allocation2 + $0x54] sm:$0xf] }
 0x1c0   : > { %15388 = vmatprep.mubr.bf16.mxu0 %v16192_v59  ;;  %v5380_v39 = vshll.u32 %v5230_v6, 16  ;;  %v14015_v31 = vcombine.low %v5349_v26, %v5359_v27  ;;  %v5372_v14 = vrot.slane %v5370_v50, 5  ;;  %v14040_v52 = vrot.slane %v6046_v36, 9  ;;  %v5233_v6 = vld [vmem:[#allocation2 + $0x5c] sm:$0x1] }
 0x1c1   : > { %v17831_v43 = vpop.f32.mrf.mxu0  ;;  %v6160_v3 = vrot.slane %v6047_v60, 5  ;;  %v5367_v4 = vor.u32 %v5366_v57, %v5363_v2  ;;  %v5376_v63 = vrot.slane %v5374_v61, 4  ;;  %v6163_v0 = vrot.slane %v6048_v12, 5  ;;  %v6049_v27 = vld [vmem:[#allocation2 + $0x54] sm:$0xe] }
 0x1c2   : > { %v17844_v1 = vpop.f32.mrf.mxu1  ;;  %v2252_v53 = vadd.f32 %v17772_v44, %v17559_v40  ;;  %v5382_v55 = vrot.slane %v5380_v39, 5  ;;  %v5385_v23 = vshrl.u32 %v5231_v45, 16  ;;  %v5388_v15 = vshll.u32 %v5231_v45, 16  ;;  %v6050_v2 = vld [vmem:[#allocation2 + $0x58] sm:$0xf] }
 0x1c3   : > { %v17850_v8 = vpop.f32.mrf.mxu0  ;;  %15409 = vmatmul.mubr.bf16.vlgmr.msra.gmra.mxu1 %v14013_v25  ;;  %v6162_v35 = vrot.slane %v6160_v3, 4  ;;  %v5368_v26 = vrot.slane %v5367_v4, 4  ;;  %v5377_v36 = vor.u32 %v5376_v63, %v5372_v14  ;;  %v5394_v25 = vshll.u32 %v5232_v58, 16  ;;  %v6051_v57 = vld [vmem:[#allocation2 + $0x5c] sm:$0x1] }
 0x1c4   : > { %v17862_v59 = vpop.f32.mrf.mxu1  ;;  %15412 = vmatprep.mubr.bf16.mxu1 %v14014_v54  ;;  %v17881_v60 = vadd.f32 %v17764_v47, %v2252_v53  ;;  %v20733_v40 = vcombine.low %v17778_v16, %v17782_v24  ;;  %v17890_v44 = vsel %vm16978_vm13, %v14040_v52, %v6160_v3  ;;  %v5387_v54 = vrot.slane %v5385_v23, 4  ;;  %v5234_v63 = vld [vmem:[#allocation2 + $0x60] sm:$0xf] }
 0x1c5   : > { %v17874_v33 = vpop.f32.mrf.mxu0  ;;  %v5390_v12 = vrot.slane %v5388_v15, 5  ;;  %v5373_v47 = vsel %vm16984_vm14, %v5368_v26, %v5372_v14  ;;  %v5378_v53 = vrot.slane %v5377_v36, 4  ;;  %v17896_v61 = vsel %vm16978_vm13, %v6162_v35, %v6163_v0 }
 0x1c6   : > { %v17878_v29 = vpop.f32.mrf.mxu1  ;;  %v5396_v39 = vrot.slane %v5394_v25, 5  ;;  %v5404_v4 = vshll.u32 %v5233_v6, 16  ;;  %v14041_v52 = vrot.slane %v6049_v27, 9  ;;  %v6167_v3 = vrot.slane %v6050_v2, 5  ;;  %v5235_v25 = vld [vmem:[#allocation2 + $0x64] sm:$0xf] }
 0x1c7   : > { %15389 = vmatmul.mubr.bf16.gmra.mxu0 %v16193_v10  ;;  %v17883_v50 = vpop.f32.mrf.mxu0  ;;  %v5398_v10 = vshrl.u32 %v5232_v58, 16  ;;  %v5391_v16 = vor.u32 %v5390_v12, %v5387_v54  ;;  %v5383_v15 = vsel %vm16984_vm14, %v5378_v53, %v5382_v55  ;;  %v6170_v58 = vrot.slane %v6051_v57, 5 }
 0x1c8   : > { %20732 = vst [vmem:[#allocation50_spill] sm:$0xff] %v17883_v50  ;;  %15456 = vmatprep.mubr.bf16.mxu0 %v20733_v40  ;;  %v17898_v45 = vpop.f32.mrf.mxu1  ;;  %v2250_v14 = vadd.f32 %v17793_v38, %v17567_v21  ;;  %v14016_v0 = vcombine.low %v5373_v47, %v5383_v15  ;;  %v5406_v36 = vrot.slane %v5404_v4, 5  ;;  %v6169_v40 = vrot.slane %v6167_v3, 4  ;;  %v6054_v47 = vld [vmem:[#allocation2 + $0x68] sm:$0x1] }
 0x1c9   : > { %20734 = vst [vmem:[#allocation51_spill] sm:$0xff] %v17898_v45  ;;  %v5400_v24 = vrot.slane %v5398_v10, 4  ;;  %v5392_v35 = vrot.slane %v5391_v16, 4  ;;  %v2253_v55 = vadd.f32 %v17811_v5, %v17577_v49  ;;  %v14055_v21 = vcombine.low %v17868_v28, %v17872_v51  ;;  %v6052_v10 = vld [vmem:[#allocation2 + $0x60] sm:$0xe] }
 0x1ca   : > { %v17907_v6 = vadd.f32 %v17784_v30, %v2250_v14  ;;  %v5409_v12 = vshrl.u32 %v5234_v63, 16  ;;  %v20735_v30 = vcombine.low %v17807_v46, %v17822_v22  ;;  %v14056_v49 = vcombine.low %v17890_v44, %v17896_v61  ;;  %v6053_v51 = vld [vmem:[#allocation2 + $0x64] sm:$0xf]  ;;  %v5237_v61 = vld [vmem:[#allocation2 + $0x6c] sm:$0xf] }
 0x1cb   : > { %v5401_v26 = vor.u32 %v5400_v24, %v5396_v39  ;;  %15413 = vmatmul.mubr.bf16.gmra.mxu1 %v14015_v31  ;;  %v5397_v38 = vsel %vm16984_vm14, %v5392_v35, %v5396_v39  ;;  %v5236_v31 = vld [vmem:[#allocation2 + $0x68] sm:$0x1]  ;;  %v17925_v5 = vadd.f32 %v17797_v32, %v2253_v55  ;;  %v5412_v57 = vshll.u32 %v5234_v63, 16 }
 0x1cc   : > { %15416 = vmatprep.mubr.bf16.mxu1 %v14016_v0  ;;  %v5418_v28 = vshll.u32 %v5235_v25, 16  ;;  %v20736_v16 = vcombine.low %v17829_v18, %v17840_v34  ;;  %v17938_v22 = vsel %vm16978_vm13, %v14041_v52, %v6167_v3  ;;  %v17942_v32 = vsel %vm16978_vm13, %v6169_v40, %v6170_v58 }
 0x1cd   : > { %v5402_v54 = vrot.slane %v5401_v26, 4  ;;  %v5411_v44 = vrot.slane %v5409_v12, 4  ;;  %v5414_v4 = vrot.slane %v5412_v57, 5  ;;  %v5422_v14 = vshrl.u32 %v5235_v25, 16 }
 0x1ce   : > { %v5420_v15 = vrot.slane %v5418_v28, 5  ;;  %v5428_v18 = vshll.u32 %v5236_v31, 16  ;;  %v14042_v34 = vrot.slane %v6052_v10, 9  ;;  %v6174_v0 = vrot.slane %v6053_v51, 5  ;;  %v6055_v51 = vld [vmem:[#allocation2 + $0x6c] sm:$0xe] }
 0x1cf   : > { %v17904_v23 = vpop.f32.mrf.mxu0  ;;  %15457 = vmatmul.mubr.bf16.vlgmr.msra.gmra.mxu0 %v20735_v30  ;;  %v5407_v46 = vsel %vm16984_vm14, %v5402_v54, %v5406_v36  ;;  %v6177_v35 = vrot.slane %v6054_v47, 5  ;;  %v5415_v52 = vor.u32 %v5414_v4, %v5411_v44  ;;  %v5424_v3 = vrot.slane %v5422_v14, 4  ;;  %v5238_v36 = vld [vmem:[#allocation2 + $0x70] sm:$0xf]  ;;  %v5239_v54 = vld [vmem:[#allocation2 + $0x74] sm:$0x1] }
 0x1d0   : > { %v17911_v27 = vpop.f32.mrf.mxu1  ;;  %15460 = vmatprep.mubr.bf16.mxu0 %v20736_v16  ;;  %v14017_v24 = vcombine.low %v5397_v38, %v5407_v46  ;;  %v2256_v58 = vadd.f32 %v17844_v1, %v17593_v7  ;;  %v5433_v40 = vshrl.u32 %v5237_v61, 16  ;;  %v14057_v55 = vcombine.low %v17938_v22, %v17942_v32  ;;  %v6056_v7 = vld [vmem:[#allocation2 + $0x70] sm:$0xf]  ;;  %v6057_v44 = vld [vmem:[#allocation2 + $0x74] sm:$0x1] }
 0x1d1   : > { %v17913_v2 = vpop.f32.mrf.mxu0  ;;  %v5430_v38 = vrot.slane %v5428_v18, 5  ;;  %v6176_v25 = vrot.slane %v6174_v0, 4  ;;  %v5436_v12 = vshll.u32 %v5237_v61, 16  ;;  %v5416_v10 = vrot.slane %v5415_v52, 4 }
 0x1d2   : > { %v17927_v53 = vpop.f32.mrf.mxu1  ;;  %v5425_v30 = vor.u32 %v5424_v3, %v5420_v15  ;;  %v17955_v57 = vadd.f32 %v17831_v43, %v2256_v58  ;;  %v5435_v28 = vrot.slane %v5433_v40, 4  ;;  %v6175_v1 = vsel %vm16978_vm13, %v14042_v34, %v6174_v0 }
 0x1d3   : > { %v17929_v39 = vpop.f32.mrf.mxu0  ;;  %15417 = vmatmul.mubr.bf16.gmra.mxu1 %v14017_v24  ;;  %v5438_v47 = vrot.slane %v5436_v12, 5  ;;  %v5442_v16 = vshll.u32 %v5238_v36, 16  ;;  %v5446_v46 = vshrl.u32 %v5238_v36, 16  ;;  %v5421_v61 = vsel %vm16984_vm14, %v5416_v10, %v5420_v15  ;;  %v5240_v12 = vld [vmem:[#allocation2 + $0x78] sm:$0xf] }
 0x1d4   : > { %v17944_v63 = vpop.f32.mrf.mxu1  ;;  %v5426_v24 = vrot.slane %v5425_v30, 4  ;;  %v6178_v43 = vsel %vm16978_vm13, %v6176_v25, %v6177_v35  ;;  %v5452_v14 = vshll.u32 %v5239_v54, 16  ;;  %v14043_v34 = vrot.slane %v6055_v51, 9 }
 0x1d5   : > { %v17946_v26 = vpop.f32.mrf.mxu0  ;;  %v5439_v18 = vor.u32 %v5438_v47, %v5435_v28  ;;  %v5444_v52 = vrot.slane %v5442_v16, 5  ;;  %v5448_v3 = vrot.slane %v5446_v46, 4  ;;  %v6181_v40 = vrot.slane %v6056_v7, 5  ;;  %v5241_v47 = vld [vmem:[#allocation2 + $0x7c] sm:$0xf] }
 0x1d6   : > { %20737 = vst [vmem:[#allocation52_spill] sm:$0xff] %v17946_v26  ;;  %v17952_v31 = vpop.f32.mrf.mxu1  ;;  %v5454_v36 = vrot.slane %v5452_v14, 5  ;;  %v6184_v15 = vrot.slane %v6057_v44, 5  ;;  %v14058_v28 = vcombine.low %v6175_v1, %v6178_v43  ;;  %v2257_v7 = vadd.f32 %v17878_v29, %v17603_v13  ;;  %v6058_v1 = vld [vmem:[#allocation2 + $0x78] sm:$0xe] }
 0x1d7   : > { %20738 = vst [vmem:[#allocation53_spill] sm:$0xff] %v17952_v31  ;;  %15461 = vmatmul.mubr.bf16.gmra.mxu0 %v14055_v21  ;;  %v5431_v21 = vsel %vm16984_vm14, %v5426_v24, %v5430_v38  ;;  %v5440_v30 = vrot.slane %v5439_v18, 4  ;;  %v5449_v35 = vor.u32 %v5448_v3, %v5444_v52  ;;  %v17979_v51 = vsel %vm16978_vm13, %v14043_v34, %v6181_v40  ;;  %v6059_v29 = vld [vmem:[#allocation2 + $0x7c] sm:$0xf]  ;;  %v6060_v14 = vld [vmem:[#allocation2 + $0x80] sm:$0x1] }
 0x1d8   : > { %15464 = vmatprep.mubr.bf16.mxu0 %v14056_v49  ;;  %v14018_v10 = vcombine.low %v5421_v61, %v5431_v21  ;;  %v2254_v49 = vadd.f32 %v17862_v59, %v17597_v37  ;;  %v6183_v38 = vrot.slane %v6181_v40, 4  ;;  %v5242_v59 = vld [vmem:[#allocation2 + $0x80] sm:$0x1]  ;;  %v5457_v44 = vshrl.u32 %v5240_v12, 16 }
 0x1d9   : > { %v5445_v16 = vsel %vm16984_vm14, %v5440_v30, %v5444_v52  ;;  %v5450_v46 = vrot.slane %v5449_v35, 4  ;;  %v17993_v43 = vadd.f32 %v17874_v33, %v2257_v7  ;;  %v5460_v13 = vshll.u32 %v5240_v12, 16  ;;  %v5243_v12 = vld [vmem:[#allocation2 + $0x84] sm:$0xf] }
 0x1da   : > { %15420 = vmatprep.mubr.bf16.mxu1 %v14018_v10  ;;  %v17986_v37 = vadd.f32 %v17850_v8, %v2254_v49  ;;  %v6185_v24 = vsel %vm16978_vm13, %v6183_v38, %v6184_v15  ;;  %v5459_v52 = vrot.slane %v5457_v44, 4  ;;  %v5466_v3 = vshll.u32 %v5241_v47, 16  ;;  %v5244_v49 = vld [vmem:[#allocation2 + $0x88] sm:$0xf] }
 0x1db   : > { %v17959_v4 = vpop.f32.mrf.mxu0  ;;  %v5455_v18 = vsel %vm16984_vm14, %v5450_v46, %v5454_v36  ;;  %v14059_v8 = vcombine.low %v17979_v51, %v6185_v24  ;;  %v5462_v40 = vrot.slane %v5460_v13, 5  ;;  %v5470_v33 = vshrl.u32 %v5241_v47, 16  ;;  %v5245_v47 = vld [vmem:[#allocation2 + $0x8c] sm:$0x1] }
 0x1dc   : > { %v17965_v0 = vpop.f32.mrf.mxu1  ;;  %v14019_v21 = vcombine.low %v5445_v16, %v5455_v18  ;;  %v5476_v15 = vshll.u32 %v5242_v59, 16  ;;  %v5468_v10 = vrot.slane %v5466_v3, 5  ;;  %v14044_v30 = vrot.slane %v6058_v1, 9  ;;  %v6063_v3 = vld [vmem:[#allocation2 + $0x8c] sm:$0x1] }
 0x1dd   : > { %v17967_v58 = vpop.f32.mrf.mxu0  ;;  %v6188_v35 = vrot.slane %v6059_v29, 5  ;;  %v6191_v36 = vrot.slane %v6060_v14, 5  ;;  %v5463_v38 = vor.u32 %v5462_v40, %v5459_v52  ;;  %v5472_v7 = vrot.slane %v5470_v33, 4  ;;  %v6061_v29 = vld [vmem:[#allocation2 + $0x84] sm:$0xe] }
 0x1de   : > { %v17973_v25 = vpop.f32.mrf.mxu1  ;;  %15421 = vmatmul.mubr.bf16.gmra.mxu1 %v14019_v21  ;;  %v5478_v46 = vrot.slane %v5476_v15, 5  ;;  %v2260_v22 = vadd.f32 %v17911_v27, %v17501_v19  ;;  %v5484_v16 = vshll.u32 %v5243_v12, 16  ;;  %v5490_v13 = vshll.u32 %v5244_v49, 16  ;;  %v6062_v14 = vld [vmem:[#allocation2 + $0x88] sm:$0xf] }
 0x1df   : > { %v17975_v54 = vpop.f32.mrf.mxu0  ;;  %15465 = vmatmul.mubr.bf16.gmra.mxu0 %v14057_v55  ;;  %v6189_v32 = vsel %vm16978_vm13, %v14044_v30, %v6188_v35  ;;  %v6190_v55 = vrot.slane %v6188_v35, 4  ;;  %v5464_v44 = vrot.slane %v5463_v38, 4  ;;  %v5473_v1 = vor.u32 %v5472_v7, %v5468_v10 }
 0x1e0   : > { %v17988_v61 = vpop.f32.mrf.mxu1  ;;  %15468 = vmatprep.mubr.bf16.mxu0 %v14058_v28  ;;  %v5481_v28 = vshrl.u32 %v5243_v12, 16  ;;  %v18012_v24 = vadd.f32 %v17904_v23, %v2260_v22  ;;  %v5486_v18 = vrot.slane %v5484_v16, 5  ;;  %v5494_v52 = vshrl.u32 %v5244_v49, 16  ;;  %v5246_v23 = vld [vmem:[#allocation2 + $0x90] sm:$0xf] }
 0x1e1   : > { %v17998_v34 = vpop.f32.mrf.mxu0  ;;  %v6192_v19 = vsel %vm16978_vm13, %v6190_v55, %v6191_v36  ;;  %v5469_v40 = vsel %vm16984_vm14, %v5464_v44, %v5468_v10  ;;  %v5474_v33 = vrot.slane %v5473_v1, 4  ;;  %v5492_v12 = vrot.slane %v5490_v13, 5  ;;  %v5247_v36 = vld [vmem:[#allocation2 + $0x94] sm:$0xf] }
 0x1e2   : > { %20739 = vst [vmem:[#allocation54_spill] sm:$0xff] %v17998_v34  ;;  %v18003_v51 = vpop.f32.mrf.mxu1  ;;  %v5483_v27 = vrot.slane %v5481_v28, 4  ;;  %v14060_v15 = vcombine.low %v6189_v32, %v6192_v19  ;;  %v5496_v38 = vrot.slane %v5494_v52, 4  ;;  %v5500_v7 = vshll.u32 %v5245_v47, 16  ;;  %v6064_v19 = vld [vmem:[#allocation2 + $0x90] sm:$0xe] }
 0x1e3   : > { %20740 = vst [vmem:[#allocation55_spill] sm:$0xff] %v18003_v51  ;;  %v14045_v22 = vrot.slane %v6061_v29, 9  ;;  %v5479_v49 = vsel %vm16984_vm14, %v5474_v33, %v5478_v46  ;;  %v6195_v55 = vrot.slane %v6062_v14, 5  ;;  %v6198_v28 = vrot.slane %v6063_v3, 5  ;;  %v5248_v14 = vld [vmem:[#allocation2 + $0x98] sm:$0x1] }
 0x1e4   : > { %v5487_v35 = vor.u32 %v5486_v18, %v5483_v27  ;;  %v2258_v10 = vadd.f32 %v17927_v53, %v17511_v41  ;;  %v14020_v32 = vcombine.low %v5469_v40, %v5479_v49  ;;  %v5497_v1 = vor.u32 %v5496_v38, %v5492_v12  ;;  %v6065_v41 = vld [vmem:[#allocation2 + $0x94] sm:$0xf]  ;;  %v6066_v53 = vld [vmem:[#allocation2 + $0x98] sm:$0x1]  ;;  %v5249_v40 = vld [vmem:[#allocation2 + $0x9c] sm:$0xf] }
 0x1e5   : > { %v5502_v13 = vrot.slane %v5500_v7, 5  ;;  %v6196_v47 = vsel %vm16978_vm13, %v14045_v22, %v6195_v55  ;;  %v6197_v29 = vrot.slane %v6195_v55, 4  ;;  %v2261_v46 = vadd.f32 %v17944_v63, %v17519_v20 }
 0x1e6   : > { %v5488_v44 = vrot.slane %v5487_v35, 4  ;;  %15424 = vmatprep.mubr.bf16.mxu1 %v14020_v32  ;;  %v5498_v52 = vrot.slane %v5497_v1, 4  ;;  %v5505_v3 = vshrl.u32 %v5246_v23, 16  ;;  %v5508_v20 = vshll.u32 %v5246_v23, 16  ;;  %v5251_v23 = vld [vmem:[#allocation2 + $0xa4] sm:$0x1] }
 0x1e7   : > { %15469 = vmatmul.mubr.bf16.gmra.mxu0 %v14059_v8  ;;  %v18031_v8 = vadd.f32 %v17913_v2, %v2258_v10  ;;  %v6199_v2 = vsel %vm16978_vm13, %v6197_v29, %v6198_v28  ;;  %v18042_v33 = vadd.f32 %v17929_v39, %v2261_v46  ;;  %v5514_v63 = vshll.u32 %v5247_v36, 16  ;;  %v5250_v10 = vld [vmem:[#allocation2 + $0xa0] sm:$0xf] }
 0x1e8   : > { %v18009_v59 = vpop.f32.mrf.mxu0  ;;  %15472 = vmatprep.mubr.bf16.mxu0 %v14060_v15  ;;  %v5493_v18 = vsel %vm16984_vm14, %v5488_v44, %v5492_v12  ;;  %v5503_v35 = vsel %vm16984_vm14, %v5498_v52, %v5502_v13  ;;  %v14061_v38 = vcombine.low %v6196_v47, %v6199_v2  ;;  %v5507_v7 = vrot.slane %v5505_v3, 4 }
 0x1e9   : > { %v18016_v21 = vpop.f32.mrf.mxu1  ;;  %v14021_v22 = vcombine.low %v5493_v18, %v5503_v35  ;;  %v5510_v12 = vrot.slane %v5508_v20, 5  ;;  %v5516_v49 = vrot.slane %v5514_v63, 5  ;;  %v5518_v55 = vshrl.u32 %v5247_v36, 16  ;;  %v6067_v18 = vld [vmem:[#allocation2 + $0x9c] sm:$0xe] }
 0x1ea   : > { %v18020_v30 = vpop.f32.mrf.mxu0  ;;  %v5524_v28 = vshll.u32 %v5248_v14, 16  ;;  %v14046_v44 = vrot.slane %v6064_v19, 9  ;;  %v6202_v39 = vrot.slane %v6065_v41, 5  ;;  %v6205_v1 = vrot.slane %v6066_v53, 5  ;;  %v6068_v41 = vld [vmem:[#allocation2 + $0xa0] sm:$0xf] }
 0x1eb   : > { %v18026_v16 = vpop.f32.mrf.mxu1  ;;  %15425 = vmatmul.mubr.bf16.gmra.mxu1 %v14021_v22  ;;  %v5511_v29 = vor.u32 %v5510_v12, %v5507_v7  ;;  %v5520_v46 = vrot.slane %v5518_v55, 4  ;;  %v2264_v13 = vadd.f32 %v17965_v0, %v17533_v42  ;;  %v5529_v47 = vshrl.u32 %v5249_v40, 16  ;;  %v6069_v53 = vld [vmem:[#allocation2 + $0xa4] sm:$0x1] }
 0x1ec   : > { %v18035_v27 = vpop.f32.mrf.mxu0  ;;  %v5526_v36 = vrot.slane %v5524_v28, 5  ;;  %v6203_v3 = vsel %vm16978_vm13, %v14046_v44, %v6202_v39  ;;  %v6204_v14 = vrot.slane %v6202_v39, 4  ;;  %v5532_v19 = vshll.u32 %v5249_v40, 16  ;;  %v5252_v44 = vld [vmem:[#allocation2 + $0xa8] sm:$0xf] }
 0x1ed   : > { %v18044_v15 = vpop.f32.mrf.mxu1  ;;  %v5512_v2 = vrot.slane %v5511_v29, 4  ;;  %v5521_v20 = vor.u32 %v5520_v46, %v5516_v49  ;;  %v18057_v63 = vadd.f32 %v17959_v4, %v2264_v13  ;;  %v5531_v35 = vrot.slane %v5529_v47, 4 }
 0x1ee   : > { %v18048_v32 = vpop.f32.mrf.mxu0  ;;  %v6206_v42 = vsel %vm16978_vm13, %v6204_v14, %v6205_v1  ;;  %v5534_v0 = vrot.slane %v5532_v19, 5  ;;  %v5538_v7 = vshll.u32 %v5250_v10, 16  ;;  %v5542_v22 = vshrl.u32 %v5250_v10, 16 }
 0x1ef   : > { %20741 = vst [vmem:[#allocation56_spill] sm:$0xff] %v18048_v32  ;;  %15473 = vmatmul.mubr.bf16.gmra.mxu0 %v14061_v38  ;;  %v18052_v52 = vpop.f32.mrf.mxu1  ;;  %v5517_v12 = vsel %vm16984_vm14, %v5512_v2, %v5516_v49  ;;  %v5522_v40 = vrot.slane %v5521_v20, 4  ;;  %v14062_v55 = vcombine.low %v6203_v3, %v6206_v42  ;;  %v5548_v28 = vshll.u32 %v5251_v23, 16  ;;  %v5253_v49 = vld [vmem:[#allocation2 + $0xac] sm:$0xf] }
 0x1f0   : > { %20742 = vst [vmem:[#allocation57_spill] sm:$0xff] %v18052_v52  ;;  %v5535_v29 = vor.u32 %v5534_v0, %v5531_v35  ;;  %v5540_v46 = vrot.slane %v5538_v7, 5  ;;  %v5544_v13 = vrot.slane %v5542_v22, 4  ;;  %v14047_v47 = vrot.slane %v6067_v18, 9  ;;  %v5254_v0 = vld [vmem:[#allocation2 + $0xb0] sm:$0x1] }
 0x1f1   : > { %v5527_v1 = vsel %vm16984_vm14, %v5522_v40, %v5526_v36  ;;  %15476 = vmatprep.mubr.bf16.mxu0 %v14062_v55  ;;  %v5550_v10 = vrot.slane %v5548_v28, 5  ;;  %v6209_v14 = vrot.slane %v6068_v41, 5  ;;  %v6212_v19 = vrot.slane %v6069_v53, 5  ;;  %v20743_v7 = vld [vmem:[#allocation28_spill] sm:$0xff]  ;;  %v6070_v53 = vld [vmem:[#allocation2 + $0xa8] sm:$0xe] }
 0x1f2   : > { %v14022_v3 = vcombine.low %v5517_v12, %v5527_v1  ;;  %v5536_v20 = vrot.slane %v5535_v29, 4  ;;  %v5545_v42 = vor.u32 %v5544_v13, %v5540_v46  ;;  %v2262_v35 = vadd.f32 %v17973_v25, %v17545_v62  ;;  %v6071_v22 = vld [vmem:[#allocation2 + $0xac] sm:$0xf]  ;;  %v6072_v40 = vld [vmem:[#allocation2 + $0xb0] sm:$0x1] }
 0x1f3   : > { %v6210_v18 = vsel %vm16978_vm13, %v14047_v47, %v6209_v14  ;;  %v6211_v36 = vrot.slane %v6209_v14, 4  ;;  %v2265_v41 = vadd.f32 %v17988_v61, %v20743_v7  ;;  %v5553_v29 = vshrl.u32 %v5252_v44, 16  ;;  %v16196_v13 = vld [vmem:[#allocation10 + $0x38] sm:$0xff]   ;;  %v5255_v14 = vld [vmem:[#allocation2 + $0xb4] sm:$0xf] }
 0x1f4   : > { %15428 = vmatprep.mubr.bf16.mxu1 %v14022_v3  ;;  %v5541_v12 = vsel %vm16984_vm14, %v5536_v20, %v5540_v46  ;;  %v5546_v62 = vrot.slane %v5545_v42, 4  ;;  %v18088_v25 = vadd.f32 %v17967_v58, %v2262_v35  ;;  %v5556_v1 = vshll.u32 %v5252_v44, 16  ;;  %v5256_v35 = vld [vmem:[#allocation2 + $0xb8] sm:$0xf]  ;;  %15488 = vmatprep.subr.bf16.mxu1 %v16196_v13 }
 0x1f5   : > { %v18059_v38 = vpop.f32.mrf.mxu0  ;;  %v6213_v61 = vsel %vm16978_vm13, %v6211_v36, %v6212_v19  ;;  %v18093_v47 = vadd.f32 %v17975_v54, %v2265_v41  ;;  %v5555_v58 = vrot.slane %v5553_v29, 4  ;;  %v5562_v42 = vshll.u32 %v5253_v49, 16  ;;  %15489 = vmatpush3.bf16.msra.mxu1 %v16196_v13 }
 0x1f6   : > { %v18065_v39 = vpop.f32.mrf.mxu1  ;;  %v5551_v46 = vsel %vm16984_vm14, %v5546_v62, %v5550_v10  ;;  %v14063_v20 = vcombine.low %v6210_v18, %v6213_v61  ;;  %v5558_v32 = vrot.slane %v5556_v1, 5  ;;  %v5566_v19 = vshrl.u32 %v5253_v49, 16  ;;  %v16197_v10 = vld [vmem:[#allocation10 + $0x78] sm:$0xff]   ;;  %v20747_v61 = vld [vmem:[#allocation30_spill] sm:$0xff]  ;;  %v5257_v49 = vld [vmem:[#allocation2 + $0xbc] sm:$0x1] }
 0x1f7   : > { %v18067_v4 = vpop.f32.mrf.mxu0  ;;  %20745 = vst [vmem:[#allocation58_spill] sm:$0xff] %v18093_v47  ;;  %v5572_v36 = vshll.u32 %v5254_v0, 16  ;;  %v5564_v41 = vrot.slane %v5562_v42, 5  ;;  %v14048_v34 = vrot.slane %v6070_v53, 9  ;;  %v6216_v26 = vrot.slane %v6071_v22, 5  ;;  %15536 = vmatprep.subr.bf16.mxu0 %v16197_v10 }
 0x1f8   : > { %v18071_v2 = vpop.f32.mrf.mxu1  ;;  %15477 = vmatmul.mubr.bf16.gmra.mxu0 %v14063_v20  ;;  %v6219_v50 = vrot.slane %v6072_v40, 5  ;;  %v5559_v18 = vor.u32 %v5558_v32, %v5555_v58  ;;  %v5568_v62 = vrot.slane %v5566_v19, 4  ;;  %v6073_v0 = vld [vmem:[#allocation2 + $0xb4] sm:$0xe]  ;;  %v5577_v22 = vshrl.u32 %v5255_v14, 16 }
 0x1f9   : > { %v18073_v23 = vpop.f32.mrf.mxu0  ;;  %v5574_v29 = vrot.slane %v5572_v36, 5  ;;  %v6217_v13 = vsel %vm16978_vm13, %v14048_v34, %v6216_v26  ;;  %v6218_v53 = vrot.slane %v6216_v26, 4  ;;  %v5580_v40 = vshll.u32 %v5255_v14, 16  ;;  %v6074_v20 = vld [vmem:[#allocation2 + $0xb8] sm:$0xf]  ;;  %15537 = vmatpush3.bf16.msra.mxu0 %v16197_v10 }
 0x1fa   : > { %v18081_v55 = vpop.f32.mrf.mxu1  ;;  %v5560_v32 = vrot.slane %v5559_v18, 4  ;;  %v5569_v58 = vor.u32 %v5568_v62, %v5564_v41  ;;  %v5579_v26 = vrot.slane %v5577_v22, 4  ;;  %v5590_v14 = vshrl.u32 %v5256_v35, 16  ;;  %v20751_v22 = vld [vmem:[#allocation31_spill] sm:$0xff] }
 0x1fb   : > { %v18083_v28 = vpop.f32.mrf.mxu0  ;;  %v6220_v34 = vsel %vm16978_vm13, %v6218_v53, %v6219_v50  ;;  %v5596_v45 = vshll.u32 %v5257_v49, 16  ;;  %v14049_v9 = vrot.slane %v6073_v0, 9  ;;  %v5259_v50 = vld [vmem:[#allocation2 + $0xc4] sm:$0xf]  ;;  %v6223_v53 = vrot.slane %v6074_v20, 5  ;;  %v20753_v20 = vld [vmem:[#allocation33_spill] sm:$0xff] }
 0x1fc   : > { %20744 = vst [vmem:[#allocation28_spill] sm:$0xff] %v18083_v28  ;;  %v18095_v7 = vpop.f32.mrf.mxu1  ;;  %v14023_v28 = vcombine.low %v5541_v12, %v5551_v46  ;;  %v2268_v12 = vadd.f32 %v18016_v21, %v20747_v61  ;;  %v5586_v21 = vshll.u32 %v5256_v35, 16  ;;  %v5582_v61 = vrot.slane %v5580_v40, 5 }
 0x1fd   : > { %20746 = vst [vmem:[#allocation59_spill] sm:$0xff] %v18095_v7  ;;  %v18097_v3 = vpop.f32.mrf.mxu0  ;;  %v16198_v7 = vld [vmem:[#allocation10 + $0x30] sm:$0xff]   ;;  %v5565_v18 = vsel %vm16984_vm14, %v5560_v32, %v5564_v41  ;;  %v5570_v62 = vrot.slane %v5569_v58, 4  ;;  %v14064_v52 = vcombine.low %v6217_v13, %v6220_v34  ;;  %v5592_v10 = vrot.slane %v5590_v14, 4 }
 0x1fe   : > { %v18101_v54 = vpop.f32.mrf.mxu1  ;;  %15429 = vmatmul.mubr.bf16.gmra.mxu1 %v14023_v28  ;;  %v6075_v28 = vld [vmem:[#allocation2 + $0xbc] sm:$0x1]  ;;  %v18114_v42 = vadd.f32 %v18009_v59, %v2268_v12  ;;  %v5588_v59 = vrot.slane %v5586_v21, 5  ;;  %v5258_v12 = vld [vmem:[#allocation2 + $0xc0] sm:$0xf]  ;;  %15490 = vmatprep.subr.bf16.mxu1 %v16198_v7  ;;  %v2266_v13 = vadd.f32 %v18026_v16, %v20751_v22  ;;  %v5598_v0 = vrot.slane %v5596_v45, 5 }
 0x1ff   : > { %v18103_v44 = vpop.f32.mrf.mxu0  ;;  %v5575_v35 = vsel %vm16984_vm14, %v5570_v62, %v5574_v29  ;;  %15480 = vmatprep.mubr.bf16.mxu0 %v14064_v52  ;;  %v6226_v41 = vrot.slane %v6075_v28, 5  ;;  %15491 = vmatpush3.bf16.msra.mxu1 %v16198_v7  ;;  %v16199_v34 = vld [vmem:[#allocation10 + $0x70] sm:$0xff]   ;;  %v6225_v29 = vrot.slane %v6223_v53, 4  ;;  %v2269_v16 = vadd.f32 %v18044_v15, %v20753_v20  ;;  %v5260_v28 = vld [vmem:[#allocation2 + $0xc8] sm:$0x1] }
 0x200   : > { %v18107_v1 = vpop.f32.mrf.mxu1  ;;  %20748 = vst [vmem:[#allocation30_spill] sm:$0xff] %v18114_v42  ;;  %v14024_v58 = vcombine.low %v5565_v18, %v5575_v35  ;;  %v5593_v49 = vor.u32 %v5592_v10, %v5588_v59  ;;  %v18139_v52 = vadd.f32 %v18020_v30, %v2266_v13  ;;  %v6077_v14 = vld [vmem:[#allocation2 + $0xc4] sm:$0xf]  ;;  %v6078_v62 = vld [vmem:[#allocation2 + $0xc8] sm:$0x1]  ;;  %v5601_v18 = vshrl.u32 %v5258_v12, 16  ;;  %15538 = vmatprep.subr.bf16.mxu0 %v16199_v34 }
 0x201   : > { %v18109_v46 = vpop.f32.mrf.mxu0  ;;  %v417_v10 = vld [vmem:[#allocation2 + $0xd4] sm:$0x1]  ;;  %v6227_v30 = vsel %vm16978_vm13, %v6225_v29, %v6226_v41  ;;  %v18152_v15 = vadd.f32 %v18035_v27, %v2269_v16  ;;  %v5604_v35 = vshll.u32 %v5258_v12, 16  ;;  %v5261_v22 = vld [vmem:[#allocation2 + $0xcc] sm:$0xf]  ;;  %15539 = vmatpush3.bf16.msra.mxu0 %v16199_v34  ;;  %v5614_v29 = vshrl.u32 %v5259_v50, 16 }
 0x202   : > { %v18116_v19 = vpop.f32.mrf.mxu1  ;;  %20752 = vst [vmem:[#allocation31_spill] sm:$0xff] %v18139_v52  ;;  %15432 = vmatprep.mubr.bf16.mxu1 %v14024_v58  ;;  %v5262_v27 = vld [vmem:[#allocation2 + $0xd0] sm:$0xf]  ;;  %v6233_v34 = vrot.slane %v6078_v62, 5 }
 0x203   : > { %v18118_v36 = vpop.f32.mrf.mxu0  ;;  %20754 = vst [vmem:[#allocation33_spill] sm:$0xff] %v18152_v15  ;;  %v5606_v52 = vrot.slane %v5604_v35, 5  ;;  %v5620_v15 = vshll.u32 %v5260_v28, 16  ;;  %v6080_v35 = vld [vmem:[#allocation2 + $0xd0] sm:$0xf] }
 0x204   : > { %20749 = vst [vmem:[#allocation60_spill] sm:$0xff] %v18118_v36  ;;  %v18124_v51 = vpop.f32.mrf.mxu1  ;;  %v5583_v36 = vor.u32 %v5582_v61, %v5579_v26  ;;  %v6224_v26 = vsel %vm16978_vm13, %v14049_v9, %v6223_v53  ;;  %v6076_v61 = vld [vmem:[#allocation2 + $0xc0] sm:$0xe]  ;;  %v5594_v9 = vrot.slane %v5593_v49, 4  ;;  %v5610_v53 = vshll.u32 %v5259_v50, 16  ;;  %v16200_v49 = vld [vmem:[#allocation10 + $0x28] sm:$0xff]  }
 0x205   : > { %20750 = vst [vmem:[#allocation61_spill] sm:$0xff] %v18124_v51  ;;  %v18126_v31 = vpop.f32.mrf.mxu0  ;;  %v14065_v58 = vcombine.low %v6224_v26, %v6227_v30  ;;  %v14050_v42 = vrot.slane %v6076_v61, 9  ;;  %15492 = vmatprep.subr.bf16.mxu1 %v16200_v49  ;;  %v5616_v26 = vrot.slane %v5614_v29, 4  ;;  %v418_v50 = vsel %vm16779_vm5, 0, %v417_v10  ;;  %v6079_v30 = vld [vmem:[#allocation2 + $0xcc] sm:$0xe] }
 0x206   : > { %v18132_v40 = vpop.f32.mrf.mxu1  ;;  %v5584_v21 = vrot.slane %v5583_v36, 4  ;;  %v5612_v41 = vrot.slane %v5610_v53, 5  ;;  %v5622_v28 = vrot.slane %v5620_v15, 5  ;;  %419 = vst [vmem:[#allocation2 + $0xd4] sm:$0x1] %v418_v50  ;;  %15493 = vmatpush3.bf16.msra.mxu1 %v16200_v49  ;;  %v5628_v10 = vshll.u32 %v5261_v22, 16 }
 0x207   : > { %v18134_v32 = vpop.f32.mrf.mxu0  ;;  %15481 = vmatmul.mubr.bf16.gmra.mxu0 %v14065_v58  ;;  %v6237_v47 = vrot.slane %v6080_v35, 5 }
 0x208   : > { %v18143_v7 = vpop.f32.mrf.mxu1  ;;  %v5589_v45 = vsel %vm16984_vm14, %v5584_v21, %v5588_v59  ;;  %v5599_v59 = vsel %vm16984_vm14, %v5594_v9, %v5598_v0  ;;  %v5603_v21 = vrot.slane %v5601_v18, 4  ;;  %v20757_v9 = vld [vmem:[#allocation35_spill] sm:$0xff]  ;;  %v5630_v50 = vrot.slane %v5628_v10, 5 }
 0x209   : > { %v18145_v36 = vpop.f32.mrf.mxu0  ;;  %v14025_v51 = vcombine.low %v5589_v45, %v5599_v59  ;;  %v2272_v45 = vadd.f32 %v18065_v39, %v20757_v9  ;;  %v5617_v39 = vor.u32 %v5616_v26, %v5612_v41 }
 0x20a   : > { %v18154_v13 = vpop.f32.mrf.mxu1  ;;  %v5607_v0 = vor.u32 %v5606_v52, %v5603_v21  ;;  %v16201_v52 = vld [vmem:[#allocation10 + $0x68] sm:$0xff]  }
 0x20b   : > { %v18156_v20 = vpop.f32.mrf.mxu0  ;;  %15433 = vmatmul.mubr.bf16.gmra.mxu1 %v14025_v51  ;;  %v5625_v51 = vshrl.u32 %v5261_v22, 16  ;;  %v18175_v58 = vadd.f32 %v18059_v38, %v2272_v45  ;;  %15540 = vmatprep.subr.bf16.mxu0 %v16201_v52 }
 0x20c   : > { %20755 = vst [vmem:[#allocation62_spill] sm:$0xff] %v18156_v20  ;;  %v18160_v16 = vpop.f32.mrf.mxu1  ;;  %v6230_v20 = vrot.slane %v6077_v14, 5  ;;  %v5608_v62 = vrot.slane %v5607_v0, 4  ;;  %v5618_v0 = vrot.slane %v5617_v39, 4  ;;  %15541 = vmatpush3.bf16.msra.mxu0 %v16201_v52  ;;  %v6239_v52 = vrot.slane %v6237_v47, 4 }
 0x20d   : > { %20756 = vst [vmem:[#allocation63_spill] sm:$0xff] %v18160_v16  ;;  %v18162_v12 = vpop.f32.mrf.mxu0  ;;  %20759 = vst [vmem:[#allocation35_spill] sm:$0xff] %v18175_v58  ;;  %v5627_v9 = vrot.slane %v5625_v51, 4  ;;  %v14051_v58 = vrot.slane %v6079_v30, 9  ;;  %v6081_v35 = vld [vmem:[#allocation2 + $0xd4] sm:$0x1] }
 0x20e   : > { %v18168_v53 = vpop.f32.mrf.mxu1  ;;  %v6231_v61 = vsel %vm16978_vm13, %v14050_v42, %v6230_v20  ;;  %v6232_v14 = vrot.slane %v6230_v20, 4  ;;  %v5634_v42 = vshll.u32 %v5262_v27, 16  ;;  %v5638_v20 = vshrl.u32 %v5262_v27, 16 }
 0x20f   : > { %v18170_v59 = vpop.f32.mrf.mxu0  ;;  %v5613_v49 = vsel %vm16984_vm14, %v5608_v62, %v5612_v41  ;;  %v5631_v27 = vor.u32 %v5630_v50, %v5627_v9  ;;  %v20761_v41 = vld [vmem:[#allocation38_spill] sm:$0xff] }
 0x210   : > { %v18177_v21 = vpop.f32.mrf.mxu1  ;;  %v6234_v15 = vsel %vm16978_vm13, %v6232_v14, %v6233_v34  ;;  %v5636_v22 = vrot.slane %v5634_v42, 5  ;;  %v5640_v16 = vrot.slane %v5638_v20, 4  ;;  %v5623_v34 = vsel %vm16984_vm14, %v5618_v0, %v5622_v28  ;;  %v20760_v14 = vld [vmem:[#allocation36_spill] sm:$0xff]  ;;  %v5263_v42 = vld [vmem:[#allocation2 + $0xd4] sm:$0x1] }
 0x211   : > { %v18179_v29 = vpop.f32.mrf.mxu0  ;;  %v14066_v26 = vcombine.low %v6231_v61, %v6234_v15  ;;  %v2270_v51 = vadd.f32 %v18071_v2, %v20760_v14  ;;  %v2273_v61 = vadd.f32 %v18081_v55, %v20761_v41  ;;  %v14026_v39 = vcombine.low %v5613_v49, %v5623_v34  ;;  %v20763_v34 = vld [vmem:[#allocation41_spill] sm:$0xff]  ;;  %v20764_v14 = vld [vmem:[#allocation42_spill] sm:$0xff] }
 0x212   : > { %v15227_v38 = vpop.f32.mrf.mxu1  ;;  %v5641_v10 = vor.u32 %v5640_v16, %v5636_v22  ;;  %v5632_v30 = vrot.slane %v5631_v27, 4  ;;  %v6238_v28 = vsel %vm16978_vm13, %v14051_v58, %v6237_v47  ;;  %v5644_v0 = vshll.u32 %v5263_v42, 16  ;;  %v20762_v16 = vld [vmem:[#allocation40_spill] sm:$0xff] }
 0x213   : > { %v18185_v45 = vpop.f32.mrf.mxu0  ;;  %15484 = vmatprep.mubr.bf16.mxu0 %v14066_v26  ;;  %v18198_v9 = vadd.f32 %v18067_v4, %v2270_v51  ;;  %v18201_v2 = vadd.f32 %v18073_v23, %v2273_v61  ;;  %15436 = vmatprep.mubr.bf16.mxu1 %v14026_v39  ;;  %v6240_v49 = vrot.slane %v6081_v35, 5  ;;  %v3291_v26 = vadd.f32 %v18101_v54, %v20762_v16 }
 0x214   : > { %v18193_v62 = vpop.f32.mrf.mxu1  ;;  %v5642_v55 = vrot.slane %v5641_v10, 4  ;;  %v3289_v27 = vadd.f32 %v18107_v1, %v20763_v34  ;;  %v3292_v47 = vadd.f32 %v18116_v19, %v20764_v14  ;;  %v5637_v23 = vsel %vm16984_vm14, %v5632_v30, %v5636_v22  ;;  %v20765_v19 = vld [vmem:[#allocation45_spill] sm:$0xff]  ;;  %v430_v34 = vld [vmem:[#allocation3 + $0xc] sm:$0x1] }
 0x215   : > { %v15278_v15 = vpop.f32.mrf.mxu0  ;;  %v5646_v58 = vrot.slane %v5644_v0, 5  ;;  %v6241_v51 = vsel %vm16978_vm13, %v6239_v52, %v6240_v49  ;;  %v18214_v41 = vadd.f32 %v18097_v3, %v3291_v26  ;;  %v3295_v10 = vadd.f32 %v18132_v40, %v20765_v19 }
 0x216   : > { %v15230_v20 = vpop.f32.mrf.mxu1  ;;  %v14067_v54 = vcombine.low %v6238_v28, %v6241_v51  ;;  %v18217_v39 = vadd.f32 %v18103_v44, %v3289_v27  ;;  %v18220_v1 = vadd.f32 %v18109_v46, %v3292_v47  ;;  %v3293_v52 = vadd.f32 %v18143_v7, %v17855_v48  ;;  %v433_v28 = vld [vmem:[#allocation3 + $0x18] sm:$0x1] }
 0x217   : > { %v4028_v50 = vpop.f32.mrf.mxu0  ;;  %v5647_v22 = vsel %vm16984_vm14, %v5642_v55, %v5646_v58  ;;  %v3296_v3 = vadd.f32 %v18154_v13, %v17860_v11  ;;  %v18233_v46 = vadd.f32 %v18126_v31, %v3295_v10  ;;  %v3299_v40 = vadd.f32 %v18168_v53, %v17881_v60 }
 0x218   : > { %v3210_v4 = vpop.f32.mrf.mxu1  ;;  %v14027_v44 = vcombine.low %v5637_v23, %v5647_v22  ;;  %15485 = vmatmul.mubr.bf16.gmra.mxu0 %v14067_v54  ;;  %v18240_v55 = vadd.f32 %v18134_v32, %v3293_v52  ;;  %v3297_v11 = vadd.f32 %v18177_v21, %v17907_v6  ;;  %v3300_v7 = vadd.f32 %v15227_v38, %v17925_v5  ;;  %v484_v54 = vld [vmem:[#allocation3 + $0x14] sm:$0x1] }
 0x219   : > { %v15279_v61 = vpop.f32.mrf.mxu0  ;;  %v18243_v48 = vadd.f32 %v18145_v36, %v3296_v3  ;;  %v18249_v31 = vadd.f32 %v18162_v12, %v3299_v40  ;;  %v3303_v60 = vadd.f32 %v15230_v20, %v17955_v57  ;;  %v3301_v36 = vadd.f32 %v3210_v4, %v17986_v37  ;;  %v487_v4 = vld [vmem:[#allocation3 + $0x20] sm:$0x1]  ;;  %v20767_v3 = vld [vmem:[#allocation58_spill] sm:$0xff]  ;;  %v439_v40 = vld [vmem:[#allocation3 + $0x30] sm:$0x1] }
 0x21a   : > { %v15231_v42 = vpop.f32.mrf.mxu1  ;;  %15437 = vmatmul.mubr.bf16.gmra.mxu1 %v14027_v44  ;;  %v18253_v53 = vadd.f32 %v18170_v59, %v3297_v11  ;;  %v18256_v32 = vadd.f32 %v18179_v29, %v3300_v7  ;;  %v434_v29 = vsel %vm16769_vm3, 0, %v433_v28  ;;  %v431_v14 = vsel %vm16769_vm3, 0, %v430_v34 }
 0x21b   : > { %v18230_v30 = vpop.f32.mrf.mxu0  ;;  %v3304_v0 = vadd.f32 %v15231_v42, %v17993_v43  ;;  %v18260_v21 = vadd.f32 %v15278_v15, %v3303_v60  ;;  %v18263_v38 = vadd.f32 %v4028_v50, %v3301_v36  ;;  %435 = vst [vmem:[#allocation3 + $0x18] sm:$0x1] %v434_v29  ;;  %v16202_v50 = vld [vmem:[#allocation10 + $0x20] sm:$0xff]   ;;  %432 = vst [vmem:[#allocation3 + $0xc] sm:$0x1] %v431_v14  ;;  %v485_v42 = vsel %vm16779_vm5, 0, %v484_v54 }
 0x21c   : > { %v18237_v35 = vpop.f32.mrf.mxu1  ;;  %15494 = vmatprep.subr.bf16.mxu1 %v16202_v50  ;;  %486 = vst [vmem:[#allocation3 + $0x14] sm:$0x1] %v485_v42  ;;  %v440_v7 = vsel %vm16769_vm3, 0, %v439_v40  ;;  %v16204_v60 = vld [vmem:[#allocation10 + $0x18] sm:$0xff]   ;;  %v427_v40 = vld [vmem:[#allocation3] sm:$0x1] }
 0x21d   : > { %v15282_v6 = vpop.f32.mrf.mxu0  ;;  %v18265_v57 = vadd.f32 %v15279_v61, %v3304_v0  ;;  %15495 = vmatpush3.bf16.msra.mxu1 %v16202_v50  ;;  %v16203_v61 = vld [vmem:[#allocation10 + $0x60] sm:$0xff]   ;;  %441 = vst [vmem:[#allocation3 + $0x30] sm:$0x1] %v440_v7  ;;  %v16207_v7 = vld [vmem:[#allocation10 + $0x50] sm:$0xff]  }
 0x21e   : > { %v15234_v13 = vpop.f32.mrf.mxu1  ;;  %15542 = vmatprep.subr.bf16.mxu0 %v16203_v61  ;;  %15496 = vmatprep.subr.bf16.mxu1 %v16204_v60 }
 0x21f   : > { %v3307_v5 = vadd.f32 %v15234_v13, %v18012_v24  ;;  %v4044_v20 = vpop.f32.mrf.mxu0  ;;  %15543 = vmatpush3.bf16.msra.mxu0 %v16203_v61  ;;  %v436_v13 = vld [vmem:[#allocation3 + $0x24] sm:$0x1] }
 0x220   : > { %v3226_v12 = vpop.f32.mrf.mxu1 }
 0x221   : > { %v3305_v59 = vadd.f32 %v3226_v12, %v18031_v8  ;;  %v18270_v16 = vadd.f32 %v15282_v6, %v3307_v5  ;;  %v15283_v24 = vpop.f32.mrf.mxu0  ;;  %v437_v6 = vsel %vm16769_vm3, 0, %v436_v13  ;;  %v20768_v5 = vld [vmem:[#allocation30_spill] sm:$0xff]  ;;  %15497 = vmatpush3.bf16.msra.mxu1 %v16204_v60  ;;  %v496_v60 = vld [vmem:[#allocation3 + $0x44] sm:$0x1]  ;;  %v428_v13 = vsel %vm16769_vm3, 0, %v427_v40 }
 0x222   : > { %v15235_v37 = vpop.f32.mrf.mxu1  ;;  %438 = vst [vmem:[#allocation3 + $0x24] sm:$0x1] %v437_v6  ;;  %v497_v6 = vsel %vm16779_vm5, 0, %v496_v60  ;;  %429 = vst [vmem:[#allocation3] sm:$0x1] %v428_v13 }
 0x223   : > { %v18272_v43 = vadd.f32 %v4044_v20, %v3305_v59  ;;  %v3308_v15 = vadd.f32 %v15235_v37, %v18042_v33  ;;  %v18279_v8 = vpop.f32.mrf.mxu0  ;;  %v488_v33 = vsel %vm16779_vm5, 0, %v487_v4  ;;  %v493_v20 = vld [vmem:[#allocation3 + $0x38] sm:$0x1]  ;;  %v20769_v37 = vld [vmem:[#allocation31_spill] sm:$0xff]  ;;  %498 = vst [vmem:[#allocation3 + $0x44] sm:$0x1] %v497_v6 }
 0x224   : > { %v18275_v26 = vpop.f32.mrf.mxu1  ;;  %489 = vst [vmem:[#allocation3 + $0x20] sm:$0x1] %v488_v33  ;;  %v16205_v33 = vld [vmem:[#allocation10 + $0x58] sm:$0xff]   ;;  %v505_v6 = vld [vmem:[#allocation3 + $0x68] sm:$0x1] }
 0x225   : > { %v18277_v27 = vadd.f32 %v15283_v24, %v3308_v15  ;;  %v494_v24 = vsel %vm16779_vm5, 0, %v493_v20  ;;  %15544 = vmatprep.subr.bf16.mxu0 %v16205_v33 }
 0x226   : > { %v15238_v47 = vpop.f32.mrf.mxu1  ;;  %v15286_v58 = vpop.f32.mrf.mxu0  ;;  %495 = vst [vmem:[#allocation3 + $0x38] sm:$0x1] %v494_v24  ;;  %15545 = vmatpush3.bf16.msra.mxu0 %v16205_v33  ;;  %v481_v24 = vld [vmem:[#allocation3 + $0x8] sm:$0x1] }
 0x227   : > { %v3311_v23 = vadd.f32 %v15238_v47, %v18057_v63  ;;  %v20770_v47 = vld [vmem:[#allocation33_spill] sm:$0xff]  ;;  %15546 = vmatprep.subr.bf16.mxu0 %v16207_v7 }
 0x228   : > { %v3242_v51 = vpop.f32.mrf.mxu1  ;;  %v4060_v22 = vpop.f32.mrf.mxu0 }
 0x229   : > { %v18286_v19 = vadd.f32 %v15286_v58, %v3311_v23  ;;  %v3309_v10 = vadd.f32 %v3242_v51, %v18088_v25  ;;  %v490_v58 = vld [vmem:[#allocation3 + $0x2c] sm:$0x1] }
 0x22a   : > { %v15239_v52 = vpop.f32.mrf.mxu1  ;;  %v15287_v28 = vpop.f32.mrf.mxu0  ;;  %v491_v61 = vsel %vm16779_vm5, 0, %v490_v58  ;;  %15547 = vmatpush3.bf16.msra.mxu0 %v16207_v7 }
 0x22b   : > { %v18291_v63 = vadd.f32 %v4060_v22, %v3309_v10  ;;  %v3312_v44 = vadd.f32 %v15239_v52, %v20767_v3  ;;  %492 = vst [vmem:[#allocation3 + $0x2c] sm:$0x1] %v491_v61  ;;  %v445_v10 = vld [vmem:[#allocation3 + $0x48] sm:$0x1]  ;;  %v442_v52 = vld [vmem:[#allocation3 + $0x3c] sm:$0x1] }
 0x22c   : > { %v18294_v11 = vpop.f32.mrf.mxu1  ;;  %v18300_v36 = vpop.f32.mrf.mxu0  ;;  %v446_v42 = vsel %vm16769_vm3, 0, %v445_v10  ;;  %v16206_v22 = vld [vmem:[#allocation10 + $0x10] sm:$0xff]   ;;  %v16211_v61 = vld [vmem:[#allocation3] sm:$0xff]   ;;  %v448_v10 = vld [vmem:[#allocation3 + $0x54] sm:$0x1] }
 0x22d   : > { %v18298_v25 = vadd.f32 %v15287_v28, %v3312_v44  ;;  %447 = vst [vmem:[#allocation3 + $0x48] sm:$0x1] %v446_v42  ;;  %v443_v44 = vsel %vm16769_vm3, 0, %v442_v52  ;;  %15498 = vmatprep.subr.bf16.mxu1 %v16206_v22  ;;  %v499_v28 = vld [vmem:[#allocation3 + $0x50] sm:$0x1]  ;;  %15504 = vmatprep.mubr.bf16.mxu1 %v16211_v61  ;;  %v16214_v61 = vld [vmem:[#allocation10 + $0x40] sm:$0xff]  }
 0x22e   : > { %v15242_v0 = vpop.f32.mrf.mxu1  ;;  %v15290_v29 = vpop.f32.mrf.mxu0  ;;  %444 = vst [vmem:[#allocation3 + $0x3c] sm:$0x1] %v443_v44  ;;  %15499 = vmatpush3.bf16.msra.mxu1 %v16206_v22  ;;  %v7776_v22 = vld [vmem:[#allocation3] sm:$0xf]  ;;  %v7777_v52 = vld [vmem:[#allocation3 + $0x4] sm:$0xf] }
 0x22f   : > { %v3315_v12 = vadd.f32 %v15242_v0, %v20768_v5  ;;  %v500_v0 = vsel %vm16779_vm5, 0, %v499_v28  ;;  %v16208_v5 = vld [vmem:[#allocation10 + $0x8] sm:$0xff]   ;;  %v7825_v40 = vshrl.u32 %v7776_v22, 16  ;;  %v7834_v28 = vshll.u32 %v7777_v52, 16 }
 0x230   : > { %v3258_v59 = vpop.f32.mrf.mxu1  ;;  %v4076_v14 = vpop.f32.mrf.mxu0  ;;  %501 = vst [vmem:[#allocation3 + $0x50] sm:$0x1] %v500_v0  ;;  %15500 = vmatprep.subr.bf16.mxu1 %v16208_v5  ;;  %v16209_v44 = vld [vmem:[#allocation10 + $0x48] sm:$0xff]   ;;  %v7838_v13 = vshrl.u32 %v7777_v52, 16 }
 0x231   : > { %v3313_v15 = vadd.f32 %v3258_v59, %v20769_v37  ;;  %v18308_v50 = vadd.f32 %v15290_v29, %v3315_v12  ;;  %v20771_v59 = vld [vmem:[#allocation35_spill] sm:$0xff]  ;;  %15548 = vmatprep.subr.bf16.mxu0 %v16209_v44 }
 0x232   : > { %v15243_v34 = vpop.f32.mrf.mxu1  ;;  %v15291_v51 = vpop.f32.mrf.mxu0  ;;  %v451_v29 = vld [vmem:[#allocation3 + $0x60] sm:$0x1]  ;;  %15501 = vmatpush3.bf16.msra.mxu1 %v16208_v5  ;;  %15549 = vmatpush3.bf16.msra.mxu0 %v16209_v44  ;;  %v457_v44 = vld [vmem:[#allocation3 + $0x78] sm:$0x1] }
 0x233   : > { %v3316_v4 = vadd.f32 %v15243_v34, %v20770_v47  ;;  %v18311_v23 = vadd.f32 %v4076_v14, %v3313_v15  ;;  %v452_v15 = vsel %vm16769_vm3, 0, %v451_v29  ;;  %v16210_v14 = vld [vmem:[#allocation10] sm:$0xff]   ;;  %v482_v47 = vsel %vm16779_vm5, 0, %v481_v24  ;;  %15550 = vmatprep.subr.bf16.mxu0 %v16214_v61 }
 0x234   : > { %v18319_v3 = vpop.f32.mrf.mxu1  ;;  %453 = vst [vmem:[#allocation3 + $0x60] sm:$0x1] %v452_v15  ;;  %483 = vst [vmem:[#allocation3 + $0x8] sm:$0x1] %v482_v47  ;;  %15502 = vmatprep.subr.bf16.mxu1 %v16210_v14  ;;  %v18336_v58 = vpop.f32.mrf.mxu0  ;;  %v506_v15 = vsel %vm16779_vm5, 0, %v505_v6  ;;  %v7836_v24 = vrot.slane %v7834_v28, 5 }
 0x235   : > { %v18315_v54 = vadd.f32 %v15291_v51, %v3316_v4  ;;  %507 = vst [vmem:[#allocation3 + $0x68] sm:$0x1] %v506_v15  ;;  %v458_v6 = vsel %vm16769_vm3, 0, %v457_v44 }
 0x236   : > { %15503 = vmatpush3.bf16.msra.mxu1 %v16210_v14  ;;  %v7840_v14 = vrot.slane %v7838_v13, 4  ;;  %15551 = vmatpush3.bf16.msra.mxu0 %v16214_v61  ;;  %459 = vst [vmem:[#allocation3 + $0x78] sm:$0x1] %v458_v6 }
 0x23b   : > { %v15246_v12 = vpop.f32.mrf.mxu1  ;;  %v7778_v5 = vld [vmem:[#allocation3 + $0x8] sm:$0x1] }
 0x23c   : > { %v3319_v20 = vadd.f32 %v15246_v12, %v20771_v59  ;;  %v7827_v12 = vrot.slane %v7825_v40, 4  ;;  %v7844_v47 = vshll.u32 %v7778_v5, 16  ;;  %v7841_v40 = vor.u32 %v7840_v14, %v7836_v24 }
 0x23d   : > { %v3274_v37 = vpop.f32.mrf.mxu1 }
 0x23e   : > { %v3317_v34 = vadd.f32 %v3274_v37, %v18198_v9  ;;  %v449_v9 = vsel %vm16769_vm3, 0, %v448_v10  ;;  %v7842_v5 = vrot.slane %v7841_v40, 4 }
 0x23f   : > { %v15247_v4 = vpop.f32.mrf.mxu1  ;;  %450 = vst [vmem:[#allocation3 + $0x54] sm:$0x1] %v449_v9 }
 0x240   : > { %v3320_v33 = vadd.f32 %v15247_v4, %v18201_v2  ;;  %v7828_v2 = vshll.u32 %v7776_v22, 16 }
 0x241   : > { %v18338_v51 = vpop.f32.mrf.mxu1 }
 0x242   : > { %v7830_v59 = vrot.slane %v7828_v2, 5  ;;  %v7846_v2 = vrot.slane %v7844_v47, 5  ;;  %v511_v47 = vld [vmem:[#allocation3 + $0x80] sm:$0x1] }
 0x243   : > { %v18340_v42 = vpop.f32.mrf.mxu1 }
 0x244   : > { %v7831_v10 = vor.u32 %v7830_v59, %v7827_v12  ;;  %v454_v12 = vld [vmem:[#allocation3 + $0x6c] sm:$0x1]  ;;  %v7847_v14 = vsel %vm16984_vm14, %v7842_v5, %v7846_v2 }
 0x245   : > { %v18344_v60 = vpop.f32.mrf.mxu1  ;;  %v455_v15 = vsel %vm16769_vm3, 0, %v454_v12 }
 0x246   : > { %v7832_v28 = vrot.slane %v7831_v10, 4  ;;  %456 = vst [vmem:[#allocation3 + $0x6c] sm:$0x1] %v455_v15 }
 0x247   : > { %v15294_v7 = vpop.f32.mrf.mxu0  ;;  %v18348_v37 = vpop.f32.mrf.mxu1 }
 0x248   : > { %v18346_v0 = vadd.f32 %v15294_v7, %v3319_v20  ;;  %v502_v20 = vld [vmem:[#allocation3 + $0x5c] sm:$0x1]  ;;  %v7837_v59 = vsel %vm16984_vm14, %v7832_v28, %v7836_v24  ;;  %v463_v28 = vld [vmem:[#allocation3 + $0x90] sm:$0x1] }
 0x249   : > { %v4092_v29 = vpop.f32.mrf.mxu0  ;;  %v18354_v22 = vpop.f32.mrf.mxu1  ;;  %v503_v52 = vsel %vm16779_vm5, 0, %v502_v20  ;;  %v14134_v20 = vcombine.low %v7837_v59, %v7847_v14  ;;  %v464_v12 = vsel %vm16769_vm3, 0, %v463_v28  ;;  %v460_v14 = vld [vmem:[#allocation3 + $0x84] sm:$0x1] }
 0x24a   : > { %v18352_v4 = vadd.f32 %v4092_v29, %v3317_v34  ;;  %504 = vst [vmem:[#allocation3 + $0x5c] sm:$0x1] %v503_v52  ;;  %v508_v52 = vld [vmem:[#allocation3 + $0x74] sm:$0x1]  ;;  %465 = vst [vmem:[#allocation3 + $0x90] sm:$0x1] %v464_v12 }
 0x24b   : > { %v15295_v9 = vpop.f32.mrf.mxu0  ;;  %v18362_v13 = vpop.f32.mrf.mxu1  ;;  %15552 = vmatprep.mubr.bf16.mxu0 %v14134_v20  ;;  %v509_v2 = vsel %vm16779_vm5, 0, %v508_v52  ;;  %v461_v20 = vsel %vm16769_vm3, 0, %v460_v14  ;;  %v517_v52 = vld [vmem:[#allocation3 + $0x98] sm:$0x1] }
 0x24c   : > { %v18358_v7 = vadd.f32 %v15295_v9, %v3320_v33  ;;  %v512_v9 = vsel %vm16779_vm5, 0, %v511_v47  ;;  %510 = vst [vmem:[#allocation3 + $0x74] sm:$0x1] %v509_v2  ;;  %462 = vst [vmem:[#allocation3 + $0x84] sm:$0x1] %v461_v20 }
 0x24d   : > { %v18360_v34 = vpop.f32.mrf.mxu0  ;;  %v18370_v29 = vpop.f32.mrf.mxu1  ;;  %513 = vst [vmem:[#allocation3 + $0x80] sm:$0x1] %v512_v9 }
 0x24f   : > { %v18368_v33 = vpop.f32.mrf.mxu0  ;;  %v15319_v10 = vpop.f32.mrf.mxu1 }
 0x250   : > { %v4708_v24 = vadd.f32 %v15319_v10, %v18243_v48 }
 0x251   : > { %v18376_v61 = vpop.f32.mrf.mxu0  ;;  %v18383_v44 = vpop.f32.mrf.mxu1 }
 0x253   : > { %v18381_v40 = vpop.f32.mrf.mxu0  ;;  %v15322_v5 = vpop.f32.mrf.mxu1 }
 0x254   : > { %v4711_v48 = vadd.f32 %v15322_v5, %v18249_v31  ;;  %v518_v31 = vsel %vm16779_vm5, 0, %v517_v52 }
 0x255   : > { %v18387_v6 = vpop.f32.mrf.mxu0  ;;  %v4606_v15 = vpop.f32.mrf.mxu1  ;;  %519 = vst [vmem:[#allocation3 + $0x98] sm:$0x1] %v518_v31 }
 0x256   : > { %v4709_v47 = vadd.f32 %v4606_v15, %v18253_v53 }
 0x257   : > { %v18392_v59 = vpop.f32.mrf.mxu0  ;;  %v15323_v9 = vpop.f32.mrf.mxu1 }
 0x258   : > { %20772 = vst [vmem:[#allocation20_spill] sm:$0xff] %v18392_v59  ;;  %v4712_v2 = vadd.f32 %v15323_v9, %v18256_v32  ;;  %v18412_v9 = vld [vmem:[#allocation10 + $0xb8] sm:$0xff]  }
 0x259   : > { %v18397_v10 = vpop.f32.mrf.mxu0  ;;  %v18402_v5 = vpop.f32.mrf.mxu1  ;;  %20776 = vst [vmem:[#allocation41_spill] sm:$0xff] %v18412_v9  ;;  %15584 = vmatprep.subr.bf16.mxu1 %v18412_v9 }
 0x25a   : > { %20773 = vst [vmem:[#allocation36_spill] sm:$0xff] %v18397_v10 }
 0x25b   : > { %v15367_v28 = vpop.f32.mrf.mxu0  ;;  %v15326_v15 = vpop.f32.mrf.mxu1 }
 0x25c   : > { %v18404_v12 = vadd.f32 %v15367_v28, %v4708_v24  ;;  %v4715_v14 = vadd.f32 %v15326_v15, %v18260_v21  ;;  %v16218_v21 = vld [vmem:[#allocation10 + $0xf8] sm:$0xff]   ;;  %v514_v15 = vld [vmem:[#allocation3 + $0x8c] sm:$0x1] }
 0x25d   : > { %v18406_v53 = vpop.f32.mrf.mxu0  ;;  %v4622_v17 = vpop.f32.mrf.mxu1  ;;  %15632 = vmatprep.subr.bf16.mxu0 %v16218_v21 }
 0x25e   : > { %20774 = vst [vmem:[#allocation38_spill] sm:$0xff] %v18404_v12  ;;  %v4713_v32 = vadd.f32 %v4622_v17, %v18263_v38 }
 0x25f   : > { %v15370_v56 = vpop.f32.mrf.mxu0  ;;  %v15327_v10 = vpop.f32.mrf.mxu1 }
 0x260   : > { %v18409_v20 = vadd.f32 %v15370_v56, %v4711_v48  ;;  %v4716_v24 = vadd.f32 %v15327_v10, %v18265_v57  ;;  %v515_v56 = vsel %vm16779_vm5, 0, %v514_v15 }
 0x261   : > { %v5057_v52 = vpop.f32.mrf.mxu0  ;;  %v18418_v28 = vpop.f32.mrf.mxu1  ;;  %516 = vst [vmem:[#allocation3 + $0x8c] sm:$0x1] %v515_v56 }
 0x262   : > { %20775 = vst [vmem:[#allocation40_spill] sm:$0xff] %v18409_v20  ;;  %v18414_v59 = vadd.f32 %v5057_v52, %v4709_v47 }
 0x263   : > { %v15371_v31 = vpop.f32.mrf.mxu0  ;;  %v15330_v38 = vpop.f32.mrf.mxu1 }
 0x264   : > { %20777 = vst [vmem:[#allocation42_spill] sm:$0xff] %v18414_v59  ;;  %v18420_v12 = vadd.f32 %v15371_v31, %v4712_v2  ;;  %v4719_v48 = vadd.f32 %v15330_v38, %v18270_v16 }
 0x265   : > { %v18424_v17 = vpop.f32.mrf.mxu0  ;;  %v4638_v47 = vpop.f32.mrf.mxu1 }
 0x266   : > { %20778 = vst [vmem:[#allocation45_spill] sm:$0xff] %v18420_v12  ;;  %20779 = vst [vmem:[#allocation19_spill] sm:$0xff] %v18424_v17  ;;  %v4717_v52 = vadd.f32 %v4638_v47, %v18272_v43 }
 0x267   : > { %v15374_v57 = vpop.f32.mrf.mxu0  ;;  %v15331_v59 = vpop.f32.mrf.mxu1 }
 0x268   : > { %v18427_v10 = vadd.f32 %v15374_v57, %v4715_v14  ;;  %v4720_v31 = vadd.f32 %v15331_v59, %v18277_v27  ;;  %v469_v57 = vld [vmem:[#allocation3 + $0xa8] sm:$0x1] }
 0x269   : > { %v5073_v9 = vpop.f32.mrf.mxu0  ;;  %v18433_v12 = vpop.f32.mrf.mxu1  ;;  %v470_v27 = vsel %vm16769_vm3, 0, %v469_v57 }
 0x26a   : > { %20780 = vst [vmem:[#allocation58_spill] sm:$0xff] %v18427_v10  ;;  %v18430_v2 = vadd.f32 %v5073_v9, %v4713_v32  ;;  %471 = vst [vmem:[#allocation3 + $0xa8] sm:$0x1] %v470_v27  ;;  %v520_v27 = vld [vmem:[#allocation3 + $0xa4] sm:$0x1] }
 0x26b   : > { %v15375_v15 = vpop.f32.mrf.mxu0  ;;  %v15334_v16 = vpop.f32.mrf.mxu1 }
 0x26c   : > { %20781 = vst [vmem:[#allocation30_spill] sm:$0xff] %v18430_v2  ;;  %v18435_v20 = vadd.f32 %v15375_v15, %v4716_v24  ;;  %v4723_v56 = vadd.f32 %v15334_v16, %v18286_v19  ;;  %v20799_v2 = vld [vmem:[#allocation46_spill] sm:$0xff] }
 0x26d   : > { %v18437_v21 = vpop.f32.mrf.mxu0  ;;  %v4654_v38 = vpop.f32.mrf.mxu1 }
 0x26e   : > { %20782 = vst [vmem:[#allocation31_spill] sm:$0xff] %v18435_v20  ;;  %20783 = vst [vmem:[#allocation33_spill] sm:$0xff] %v18437_v21  ;;  %v4721_v32 = vadd.f32 %v4654_v38, %v18291_v63  ;;  %v523_v38 = vld [vmem:[#allocation3 + $0xb0] sm:$0x1] }
 0x26f   : > { %v15378_v14 = vpop.f32.mrf.mxu0  ;;  %v15335_v9 = vpop.f32.mrf.mxu1 }
 0x270   : > { %v18440_v43 = vadd.f32 %v15378_v14, %v4719_v48  ;;  %v4724_v47 = vadd.f32 %v15335_v9, %v18298_v25  ;;  %v466_v14 = vld [vmem:[#allocation3 + $0x9c] sm:$0x1]  ;;  %v524_v25 = vsel %vm16779_vm5, 0, %v523_v38 }
 0x271   : > { %v5089_v59 = vpop.f32.mrf.mxu0  ;;  %v18448_v20 = vpop.f32.mrf.mxu1  ;;  %525 = vst [vmem:[#allocation3 + $0xb0] sm:$0x1] %v524_v25  ;;  %v20795_v25 = vld [vmem:[#allocation27_spill] sm:$0xff] }
 0x272   : > { %20784 = vst [vmem:[#allocation35_spill] sm:$0xff] %v18440_v43  ;;  %v18445_v24 = vadd.f32 %v5089_v59, %v4717_v52  ;;  %v467_v52 = vsel %vm16769_vm3, 0, %v466_v14 }
 0x273   : > { %v15379_v15 = vpop.f32.mrf.mxu0  ;;  %v15338_v48 = vpop.f32.mrf.mxu1  ;;  %468 = vst [vmem:[#allocation3 + $0x9c] sm:$0x1] %v467_v52 }
 0x274   : > { %20785 = vst [vmem:[#allocation64_spill] sm:$0xff] %v18445_v24  ;;  %v18450_v19 = vadd.f32 %v15379_v15, %v4720_v31  ;;  %v4727_v63 = vadd.f32 %v15338_v48, %v18308_v50  ;;  %v521_v50 = vsel %vm16779_vm5, 0, %v520_v27  ;;  %v20796_v27 = vld [vmem:[#allocation47_spill] sm:$0xff] }
 0x275   : > { %v18452_v16 = vpop.f32.mrf.mxu0  ;;  %v4670_v43 = vpop.f32.mrf.mxu1  ;;  %522 = vst [vmem:[#allocation3 + $0xa4] sm:$0x1] %v521_v50 }
 0x276   : > { %20786 = vst [vmem:[#allocation65_spill] sm:$0xff] %v18450_v19  ;;  %20787 = vst [vmem:[#allocation66_spill] sm:$0xff] %v18452_v16  ;;  %v4725_v31 = vadd.f32 %v4670_v43, %v18311_v23  ;;  %v20793_v43 = vld [vmem:[#allocation25_spill] sm:$0xff] }
 0x277   : > { %v15382_v57 = vpop.f32.mrf.mxu0  ;;  %v15339_v15 = vpop.f32.mrf.mxu1 }
 0x278   : > { %v18459_v59 = vadd.f32 %v15382_v57, %v4723_v56  ;;  %v4728_v14 = vadd.f32 %v15339_v15, %v18315_v54  ;;  %v20794_v57 = vld [vmem:[#allocation44_spill] sm:$0xff] }
 0x279   : > { %v5105_v9 = vpop.f32.mrf.mxu0  ;;  %v18467_v24 = vpop.f32.mrf.mxu1  ;;  %v2243_v52 = vadd.f32 %v20794_v57, %v20793_v43  ;;  %v20801_v57 = vld [vmem:[#allocation32_spill] sm:$0xff] }
 0x27a   : > { %20788 = vst [vmem:[#allocation67_spill] sm:$0xff] %v18459_v59  ;;  %v18464_v48 = vadd.f32 %v5105_v9, %v4721_v32  ;;  %20790 = vst [vmem:[#allocation69_spill] sm:$0xff] %v18467_v24  ;;  %v2247_v59 = vadd.f32 %v20796_v27, %v20795_v25  ;;  %v20802_v25 = vld [vmem:[#allocation49_spill] sm:$0xff] }
 0x27b   : > { %v15383_v19 = vpop.f32.mrf.mxu0  ;;  %v15342_v23 = vpop.f32.mrf.mxu1  ;;  %v2251_v27 = vadd.f32 %v20802_v25, %v20801_v57 }
 0x27c   : > { %20789 = vst [vmem:[#allocation68_spill] sm:$0xff] %v18464_v48  ;;  %v18469_v38 = vadd.f32 %v15383_v19, %v4724_v47  ;;  %v4731_v50 = vadd.f32 %v15342_v23, %v18346_v0  ;;  %v20798_v19 = vld [vmem:[#allocation43_spill] sm:$0xff]  ;;  %v2844_v10 = vadd.f32 %v20799_v2, %v2247_v59  ;;  %v20803_v0 = vld [vmem:[#allocation37_spill] sm:$0xff]  ;;  %v20810_v59 = vld [vmem:[#allocation34_spill] sm:$0xff] }
 0x27d   : > { %v18471_v56 = vpop.f32.mrf.mxu0  ;;  %v4686_v9 = vpop.f32.mrf.mxu1  ;;  %v20804_v23 = vld [vmem:[#allocation51_spill] sm:$0xff] }
 0x27e   : > { %20791 = vst [vmem:[#allocation70_spill] sm:$0xff] %v18469_v38  ;;  %20792 = vst [vmem:[#allocation71_spill] sm:$0xff] %v18471_v56  ;;  %v4729_v54 = vadd.f32 %v4686_v9, %v18352_v4  ;;  %v2840_v38 = vadd.f32 %v20798_v19, %v2243_v52  ;;  %v2255_v16 = vadd.f32 %v20804_v23, %v20803_v0  ;;  %v20807_v4 = vld [vmem:[#allocation29_spill] sm:$0xff]  ;;  %v20808_v9 = vld [vmem:[#allocation55_spill] sm:$0xff] }
 0x27f   : > { %v15386_v32 = vpop.f32.mrf.mxu0  ;;  %v15343_v47 = vpop.f32.mrf.mxu1  ;;  %v2263_v21 = vadd.f32 %v20808_v9, %v20807_v4  ;;  %v475_v2 = vld [vmem:[#allocation3 + $0xc0] sm:$0x1]  ;;  %v20815_v0 = vld [vmem:[#allocation61_spill] sm:$0xff] }
 0x280   : > { %v18478_v48 = vadd.f32 %v15386_v32, %v4727_v63  ;;  %v4732_v43 = vadd.f32 %v15343_v47, %v18358_v7  ;;  %v20805_v63 = vld [vmem:[#allocation26_spill] sm:$0xff]  ;;  %v20806_v32 = vld [vmem:[#allocation53_spill] sm:$0xff]  ;;  %v20812_v7 = vld [vmem:[#allocation39_spill] sm:$0xff]  ;;  %v476_v25 = vsel %vm16769_vm3, 0, %v475_v2  ;;  %v3290_v23 = vadd.f32 %v20815_v0, %v2840_v38 }
 0x281   : > { %v5121_v15 = vpop.f32.mrf.mxu0  ;;  %v18494_v52 = vpop.f32.mrf.mxu1  ;;  %v20813_v47 = vld [vmem:[#allocation59_spill] sm:$0xff]  ;;  %477 = vst [vmem:[#allocation3 + $0xc0] sm:$0x1] %v476_v25  ;;  %v20822_v38 = vld [vmem:[#allocation56_spill] sm:$0xff]  ;;  %v4701_v25 = vadd.f32 %v18344_v60, %v18217_v39  ;;  %v472_v60 = vld [vmem:[#allocation3 + $0xb4] sm:$0x1] }
 0x282   : > { %20797 = vst [vmem:[#allocation25_spill] sm:$0xff] %v18478_v48  ;;  %v18483_v56 = vadd.f32 %v5121_v15, %v4725_v31  ;;  %v2259_v48 = vadd.f32 %v20806_v32, %v20805_v63  ;;  %20809 = vst [vmem:[#allocation27_spill] sm:$0xff] %v18494_v52  ;;  %v20811_v31 = vld [vmem:[#allocation57_spill] sm:$0xff]  ;;  %v2271_v19 = vadd.f32 %v20813_v47, %v20812_v7  ;;  %v20816_v63 = vld [vmem:[#allocation63_spill] sm:$0xff] }
 0x283   : > { %v15387_v17 = vpop.f32.mrf.mxu0  ;;  %v2267_v15 = vadd.f32 %v20811_v31, %v20810_v59  ;;  %v3294_v32 = vadd.f32 %v20816_v63, %v2844_v10  ;;  %v15410_v9 = vpop.f32.mrf.mxu1  ;;  %v20818_v59 = vld [vmem:[#allocation48_spill] sm:$0xff]  ;;  %v20819_v52 = vld [vmem:[#allocation50_spill] sm:$0xff] }
 0x284   : > { %20800 = vst [vmem:[#allocation44_spill] sm:$0xff] %v18483_v56  ;;  %v18500_v57 = vadd.f32 %v15387_v17, %v4728_v14  ;;  %v4703_v56 = vadd.f32 %v18340_v42, %v18214_v41  ;;  %v2848_v31 = vadd.f32 %v20818_v59, %v2251_v27  ;;  %v2852_v7 = vadd.f32 %v20819_v52, %v2255_v16  ;;  %v20820_v17 = vld [vmem:[#allocation52_spill] sm:$0xff]  ;;  %v20821_v47 = vld [vmem:[#allocation54_spill] sm:$0xff] }
 0x285   : > { %v18506_v4 = vpop.f32.mrf.mxu0  ;;  %v2856_v14 = vadd.f32 %v20820_v17, %v2259_v48  ;;  %v5843_v24 = vpop.f32.mrf.mxu1  ;;  %v2864_v0 = vadd.f32 %v20822_v38, %v2267_v15  ;;  %v20823_v10 = vld [vmem:[#allocation28_spill] sm:$0xff]  ;;  %v20825_v27 = vld [vmem:[#allocation62_spill] sm:$0xff] }
 0x286   : > { %20814 = vst [vmem:[#allocation47_spill] sm:$0xff] %v18500_v57  ;;  %20817 = vst [vmem:[#allocation43_spill] sm:$0xff] %v18506_v4  ;;  %v2860_v57 = vadd.f32 %v20821_v47, %v2263_v21  ;;  %v2868_v63 = vadd.f32 %v20823_v10, %v2271_v19  ;;  %v20824_v41 = vld [vmem:[#allocation60_spill] sm:$0xff]  ;;  %v4112_v59 = vadd.f32 %v20825_v27, %v3294_v32 }
 0x287   : > { %v15390_v2 = vpop.f32.mrf.mxu0  ;;  %v4108_v42 = vadd.f32 %v20824_v41, %v3290_v23  ;;  %v3298_v16 = vadd.f32 %v18193_v62, %v2848_v31  ;;  %v3302_v48 = vadd.f32 %v18237_v35, %v2852_v7  ;;  %v15411_v52 = vpop.f32.mrf.mxu1  ;;  %v3306_v17 = vadd.f32 %v18275_v26, %v2856_v14  ;;  %v529_v26 = vld [vmem:[#allocation3 + $0xc8] sm:$0x1] }
 0x288   : > { %v18518_v4 = vadd.f32 %v15390_v2, %v4731_v50  ;;  %v5154_v15 = vadd.f32 %v18368_v33, %v4703_v56  ;;  %v4704_v19 = vadd.f32 %v18348_v37, %v18220_v1  ;;  %v3310_v50 = vadd.f32 %v18294_v11, %v2860_v57  ;;  %v526_v11 = vld [vmem:[#allocation3 + $0xbc] sm:$0x1]  ;;  %v20827_v27 = vld [vmem:[#allocation36_spill] sm:$0xff] }
 0x289   : > { %v5137_v21 = vpop.f32.mrf.mxu0  ;;  %v3314_v23 = vadd.f32 %v18319_v3, %v2864_v0  ;;  %v4702_v62 = vadd.f32 %v18354_v22, %v4108_v42  ;;  %v5846_v35 = vpop.f32.mrf.mxu1  ;;  %v473_v31 = vsel %vm16769_vm3, 0, %v472_v60  ;;  %v5152_v33 = vadd.f32 %v18376_v61, %v4701_v25  ;;  %v18554_v0 = vld [vmem:[#allocation13] ss:$0 sm:$0xff]  ;;  %v20826_v25 = vld [vmem:[#allocation20_spill] sm:$0xff] }
 0x28a   : > { %v18528_v39 = vadd.f32 %v5137_v21, %v4729_v54  ;;  %v5972_v1 = vadd.f32 %v15410_v9, %v5154_v15  ;;  %474 = vst [vmem:[#allocation3 + $0xb4] sm:$0x1] %v473_v31  ;;  %v530_v37 = vsel %vm16779_vm5, 0, %v529_v26  ;;  %v4116_v3 = vadd.f32 %v18185_v45, %v3298_v16  ;;  %v20828_v16 = vld [vmem:[#allocation69_spill] sm:$0xff] }
 0x28b   : > { %v15391_v32 = vpop.f32.mrf.mxu0  ;;  %v4120_v22 = vadd.f32 %v18230_v30, %v3302_v48  ;;  %v3318_v54 = vadd.f32 %v18338_v51, %v2868_v63  ;;  %v15414_v7 = vpop.f32.mrf.mxu1  ;;  %531 = vst [vmem:[#allocation3 + $0xc8] sm:$0x1] %v530_v37  ;;  %v527_v61 = vsel %vm16779_vm5, 0, %v526_v11  ;;  %v5155_v9 = vadd.f32 %v18381_v40, %v4704_v19  ;;  %v20829_v48 = vld [vmem:[#allocation27_spill] sm:$0xff] }
 0x28c   : > { %v18536_v56 = vadd.f32 %v15391_v32, %v4732_v43  ;;  %v4124_v43 = vadd.f32 %v18279_v8, %v3306_v17  ;;  %v4707_v14 = vadd.f32 %v18362_v13, %v18233_v46  ;;  %v5970_v47 = vadd.f32 %v5843_v24, %v5152_v33  ;;  %528 = vst [vmem:[#allocation3 + $0xbc] sm:$0x1] %v527_v61 }
 0x28d   : > { %v5140_v57 = vpop.f32.mrf.mxu0  ;;  %v4128_v45 = vadd.f32 %v18300_v36, %v3310_v50  ;;  %v4132_v30 = vadd.f32 %v18336_v58, %v3314_v23  ;;  %v4705_v51 = vadd.f32 %v18370_v29, %v18240_v55  ;;  %v4706_v2 = vadd.f32 %v18383_v44, %v4112_v59  ;;  %v5859_v8 = vpop.f32.mrf.mxu1  ;;  %v18562_v29 = vld [vmem:[#allocation13 + $0x1] ss:$0 sm:$0xff]  ;;  %v20831_v50 = vld [vmem:[#allocation33_spill] sm:$0xff] }
 0x28e   : > { %v5153_v40 = vadd.f32 %v18387_v6, %v4702_v62  ;;  %v4710_v10 = vadd.f32 %v18402_v5, %v4116_v3  ;;  %v5973_v13 = vadd.f32 %v15411_v52, %v5155_v9  ;;  %v4136_v24 = vadd.f32 %v18360_v34, %v3318_v54  ;;  %v20830_v52 = vld [vmem:[#allocation19_spill] sm:$0xff]  ;;  %v20832_v62 = vld [vmem:[#allocation66_spill] sm:$0xff] }
 0x28f   : > { %v15458_v38 = vpop.f32.mrf.mxu0  ;;  %v4714_v36 = vadd.f32 %v18418_v28, %v4120_v22  ;;  %v4718_v58 = vadd.f32 %v18433_v12, %v4124_v43  ;;  %v4722_v55 = vadd.f32 %v18448_v20, %v4128_v45  ;;  %v15415_v63 = vpop.f32.mrf.mxu1  ;;  %v5158_v41 = vadd.f32 %v20826_v25, %v4707_v14  ;;  %v20834_v22 = vld [vmem:[#allocation43_spill] sm:$0xff]  ;;  %v20835_v14 = vld [vmem:[#allocation38_spill] sm:$0xff] }
 0x290   : > { %v6566_v46 = vadd.f32 %v15458_v38, %v5972_v1  ;;  %v5971_v5 = vadd.f32 %v5846_v35, %v5153_v40  ;;  %v5156_v59 = vadd.f32 %v20827_v27, %v4705_v51  ;;  %v5157_v34 = vadd.f32 %v18406_v53, %v4706_v2  ;;  %v20833_v53 = vld [vmem:[#allocation71_spill] sm:$0xff] }
 0x291   : > { %v6437_v44 = vpop.f32.mrf.mxu0  ;;  %v4726_v28 = vadd.f32 %v20828_v16, %v4132_v30  ;;  %v4730_v12 = vadd.f32 %v20829_v48, %v4136_v24  ;;  %v5862_v20 = vpop.f32.mrf.mxu1  ;;  %v18571_v17 = vadd.f32 %v20830_v52, %v4710_v10  ;;  %v18576_v23 = vadd.f32 %v20831_v50, %v4714_v36  ;;  %v20837_v24 = vld [vmem:[#allocation42_spill] sm:$0xff] }
 0x292   : > { %v6667_v6 = vmul.f32 %v18554_v0, %v6566_v46  ;;  %v6564_v42 = vadd.f32 %v6437_v44, %v5970_v47  ;;  %v18579_v32 = vadd.f32 %v20832_v62, %v4718_v58  ;;  %v18582_v35 = vadd.f32 %v20833_v53, %v4722_v55  ;;  %v20836_v46 = vld [vmem:[#allocation40_spill] sm:$0xff] }
 0x293   : > { %v15459_v21 = vpop.f32.mrf.mxu0  ;;  %v5976_v26 = vadd.f32 %v15414_v7, %v5158_v41  ;;  %v15418_v33 = vpop.f32.mrf.mxu1  ;;  %v18587_v54 = vadd.f32 %v20834_v22, %v4726_v28  ;;  %v18589_v61 = vadd.f32 %v5140_v57, %v4730_v12  ;;  %v5974_v9 = vadd.f32 %v5859_v8, %v5156_v59  ;;  %v7190_v28 = vld [vmem:[#allocation3 + $0x18] sm:$0xf]  ;;  %v7183_v53 = vld [vmem:[#allocation3 + $0xc] sm:$0xf] }
 0x294   : > { %v6704_v15 = vadd.f32 %v18562_v29, %v6667_v6  ;;  %v6665_v19 = vmul.f32 %v18554_v0, %v6564_v42  ;;  %v6567_v60 = vadd.f32 %v15459_v21, %v5973_v13  ;;  %v5977_v47 = vadd.f32 %v15415_v63, %v20835_v14  ;;  %v20838_v42 = vld [vmem:[#allocation45_spill] sm:$0xff]  ;;  %v7194_v14 = vld [vmem:[#allocation3 + $0x20] sm:$0x1] }
 0x295   : > { %v6440_v31 = vpop.f32.mrf.mxu0  ;;  %v5875_v45 = vpop.f32.mrf.mxu1  ;;  %v5975_v10 = vadd.f32 %v5862_v20, %v5157_v34  ;;  %v18595_v13 = vadd.f32 %v15418_v33, %v20836_v46 }
 0x296   : > { %v6736_v1 = vmax.f32 %v6704_v15, 0.0  ;;  %v6702_v37 = vadd.f32 %v18562_v29, %v6665_v19  ;;  %v6668_v11 = vmul.f32 %v18554_v0, %v6567_v60  ;;  %v6565_v3 = vadd.f32 %v6440_v31, %v5971_v5 }
 0x297   : > { %v15462_v43 = vpop.f32.mrf.mxu0  ;;  %v18598_v57 = vadd.f32 %v5875_v45, %v20837_v24  ;;  %v15419_v36 = vpop.f32.mrf.mxu1 }
 0x298   : > { %v14442_v30 = vpack.c.bf16 %v6736_v1, %v6736_v1  ;;  %v6734_v51 = vmax.f32 %v6702_v37, 0.0  ;;  %v6705_v7 = vadd.f32 %v18562_v29, %v6668_v11  ;;  %v6666_v2 = vmul.f32 %v18554_v0, %v6565_v3 }
 0x299   : > { %v6570_v38 = vadd.f32 %v15462_v43, %v5976_v26  ;;  %v6453_v40 = vpop.f32.mrf.mxu0  ;;  %v18603_v5 = vadd.f32 %v15419_v36, %v20838_v42  ;;  %v18607_v15 = vpop.f32.mrf.mxu1 }
 0x29a   : > { %v6880_v8 = vshrl.u32 %v14442_v30, 16  ;;  %v6883_v58 = vshll.u32 %v14442_v30, 16  ;;  %v14440_v55 = vpack.c.bf16 %v6734_v51, %v6734_v51  ;;  %v6737_v44 = vmax.f32 %v6705_v7, 0.0 }
 0x29b   : > { %v6703_v63 = vadd.f32 %v18562_v29, %v6666_v2  ;;  %v6671_v25 = vmul.f32 %v18554_v0, %v6570_v38  ;;  %v6568_v41 = vadd.f32 %v6453_v40, %v5974_v9  ;;  %v15463_v6 = vpop.f32.mrf.mxu0 }
 0x29c   : > { %v6882_v27 = vrot.slane %v6880_v8, 7  ;;  %v6863_v59 = vshrl.u32 %v14440_v55, 16  ;;  %v6866_v34 = vshll.u32 %v14440_v55, 16  ;;  %v14443_v16 = vpack.c.bf16 %v6737_v44, %v6737_v44 }
 0x29d   : > { %v6735_v48 = vmax.f32 %v6703_v63, 0.0  ;;  %v6708_v12 = vadd.f32 %v18562_v29, %v6671_v25  ;;  %v6669_v21 = vmul.f32 %v18554_v0, %v6568_v41  ;;  %v6571_v20 = vadd.f32 %v15463_v6, %v5977_v47  ;;  %v6456_v52 = vpop.f32.mrf.mxu0  ;;  %v7187_v6 = vld [vmem:[#allocation3 + $0x14] sm:$0x1] }
 0x29e   : > { %v6885_v19 = vor.u32 %v6883_v58, %v6882_v27  ;;  %v6886_v60 = vrot.slane %v6882_v27, 4  ;;  %v6865_v50 = vrot.slane %v6863_v59, 7  ;;  %v6888_v62 = vshrl.u32 %v14443_v16, 16  ;;  %v15422_v2 = vpop.f32.mrf.mxu1 }
 0x29f   : > { %v6891_v31 = vshll.u32 %v14443_v16, 16  ;;  %v14441_v26 = vpack.c.bf16 %v6735_v48, %v6735_v48  ;;  %v6740_v33 = vmax.f32 %v6708_v12, 0.0  ;;  %v6706_v1 = vadd.f32 %v18562_v29, %v6669_v21  ;;  %v15466_v37 = vpop.f32.mrf.mxu0  ;;  %v7204_v21 = vld [vmem:[#allocation3 + $0x30] sm:$0xf] }
 0x2a0   : > { %v7191_v3 = vsel %vm16801_vm8, %v6885_v19, %v7190_v28  ;;  %v6868_v22 = vor.u32 %v6866_v34, %v6865_v50  ;;  %v6869_v43 = vrot.slane %v6865_v50, 4  ;;  %v6890_v9 = vrot.slane %v6888_v62, 7  ;;  %v18620_v59 = vpop.f32.mrf.mxu1 }
 0x2a1   : > { %7192 = vst [vmem:[#allocation3 + $0x18] sm:$0xf] %v7191_v3  ;;  %v6871_v47 = vshrl.u32 %v14441_v26, 16  ;;  %v6874_v45 = vshll.u32 %v14441_v26, 16  ;;  %v14446_v30 = vpack.c.bf16 %v6740_v33, %v6740_v33  ;;  %v6738_v51 = vmax.f32 %v6706_v1, 0.0  ;;  %v6469_v7 = vpop.f32.mrf.mxu0 }
 0x2a2   : > { %v7184_v38 = vsel %vm16801_vm8, %v6868_v22, %v7183_v53  ;;  %v6893_v40 = vor.u32 %v6891_v31, %v6890_v9  ;;  %v6895_v46 = vrot.slane %v6890_v9, 4  ;;  %v6672_v24 = vmul.f32 %v18554_v0, %v6571_v20  ;;  %v18632_v22 = vpop.f32.mrf.mxu1 }
 0x2a3   : > { %7185 = vst [vmem:[#allocation3 + $0xc] sm:$0xf] %v7184_v38  ;;  %v6873_v36 = vrot.slane %v6871_v47, 7  ;;  %v6914_v8 = vshrl.u32 %v14446_v30, 16  ;;  %v6917_v58 = vshll.u32 %v14446_v30, 16  ;;  %v14444_v55 = vpack.c.bf16 %v6738_v51, %v6738_v51  ;;  %v15467_v44 = vpop.f32.mrf.mxu0 }
 0x2a4   : > { %v6894_v25 = vsel %vm16795_vm7, %v6886_v60, %v6893_v40  ;;  %v7195_v41 = vsel %vm16769_vm3, %v6895_v46, %v7194_v14  ;;  %v6709_v42 = vadd.f32 %v18562_v29, %v6672_v24  ;;  %v6569_v27 = vadd.f32 %v6456_v52, %v5975_v10 }
 0x2a5   : > { %7193 = vst [vmem:[#allocation3 + $0x1c] sm:$0xf] %v6894_v25  ;;  %7196 = vst [vmem:[#allocation3 + $0x20] sm:$0x1] %v7195_v41  ;;  %v6876_v34 = vor.u32 %v6874_v45, %v6873_v36  ;;  %v6878_v16 = vrot.slane %v6873_v36, 4  ;;  %v6916_v28 = vrot.slane %v6914_v8, 7  ;;  %v6472_v12 = vpop.f32.mrf.mxu0  ;;  %v6574_v50 = vadd.f32 %v15466_v37, %v18595_v13  ;;  %v18650_v8 = vpop.f32.mrf.mxu1 }
 0x2a6   : > { %v6897_v48 = vshrl.u32 %v14444_v55, 16  ;;  %v6900_v20 = vshll.u32 %v14444_v55, 16  ;;  %v6741_v19 = vmax.f32 %v6709_v42, 0.0  ;;  %v6670_v60 = vmul.f32 %v18554_v0, %v6569_v27  ;;  %v7197_v37 = vld [vmem:[#allocation3 + $0x24] sm:$0xf] }
 0x2a7   : > { %v6877_v62 = vsel %vm16795_vm7, %v6869_v43, %v6876_v34  ;;  %v7188_v10 = vsel %vm16769_vm3, %v6878_v16, %v7187_v6  ;;  %v6919_v52 = vor.u32 %v6917_v58, %v6916_v28  ;;  %v6920_v53 = vrot.slane %v6916_v28, 4  ;;  %v15470_v3 = vpop.f32.mrf.mxu0  ;;  %v7208_v58 = vld [vmem:[#allocation3 + $0x38] sm:$0x1]  ;;  %v16219_v16 = vld [vmem:[#allocation10 + $0xb0] sm:$0xff]  }
 0x2a8   : > { %7186 = vst [vmem:[#allocation3 + $0x10] sm:$0xf] %v6877_v62  ;;  %7189 = vst [vmem:[#allocation3 + $0x14] sm:$0x1] %v7188_v10  ;;  %v18628_v31 = vrot.slane %v6897_v48, 7  ;;  %v14447_v26 = vpack.c.bf16 %v6741_v19, %v6741_v19  ;;  %v6707_v33 = vadd.f32 %v18562_v29, %v6670_v60  ;;  %v6675_v1 = vmul.f32 %v18554_v0, %v6574_v50 }
 0x2a9   : > { %v7205_v13 = vsel %vm16801_vm8, %v6919_v52, %v7204_v21  ;;  %v6572_v43 = vadd.f32 %v6469_v7, %v18598_v57  ;;  %v6575_v9 = vadd.f32 %v15467_v44, %v18603_v5  ;;  %v5979_v14 = vadd.f32 %v18607_v15, %v18571_v17  ;;  %v20841_v17 = vld [vmem:[#allocation58_spill] sm:$0xff]  ;;  %v18648_v36 = vpop.f32.mrf.mxu0 }
 0x2aa   : > { %7206 = vst [vmem:[#allocation3 + $0x30] sm:$0xf] %v7205_v13  ;;  %v6902_v47 = vor.u32 %v6900_v20, %v18628_v31  ;;  %v6903_v45 = vrot.slane %v18628_v31, 4  ;;  %v6922_v30 = vshrl.u32 %v14447_v26, 16  ;;  %v6925_v51 = vshll.u32 %v14447_v26, 16 }
 0x2ab   : > { %v6739_v38 = vmax.f32 %v6707_v33, 0.0  ;;  %v6712_v40 = vadd.f32 %v18562_v29, %v6675_v1  ;;  %v6673_v46 = vmul.f32 %v18554_v0, %v6572_v43  ;;  %v6676_v24 = vmul.f32 %v18554_v0, %v6575_v9  ;;  %v15471_v62 = vpop.f32.mrf.mxu0  ;;  %v18660_v10 = vpop.f32.mrf.mxu1  ;;  %v7201_v13 = vld [vmem:[#allocation3 + $0x2c] sm:$0x1]  ;;  %v20842_v9 = vld [vmem:[#allocation30_spill] sm:$0xff] }
 0x2ac   : > { %v7198_v57 = vsel %vm16801_vm8, %v6902_v47, %v7197_v37  ;;  %v6924_v5 = vrot.slane %v6922_v30, 7  ;;  %v6573_v7 = vadd.f32 %v6472_v12, %v5979_v14  ;;  %v5984_v15 = vadd.f32 %v15422_v2, %v20841_v17  ;;  %v16213_v52 = vld [vmem:[#allocation3 + $0x18] sm:$0xff]   ;;  %v20843_v47 = vld [vmem:[#allocation41_spill] sm:$0xff] }
 0x2ad   : > { %7199 = vst [vmem:[#allocation3 + $0x24] sm:$0xf] %v7198_v57  ;;  %v14445_v55 = vpack.c.bf16 %v6739_v38, %v6739_v38  ;;  %v6744_v44 = vmax.f32 %v6712_v40, 0.0  ;;  %v6710_v25 = vadd.f32 %v18562_v29, %v6673_v46  ;;  %v6713_v41 = vadd.f32 %v18562_v29, %v6676_v24  ;;  %v7218_v40 = vld [vmem:[#allocation3 + $0x48] sm:$0xf]  ;;  %v16223_v24 = vld [vmem:[#allocation10 + $0xa8] sm:$0xff]  }
 0x2ae   : > { %v6927_v6 = vor.u32 %v6925_v51, %v6924_v5  ;;  %v6929_v42 = vrot.slane %v6924_v5, 4  ;;  %v6674_v27 = vmul.f32 %v18554_v0, %v6573_v7  ;;  %v6578_v34 = vadd.f32 %v15470_v3, %v5984_v15  ;;  %v6488_v15 = vpop.f32.mrf.mxu0 }
 0x2af   : > { %v6905_v28 = vshrl.u32 %v14445_v55, 16  ;;  %v6908_v2 = vshll.u32 %v14445_v55, 16  ;;  %v14450_v48 = vpack.c.bf16 %v6744_v44, %v6744_v44  ;;  %v6742_v12 = vmax.f32 %v6710_v25, 0.0  ;;  %v16212_v21 = vld [vmem:[#allocation3 + $0xc] sm:$0xff]  }
 0x2b0   : > { %v6928_v20 = vsel %vm16795_vm7, %v6920_v53, %v6927_v6  ;;  %v7209_v19 = vsel %vm16769_vm3, %v6929_v42, %v7208_v58  ;;  %v6745_v60 = vmax.f32 %v6713_v41, 0.0  ;;  %v6711_v50 = vadd.f32 %v18562_v29, %v6674_v27  ;;  %15505 = vmatmul.mubr.bf16.vlgmr.msra.gmra.mxu1 %v16212_v21  ;;  %v5907_v58 = vpop.f32.mrf.mxu1  ;;  %v7211_v41 = vld [vmem:[#allocation3 + $0x3c] sm:$0xf]  ;;  %v7222_v27 = vld [vmem:[#allocation3 + $0x50] sm:$0x1] }
 0x2b1   : > { %7207 = vst [vmem:[#allocation3 + $0x34] sm:$0xf] %v6928_v20  ;;  %7210 = vst [vmem:[#allocation3 + $0x38] sm:$0x1] %v7209_v19  ;;  %v6907_v26 = vrot.slane %v6905_v28, 7  ;;  %v6948_v33 = vshrl.u32 %v14450_v48, 16  ;;  %v14448_v3 = vpack.c.bf16 %v6742_v12, %v6742_v12  ;;  %v6679_v43 = vmul.f32 %v18554_v0, %v6578_v34  ;;  %15508 = vmatprep.mubr.bf16.mxu1 %v16213_v52  ;;  %v15474_v52 = vpop.f32.mrf.mxu0 }
 0x2b2   : > { %v6951_v1 = vshll.u32 %v14450_v48, 16  ;;  %v14451_v37 = vpack.c.bf16 %v6745_v60, %v6745_v60  ;;  %v6743_v53 = vmax.f32 %v6711_v50, 0.0  ;;  %v5982_v14 = vadd.f32 %v18620_v59, %v20842_v9  ;;  %15585 = vmatpush3.bf16.msra.mxu1 %v20843_v47  ;;  %v20844_v48 = vld [vmem:[#allocation31_spill] sm:$0xff]  ;;  %v16227_v21 = vld [vmem:[#allocation10 + $0xa0] sm:$0xff]   ;;  %v16231_v47 = vld [vmem:[#allocation10 + $0x98] sm:$0xff]  }
 0x2b3   : > { %v6910_v30 = vor.u32 %v6908_v2, %v6907_v26  ;;  %v6912_v51 = vrot.slane %v6907_v26, 4  ;;  %v6950_v38 = vrot.slane %v6948_v33, 7  ;;  %v6931_v46 = vshrl.u32 %v14448_v3, 16  ;;  %15586 = vmatprep.subr.bf16.mxu1 %v16219_v16  ;;  %v15427_v26 = vpop.f32.mrf.mxu1 }
 0x2b4   : > { %v6934_v57 = vshll.u32 %v14448_v3, 16  ;;  %v6956_v5 = vshrl.u32 %v14451_v37, 16  ;;  %v6959_v7 = vshll.u32 %v14451_v37, 16  ;;  %v14449_v17 = vpack.c.bf16 %v6743_v53, %v6743_v53  ;;  %v7215_v37 = vld [vmem:[#allocation3 + $0x44] sm:$0x1] }
 0x2b5   : > { %v6911_v59 = vsel %vm16795_vm7, %v6903_v45, %v6910_v30  ;;  %v7202_v55 = vsel %vm16769_vm3, %v6912_v51, %v7201_v13  ;;  %v6953_v44 = vor.u32 %v6951_v1, %v6950_v38  ;;  %v6954_v25 = vrot.slane %v6950_v38, 4  ;;  %v20845_v38 = vld [vmem:[#allocation35_spill] sm:$0xff] }
 0x2b6   : > { %7200 = vst [vmem:[#allocation3 + $0x28] sm:$0xf] %v6911_v59  ;;  %7203 = vst [vmem:[#allocation3 + $0x2c] sm:$0x1] %v7202_v55  ;;  %v6933_v6 = vrot.slane %v6931_v46, 7  ;;  %v6958_v42 = vrot.slane %v6956_v5, 7  ;;  %15587 = vmatpush3.bf16.msra.mxu1 %v16219_v16  ;;  %v6716_v2 = vadd.f32 %v18562_v29, %v6679_v43  ;;  %v6576_v45 = vadd.f32 %v18648_v36, %v5982_v14 }
 0x2b7   : > { %v6939_v34 = vshrl.u32 %v14449_v17, 16  ;;  %v6942_v28 = vshll.u32 %v14449_v17, 16  ;;  %v7219_v31 = vsel %vm16801_vm8, %v6953_v44, %v7218_v40  ;;  %v5985_v12 = vadd.f32 %v18632_v22, %v20844_v48  ;;  %15588 = vmatprep.subr.bf16.mxu1 %v16223_v24  ;;  %v20846_v46 = vld [vmem:[#allocation64_spill] sm:$0xff] }
 0x2b8   : > { %7220 = vst [vmem:[#allocation3 + $0x48] sm:$0xf] %v7219_v31  ;;  %v6936_v20 = vor.u32 %v6934_v57, %v6933_v6  ;;  %v6937_v19 = vrot.slane %v6933_v6, 4  ;;  %v6961_v60 = vor.u32 %v6959_v7, %v6958_v42  ;;  %v6963_v50 = vrot.slane %v6958_v42, 4  ;;  %v20847_v6 = vld [vmem:[#allocation65_spill] sm:$0xff] }
 0x2b9   : > { %v6941_v16 = vrot.slane %v6939_v34, 7  ;;  %v6748_v33 = vmax.f32 %v6716_v2, 0.0  ;;  %v6677_v1 = vmul.f32 %v18554_v0, %v6576_v45  ;;  %v6579_v3 = vadd.f32 %v15471_v62, %v5985_v12  ;;  %v16235_v34 = vld [vmem:[#allocation10 + $0x90] sm:$0xff]  }
 0x2ba   : > { %v7212_v36 = vsel %vm16801_vm8, %v6936_v20, %v7211_v41  ;;  %v6962_v22 = vsel %vm16795_vm7, %v6954_v25, %v6961_v60  ;;  %v7223_v13 = vsel %vm16769_vm3, %v6963_v50, %v7222_v27  ;;  %v5983_v53 = vadd.f32 %v18650_v8, %v18576_v23  ;;  %15589 = vmatpush3.bf16.msra.mxu1 %v16223_v24  ;;  %v6501_v23 = vpop.f32.mrf.mxu0  ;;  %v5910_v8 = vpop.f32.mrf.mxu1 }
 0x2bb   : > { %7213 = vst [vmem:[#allocation3 + $0x3c] sm:$0xf] %v7212_v36  ;;  %7221 = vst [vmem:[#allocation3 + $0x4c] sm:$0xf] %v6962_v22  ;;  %v6944_v43 = vor.u32 %v6942_v28, %v6941_v16  ;;  %v6946_v9 = vrot.slane %v6941_v16, 4  ;;  %v14454_v62 = vpack.c.bf16 %v6748_v33, %v6748_v33  ;;  %v6714_v14 = vadd.f32 %v18562_v29, %v6677_v1  ;;  %v16239_v36 = vld [vmem:[#allocation10 + $0x88] sm:$0xff]  }
 0x2bc   : > { %7224 = vst [vmem:[#allocation3 + $0x50] sm:$0x1] %v7223_v13  ;;  %15590 = vmatprep.subr.bf16.mxu1 %v16227_v21  ;;  %v6680_v30 = vmul.f32 %v18554_v0, %v6579_v3  ;;  %v6577_v51 = vadd.f32 %v6488_v15, %v5983_v53  ;;  %v5988_v40 = vadd.f32 %v18660_v10, %v20845_v38  ;;  %v7232_v28 = vld [vmem:[#allocation3 + $0x60] sm:$0xf]  ;;  %v15475_v12 = vpop.f32.mrf.mxu0  ;;  %v7225_v13 = vld [vmem:[#allocation3 + $0x54] sm:$0xf] }
 0x2bd   : > { %v5986_v57 = vadd.f32 %v5907_v58, %v20846_v46  ;;  %v6945_v24 = vsel %vm16795_vm7, %v6937_v19, %v6944_v43  ;;  %v7216_v5 = vsel %vm16769_vm3, %v6946_v9, %v7215_v37  ;;  %v6982_v7 = vshrl.u32 %v14454_v62, 16  ;;  %v16216_v59 = vld [vmem:[#allocation3 + $0x24] sm:$0xff]   ;;  %v16217_v58 = vld [vmem:[#allocation3 + $0x30] sm:$0xff]  }
 0x2be   : > { %v6985_v17 = vshll.u32 %v14454_v62, 16  ;;  %7214 = vst [vmem:[#allocation3 + $0x40] sm:$0xf] %v6945_v24  ;;  %7217 = vst [vmem:[#allocation3 + $0x44] sm:$0x1] %v7216_v5  ;;  %v6746_v55 = vmax.f32 %v6714_v14, 0.0  ;;  %v6717_v15 = vadd.f32 %v18562_v29, %v6680_v30  ;;  %v6678_v10 = vmul.f32 %v18554_v0, %v6577_v51  ;;  %15591 = vmatpush3.bf16.msra.mxu1 %v16227_v21  ;;  %v6504_v9 = vpop.f32.mrf.mxu0  ;;  %v15430_v62 = vpop.f32.mrf.mxu1 }
 0x2bf   : > { %v6582_v44 = vadd.f32 %v15474_v52, %v5988_v40  ;;  %v18698_v25 = vrot.slane %v6982_v7, 7  ;;  %v6580_v41 = vadd.f32 %v6501_v23, %v5986_v57  ;;  %v5989_v42 = vadd.f32 %v15427_v26, %v20847_v6  ;;  %15509 = vmatmul.mubr.bf16.gmra.mxu1 %v16216_v59  ;;  %15592 = vmatprep.subr.bf16.mxu1 %v16231_v47  ;;  %v7236_v24 = vld [vmem:[#allocation3 + $0x68] sm:$0x1]  ;;  %v7229_v6 = vld [vmem:[#allocation3 + $0x5c] sm:$0x1] }
 0x2c0   : > { %v5987_v27 = vadd.f32 %v5910_v8, %v18579_v32  ;;  %v14452_v31 = vpack.c.bf16 %v6746_v55, %v6746_v55  ;;  %v6749_v2 = vmax.f32 %v6717_v15, 0.0  ;;  %v6715_v45 = vadd.f32 %v18562_v29, %v6678_v10  ;;  %15512 = vmatprep.mubr.bf16.mxu1 %v16217_v58  ;;  %v16242_v55 = vld [vmem:[#allocation10 + $0x80] sm:$0xff]  }
 0x2c1   : > { %v6683_v48 = vmul.f32 %v18554_v0, %v6582_v44  ;;  %v6987_v21 = vor.u32 %v6985_v17, %v18698_v25  ;;  %v6988_v20 = vrot.slane %v18698_v25, 4  ;;  %v6681_v19 = vmul.f32 %v18554_v0, %v6580_v41  ;;  %v15478_v25 = vpop.f32.mrf.mxu0  ;;  %v5923_v41 = vpop.f32.mrf.mxu1 }
 0x2c2   : > { %v6583_v60 = vadd.f32 %v15475_v12, %v5989_v42  ;;  %v6965_v32 = vshrl.u32 %v14452_v31, 16  ;;  %v6968_v50 = vshll.u32 %v14452_v31, 16  ;;  %v14455_v52 = vpack.c.bf16 %v6749_v2, %v6749_v2  ;;  %15593 = vmatpush3.bf16.msra.mxu1 %v16231_v47  ;;  %v16221_v8 = vld [vmem:[#allocation3 + $0x48] sm:$0xff]  }
 0x2c3   : > { %v6747_v26 = vmax.f32 %v6715_v45, 0.0  ;;  %v7233_v16 = vsel %vm16801_vm8, %v6987_v21, %v7232_v28  ;;  %v6720_v33 = vadd.f32 %v18562_v29, %v6683_v48  ;;  %v6718_v1 = vadd.f32 %v18562_v29, %v6681_v19  ;;  %15594 = vmatprep.subr.bf16.mxu1 %v16235_v34 }
 0x2c4   : > { %v6684_v3 = vmul.f32 %v18554_v0, %v6583_v60  ;;  %7234 = vst [vmem:[#allocation3 + $0x60] sm:$0xf] %v7233_v16  ;;  %v6967_v22 = vrot.slane %v6965_v32, 7  ;;  %v6990_v37 = vshrl.u32 %v14455_v52, 16  ;;  %v6993_v53 = vshll.u32 %v14455_v52, 16  ;;  %v16245_v32 = vld [vmem:[#allocation10 + $0x138] sm:$0xff]  }
 0x2c5   : > { %v14453_v43 = vpack.c.bf16 %v6747_v26, %v6747_v26  ;;  %v6752_v14 = vmax.f32 %v6720_v33, 0.0  ;;  %v6750_v47 = vmax.f32 %v6718_v1, 0.0  ;;  %v6581_v51 = vadd.f32 %v6504_v9, %v5987_v27  ;;  %v16220_v38 = vld [vmem:[#allocation3 + $0x3c] sm:$0xff]   ;;  %v7246_v52 = vld [vmem:[#allocation3 + $0x78] sm:$0xf]  ;;  %v20849_v1 = vld [vmem:[#allocation68_spill] sm:$0xff] }
 0x2c6   : > { %v6721_v30 = vadd.f32 %v18562_v29, %v6684_v3  ;;  %v6970_v40 = vor.u32 %v6968_v50, %v6967_v22  ;;  %v6971_v46 = vrot.slane %v6967_v22, 4  ;;  %v6992_v57 = vrot.slane %v6990_v37, 7  ;;  %15595 = vmatpush3.bf16.msra.mxu1 %v16235_v34  ;;  %v7239_v26 = vld [vmem:[#allocation3 + $0x6c] sm:$0xf]  ;;  %v20848_v16 = vld [vmem:[#allocation67_spill] sm:$0xff]  ;;  %v15431_v22 = vpop.f32.mrf.mxu1 }
 0x2c7   : > { %v6973_v23 = vshrl.u32 %v14453_v43, 16  ;;  %v6976_v5 = vshll.u32 %v14453_v43, 16  ;;  %v14458_v7 = vpack.c.bf16 %v6752_v14, %v6752_v14  ;;  %v14456_v17 = vpack.c.bf16 %v6750_v47, %v6750_v47  ;;  %15513 = vmatmul.mubr.bf16.gmra.mxu1 %v16220_v38  ;;  %15596 = vmatprep.subr.bf16.mxu1 %v16239_v36  ;;  %v7779_v9 = vld [vmem:[#allocation3 + $0xc] sm:$0xf]  ;;  %v7780_v38 = vld [vmem:[#allocation3 + $0x10] sm:$0xf] }
 0x2c8   : > { %v6753_v59 = vmax.f32 %v6721_v30, 0.0  ;;  %v7226_v15 = vsel %vm16801_vm8, %v6970_v40, %v7225_v13  ;;  %v6995_v10 = vor.u32 %v6993_v53, %v6992_v57  ;;  %v6997_v44 = vrot.slane %v6992_v57, 4  ;;  %15516 = vmatprep.mubr.bf16.mxu1 %v16221_v8  ;;  %v20850_v57 = vld [vmem:[#allocation70_spill] sm:$0xff] }
 0x2c9   : > { %v6975_v58 = vrot.slane %v6973_v23, 7  ;;  %7227 = vst [vmem:[#allocation3 + $0x54] sm:$0xf] %v7226_v15  ;;  %v7016_v42 = vshrl.u32 %v14458_v7, 16  ;;  %v7019_v27 = vshll.u32 %v14458_v7, 16  ;;  %v6999_v34 = vshrl.u32 %v14456_v17, 16 }
 0x2ca   : > { %v7002_v28 = vshll.u32 %v14456_v17, 16  ;;  %v6996_v31 = vsel %vm16795_vm7, %v6988_v20, %v6995_v10  ;;  %v7237_v2 = vsel %vm16769_vm3, %v6997_v44, %v7236_v24  ;;  %15597 = vmatpush3.bf16.msra.mxu1 %v16239_v36  ;;  %v14459_v19 = vpack.c.bf16 %v6753_v59, %v6753_v59  ;;  %v6517_v36 = vpop.f32.mrf.mxu0  ;;  %v7250_v59 = vld [vmem:[#allocation3 + $0x80] sm:$0x1] }
 0x2cb   : > { %v6978_v45 = vor.u32 %v6976_v5, %v6975_v58  ;;  %v6980_v48 = vrot.slane %v6975_v58, 4  ;;  %7235 = vst [vmem:[#allocation3 + $0x64] sm:$0xf] %v6996_v31  ;;  %7238 = vst [vmem:[#allocation3 + $0x68] sm:$0x1] %v7237_v2  ;;  %v7018_v12 = vrot.slane %v7016_v42, 7  ;;  %v6682_v60 = vmul.f32 %v18554_v0, %v6581_v51  ;;  %15598 = vmatprep.subr.bf16.mxu1 %v16242_v55 }
 0x2cc   : > { %v18719_v21 = vrot.slane %v6999_v34, 7  ;;  %v5992_v33 = vadd.f32 %v15430_v62, %v20848_v16  ;;  %v5990_v3 = vadd.f32 %v5923_v41, %v20849_v1  ;;  %v7024_v14 = vshrl.u32 %v14459_v19, 16  ;;  %v15479_v7 = vpop.f32.mrf.mxu0  ;;  %v7781_v34 = vld [vmem:[#allocation3 + $0x14] sm:$0x1] }
 0x2cd   : > { %v6979_v50 = vsel %vm16795_vm7, %v6971_v46, %v6978_v45  ;;  %v7230_v20 = vsel %vm16769_vm3, %v6980_v48, %v7229_v6  ;;  %v7021_v13 = vor.u32 %v7019_v27, %v7018_v12  ;;  %v7022_v37 = vrot.slane %v7018_v12, 4 }
 0x2ce   : > { %7228 = vst [vmem:[#allocation3 + $0x58] sm:$0xf] %v6979_v50  ;;  %7231 = vst [vmem:[#allocation3 + $0x5c] sm:$0x1] %v7230_v20  ;;  %v7004_v53 = vor.u32 %v7002_v28, %v18719_v21  ;;  %v7005_v43 = vrot.slane %v18719_v21, 4  ;;  %v7027_v47 = vshll.u32 %v14459_v19, 16  ;;  %v6719_v30 = vadd.f32 %v18562_v29, %v6682_v60  ;;  %15599 = vmatpush3.bf16.msra.mxu1 %v16242_v55 }
 0x2cf   : > { %v6586_v51 = vadd.f32 %v15478_v25, %v5992_v33  ;;  %v7247_v62 = vsel %vm16801_vm8, %v7021_v13, %v7246_v52  ;;  %v6584_v46 = vadd.f32 %v6517_v36, %v5990_v3  ;;  %v5993_v23 = vadd.f32 %v15431_v22, %v20850_v57  ;;  %15680 = vmatprep.subr.bf16.mxu1 %v16245_v32  ;;  %v5926_v52 = vpop.f32.mrf.mxu1  ;;  %v7243_v33 = vld [vmem:[#allocation3 + $0x74] sm:$0x1]  ;;  %v6520_v57 = vpop.f32.mrf.mxu0 }
 0x2d0   : > { %v7240_v40 = vsel %vm16801_vm8, %v7004_v53, %v7239_v26  ;;  %7248 = vst [vmem:[#allocation3 + $0x78] sm:$0xf] %v7247_v62  ;;  %v7026_v8 = vrot.slane %v7024_v14, 7  ;;  %v6751_v24 = vmax.f32 %v6719_v30, 0.0  ;;  %v7849_v17 = vshrl.u32 %v7779_v9, 16 }
 0x2d1   : > { %7241 = vst [vmem:[#allocation3 + $0x6c] sm:$0xf] %v7240_v40  ;;  %v6687_v5 = vmul.f32 %v18554_v0, %v6586_v51  ;;  %v6685_v55 = vmul.f32 %v18554_v0, %v6584_v46  ;;  %v6587_v15 = vadd.f32 %v15479_v7, %v5993_v23  ;;  %v7852_v10 = vshll.u32 %v7779_v9, 16  ;;  %v7782_v23 = vld [vmem:[#allocation3 + $0x18] sm:$0xf] }
 0x2d2   : > { %v7858_v44 = vshll.u32 %v7780_v38, 16  ;;  %v7029_v58 = vor.u32 %v7027_v47, %v7026_v8  ;;  %v7031_v25 = vrot.slane %v7026_v8, 4  ;;  %v14457_v41 = vpack.c.bf16 %v6751_v24, %v6751_v24  ;;  %v16225_v26 = vld [vmem:[#allocation3 + $0x60] sm:$0xff]   ;;  %v15434_v8 = vpop.f32.mrf.mxu1 }
 0x2d3   : > { %v6724_v6 = vadd.f32 %v18562_v29, %v6687_v5  ;;  %v6722_v42 = vadd.f32 %v18562_v29, %v6685_v55  ;;  %v6688_v27 = vmul.f32 %v18554_v0, %v6587_v15  ;;  %v7851_v28 = vrot.slane %v7849_v17, 4  ;;  %v7260_v5 = vld [vmem:[#allocation3 + $0x90] sm:$0xf]  ;;  %v7253_v7 = vld [vmem:[#allocation3 + $0x84] sm:$0xf] }
 0x2d4   : > { %v7854_v31 = vrot.slane %v7852_v10, 5  ;;  %v7030_v2 = vsel %vm16795_vm7, %v7022_v37, %v7029_v58  ;;  %v7251_v45 = vsel %vm16769_vm3, %v7031_v25, %v7250_v59  ;;  %v7007_v48 = vshrl.u32 %v14457_v41, 16  ;;  %v7783_v58 = vld [vmem:[#allocation3 + $0x1c] sm:$0xf] }
 0x2d5   : > { %v7010_v12 = vshll.u32 %v14457_v41, 16  ;;  %v16224_v19 = vld [vmem:[#allocation3 + $0x54] sm:$0xff]   ;;  %7249 = vst [vmem:[#allocation3 + $0x7c] sm:$0xf] %v7030_v2  ;;  %7252 = vst [vmem:[#allocation3 + $0x80] sm:$0x1] %v7251_v45  ;;  %v6725_v50 = vadd.f32 %v18562_v29, %v6688_v27  ;;  %v5991_v21 = vadd.f32 %v5926_v52, %v18582_v35  ;;  %v5939_v2 = vpop.f32.mrf.mxu1 }
 0x2d6   : > { %v6756_v60 = vmax.f32 %v6724_v6, 0.0  ;;  %v6754_v32 = vmax.f32 %v6722_v42, 0.0  ;;  %v7855_v20 = vor.u32 %v7854_v31, %v7851_v28  ;;  %v7009_v16 = vrot.slane %v7007_v48, 7  ;;  %15517 = vmatmul.mubr.bf16.gmra.mxu1 %v16224_v19  ;;  %v15482_v31 = vpop.f32.mrf.mxu0  ;;  %v7264_v48 = vld [vmem:[#allocation3 + $0x98] sm:$0x1] }
 0x2d7   : > { %v7860_v1 = vrot.slane %v7858_v44, 5  ;;  %v7862_v3 = vshrl.u32 %v7780_v38, 16  ;;  %v7868_v36 = vshll.u32 %v7781_v34, 16  ;;  %v6757_v37 = vmax.f32 %v6725_v50, 0.0  ;;  %15520 = vmatprep.mubr.bf16.mxu1 %v16225_v26  ;;  %v7784_v50 = vld [vmem:[#allocation3 + $0x20] sm:$0x1] }
 0x2d8   : > { %v14462_v22 = vpack.c.bf16 %v6756_v60, %v6756_v60  ;;  %v14460_v13 = vpack.c.bf16 %v6754_v32, %v6754_v32  ;;  %v7856_v53 = vrot.slane %v7855_v20, 4  ;;  %v7012_v9 = vor.u32 %v7010_v12, %v7009_v16 }
 0x2d9   : > { %v7014_v14 = vrot.slane %v7009_v16, 4  ;;  %v7864_v47 = vrot.slane %v7862_v3, 4  ;;  %v7870_v30 = vrot.slane %v7868_v36, 5  ;;  %v14463_v17 = vpack.c.bf16 %v6757_v37, %v6757_v37  ;;  %v16222_v3 = vld [vmem:[#allocation10 + $0xf0] sm:$0xff]  }
 0x2da   : > { %v7050_v51 = vshrl.u32 %v14462_v22, 16  ;;  %v7053_v62 = vshll.u32 %v14462_v22, 16  ;;  %v7033_v40 = vshrl.u32 %v14460_v13, 16  ;;  %v7036_v46 = vshll.u32 %v14460_v13, 16 }
 0x2db   : > { %v7013_v38 = vsel %vm16795_vm7, %v7005_v43, %v7012_v9  ;;  %v7244_v24 = vsel %vm16769_vm3, %v7014_v14, %v7243_v33  ;;  %v7861_v55 = vsel %vm16984_vm14, %v7856_v53, %v7860_v1  ;;  %v7865_v44 = vor.u32 %v7864_v47, %v7860_v1  ;;  %v6533_v53 = vpop.f32.mrf.mxu0  ;;  %v15435_v9 = vpop.f32.mrf.mxu1  ;;  %v7785_v14 = vld [vmem:[#allocation3 + $0x24] sm:$0xf] }
 0x2dc   : > { %7242 = vst [vmem:[#allocation3 + $0x70] sm:$0xf] %v7013_v38  ;;  %7245 = vst [vmem:[#allocation3 + $0x74] sm:$0x1] %v7244_v24  ;;  %v7052_v15 = vrot.slane %v7050_v51, 7  ;;  %v18754_v10 = vrot.slane %v7033_v40, 7  ;;  %v6585_v19 = vadd.f32 %v6520_v57, %v5991_v21 }
 0x2dd   : > { %v7058_v25 = vshrl.u32 %v14463_v17, 16  ;;  %v7061_v43 = vshll.u32 %v14463_v17, 16  ;;  %v7873_v41 = vshrl.u32 %v7782_v23, 16  ;;  %v7876_v6 = vshll.u32 %v7782_v23, 16  ;;  %v20852_v57 = vld [vmem:[#allocation25_spill] sm:$0xff]  ;;  %v20853_v38 = vld [vmem:[#allocation44_spill] sm:$0xff] }
 0x2de   : > { %v7055_v42 = vor.u32 %v7053_v62, %v7052_v15  ;;  %v7056_v27 = vrot.slane %v7052_v15, 4  ;;  %v7038_v34 = vor.u32 %v7036_v46, %v18754_v10  ;;  %v7039_v28 = vrot.slane %v18754_v10, 4  ;;  %v20854_v15 = vld [vmem:[#allocation47_spill] sm:$0xff]  ;;  %v7786_v21 = vld [vmem:[#allocation3 + $0x28] sm:$0xf] }
 0x2df   : > { %v7060_v45 = vrot.slane %v7058_v25, 7  ;;  %v7866_v12 = vrot.slane %v7865_v44, 4  ;;  %v7875_v60 = vrot.slane %v7873_v41, 4  ;;  %v7878_v20 = vrot.slane %v7876_v6, 5  ;;  %v7274_v10 = vld [vmem:[#allocation3 + $0xa8] sm:$0xf] }
 0x2e0   : > { %v7261_v35 = vsel %vm16801_vm8, %v7055_v42, %v7260_v5  ;;  %v7254_v32 = vsel %vm16801_vm8, %v7038_v34, %v7253_v7  ;;  %v7882_v52 = vshll.u32 %v7783_v58, 16  ;;  %v6686_v1 = vmul.f32 %v18554_v0, %v6585_v19  ;;  %v16226_v5 = vld [vmem:[#allocation10 + $0xe8] sm:$0xff]  }
 0x2e1   : > { %7262 = vst [vmem:[#allocation3 + $0x90] sm:$0xf] %v7261_v35  ;;  %7255 = vst [vmem:[#allocation3 + $0x84] sm:$0xf] %v7254_v32  ;;  %v7063_v26 = vor.u32 %v7061_v43, %v7060_v45  ;;  %v7065_v16 = vrot.slane %v7060_v45, 4  ;;  %v7871_v33 = vsel %vm16984_vm14, %v7866_v12, %v7870_v30  ;;  %v7879_v22 = vor.u32 %v7878_v20, %v7875_v60 }
 0x2e2   : > { %v14135_v36 = vcombine.low %v7861_v55, %v7871_v33  ;;  %v7884_v13 = vrot.slane %v7882_v52, 5  ;;  %v7886_v37 = vshrl.u32 %v7783_v58, 16  ;;  %v6723_v62 = vadd.f32 %v18562_v29, %v6686_v1  ;;  %v16341_v55 = vld [vmem:[#allocation10 + $0xf8] sm:$0xff]   ;;  %v16229_v58 = vld [vmem:[#allocation3 + $0x78] sm:$0xff]  }
 0x2e3   : > { %v7064_v47 = vsel %vm16795_vm7, %v7056_v27, %v7063_v26  ;;  %v7265_v51 = vsel %vm16769_vm3, %v7065_v16, %v7264_v48  ;;  %v7892_v40 = vshll.u32 %v7784_v50, 16  ;;  %v16228_v30 = vld [vmem:[#allocation3 + $0x6c] sm:$0xff]   ;;  %v7880_v0 = vrot.slane %v7879_v22, 4  ;;  %v18776_v48 = vld [vmem:[#allocation13] ss:$0 sm:$0xff] }
 0x2e4   : > { %7263 = vst [vmem:[#allocation3 + $0x94] sm:$0xf] %v7064_v47  ;;  %7266 = vst [vmem:[#allocation3 + $0x98] sm:$0x1] %v7265_v51  ;;  %15553 = vmatmul.mubr.bf16.vlgmr.msra.gmra.mxu0 %v14135_v36  ;;  %v7888_v46 = vrot.slane %v7886_v37, 4  ;;  %v5996_v23 = vadd.f32 %v15434_v8, %v20852_v57  ;;  %v5994_v24 = vadd.f32 %v5939_v2, %v20853_v38  ;;  %v6755_v7 = vmax.f32 %v6723_v62, 0.0  ;;  %v15483_v8 = vpop.f32.mrf.mxu0  ;;  %v5942_v36 = vpop.f32.mrf.mxu1 }
 0x2e5   : > { %v7894_v17 = vrot.slane %v7892_v40, 5  ;;  %15633 = vmatpush3.bf16.msra.mxu0 %v16341_v55  ;;  %v5997_v44 = vadd.f32 %v15435_v9, %v20854_v15  ;;  %v7897_v29 = vshrl.u32 %v7785_v14, 16  ;;  %15521 = vmatmul.mubr.bf16.gmra.mxu1 %v16228_v30  ;;  %v7885_v25 = vsel %vm16984_vm14, %v7880_v0, %v7884_v13  ;;  %v7787_v50 = vld [vmem:[#allocation3 + $0x2c] sm:$0x1]  ;;  %v18783_v26 = vld [vmem:[#allocation13 + $0x1] ss:$0 sm:$0xff] }
 0x2e6   : > { %v7889_v43 = vor.u32 %v7888_v46, %v7884_v13  ;;  %v6590_v41 = vadd.f32 %v15482_v31, %v5996_v23  ;;  %v6588_v6 = vadd.f32 %v6533_v53, %v5994_v24  ;;  %15634 = vmatprep.subr.bf16.mxu0 %v16222_v3  ;;  %v14461_v42 = vpack.c.bf16 %v6755_v7, %v6755_v7  ;;  %v16230_v22 = vld [vmem:[#allocation10 + $0xe0] sm:$0xff]   ;;  %v6536_v7 = vpop.f32.mrf.mxu0  ;;  %v18790_v55 = vpop.f32.mrf.mxu1  ;;  %v16234_v15 = vld [vmem:[#allocation10 + $0xd8] sm:$0xff]  }
 0x2e7   : > { %v6591_v27 = vadd.f32 %v15483_v8, %v5997_v44  ;;  %v7899_v34 = vrot.slane %v7897_v29, 4  ;;  %v7900_v2 = vshll.u32 %v7785_v14, 16  ;;  %15524 = vmatprep.mubr.bf16.mxu1 %v16229_v58  ;;  %v7906_v60 = vshll.u32 %v7786_v21, 16  ;;  %v18801_v58 = vld [vmem:[#allocation3 + $0x34] sm:$0xf] }
 0x2e8   : > { %v7890_v45 = vrot.slane %v7889_v43, 4  ;;  %v6691_v12 = vmul.f32 %v18776_v48, %v6590_v41  ;;  %v6689_v19 = vmul.f32 %v18776_v48, %v6588_v6  ;;  %v7041_v35 = vshrl.u32 %v14461_v42, 16 }
 0x2e9   : > { %v7044_v32 = vshll.u32 %v14461_v42, 16  ;;  %v6692_v31 = vmul.f32 %v18776_v48, %v6591_v27  ;;  %v7902_v20 = vrot.slane %v7900_v2, 5  ;;  %15635 = vmatpush3.bf16.msra.mxu0 %v16222_v3  ;;  %v18787_v1 = vrot.slane %v7906_v60, 5  ;;  %v7257_v3 = vld [vmem:[#allocation3 + $0x8c] sm:$0x1]  ;;  %v5955_v60 = vpop.f32.mrf.mxu1 }
 0x2ea   : > { %v7895_v52 = vsel %vm16984_vm14, %v7890_v45, %v7894_v17  ;;  %v6728_v16 = vadd.f32 %v18783_v26, %v6691_v12  ;;  %v6726_v33 = vadd.f32 %v18783_v26, %v6689_v19  ;;  %15636 = vmatprep.subr.bf16.mxu0 %v16226_v5  ;;  %v7043_v13 = vrot.slane %v7041_v35, 7  ;;  %v7788_v17 = vld [vmem:[#allocation3 + $0x30] sm:$0xf]  ;;  %v15486_v19 = vpop.f32.mrf.mxu0  ;;  %v16238_v35 = vld [vmem:[#allocation10 + $0xd0] sm:$0xff]  }
 0x2eb   : > { %v14136_v37 = vcombine.low %v7885_v25, %v7895_v52  ;;  %v6729_v53 = vadd.f32 %v18783_v26, %v6692_v31  ;;  %v7903_v9 = vor.u32 %v7902_v20, %v7899_v34  ;;  %v7910_v51 = vshrl.u32 %v7786_v21, 16 }
 0x2ec   : > { %v6760_v14 = vmax.f32 %v6728_v16, 0.0  ;;  %v6758_v47 = vmax.f32 %v6726_v33, 0.0  ;;  %v7916_v62 = vshll.u32 %v7787_v50, 16  ;;  %v7046_v40 = vor.u32 %v7044_v32, %v7043_v13  ;;  %v7267_v32 = vld [vmem:[#allocation3 + $0x9c] sm:$0xf] }
 0x2ed   : > { %v7048_v30 = vrot.slane %v7043_v13, 4  ;;  %15556 = vmatprep.mubr.bf16.mxu0 %v14136_v37  ;;  %v6761_v0 = vmax.f32 %v6729_v53, 0.0  ;;  %v7904_v46 = vrot.slane %v7903_v9, 4  ;;  %15637 = vmatpush3.bf16.msra.mxu0 %v16226_v5  ;;  %v7912_v38 = vrot.slane %v7910_v51, 4  ;;  %v7790_v9 = vld [vmem:[#allocation3 + $0x38] sm:$0x1] }
 0x2ee   : > { %v14466_v57 = vpack.c.bf16 %v6760_v14, %v6760_v14  ;;  %v14464_v23 = vpack.c.bf16 %v6758_v47, %v6758_v47  ;;  %v7918_v24 = vrot.slane %v7916_v62, 5  ;;  %15638 = vmatprep.subr.bf16.mxu0 %v16230_v22  ;;  %v7047_v44 = vsel %vm16795_vm7, %v7039_v28, %v7046_v40  ;;  %v6549_v62 = vpop.f32.mrf.mxu0  ;;  %v15439_v40 = vpop.f32.mrf.mxu1 }
 0x2ef   : > { %v7258_v21 = vsel %vm16769_vm3, %v7048_v30, %v7257_v3  ;;  %v14467_v29 = vpack.c.bf16 %v6761_v0, %v6761_v0  ;;  %v7909_v5 = vsel %vm16984_vm14, %v7904_v46, %v18787_v1  ;;  %7256 = vst [vmem:[#allocation3 + $0x88] sm:$0xf] %v7047_v44  ;;  %v7913_v28 = vor.u32 %v7912_v38, %v18787_v1  ;;  %v16241_v30 = vld [vmem:[#allocation10 + $0xc8] sm:$0xff]   ;;  %v7791_v38 = vld [vmem:[#allocation3 + $0x3c] sm:$0xf] }
 0x2f0   : > { %7259 = vst [vmem:[#allocation3 + $0x8c] sm:$0x1] %v7258_v21  ;;  %v7084_v25 = vshrl.u32 %v14466_v57, 16  ;;  %v7087_v43 = vshll.u32 %v14466_v57, 16  ;;  %v7067_v41 = vshrl.u32 %v14464_v23, 16  ;;  %v7070_v6 = vshll.u32 %v14464_v23, 16 }
 0x2f1   : > { %v7092_v8 = vshrl.u32 %v14467_v29, 16  ;;  %v7095_v42 = vshll.u32 %v14467_v29, 16  ;;  %v5995_v27 = vadd.f32 %v5942_v36, %v18587_v54  ;;  %15639 = vmatpush3.bf16.msra.mxu0 %v16230_v22  ;;  %v7921_v45 = vshrl.u32 %v7788_v17, 16  ;;  %v7278_v36 = vld [vmem:[#allocation3 + $0xb0] sm:$0x1] }
 0x2f2   : > { %v7086_v34 = vrot.slane %v7084_v25, 7  ;;  %v18805_v2 = vrot.slane %v7067_v41, 7  ;;  %v7924_v12 = vshll.u32 %v7788_v17, 16  ;;  %15640 = vmatprep.subr.bf16.mxu0 %v16234_v15  ;;  %v7914_v50 = vrot.slane %v7913_v28, 4  ;;  %v16233_v21 = vld [vmem:[#allocation3 + $0x90] sm:$0xff]  }
 0x2f3   : > { %v7094_v31 = vrot.slane %v7092_v8, 7  ;;  %v6589_v20 = vadd.f32 %v6536_v7, %v5995_v27  ;;  %v7930_v52 = vshll.u32 %v18801_v58, 16  ;;  %v7923_v51 = vrot.slane %v7921_v45, 4  ;;  %v15487_v8 = vpop.f32.mrf.mxu0 }
 0x2f4   : > { %v7089_v16 = vor.u32 %v7087_v43, %v7086_v34  ;;  %v7090_v33 = vrot.slane %v7086_v34, 4  ;;  %v7072_v54 = vor.u32 %v7070_v6, %v18805_v2  ;;  %v7073_v1 = vrot.slane %v18805_v2, 4 }
 0x2f5   : > { %v7097_v22 = vor.u32 %v7095_v42, %v7094_v31  ;;  %v7099_v13 = vrot.slane %v7094_v31, 4  ;;  %v7919_v37 = vsel %vm16984_vm14, %v7914_v50, %v7918_v24  ;;  %v6690_v53 = vmul.f32 %v18776_v48, %v6589_v20  ;;  %15641 = vmatpush3.bf16.msra.mxu0 %v16234_v15  ;;  %v18831_v31 = vld [vmem:[#allocation10 + $0x178] sm:$0xff]  }
 0x2f6   : > { %v7275_v3 = vsel %vm16801_vm8, %v7089_v16, %v7274_v10  ;;  %v7268_v14 = vsel %vm16801_vm8, %v7072_v54, %v7267_v32  ;;  %v14137_v47 = vcombine.low %v7909_v5, %v7919_v37  ;;  %15642 = vmatprep.subr.bf16.mxu0 %v16238_v35  ;;  %v7926_v23 = vrot.slane %v7924_v12, 5  ;;  %v16232_v24 = vld [vmem:[#allocation3 + $0x84] sm:$0xff]  }
 0x2f7   : > { %7276 = vst [vmem:[#allocation3 + $0xa8] sm:$0xf] %v7275_v3  ;;  %7269 = vst [vmem:[#allocation3 + $0x9c] sm:$0xf] %v7268_v14  ;;  %v7098_v0 = vsel %vm16795_vm7, %v7090_v33, %v7097_v22  ;;  %v7279_v46 = vsel %vm16769_vm3, %v7099_v13, %v7278_v36  ;;  %v6727_v57 = vadd.f32 %v18783_v26, %v6690_v53  ;;  %v7932_v7 = vrot.slane %v7930_v52, 5 }
 0x2f8   : > { %7277 = vst [vmem:[#allocation3 + $0xac] sm:$0xf] %v7098_v0  ;;  %7280 = vst [vmem:[#allocation3 + $0xb0] sm:$0x1] %v7279_v46  ;;  %15557 = vmatmul.mubr.bf16.gmra.mxu0 %v14137_v47  ;;  %v7934_v17 = vshrl.u32 %v18801_v58, 16  ;;  %v7940_v15 = vshll.u32 %v7790_v9, 16  ;;  %v6000_v44 = vadd.f32 %v18790_v55, %v18518_v4  ;;  %v7927_v5 = vor.u32 %v7926_v23, %v7923_v51 }
 0x2f9   : > { %v6759_v29 = vmax.f32 %v6727_v57, 0.0  ;;  %v5998_v25 = vadd.f32 %v5955_v60, %v18528_v39  ;;  %v6001_v43 = vadd.f32 %v15439_v40, %v18536_v56  ;;  %15525 = vmatmul.mubr.bf16.gmra.mxu1 %v16232_v24  ;;  %15643 = vmatpush3.bf16.msra.mxu0 %v16238_v35  ;;  %v7945_v42 = vshrl.u32 %v7791_v38, 16  ;;  %v16243_v58 = vld [vmem:[#allocation10 + $0xc0] sm:$0xff]   ;;  %v7792_v39 = vld [vmem:[#allocation3 + $0x40] sm:$0xf] }
 0x2fa   : > { %v7936_v41 = vrot.slane %v7934_v17, 4  ;;  %v7942_v6 = vrot.slane %v7940_v15, 5  ;;  %v6594_v10 = vadd.f32 %v15486_v19, %v6000_v44  ;;  %15528 = vmatprep.mubr.bf16.mxu1 %v16233_v21  ;;  %15644 = vmatprep.subr.bf16.mxu0 %v16241_v30  ;;  %v7928_v27 = vrot.slane %v7927_v5, 4  ;;  %v7271_v13 = vld [vmem:[#allocation3 + $0xa4] sm:$0x1]  ;;  %v5958_v17 = vpop.f32.mrf.mxu1 }
 0x2fb   : > { %v14465_v28 = vpack.c.bf16 %v6759_v29, %v6759_v29  ;;  %v6592_v4 = vadd.f32 %v6549_v62, %v5998_v25  ;;  %v6595_v55 = vadd.f32 %v15487_v8, %v6001_v43  ;;  %v7947_v12 = vrot.slane %v7945_v42, 4  ;;  %v7793_v0 = vld [vmem:[#allocation3 + $0x44] sm:$0x1]  ;;  %v7794_v5 = vld [vmem:[#allocation3 + $0x48] sm:$0xf] }
 0x2fc   : > { %v7937_v34 = vor.u32 %v7936_v41, %v7932_v7  ;;  %v6695_v45 = vmul.f32 %v18776_v48, %v6594_v10  ;;  %v7948_v56 = vshll.u32 %v7791_v38, 16  ;;  %v7933_v19 = vsel %vm16984_vm14, %v7928_v27, %v7932_v7  ;;  %v7288_v42 = vld [vmem:[#allocation3 + $0xc0] sm:$0xf] }
 0x2fd   : > { %v7075_v60 = vshrl.u32 %v14465_v28, 16  ;;  %v7078_v35 = vshll.u32 %v14465_v28, 16  ;;  %v6693_v32 = vmul.f32 %v18776_v48, %v6592_v4  ;;  %15645 = vmatpush3.bf16.msra.mxu0 %v16241_v30  ;;  %v6696_v52 = vmul.f32 %v18776_v48, %v6595_v55  ;;  %v6552_v4 = vpop.f32.mrf.mxu0 }
 0x2fe   : > { %v7938_v50 = vrot.slane %v7937_v34, 4  ;;  %v6732_v20 = vadd.f32 %v18783_v26, %v6695_v45  ;;  %v7950_v16 = vrot.slane %v7948_v56, 5  ;;  %15646 = vmatprep.subr.bf16.mxu0 %v16243_v58  ;;  %v7954_v36 = vshll.u32 %v7792_v39, 16 }
 0x2ff   : > { %v7077_v33 = vrot.slane %v7075_v60, 7  ;;  %v6730_v54 = vadd.f32 %v18783_v26, %v6693_v32  ;;  %v7958_v22 = vshrl.u32 %v7792_v39, 16  ;;  %v6733_v9 = vadd.f32 %v18783_v26, %v6696_v52  ;;  %v7281_v39 = vld [vmem:[#allocation3 + $0xb4] sm:$0xf]  ;;  %v7795_v60 = vld [vmem:[#allocation3 + $0x4c] sm:$0xf] }
 0x300   : > { %v7943_v37 = vsel %vm16984_vm14, %v7938_v50, %v7942_v6  ;;  %v6764_v53 = vmax.f32 %v6732_v20, 0.0  ;;  %v7951_v3 = vor.u32 %v7950_v16, %v7947_v12  ;;  %v7956_v57 = vrot.slane %v7954_v36, 5  ;;  %v7292_v32 = vld [vmem:[#allocation3 + $0xc8] sm:$0x1]  ;;  %v7796_v50 = vld [vmem:[#allocation3 + $0x50] sm:$0x1] }
 0x301   : > { %v7080_v14 = vor.u32 %v7078_v35, %v7077_v33  ;;  %v7082_v47 = vrot.slane %v7077_v33, 4  ;;  %v14138_v51 = vcombine.low %v7933_v19, %v7943_v37  ;;  %v6762_v62 = vmax.f32 %v6730_v54, 0.0  ;;  %15647 = vmatpush3.bf16.msra.mxu0 %v16243_v58  ;;  %v7797_v36 = vld [vmem:[#allocation3 + $0x54] sm:$0xf] }
 0x302   : > { %v14470_v40 = vpack.c.bf16 %v6764_v53, %v6764_v53  ;;  %v6765_v30 = vmax.f32 %v6733_v9, 0.0  ;;  %v7952_v46 = vrot.slane %v7951_v3, 4  ;;  %15728 = vmatprep.subr.bf16.mxu0 %v18831_v31  ;;  %v7960_v7 = vrot.slane %v7958_v22, 4  ;;  %v7798_v22 = vld [vmem:[#allocation3 + $0x58] sm:$0xf] }
 0x303   : > { %v7081_v23 = vsel %vm16795_vm7, %v7073_v1, %v7080_v14  ;;  %v7272_v38 = vsel %vm16769_vm3, %v7082_v47, %v7271_v13  ;;  %15560 = vmatprep.mubr.bf16.mxu0 %v14138_v51  ;;  %v14468_v24 = vpack.c.bf16 %v6762_v62, %v6762_v62  ;;  %v7964_v1 = vshll.u32 %v7793_v0, 16  ;;  %v7799_v0 = vld [vmem:[#allocation3 + $0x5c] sm:$0x1] }
 0x304   : > { %7270 = vst [vmem:[#allocation3 + $0xa0] sm:$0xf] %v7081_v23  ;;  %7273 = vst [vmem:[#allocation3 + $0xa4] sm:$0x1] %v7272_v38  ;;  %v7118_v15 = vshrl.u32 %v14470_v40, 16  ;;  %v7121_v44 = vshll.u32 %v14470_v40, 16  ;;  %v14471_v21 = vpack.c.bf16 %v6765_v30, %v6765_v30  ;;  %v7957_v29 = vsel %vm16984_vm14, %v7952_v46, %v7956_v57 }
 0x305   : > { %v7101_v2 = vshrl.u32 %v14468_v24, 16  ;;  %v7104_v25 = vshll.u32 %v14468_v24, 16  ;;  %v7961_v43 = vor.u32 %v7960_v7, %v7956_v57  ;;  %v5999_v8 = vadd.f32 %v5958_v17, %v18589_v61  ;;  %v16237_v40 = vld [vmem:[#allocation3 + $0xa8] sm:$0xff]   ;;  %v7800_v7 = vld [vmem:[#allocation3 + $0x60] sm:$0xf] }
 0x306   : > { %v7120_v41 = vrot.slane %v7118_v15, 7  ;;  %v7126_v6 = vshrl.u32 %v14471_v21, 16  ;;  %v7129_v10 = vshll.u32 %v14471_v21, 16  ;;  %v7966_v27 = vrot.slane %v7964_v1, 5 }
 0x307   : > { %v18849_v58 = vrot.slane %v7101_v2, 7  ;;  %v7962_v28 = vrot.slane %v7961_v43, 4  ;;  %v7969_v55 = vshrl.u32 %v7794_v5, 16  ;;  %v6593_v56 = vadd.f32 %v6552_v4, %v5999_v8 }
 0x308   : > { %v7123_v34 = vor.u32 %v7121_v44, %v7120_v41  ;;  %v7124_v45 = vrot.slane %v7120_v41, 4  ;;  %v7128_v12 = vrot.slane %v7126_v6, 7  ;;  %v7972_v53 = vshll.u32 %v7794_v5, 16  ;;  %v7801_v41 = vld [vmem:[#allocation3 + $0x64] sm:$0xf] }
 0x309   : > { %v7106_v35 = vor.u32 %v7104_v25, %v18849_v58  ;;  %v7107_v19 = vrot.slane %v18849_v58, 4  ;;  %v7967_v61 = vsel %vm16984_vm14, %v7962_v28, %v7966_v27  ;;  %v7971_v20 = vrot.slane %v7969_v55, 4 }
 0x30a   : > { %v7289_v52 = vsel %vm16801_vm8, %v7123_v34, %v7288_v42  ;;  %v7131_v16 = vor.u32 %v7129_v10, %v7128_v12  ;;  %v7133_v33 = vrot.slane %v7128_v12, 4  ;;  %v14139_v54 = vcombine.low %v7957_v29, %v7967_v61 }
 0x30b   : > { %7290 = vst [vmem:[#allocation3 + $0xc0] sm:$0xf] %v7289_v52  ;;  %v7282_v13 = vsel %vm16801_vm8, %v7106_v35, %v7281_v39  ;;  %v6694_v37 = vmul.f32 %v18776_v48, %v6593_v56  ;;  %v7978_v9 = vshll.u32 %v7795_v60, 16  ;;  %v16236_v3 = vld [vmem:[#allocation3 + $0x9c] sm:$0xff]   ;;  %v7982_v51 = vshrl.u32 %v7795_v60, 16 }
 0x30c   : > { %7283 = vst [vmem:[#allocation3 + $0xb4] sm:$0xf] %v7282_v13  ;;  %v7132_v14 = vsel %vm16795_vm7, %v7124_v45, %v7131_v16  ;;  %v7293_v47 = vsel %vm16769_vm3, %v7133_v33, %v7292_v32  ;;  %15561 = vmatmul.mubr.bf16.gmra.mxu0 %v14139_v54  ;;  %v7988_v62 = vshll.u32 %v7796_v50, 16  ;;  %v7974_v30 = vrot.slane %v7972_v53, 5  ;;  %15529 = vmatmul.mubr.bf16.gmra.mxu1 %v16236_v3  ;;  %v7802_v45 = vld [vmem:[#allocation3 + $0x68] sm:$0x1] }
 0x30d   : > { %7291 = vst [vmem:[#allocation3 + $0xc4] sm:$0xf] %v7132_v14  ;;  %7294 = vst [vmem:[#allocation3 + $0xc8] sm:$0x1] %v7293_v47  ;;  %v6731_v11 = vadd.f32 %v18783_v26, %v6694_v37  ;;  %v7980_v48 = vrot.slane %v7978_v9, 5  ;;  %v7993_v46 = vshrl.u32 %v7797_v36, 16  ;;  %15532 = vmatprep.mubr.bf16.mxu1 %v16237_v40 }
 0x30e   : > { %v7984_v57 = vrot.slane %v7982_v51, 4  ;;  %v7990_v23 = vrot.slane %v7988_v62, 5  ;;  %v7996_v38 = vshll.u32 %v7797_v36, 16  ;;  %v8002_v24 = vshll.u32 %v7798_v22, 16  ;;  %v7285_v39 = vld [vmem:[#allocation3 + $0xbc] sm:$0x1] }
 0x30f   : > { %v6763_v17 = vmax.f32 %v6731_v11, 0.0  ;;  %v7975_v15 = vor.u32 %v7974_v30, %v7971_v20  ;;  %v7995_v44 = vrot.slane %v7993_v46, 4  ;;  %v8006_v21 = vshrl.u32 %v7798_v22, 16  ;;  %v7803_v36 = vld [vmem:[#allocation3 + $0x6c] sm:$0xf] }
 0x310   : > { %v7985_v29 = vor.u32 %v7984_v57, %v7980_v48  ;;  %v7998_v5 = vrot.slane %v7996_v38, 5  ;;  %v8004_v2 = vrot.slane %v8002_v24, 5  ;;  %v8012_v25 = vshll.u32 %v7799_v0, 16  ;;  %v7804_v9 = vld [vmem:[#allocation3 + $0x70] sm:$0xf] }
 0x311   : > { %v14469_v26 = vpack.c.bf16 %v6763_v17, %v6763_v17  ;;  %v7976_v43 = vrot.slane %v7975_v15, 4  ;;  %v8008_v1 = vrot.slane %v8006_v21, 4  ;;  %v8017_v6 = vshrl.u32 %v7800_v7, 16  ;;  %v7806_v3 = vld [vmem:[#allocation3 + $0x78] sm:$0xf] }
 0x312   : > { %v7986_v10 = vrot.slane %v7985_v29, 4  ;;  %v7999_v8 = vor.u32 %v7998_v5, %v7995_v44  ;;  %v8014_v42 = vrot.slane %v8012_v25, 5  ;;  %v8020_v28 = vshll.u32 %v7800_v7, 16  ;;  %v7805_v40 = vld [vmem:[#allocation3 + $0x74] sm:$0x1] }
 0x313   : > { %v7109_v27 = vshrl.u32 %v14469_v26, 16  ;;  %v7112_v4 = vshll.u32 %v14469_v26, 16  ;;  %v7981_v55 = vsel %vm16984_vm14, %v7976_v43, %v7980_v48  ;;  %v8009_v34 = vor.u32 %v8008_v1, %v8004_v2  ;;  %v7807_v24 = vld [vmem:[#allocation3 + $0x7c] sm:$0xf]  ;;  %v7808_v21 = vld [vmem:[#allocation3 + $0x80] sm:$0x1] }
 0x314   : > { %v7991_v12 = vsel %vm16984_vm14, %v7986_v10, %v7990_v23  ;;  %v8000_v56 = vrot.slane %v7999_v8, 4  ;;  %v8019_v60 = vrot.slane %v8017_v6, 4  ;;  %v8022_v35 = vrot.slane %v8020_v28, 5  ;;  %v7809_v43 = vld [vmem:[#allocation3 + $0x84] sm:$0xf] }
 0x315   : > { %v7111_v32 = vrot.slane %v7109_v27, 7  ;;  %v14140_v61 = vcombine.low %v7981_v55, %v7991_v12  ;;  %v8010_v50 = vrot.slane %v8009_v34, 4  ;;  %v8026_v20 = vshll.u32 %v7801_v41, 16  ;;  %v7810_v8 = vld [vmem:[#allocation3 + $0x88] sm:$0xf] }
 0x316   : > { %v8005_v52 = vsel %vm16984_vm14, %v8000_v56, %v8004_v2  ;;  %v8023_v16 = vor.u32 %v8022_v35, %v8019_v60  ;;  %v8030_v33 = vshrl.u32 %v7801_v41, 16  ;;  %v8036_v54 = vshll.u32 %v7802_v45, 16  ;;  %v7812_v55 = vld [vmem:[#allocation3 + $0x90] sm:$0xf]  ;;  %v7811_v12 = vld [vmem:[#allocation3 + $0x8c] sm:$0x1] }
 0x317   : > { %v7114_v22 = vor.u32 %v7112_v4, %v7111_v32  ;;  %v7116_v13 = vrot.slane %v7111_v32, 4  ;;  %15564 = vmatprep.mubr.bf16.mxu0 %v14140_v61  ;;  %v8015_v37 = vsel %vm16984_vm14, %v8010_v50, %v8014_v42  ;;  %v8028_v53 = vrot.slane %v8026_v20, 5 }
 0x318   : > { %v14141_v14 = vcombine.low %v8005_v52, %v8015_v37  ;;  %v8024_v47 = vrot.slane %v8023_v16, 4  ;;  %v8032_v51 = vrot.slane %v8030_v33, 4  ;;  %v8038_v62 = vrot.slane %v8036_v54, 5  ;;  %v7813_v33 = vld [vmem:[#allocation3 + $0x94] sm:$0xf] }
 0x319   : > { %v7115_v11 = vsel %vm16795_vm7, %v7107_v19, %v7114_v22  ;;  %v7286_v30 = vsel %vm16769_vm3, %v7116_v13, %v7285_v39  ;;  %v8041_v48 = vshrl.u32 %v7803_v36, 16  ;;  %v8044_v0 = vshll.u32 %v7803_v36, 16  ;;  %v7814_v37 = vld [vmem:[#allocation3 + $0x98] sm:$0x1] }
 0x31a   : > { %7284 = vst [vmem:[#allocation3 + $0xb8] sm:$0xf] %v7115_v11  ;;  %7287 = vst [vmem:[#allocation3 + $0xbc] sm:$0x1] %v7286_v30  ;;  %15565 = vmatmul.mubr.bf16.gmra.mxu0 %v14141_v14  ;;  %v8029_v46 = vsel %vm16984_vm14, %v8024_v47, %v8028_v53  ;;  %v8033_v57 = vor.u32 %v8032_v51, %v8028_v53  ;;  %v8050_v23 = vshll.u32 %v7804_v9, 16  ;;  %v8054_v38 = vshrl.u32 %v7804_v9, 16 }
 0x31b   : > { %v8043_v7 = vrot.slane %v8041_v48, 4  ;;  %v8046_v58 = vrot.slane %v8044_v0, 5  ;;  %v8060_v17 = vshll.u32 %v7805_v40, 16  ;;  %v8065_v63 = vshrl.u32 %v7806_v3, 16  ;;  %v7815_v47 = vld [vmem:[#allocation3 + $0x9c] sm:$0xf] }
 0x31c   : > { %v8034_v19 = vrot.slane %v8033_v57, 4  ;;  %v8052_v15 = vrot.slane %v8050_v23, 5  ;;  %v8056_v44 = vrot.slane %v8054_v38, 4  ;;  %v8068_v29 = vshll.u32 %v7806_v3, 16 }
 0x31d   : > { %v8047_v5 = vor.u32 %v8046_v58, %v8043_v7  ;;  %v8062_v2 = vrot.slane %v8060_v17, 5  ;;  %v8067_v25 = vrot.slane %v8065_v63, 4  ;;  %v8074_v26 = vshll.u32 %v7807_v24, 16  ;;  %v7816_v7 = vld [vmem:[#allocation3 + $0xa0] sm:$0xf] }
 0x31e   : > { %v8039_v1 = vsel %vm16984_vm14, %v8034_v19, %v8038_v62  ;;  %v8057_v41 = vor.u32 %v8056_v44, %v8052_v15  ;;  %v8070_v6 = vrot.slane %v8068_v29, 5  ;;  %v8078_v10 = vshrl.u32 %v7807_v24, 16 }
 0x31f   : > { %v14142_v42 = vcombine.low %v8029_v46, %v8039_v1  ;;  %v8048_v28 = vrot.slane %v8047_v5, 4  ;;  %v8076_v27 = vrot.slane %v8074_v26, 5  ;;  %v8084_v4 = vshll.u32 %v7808_v21, 16  ;;  %v7818_v1 = vld [vmem:[#allocation3 + $0xa8] sm:$0xf] }
 0x320   : > { %v8058_v34 = vrot.slane %v8057_v41, 4  ;;  %v8071_v45 = vor.u32 %v8070_v6, %v8067_v25  ;;  %v8080_v39 = vrot.slane %v8078_v10, 4  ;;  %v8089_v56 = vshrl.u32 %v7809_v43, 16  ;;  %v7817_v25 = vld [vmem:[#allocation3 + $0xa4] sm:$0x1] }
 0x321   : > { %15568 = vmatprep.mubr.bf16.mxu0 %v14142_v42  ;;  %v8053_v60 = vsel %vm16984_vm14, %v8048_v28, %v8052_v15  ;;  %v8092_v35 = vshll.u32 %v7809_v43, 16  ;;  %v8098_v32 = vshll.u32 %v7810_v8, 16  ;;  %v16240_v61 = vld [vmem:[#allocation3 + $0xb4] sm:$0xff]   ;;  %v8102_v13 = vshrl.u32 %v7810_v8, 16  ;;  %v7819_v42 = vld [vmem:[#allocation3 + $0xac] sm:$0xf] }
 0x322   : > { %v8063_v50 = vsel %vm16984_vm14, %v8058_v34, %v8062_v2  ;;  %v8072_v20 = vrot.slane %v8071_v45, 4  ;;  %v8081_v52 = vor.u32 %v8080_v39, %v8076_v27  ;;  %v8091_v16 = vrot.slane %v8089_v56, 4  ;;  %15533 = vmatmul.mubr.bf16.gmra.mxu1 %v16240_v61 }
 0x323   : > { %v14143_v54 = vcombine.low %v8053_v60, %v8063_v50  ;;  %v8094_v36 = vrot.slane %v8092_v35, 5  ;;  %v8100_v22 = vrot.slane %v8098_v32, 5  ;;  %v8086_v9 = vrot.slane %v8084_v4, 5  ;;  %v8594_v50 = vld [vmem:[#allocation3] sm:$0xe] }
 0x324   : > { %v8082_v53 = vrot.slane %v8081_v52, 4  ;;  %v8108_v3 = vshll.u32 %v7811_v12, 16  ;;  %v8113_v14 = vshrl.u32 %v7812_v55, 16  ;;  %v8104_v62 = vrot.slane %v8102_v13, 4  ;;  %v7820_v12 = vld [vmem:[#allocation3 + $0xb0] sm:$0x1] }
 0x325   : > { %15569 = vmatmul.mubr.bf16.gmra.mxu0 %v14143_v54  ;;  %v8095_v51 = vor.u32 %v8094_v36, %v8091_v16  ;;  %v8116_v40 = vshll.u32 %v7812_v55, 16  ;;  %v8122_v11 = vshll.u32 %v7813_v33, 16  ;;  %v8077_v30 = vsel %vm16984_vm14, %v8072_v20, %v8076_v27  ;;  %v8595_v20 = vld [vmem:[#allocation3 + $0x4] sm:$0xf]  ;;  %v8596_v36 = vld [vmem:[#allocation3 + $0x8] sm:$0x1] }
 0x326   : > { %v8087_v48 = vsel %vm16984_vm14, %v8082_v53, %v8086_v9  ;;  %v8115_v0 = vrot.slane %v8113_v14, 4  ;;  %v8126_v46 = vshrl.u32 %v7813_v33, 16  ;;  %v8105_v38 = vor.u32 %v8104_v62, %v8100_v22 }
 0x327   : > { %v14144_v57 = vcombine.low %v8077_v30, %v8087_v48  ;;  %v8096_v23 = vrot.slane %v8095_v51, 4  ;;  %v8118_v24 = vrot.slane %v8116_v40, 5  ;;  %v8124_v58 = vrot.slane %v8122_v11, 5  ;;  %v8598_v51 = vld [vmem:[#allocation3 + $0x10] sm:$0xf] }
 0x328   : > { %v8128_v17 = vrot.slane %v8126_v46, 4  ;;  %v8132_v63 = vshll.u32 %v7814_v37, 16  ;;  %v8137_v19 = vshrl.u32 %v7815_v47, 16  ;;  %v8106_v15 = vrot.slane %v8105_v38, 4  ;;  %v8597_v48 = vld [vmem:[#allocation3 + $0xc] sm:$0xe] }
 0x329   : > { %15572 = vmatprep.mubr.bf16.mxu0 %v14144_v57  ;;  %v8110_v44 = vrot.slane %v8108_v3, 5  ;;  %v8119_v21 = vor.u32 %v8118_v24, %v8115_v0  ;;  %v8140_v29 = vshll.u32 %v7815_v47, 16  ;;  %v8101_v5 = vsel %vm16984_vm14, %v8096_v23, %v8100_v22  ;;  %v7821_v0 = vld [vmem:[#allocation3 + $0xb4] sm:$0xf] }
 0x32a   : > { %v8129_v2 = vor.u32 %v8128_v17, %v8124_v58  ;;  %v8139_v26 = vrot.slane %v8137_v19, 4  ;;  %v8146_v43 = vshll.u32 %v7816_v7, 16  ;;  %v8150_v8 = vshrl.u32 %v7816_v7, 16  ;;  %v8599_v7 = vld [vmem:[#allocation3 + $0x14] sm:$0x1] }
 0x32b   : > { %v8111_v41 = vsel %vm16984_vm14, %v8106_v15, %v8110_v44  ;;  %v8120_v6 = vrot.slane %v8119_v21, 4  ;;  %v8142_v10 = vrot.slane %v8140_v29, 5  ;;  %v8134_v4 = vrot.slane %v8132_v63, 5  ;;  %v7822_v15 = vld [vmem:[#allocation3 + $0xb8] sm:$0xf] }
 0x32c   : > { %v14145_v28 = vcombine.low %v8101_v5, %v8111_v41  ;;  %v8130_v27 = vrot.slane %v8129_v2, 4  ;;  %v8148_v55 = vrot.slane %v8146_v43, 5  ;;  %v8152_v45 = vrot.slane %v8150_v8, 4  ;;  %v7823_v29 = vld [vmem:[#allocation3 + $0xbc] sm:$0x1] }
 0x32d   : > { %v8143_v34 = vor.u32 %v8142_v10, %v8139_v26  ;;  %v8156_v39 = vshll.u32 %v7817_v25, 16  ;;  %v8161_v56 = vshrl.u32 %v7818_v1, 16  ;;  %v8125_v60 = vsel %vm16984_vm14, %v8120_v6, %v8124_v58 }
 0x32e   : > { %15573 = vmatmul.mubr.bf16.gmra.mxu0 %v14145_v28  ;;  %v8135_v35 = vsel %vm16984_vm14, %v8130_v27, %v8134_v4  ;;  %v8164_v32 = vshll.u32 %v7818_v1, 16  ;;  %v8170_v61 = vshll.u32 %v7819_v42, 16  ;;  %v8153_v33 = vor.u32 %v8152_v45, %v8148_v55  ;;  %v8604_v45 = vld [vmem:[#allocation3 + $0x28] sm:$0xf] }
 0x32f   : > { %v14146_v52 = vcombine.low %v8125_v60, %v8135_v35  ;;  %v8144_v16 = vrot.slane %v8143_v34, 4  ;;  %v8163_v54 = vrot.slane %v8161_v56, 4  ;;  %v8174_v37 = vshrl.u32 %v7819_v42, 16  ;;  %v8601_v42 = vld [vmem:[#allocation3 + $0x1c] sm:$0xf] }
 0x330   : > { %v8166_v22 = vrot.slane %v8164_v32, 5  ;;  %v8172_v13 = vrot.slane %v8170_v61, 5  ;;  %v8180_v53 = vshll.u32 %v7820_v12, 16  ;;  %v8154_v9 = vrot.slane %v8153_v33, 4  ;;  %v8600_v34 = vld [vmem:[#allocation3 + $0x18] sm:$0xe] }
 0x331   : > { %15576 = vmatprep.mubr.bf16.mxu0 %v14146_v52  ;;  %v8158_v3 = vrot.slane %v8156_v39, 5  ;;  %v14158_v14 = vrot.slane %v8594_v50, 9  ;;  %v8692_v47 = vrot.slane %v8595_v20, 5  ;;  %v8149_v62 = vsel %vm16984_vm14, %v8144_v16, %v8148_v55  ;;  %v8602_v35 = vld [vmem:[#allocation3 + $0x20] sm:$0x1]  ;;  %v16249_v16 = vld [vmem:[#allocation10 + $0x130] sm:$0xff]  }
 0x332   : > { %v8167_v40 = vor.u32 %v8166_v22, %v8163_v54  ;;  %v8176_v11 = vrot.slane %v8174_v37, 4  ;;  %v8695_v30 = vrot.slane %v8596_v36, 5  ;;  %v8182_v57 = vrot.slane %v8180_v53, 5  ;;  %v8603_v32 = vld [vmem:[#allocation3 + $0x24] sm:$0xe] }
 0x333   : > { %v8159_v46 = vsel %vm16984_vm14, %v8154_v9, %v8158_v3  ;;  %v8693_v38 = vsel %vm16978_vm13, %v14158_v14, %v8692_v47  ;;  %v8694_v24 = vrot.slane %v8692_v47, 4  ;;  %v8699_v19 = vrot.slane %v8598_v51, 5  ;;  %v8605_v52 = vld [vmem:[#allocation3 + $0x2c] sm:$0x1]  ;;  %v8606_v22 = vld [vmem:[#allocation3 + $0x30] sm:$0xe] }
 0x334   : > { %v14147_v58 = vcombine.low %v8149_v62, %v8159_v46  ;;  %v8168_v17 = vrot.slane %v8167_v40, 4  ;;  %v8177_v63 = vor.u32 %v8176_v11, %v8172_v13  ;;  %v14159_v21 = vrot.slane %v8597_v48, 9  ;;  %v18915_v14 = vld [vmem:[#allocation3 + $0x40] sm:$0xf]  ;;  %v16344_v51 = vld [vmem:[#allocation10 + $0x138] sm:$0xff]  }
 0x335   : > { %v8696_v44 = vsel %vm16978_vm13, %v8694_v24, %v8695_v30  ;;  %v8185_v5 = vshrl.u32 %v7821_v0, 16  ;;  %v8188_v2 = vshll.u32 %v7821_v0, 16  ;;  %v8702_v1 = vrot.slane %v8599_v7, 5  ;;  %v8608_v30 = vld [vmem:[#allocation3 + $0x38] sm:$0x1] }
 0x336   : > { %15577 = vmatmul.mubr.bf16.gmra.mxu0 %v14147_v58  ;;  %v8173_v25 = vsel %vm16984_vm14, %v8168_v17, %v8172_v13  ;;  %v8178_v26 = vrot.slane %v8177_v63, 4  ;;  %v14174_v43 = vcombine.low %v8693_v38, %v8696_v44  ;;  %v8701_v41 = vrot.slane %v8699_v19, 4  ;;  %v8607_v13 = vld [vmem:[#allocation3 + $0x34] sm:$0xf]  ;;  %v16253_v38 = vld [vmem:[#allocation10 + $0x128] sm:$0xff]  }
 0x337   : > { %v8187_v6 = vrot.slane %v8185_v5, 4  ;;  %v8190_v10 = vrot.slane %v8188_v2, 5  ;;  %v8194_v8 = vshll.u32 %v7822_v15, 16  ;;  %v8700_v27 = vsel %vm16978_vm13, %v14159_v21, %v8699_v19  ;;  %v8609_v17 = vld [vmem:[#allocation3 + $0x3c] sm:$0xe] }
 0x338   : > { %v8183_v28 = vsel %vm16984_vm14, %v8178_v26, %v8182_v57  ;;  %15600 = vmatprep.mubr.bf16.mxu1 %v14174_v43  ;;  %v8198_v4 = vshrl.u32 %v7822_v15, 16  ;;  %v8204_v55 = vshll.u32 %v7823_v29, 16  ;;  %v8703_v12 = vsel %vm16978_vm13, %v8701_v41, %v8702_v1  ;;  %v8611_v63 = vld [vmem:[#allocation3 + $0x44] sm:$0x1]  ;;  %v8613_v15 = vld [vmem:[#allocation3 + $0x4c] sm:$0xf] }
 0x339   : > { %v14148_v39 = vcombine.low %v8173_v25, %v8183_v28  ;;  %v8191_v56 = vor.u32 %v8190_v10, %v8187_v6  ;;  %v8196_v60 = vrot.slane %v8194_v8, 5  ;;  %v14175_v61 = vcombine.low %v8700_v27, %v8703_v12  ;;  %v18930_v2 = vld [vmem:[#allocation3 + $0x58] sm:$0xf]  ;;  %v8612_v1 = vld [vmem:[#allocation3 + $0x48] sm:$0xe]  ;;  %v16244_v6 = vld [vmem:[#allocation3 + $0xc] sm:$0xff]  }
 0x33a   : > { %v8200_v50 = vrot.slane %v8198_v4, 4  ;;  %v8706_v20 = vrot.slane %v8601_v42, 5  ;;  %v14160_v54 = vrot.slane %v8600_v34, 9  ;;  %v8713_v36 = vrot.slane %v8604_v45, 5  ;;  %v8614_v41 = vld [vmem:[#allocation3 + $0x50] sm:$0x1] }
 0x33b   : > { %15580 = vmatprep.mubr.bf16.mxu0 %v14148_v39  ;;  %v8192_v33 = vrot.slane %v8191_v56, 4  ;;  %15601 = vmatmul.mubr.bf16.vlgmr.msra.gmra.mxu1 %v14175_v61  ;;  %v8206_v53 = vrot.slane %v8204_v55, 5  ;;  %v8709_v3 = vrot.slane %v8602_v35, 5  ;;  %v14161_v62 = vrot.slane %v8603_v32, 9  ;;  %v8615_v27 = vld [vmem:[#allocation3 + $0x54] sm:$0xe] }
 0x33c   : > { %v8201_v37 = vor.u32 %v8200_v50, %v8196_v60  ;;  %v8708_v9 = vrot.slane %v8706_v20, 4  ;;  %v8707_v47 = vsel %vm16978_vm13, %v14160_v54, %v8706_v20  ;;  %15681 = vmatpush3.bf16.msra.mxu1 %v16344_v51  ;;  %v8715_v40 = vrot.slane %v8713_v36, 4  ;;  %v8619_v4 = vld [vmem:[#allocation3 + $0x64] sm:$0xf]  ;;  %v16257_v55 = vld [vmem:[#allocation10 + $0x120] sm:$0xff]  }
 0x33d   : > { %v8716_v11 = vrot.slane %v8605_v52, 5  ;;  %v8197_v48 = vsel %vm16984_vm14, %v8192_v33, %v8196_v60  ;;  %v8720_v57 = vrot.slane %v8607_v13, 5  ;;  %15682 = vmatprep.subr.bf16.mxu1 %v16249_v16  ;;  %v8714_v7 = vsel %vm16978_vm13, %v14161_v62, %v8713_v36  ;;  %v8617_v45 = vld [vmem:[#allocation3 + $0x5c] sm:$0x1]  ;;  %v8618_v12 = vld [vmem:[#allocation3 + $0x60] sm:$0xe] }
 0x33e   : > { %v8202_v0 = vrot.slane %v8201_v37, 4  ;;  %v8710_v46 = vsel %vm16978_vm13, %v8708_v9, %v8709_v3  ;;  %v8727_v19 = vrot.slane %v18915_v14, 5  ;;  %v14162_v21 = vrot.slane %v8606_v22, 9  ;;  %v8622_v56 = vld [vmem:[#allocation3 + $0x70] sm:$0xf]  ;;  %v16246_v3 = vld [vmem:[#allocation3 + $0x18] sm:$0xff]  }
 0x33f   : > { %v14176_v24 = vcombine.low %v8707_v47, %v8710_v46  ;;  %v8717_v58 = vsel %vm16978_vm13, %v8715_v40, %v8716_v11  ;;  %v8722_v29 = vrot.slane %v8720_v57, 4  ;;  %v8723_v5 = vrot.slane %v8608_v30, 5  ;;  %v8620_v50 = vld [vmem:[#allocation3 + $0x68] sm:$0x1]  ;;  %v8621_v33 = vld [vmem:[#allocation3 + $0x6c] sm:$0xe] }
 0x340   : > { %v8207_v44 = vsel %vm16984_vm14, %v8202_v0, %v8206_v53  ;;  %v14177_v26 = vcombine.low %v8714_v7, %v8717_v58  ;;  %15683 = vmatpush3.bf16.msra.mxu1 %v16249_v16  ;;  %v8729_v43 = vrot.slane %v8727_v19, 4  ;;  %v8721_v10 = vsel %vm16978_vm13, %v14162_v21, %v8720_v57  ;;  %v18943_v37 = vld [vmem:[#allocation3 + $0x78] sm:$0xe]  ;;  %v18945_v53 = vld [vmem:[#allocation3 + $0x7c] sm:$0xf]  ;;  %v16261_v9 = vld [vmem:[#allocation10 + $0x118] sm:$0xff]  }
 0x341   : > { %v14149_v25 = vcombine.low %v8197_v48, %v8207_v44  ;;  %15604 = vmatprep.mubr.bf16.mxu1 %v14176_v24  ;;  %v8724_v8 = vsel %vm16978_vm13, %v8722_v29, %v8723_v5  ;;  %v8730_v42 = vrot.slane %v8611_v63, 5  ;;  %v8734_v28 = vrot.slane %v8613_v15, 5  ;;  %15684 = vmatprep.subr.bf16.mxu1 %v16253_v38  ;;  %v8623_v40 = vld [vmem:[#allocation3 + $0x74] sm:$0x1]  ;;  %v8626_v11 = vld [vmem:[#allocation3 + $0x80] sm:$0x1] }
 0x342   : > { %v14178_v34 = vcombine.low %v8721_v10, %v8724_v8  ;;  %v8741_v39 = vrot.slane %v18930_v2, 5  ;;  %v14163_v60 = vrot.slane %v8609_v17, 9  ;;  %v8737_v61 = vrot.slane %v8614_v41, 5  ;;  %v18949_v30 = vld [vmem:[#allocation3 + $0x88] sm:$0xf] }
 0x343   : > { %15581 = vmatmul.mubr.bf16.gmra.mxu0 %v14149_v25  ;;  %15605 = vmatmul.mubr.bf16.gmra.mxu1 %v14177_v26  ;;  %v8731_v35 = vsel %vm16978_vm13, %v8729_v43, %v8730_v42  ;;  %v8736_v32 = vrot.slane %v8734_v28, 4  ;;  %v14164_v20 = vrot.slane %v8612_v1, 9  ;;  %v8748_v16 = vrot.slane %v8619_v4, 5  ;;  %v16248_v48 = vld [vmem:[#allocation3 + $0x24] sm:$0xff]   ;;  %v18955_v7 = vld [vmem:[#allocation3 + $0x94] sm:$0xf] }
 0x344   : > { %15648 = vmatprep.mubr.bf16.mxu0 %v16244_v6  ;;  %15608 = vmatprep.mubr.bf16.mxu1 %v14178_v34  ;;  %v8743_v52 = vrot.slane %v8741_v39, 4  ;;  %v8728_v54 = vsel %vm16978_vm13, %v14163_v60, %v8727_v19  ;;  %v8744_v22 = vrot.slane %v8617_v45, 5  ;;  %v8755_v13 = vrot.slane %v8622_v56, 5  ;;  %v8627_v24 = vld [vmem:[#allocation3 + $0x84] sm:$0xe]  ;;  %v16251_v17 = vld [vmem:[#allocation10 + $0x170] sm:$0xff]  }
 0x345   : > { %15685 = vmatpush3.bf16.msra.mxu1 %v16253_v38  ;;  %v8738_v36 = vsel %vm16978_vm13, %v8736_v32, %v8737_v61  ;;  %v14179_v14 = vcombine.low %v8728_v54, %v8731_v35  ;;  %v8735_v47 = vsel %vm16978_vm13, %v14164_v20, %v8734_v28  ;;  %v14165_v51 = vrot.slane %v8615_v27, 9  ;;  %v8630_v44 = vld [vmem:[#allocation3 + $0x90] sm:$0xe]  ;;  %v8632_v21 = vld [vmem:[#allocation3 + $0x98] sm:$0x1]  ;;  %v16265_v29 = vld [vmem:[#allocation10 + $0x110] sm:$0xff]  }
 0x346   : > { %15686 = vmatprep.subr.bf16.mxu1 %v16257_v55  ;;  %v8750_v62 = vrot.slane %v8748_v16, 4  ;;  %v18953_v0 = vsel %vm16978_vm13, %v8743_v52, %v8744_v22  ;;  %v14166_v46 = vrot.slane %v8618_v12, 9  ;;  %v8751_v57 = vrot.slane %v8620_v50, 5  ;;  %v8629_v26 = vld [vmem:[#allocation3 + $0x8c] sm:$0x1]  ;;  %v16269_v52 = vld [vmem:[#allocation10 + $0x108] sm:$0xff]  }
 0x347   : > { %v8757_v38 = vrot.slane %v8755_v13, 4  ;;  %v14180_v58 = vcombine.low %v8735_v47, %v8738_v36  ;;  %v18959_v63 = vsel %vm16978_vm13, %v14165_v51, %v8741_v39  ;;  %v14167_v19 = vrot.slane %v8621_v33, 9  ;;  %v8634_v1 = vld [vmem:[#allocation3 + $0xa0] sm:$0xf]  ;;  %v8633_v42 = vld [vmem:[#allocation3 + $0x9c] sm:$0xe] }
 0x348   : > { %v8762_v15 = vrot.slane %v18945_v53, 5  ;;  %v18964_v5 = vsel %vm16978_vm13, %v14166_v46, %v8748_v16  ;;  %v18968_v2 = vsel %vm16978_vm13, %v8750_v62, %v8751_v57  ;;  %v8758_v25 = vrot.slane %v8623_v40, 5  ;;  %v8635_v28 = vld [vmem:[#allocation3 + $0xa4] sm:$0x1]  ;;  %v8636_v35 = vld [vmem:[#allocation3 + $0xa8] sm:$0xe] }
 0x349   : > { %15687 = vmatpush3.bf16.msra.mxu1 %v16257_v55  ;;  %v8769_v43 = vrot.slane %v18949_v30, 5  ;;  %v14181_v41 = vcombine.low %v18959_v63, %v18953_v0  ;;  %v18975_v6 = vsel %vm16978_vm13, %v14167_v19, %v8755_v13  ;;  %v14168_v10 = vrot.slane %v18943_v37, 9  ;;  %v16255_v39 = vld [vmem:[#allocation10 + $0x168] sm:$0xff]   ;;  %v8637_v32 = vld [vmem:[#allocation3 + $0xac] sm:$0xf]  ;;  %v16250_v54 = vld [vmem:[#allocation3 + $0x30] sm:$0xff]  }
 0x34a   : > { %15688 = vmatprep.subr.bf16.mxu1 %v16261_v9  ;;  %v8764_v8 = vrot.slane %v8762_v15, 4  ;;  %v18981_v27 = vsel %vm16978_vm13, %v8757_v38, %v8758_v25  ;;  %v8765_v4 = vrot.slane %v8626_v11, 5  ;;  %v8776_v34 = vrot.slane %v18955_v7, 5  ;;  %v18990_v16 = vld [vmem:[#allocation3 + $0xb8] sm:$0xf]  ;;  %v16252_v53 = vld [vmem:[#allocation3 + $0x3c] sm:$0xff]  }
 0x34b   : > { %15649 = vmatmul.mubr.bf16.vlgmr.msra.gmra.mxu0 %v16246_v3  ;;  %v8771_v55 = vrot.slane %v8769_v43, 4  ;;  %15609 = vmatmul.mubr.bf16.gmra.mxu1 %v14179_v14  ;;  %v14182_v45 = vcombine.low %v18964_v5, %v18968_v2  ;;  %v14169_v12 = vrot.slane %v8627_v24, 9  ;;  %v8772_v56 = vrot.slane %v8629_v26, 5  ;;  %v9638_v33 = vld [vmem:[#allocation3 + $0xc] sm:$0xf]  ;;  %v16259_v11 = vld [vmem:[#allocation10 + $0x160] sm:$0xff]  }
 0x34c   : > { %15652 = vmatprep.mubr.bf16.mxu0 %v16248_v48  ;;  %15729 = vmatpush3.bf16.msra.mxu0 %v18831_v31  ;;  %v8783_v60 = vrot.slane %v8634_v1, 5  ;;  %v18988_v31 = vsel %vm16978_vm13, %v8764_v8, %v8765_v4  ;;  %v14170_v61 = vrot.slane %v8630_v44, 9  ;;  %v8778_v50 = vrot.slane %v8776_v34, 4  ;;  %v19010_v51 = vld [vmem:[#allocation3 + $0xb0] sm:$0x1]  ;;  %v16254_v5 = vld [vmem:[#allocation3 + $0x48] sm:$0xff]  }
 0x34d   : > { %15730 = vmatprep.subr.bf16.mxu0 %v16251_v17  ;;  %15612 = vmatprep.mubr.bf16.mxu1 %v14180_v58  ;;  %v8779_v20 = vrot.slane %v8632_v21, 5  ;;  %v14183_v36 = vcombine.low %v18975_v6, %v18981_v27  ;;  %v18996_v22 = vsel %vm16978_vm13, %v8771_v55, %v8772_v56  ;;  %v8786_v37 = vrot.slane %v8635_v28, 5  ;;  %v9639_v62 = vld [vmem:[#allocation3 + $0x10] sm:$0xf]  ;;  %v19022_v57 = vld [vmem:[#allocation3 + $0xb4] sm:$0xe] }
 0x34e   : > { %15689 = vmatpush3.bf16.msra.mxu1 %v16261_v9  ;;  %v8785_v13 = vrot.slane %v8783_v60, 4  ;;  %v19000_v9 = vsel %vm16978_vm13, %v14168_v10, %v8762_v15  ;;  %v19004_v3 = vsel %vm16978_vm13, %v14169_v12, %v8769_v43  ;;  %v14171_v47 = vrot.slane %v8633_v42, 9  ;;  %v19024_v38 = vld [vmem:[#allocation3 + $0xbc] sm:$0x1]  ;;  %v19033_v19 = vld [vmem:[#allocation3 + $0x14] sm:$0x1] }
 0x34f   : > { %15690 = vmatprep.subr.bf16.mxu1 %v16265_v29  ;;  %v19008_v14 = vsel %vm16978_vm13, %v8778_v50, %v8779_v20  ;;  %v14184_v40 = vcombine.low %v19000_v9, %v18988_v31  ;;  %v19016_v30 = vsel %vm16978_vm13, %v14170_v61, %v8776_v34  ;;  %v8790_v46 = vrot.slane %v8637_v32, 5  ;;  %v9641_v15 = vld [vmem:[#allocation3 + $0x18] sm:$0xf]  ;;  %v9642_v44 = vld [vmem:[#allocation3 + $0x1c] sm:$0xf]  ;;  %v16263_v28 = vld [vmem:[#allocation10 + $0x158] sm:$0xff]  }
 0x350   : > { %15731 = vmatpush3.bf16.msra.mxu0 %v16251_v17  ;;  %v19020_v48 = vsel %vm16978_vm13, %v8785_v13, %v8786_v37  ;;  %v14185_v24 = vcombine.low %v19004_v3, %v18996_v22  ;;  %v19030_v7 = vsel %vm16978_vm13, %v14171_v47, %v8783_v60  ;;  %v14172_v58 = vrot.slane %v8636_v35, 9  ;;  %v16273_v43 = vld [vmem:[#allocation10 + $0x100] sm:$0xff]   ;;  %v9644_v12 = vld [vmem:[#allocation3 + $0x24] sm:$0xf]  ;;  %v9643_v60 = vld [vmem:[#allocation3 + $0x20] sm:$0x1] }
 0x351   : > { %15732 = vmatprep.subr.bf16.mxu0 %v16255_v39  ;;  %v8797_v17 = vrot.slane %v18990_v16, 5  ;;  %v14186_v21 = vcombine.low %v19016_v30, %v19008_v14  ;;  %v8793_v25 = vrot.slane %v19010_v51, 5  ;;  %v9687_v26 = vshrl.u32 %v9638_v33, 16  ;;  %v19057_v20 = vld [vmem:[#allocation10 + $0x1b8] sm:$0xff]   ;;  %v16262_v14 = vld [vmem:[#allocation3 + $0x78] sm:$0xff]  }
 0x352   : > { %15691 = vmatpush3.bf16.msra.mxu1 %v16265_v29  ;;  %v9690_v29 = vshll.u32 %v9638_v33, 16  ;;  %v14187_v1 = vcombine.low %v19030_v7, %v19020_v48  ;;  %v14173_v10 = vrot.slane %v19022_v57, 9  ;;  %v9696_v8 = vshll.u32 %v9639_v62, 16  ;;  %v16256_v2 = vld [vmem:[#allocation3 + $0x54] sm:$0xff]   ;;  %v16260_v31 = vld [vmem:[#allocation3 + $0x6c] sm:$0xff]  }
 0x353   : > { %15653 = vmatmul.mubr.bf16.gmra.mxu0 %v16250_v54  ;;  %15692 = vmatprep.subr.bf16.mxu1 %v16269_v52  ;;  %v9700_v42 = vshrl.u32 %v9639_v62, 16  ;;  %v19046_v4 = vsel %vm16978_vm13, %v14172_v58, %v8790_v46  ;;  %v8792_v55 = vrot.slane %v8790_v46, 4  ;;  %v9689_v34 = vrot.slane %v9687_v26, 4  ;;  %v9645_v54 = vld [vmem:[#allocation3 + $0x28] sm:$0xf] }
 0x354   : > { %15656 = vmatprep.mubr.bf16.mxu0 %v16252_v53  ;;  %15733 = vmatpush3.bf16.msra.mxu0 %v16255_v39  ;;  %v9692_v39 = vrot.slane %v9690_v29, 5  ;;  %v8799_v56 = vrot.slane %v8797_v17, 4  ;;  %v8800_v0 = vrot.slane %v19024_v38, 5  ;;  %v19054_v63 = vrot.slane %v9696_v8, 5  ;;  %v16267_v53 = vld [vmem:[#allocation10 + $0x150] sm:$0xff]  }
 0x355   : > { %15613 = vmatmul.mubr.bf16.gmra.mxu1 %v14181_v41  ;;  %15734 = vmatprep.subr.bf16.mxu0 %v16259_v11  ;;  %v9702_v41 = vrot.slane %v9700_v42, 4  ;;  %v9706_v35 = vshll.u32 %v19033_v19, 16  ;;  %v9711_v32 = vshrl.u32 %v9641_v15, 16  ;;  %v9714_v61 = vshll.u32 %v9641_v15, 16  ;;  %v9646_v46 = vld [vmem:[#allocation3 + $0x2c] sm:$0x1] }
 0x356   : > { %15616 = vmatprep.mubr.bf16.mxu1 %v14182_v45  ;;  %15693 = vmatpush3.bf16.msra.mxu1 %v16269_v52  ;;  %v9720_v50 = vshll.u32 %v9642_v44, 16  ;;  %v9693_v45 = vor.u32 %v9692_v39, %v9689_v34  ;;  %v9724_v33 = vshrl.u32 %v9642_v44, 16  ;;  %v9735_v13 = vshrl.u32 %v9644_v12, 16  ;;  %v10457_v26 = vld [vmem:[#allocation3 + $0x10] sm:$0xf]  ;;  %v16271_v34 = vld [vmem:[#allocation10 + $0x148] sm:$0xff]  }
 0x357   : > { %15694 = vmatprep.subr.bf16.mxu1 %v16273_v43  ;;  %v9703_v52 = vor.u32 %v9702_v41, %v19054_v63  ;;  %v19062_v37 = vsel %vm16978_vm13, %v8792_v55, %v8793_v25  ;;  %v9713_v47 = vrot.slane %v9711_v32, 4  ;;  %v9716_v51 = vrot.slane %v9714_v61, 5  ;;  %v10458_v32 = vld [vmem:[#allocation3 + $0x14] sm:$0x1] }
 0x358   : > { %15735 = vmatpush3.bf16.msra.mxu0 %v16259_v11  ;;  %v19064_v62 = vrot.slane %v9720_v50, 5  ;;  %v9726_v11 = vrot.slane %v9724_v33, 4  ;;  %v9730_v38 = vshll.u32 %v9643_v60, 16  ;;  %v9737_v58 = vrot.slane %v9735_v13, 4  ;;  %v9648_v61 = vld [vmem:[#allocation3 + $0x34] sm:$0xf] }
 0x359   : > { %15736 = vmatprep.subr.bf16.mxu0 %v16263_v28  ;;  %v9704_v57 = vrot.slane %v9703_v52, 4  ;;  %v19068_v19 = vsel %vm16978_vm13, %v8799_v56, %v8800_v0  ;;  %v9717_v15 = vor.u32 %v9716_v51, %v9713_v47  ;;  %v9738_v44 = vshll.u32 %v9644_v12, 16  ;;  %v9647_v56 = vld [vmem:[#allocation3 + $0x30] sm:$0xf]  ;;  %v9649_v50 = vld [vmem:[#allocation3 + $0x38] sm:$0x1] }
 0x35a   : > { %15695 = vmatpush3.bf16.msra.mxu1 %v16273_v43  ;;  %v9744_v25 = vshll.u32 %v9645_v54, 16  ;;  %v9694_v29 = vrot.slane %v9693_v45, 4  ;;  %v9708_v8 = vrot.slane %v9706_v35, 5  ;;  %v9727_v43 = vor.u32 %v9726_v11, %v19064_v62  ;;  %v9650_v45 = vld [vmem:[#allocation3 + $0x3c] sm:$0xf] }
 0x35b   : > { %15657 = vmatmul.mubr.bf16.gmra.mxu0 %v16254_v5  ;;  %15776 = vmatprep.subr.bf16.mxu1 %v19057_v20  ;;  %v9748_v42 = vshrl.u32 %v9645_v54, 16  ;;  %v19079_v55 = vsel %vm16978_vm13, %v14173_v10, %v8797_v17  ;;  %v9740_v39 = vrot.slane %v9738_v44, 5  ;;  %v14188_v6 = vcombine.low %v19046_v4, %v19062_v37  ;;  %v10456_v17 = vld [vmem:[#allocation3 + $0xc] sm:$0xe]  ;;  %v16258_v10 = vld [vmem:[#allocation3 + $0x60] sm:$0xff]  }
 0x35c   : > { %15660 = vmatprep.mubr.bf16.mxu0 %v16256_v2  ;;  %15737 = vmatpush3.bf16.msra.mxu0 %v16263_v28  ;;  %v19081_v12 = vrot.slane %v9744_v25, 5  ;;  %v9754_v28 = vshll.u32 %v9646_v46, 16  ;;  %v9709_v27 = vsel %vm16984_vm14, %v9704_v57, %v9708_v8  ;;  %v9728_v16 = vrot.slane %v9727_v43, 4  ;;  %v9652_v8 = vld [vmem:[#allocation3 + $0x44] sm:$0x1] }
 0x35d   : > { %15617 = vmatmul.mubr.bf16.gmra.mxu1 %v14183_v36  ;;  %15738 = vmatprep.subr.bf16.mxu0 %v16267_v53  ;;  %v9750_v36 = vrot.slane %v9748_v42, 4  ;;  %v14189_v0 = vcombine.low %v19079_v55, %v19068_v19  ;;  %v9718_v41 = vrot.slane %v9717_v15, 4  ;;  %v9732_v60 = vrot.slane %v9730_v38, 5  ;;  %v9651_v15 = vld [vmem:[#allocation3 + $0x40] sm:$0xf] }
 0x35e   : > { %15620 = vmatprep.mubr.bf16.mxu1 %v14184_v40  ;;  %v9741_v35 = vor.u32 %v9740_v39, %v9737_v58  ;;  %v9699_v9 = vsel %vm16984_vm14, %v9694_v29, %v19054_v63  ;;  %v10554_v40 = vrot.slane %v10457_v26, 5  ;;  %v9759_v5 = vshrl.u32 %v9647_v56, 16  ;;  %v19115_v43 = vld [vmem:[#allocation3 + $0x1c] sm:$0xf] }
 0x35f   : > { %v9762_v2 = vshll.u32 %v9647_v56, 16  ;;  %v19095_v52 = vcombine.low %v9699_v9, %v9709_v27  ;;  %v9733_v33 = vsel %vm16984_vm14, %v9728_v16, %v9732_v60  ;;  %v9751_v54 = vor.u32 %v9750_v36, %v19081_v12  ;;  %v16264_v9 = vld [vmem:[#allocation3 + $0x84] sm:$0xff]  }
 0x360   : > { %15739 = vmatpush3.bf16.msra.mxu0 %v16267_v53  ;;  %v19100_v13 = vrot.slane %v9754_v28, 5  ;;  %v16275_v53 = vld [vmem:[#allocation10 + $0x140] sm:$0xff]   ;;  %v14246_v47 = vrot.slane %v10456_v17, 9  ;;  %v9761_v51 = vrot.slane %v9759_v5, 4  ;;  %v9768_v63 = vshll.u32 %v9648_v61, 16  ;;  %v19120_v28 = vld [vmem:[#allocation10 + $0x1f8] sm:$0xff]  }
 0x361   : > { %15740 = vmatprep.subr.bf16.mxu0 %v16271_v34  ;;  %v9764_v46 = vrot.slane %v9762_v2, 5  ;;  %v9723_v57 = vsel %vm16984_vm14, %v9718_v41, %v19064_v62  ;;  %v19105_v11 = vrot.slane %v9741_v35, 4  ;;  %v10557_v38 = vrot.slane %v10458_v32, 5  ;;  %v10459_v17 = vld [vmem:[#allocation3 + $0x18] sm:$0xe] }
 0x362   : > { %v9772_v58 = vshrl.u32 %v9648_v61, 16  ;;  %v19107_v44 = vcombine.low %v9723_v57, %v9733_v33  ;;  %v19111_v25 = vsel %vm16978_vm13, %v14246_v47, %v10554_v40  ;;  %v10556_v26 = vrot.slane %v10554_v40, 4  ;;  %v10463_v41 = vld [vmem:[#allocation3 + $0x28] sm:$0xf]  ;;  %v10462_v35 = vld [vmem:[#allocation3 + $0x24] sm:$0xe] }
 0x363   : > { %15661 = vmatmul.mubr.bf16.gmra.mxu0 %v16258_v10  ;;  %v19113_v29 = vrot.slane %v9768_v63, 5  ;;  %v9752_v62 = vrot.slane %v9751_v54, 4  ;;  %v9783_v39 = vshrl.u32 %v9650_v45, 16  ;;  %v9765_v56 = vor.u32 %v9764_v46, %v9761_v51  ;;  %v10461_v10 = vld [vmem:[#allocation3 + $0x20] sm:$0x1] }
 0x364   : > { %15664 = vmatprep.mubr.bf16.mxu0 %v16260_v31  ;;  %15741 = vmatpush3.bf16.msra.mxu0 %v16271_v34  ;;  %v9774_v42 = vrot.slane %v9772_v58, 4  ;;  %v9778_v34 = vshll.u32 %v9649_v50, 16  ;;  %v9786_v27 = vshll.u32 %v9650_v45, 16  ;;  %v9792_v16 = vshll.u32 %v9651_v15, 16  ;;  %v10464_v32 = vld [vmem:[#allocation3 + $0x2c] sm:$0x1] }
 0x365   : > { %15621 = vmatmul.mubr.bf16.gmra.mxu1 %v14185_v24  ;;  %15742 = vmatprep.subr.bf16.mxu0 %v16275_v53  ;;  %v9796_v36 = vshrl.u32 %v9651_v15, 16  ;;  %v9747_v22 = vsel %vm16984_vm14, %v19105_v11, %v19081_v12  ;;  %v9785_v24 = vrot.slane %v9783_v39, 4  ;;  %v9802_v60 = vshll.u32 %v9652_v8, 16  ;;  %v9654_v63 = vld [vmem:[#allocation3 + $0x4c] sm:$0xf] }
 0x366   : > { %15624 = vmatprep.mubr.bf16.mxu1 %v14186_v21  ;;  %v9775_v3 = vor.u32 %v9774_v42, %v19113_v29  ;;  %v19132_v30 = vsel %vm16978_vm13, %v10556_v26, %v10557_v38  ;;  %v9788_v21 = vrot.slane %v9786_v27, 5  ;;  %v19134_v61 = vrot.slane %v9792_v16, 5  ;;  %v9656_v15 = vld [vmem:[#allocation3 + $0x54] sm:$0xf]  ;;  %v9657_v42 = vld [vmem:[#allocation3 + $0x58] sm:$0xf] }
 0x367   : > { %v9798_v31 = vrot.slane %v9796_v36, 4  ;;  %v9757_v12 = vsel %vm16984_vm14, %v9752_v62, %v19100_v13  ;;  %v9780_v50 = vrot.slane %v9778_v34, 5  ;;  %v10561_v5 = vrot.slane %v19115_v43, 5  ;;  %v16266_v36 = vld [vmem:[#allocation3 + $0x90] sm:$0xff]  }
 0x368   : > { %15743 = vmatpush3.bf16.msra.mxu0 %v16275_v53  ;;  %v9776_v40 = vrot.slane %v9775_v3, 4  ;;  %v9766_v2 = vrot.slane %v9765_v56, 4  ;;  %v9789_v45 = vor.u32 %v9788_v21, %v9785_v24  ;;  %v10568_v54 = vrot.slane %v10463_v41, 5  ;;  %v9653_v53 = vld [vmem:[#allocation3 + $0x48] sm:$0xf] }
 0x369   : > { %15824 = vmatprep.subr.bf16.mxu0 %v19120_v28  ;;  %v9799_v33 = vor.u32 %v9798_v31, %v19134_v61  ;;  %v14262_v47 = vcombine.low %v19111_v25, %v19132_v30  ;;  %v19144_v51 = vrot.slane %v9802_v60, 5  ;;  %v14247_v46 = vrot.slane %v10459_v17, 9  ;;  %v10465_v31 = vld [vmem:[#allocation3 + $0x30] sm:$0xe]  ;;  %v9669_v30 = vld [vmem:[#allocation3 + $0x88] sm:$0xf] }
 0x36a   : > { %v10564_v13 = vrot.slane %v10461_v10, 5  ;;  %v9781_v57 = vsel %vm16984_vm14, %v9776_v40, %v9780_v50  ;;  %v10563_v11 = vrot.slane %v10561_v5, 4  ;;  %v14248_v38 = vrot.slane %v10462_v35, 9  ;;  %v16268_v10 = vld [vmem:[#allocation3 + $0x9c] sm:$0xff]  }
 0x36b   : > { %15665 = vmatmul.mubr.bf16.gmra.mxu0 %v16262_v14  ;;  %v10571_v58 = vrot.slane %v10464_v32, 5  ;;  %v9790_v26 = vrot.slane %v9789_v45, 4  ;;  %v9800_v8 = vrot.slane %v9799_v33, 4  ;;  %v9807_v43 = vshrl.u32 %v9653_v53, 16  ;;  %v10469_v45 = vld [vmem:[#allocation3 + $0x40] sm:$0xf] }
 0x36c   : > { %15668 = vmatprep.mubr.bf16.mxu0 %v16264_v9  ;;  %v9810_v62 = vshll.u32 %v9653_v53, 16  ;;  %v19154_v34 = vcombine.low %v9747_v22, %v9757_v12  ;;  %v9771_v39 = vsel %vm16984_vm14, %v9766_v2, %v19113_v29  ;;  %v10570_v56 = vrot.slane %v10568_v54, 4  ;;  %v9658_v22 = vld [vmem:[#allocation3 + $0x5c] sm:$0x1]  ;;  %v10466_v9 = vld [vmem:[#allocation3 + $0x34] sm:$0xf] }
 0x36d   : > { %15625 = vmatmul.mubr.bf16.gmra.mxu1 %v14187_v1  ;;  %v9816_v27 = vshll.u32 %v9654_v63, 16  ;;  %v19159_v16 = vcombine.low %v9771_v39, %v9781_v57  ;;  %v19163_v48 = vsel %vm16978_vm13, %v14247_v46, %v10561_v5  ;;  %v9809_v7 = vrot.slane %v9807_v43, 4  ;;  %v10467_v2 = vld [vmem:[#allocation3 + $0x38] sm:$0x1]  ;;  %v10468_v46 = vld [vmem:[#allocation3 + $0x3c] sm:$0xe] }
 0x36e   : > { %15628 = vmatprep.mubr.bf16.mxu1 %v14188_v6  ;;  %v9812_v1 = vrot.slane %v9810_v62, 5  ;;  %v19167_v4 = vsel %vm16978_vm13, %v10563_v11, %v10564_v13  ;;  %v19171_v37 = vsel %vm16978_vm13, %v14248_v38, %v10568_v54  ;;  %v9655_v6 = vld [vmem:[#allocation3 + $0x50] sm:$0x1]  ;;  %v9820_v17 = vshrl.u32 %v9654_v63, 16  ;;  %v10470_v38 = vld [vmem:[#allocation3 + $0x44] sm:$0x1] }
 0x36f   : > { %v19173_v29 = vrot.slane %v9816_v27, 5  ;;  %v9831_v3 = vshrl.u32 %v9656_v15, 16  ;;  %v9834_v24 = vshll.u32 %v9656_v15, 16  ;;  %v9840_v60 = vshll.u32 %v9657_v42, 16  ;;  %v16270_v27 = vld [vmem:[#allocation3 + $0xa8] sm:$0xff]  }
 0x370   : > { %v9813_v41 = vor.u32 %v9812_v1, %v9809_v7  ;;  %v9805_v35 = vsel %vm16984_vm14, %v9800_v8, %v19144_v51  ;;  %v19180_v32 = vsel %vm16978_vm13, %v10570_v56, %v10571_v58  ;;  %v9822_v14 = vrot.slane %v9820_v17, 4  ;;  %v9659_v58 = vld [vmem:[#allocation3 + $0x60] sm:$0xf]  ;;  %v9662_v17 = vld [vmem:[#allocation3 + $0x6c] sm:$0xf] }
 0x371   : > { %v9844_v21 = vshrl.u32 %v9657_v42, 16  ;;  %v9826_v12 = vshll.u32 %v9655_v6, 16  ;;  %v9833_v40 = vrot.slane %v9831_v3, 4  ;;  %v9836_v50 = vrot.slane %v9834_v24, 5  ;;  %v9663_v24 = vld [vmem:[#allocation3 + $0x70] sm:$0xf] }
 0x372   : > { %v19182_v5 = vrot.slane %v9840_v60, 5  ;;  %v19184_v33 = vrot.slane %v9813_v41, 4  ;;  %v9823_v54 = vor.u32 %v9822_v14, %v19173_v29  ;;  %v9850_v51 = vshll.u32 %v9658_v22, 16  ;;  %v16278_v60 = vld [vmem:[#allocation10 + $0x1b0] sm:$0xff]  }
 0x373   : > { %15669 = vmatmul.mubr.bf16.gmra.mxu0 %v16266_v36  ;;  %v9846_v53 = vrot.slane %v9844_v21, 4  ;;  %v9795_v13 = vsel %vm16984_vm14, %v9790_v26, %v19134_v61  ;;  %v14263_v63 = vcombine.low %v19163_v48, %v19167_v4  ;;  %v9837_v57 = vor.u32 %v9836_v50, %v9833_v40  ;;  %v9661_v21 = vld [vmem:[#allocation3 + $0x68] sm:$0x1] }
 0x374   : > { %15672 = vmatprep.mubr.bf16.mxu0 %v16268_v10  ;;  %v10575_v11 = vrot.slane %v10466_v9, 5  ;;  %v19196_v15 = vcombine.low %v9795_v13, %v9805_v35  ;;  %v19198_v8 = vrot.slane %v9823_v54, 4  ;;  %v10582_v55 = vrot.slane %v10469_v45, 5  ;;  %v16272_v10 = vld [vmem:[#allocation3 + $0xb4] sm:$0xff]   ;;  %v10472_v13 = vld [vmem:[#allocation3 + $0x4c] sm:$0xf] }
 0x375   : > { %15629 = vmatmul.mubr.bf16.gmra.mxu1 %v14189_v0  ;;  %v9847_v19 = vor.u32 %v9846_v53, %v19182_v5  ;;  %v9660_v0 = vld [vmem:[#allocation3 + $0x64] sm:$0xf]  ;;  %v14264_v61 = vcombine.low %v19171_v37, %v19180_v32  ;;  %v9828_v26 = vrot.slane %v9826_v12, 5  ;;  %v14249_v43 = vrot.slane %v10465_v31, 9 }
 0x376   : > { %15696 = vmatprep.mubr.bf16.mxu1 %v19095_v52  ;;  %v10577_v62 = vrot.slane %v10575_v11, 4  ;;  %v9819_v42 = vsel %vm16984_vm14, %v19184_v33, %v19173_v29  ;;  %v19209_v39 = vrot.slane %v9850_v51, 5  ;;  %v10578_v56 = vrot.slane %v10467_v2, 5  ;;  %v9664_v2 = vld [vmem:[#allocation3 + $0x74] sm:$0x1]  ;;  %v19230_v33 = vpop.f32.mrf.mxu1 }
 0x377   : > { %v19207_v52 = vrot.slane %v9847_v19, 4  ;;  %v9838_v7 = vrot.slane %v9837_v57, 4  ;;  %v19213_v1 = vsel %vm16978_vm13, %v14249_v43, %v10575_v11  ;;  %v14250_v36 = vrot.slane %v10468_v46, 9  ;;  %v16280_v11 = vld [vmem:[#allocation10 + $0x1a8] sm:$0xff]  }
 0x378   : > { %v9855_v6 = vshrl.u32 %v9659_v58, 16  ;;  %v9829_v41 = vsel %vm16984_vm14, %v19198_v8, %v9828_v26  ;;  %v10584_v29 = vrot.slane %v10582_v55, 4  ;;  %v10585_v22 = vrot.slane %v10470_v38, 5  ;;  %v10471_v26 = vld [vmem:[#allocation3 + $0x48] sm:$0xe]  ;;  %v16274_v43 = vld [vmem:[#allocation3 + $0xc0] sm:$0xff]  }
 0x379   : > { %v9858_v3 = vshll.u32 %v9659_v58, 16  ;;  %v19220_v35 = vsel %vm16978_vm13, %v10577_v62, %v10578_v56  ;;  %v19224_v14 = vsel %vm16978_vm13, %v14250_v36, %v10582_v55  ;;  %v9864_v9 = vshll.u32 %v9660_v0, 16  ;;  %v19246_v56 = vpop.f32.mrf.mxu1 }
 0x37a   : > { %v9857_v31 = vrot.slane %v9855_v6, 4  ;;  %v9853_v12 = vsel %vm16984_vm14, %v19207_v52, %v19209_v39  ;;  %v9868_v50 = vshrl.u32 %v9660_v0, 16  ;;  %v9879_v45 = vshrl.u32 %v9662_v17, 16  ;;  %v19244_v39 = vld [vmem:[#allocation3 + $0x58] sm:$0xf] }
 0x37b   : > { %15673 = vmatmul.mubr.bf16.gmra.mxu0 %v16270_v27  ;;  %v9860_v40 = vrot.slane %v9858_v3, 5  ;;  %v19233_v54 = vrot.slane %v9864_v9, 5  ;;  %v9882_v53 = vshll.u32 %v9662_v17, 16  ;;  %v9888_v51 = vshll.u32 %v9663_v24, 16 }
 0x37c   : > { %15676 = vmatprep.mubr.bf16.mxu0 %v16272_v10  ;;  %v9892_v46 = vshrl.u32 %v9663_v24, 16  ;;  %v19239_v57 = vsel %vm16978_vm13, %v10584_v29, %v10585_v22  ;;  %v9870_v58 = vrot.slane %v9868_v50, 4  ;;  %v9881_v8 = vrot.slane %v9879_v45, 4  ;;  %v10473_v10 = vld [vmem:[#allocation3 + $0x50] sm:$0x1] }
 0x37d   : > { %15697 = vmatmul.mubr.bf16.vlgmr.msra.gmra.mxu1 %v19107_v44  ;;  %v9861_v38 = vor.u32 %v9860_v40, %v9857_v31  ;;  %v9874_v44 = vshll.u32 %v9661_v21, 16  ;;  %v9884_v19 = vrot.slane %v9882_v53, 5  ;;  %v19241_v55 = vrot.slane %v9888_v51, 5  ;;  %v19254_v29 = vld [vmem:[#allocation3 + $0x54] sm:$0xe] }
 0x37e   : > { %15700 = vmatprep.mubr.bf16.mxu1 %v19154_v34  ;;  %15777 = vmatpush3.bf16.msra.mxu1 %v19057_v20  ;;  %v9894_v0 = vrot.slane %v9892_v46, 4  ;;  %v9871_v34 = vor.u32 %v9870_v58, %v19233_v54  ;;  %v9898_v20 = vshll.u32 %v9664_v2, 16  ;;  %v10589_v52 = vrot.slane %v10472_v13, 5  ;;  %v9665_v22 = vld [vmem:[#allocation3 + $0x78] sm:$0xf]  ;;  %v19273_v46 = vpop.f32.mrf.mxu1 }
 0x37f   : > { %15778 = vmatprep.subr.bf16.mxu1 %v16278_v60  ;;  %v9862_v62 = vrot.slane %v9861_v38, 4  ;;  %v19248_v27 = vcombine.low %v9819_v42, %v9829_v41  ;;  %v9843_v36 = vsel %vm16984_vm14, %v9838_v7, %v19182_v5  ;;  %v9885_v6 = vor.u32 %v9884_v19, %v9881_v8  ;;  %v19260_v41 = vld [vmem:[#allocation3 + $0x5c] sm:$0x1]  ;;  %v9668_v51 = vld [vmem:[#allocation3 + $0x84] sm:$0xf] }
 0x380   : > { %v9895_v17 = vor.u32 %v9894_v0, %v19241_v55  ;;  %v19256_v3 = vcombine.low %v9843_v36, %v9853_v12  ;;  %v14265_v24 = vcombine.low %v19213_v1, %v19220_v35  ;;  %v9872_v21 = vrot.slane %v9871_v34, 4  ;;  %v9666_v31 = vld [vmem:[#allocation3 + $0x7c] sm:$0xf]  ;;  %v9667_v12 = vld [vmem:[#allocation3 + $0x80] sm:$0x1] }
 0x381   : > { %v10591_v42 = vrot.slane %v10589_v52, 4  ;;  %v14266_v5 = vcombine.low %v19224_v14, %v19239_v57  ;;  %v9876_v7 = vrot.slane %v9874_v44, 5  ;;  %v14251_v9 = vrot.slane %v10471_v26, 9 }
 0x382   : > { %15779 = vmatpush3.bf16.msra.mxu1 %v16278_v60  ;;  %v10596_v40 = vrot.slane %v19244_v39, 5  ;;  %v16282_v60 = vld [vmem:[#allocation10 + $0x1a0] sm:$0xff]   ;;  %v9867_v50 = vsel %vm16984_vm14, %v9862_v62, %v19233_v54  ;;  %v19271_v2 = vrot.slane %v9898_v20, 5  ;;  %v10592_v45 = vrot.slane %v10473_v10, 5  ;;  %v19291_v20 = vpop.f32.mrf.mxu1  ;;  %v16288_v39 = vld [vmem:[#allocation10 + $0x188] sm:$0xff]  }
 0x383   : > { %15677 = vmatmul.mubr.bf16.gmra.mxu0 %v16274_v43  ;;  %15780 = vmatprep.subr.bf16.mxu1 %v16280_v11  ;;  %v9903_v53 = vshrl.u32 %v9665_v22, 16  ;;  %v9886_v13 = vrot.slane %v9885_v6, 4  ;;  %v9896_v38 = vrot.slane %v9895_v17, 4  ;;  %v19278_v58 = vsel %vm16978_vm13, %v14251_v9, %v10589_v52  ;;  %v16284_v43 = vld [vmem:[#allocation10 + $0x198] sm:$0xff]   ;;  %v16279_v52 = vld [vmem:[#allocation10 + $0x1f0] sm:$0xff]  }
 0x384   : > { %15744 = vmatprep.mubr.bf16.mxu0 %v14262_v47  ;;  %v14252_v25 = vrot.slane %v19254_v29, 9  ;;  %v9877_v47 = vsel %vm16984_vm14, %v9872_v21, %v9876_v7  ;;  %v19286_v54 = vsel %vm16978_vm13, %v10591_v42, %v10592_v45  ;;  %v10599_v8 = vrot.slane %v19260_v41, 5  ;;  %v10478_v29 = vld [vmem:[#allocation3 + $0x64] sm:$0xf]  ;;  %v9670_v42 = vld [vmem:[#allocation3 + $0x8c] sm:$0x1] }
 0x385   : > { %15701 = vmatmul.mubr.bf16.gmra.mxu1 %v19159_v16  ;;  %v10598_v16 = vrot.slane %v10596_v40, 4  ;;  %v9905_v44 = vrot.slane %v9903_v53, 4  ;;  %v9906_v19 = vshll.u32 %v9665_v22, 16  ;;  %v9912_v0 = vshll.u32 %v9666_v31, 16  ;;  %v10477_v45 = vld [vmem:[#allocation3 + $0x60] sm:$0xe] }
 0x386   : > { %15704 = vmatprep.mubr.bf16.mxu1 %v19196_v15  ;;  %15781 = vmatpush3.bf16.msra.mxu1 %v16280_v11  ;;  %v9916_v26 = vshrl.u32 %v9666_v31, 16  ;;  %v9922_v15 = vshll.u32 %v9667_v12, 16  ;;  %v9927_v11 = vshrl.u32 %v9668_v51, 16  ;;  %v9930_v62 = vshll.u32 %v9668_v51, 16  ;;  %v19314_v53 = vld [vmem:[#allocation3 + $0x70] sm:$0xf]  ;;  %v19316_v51 = vpop.f32.mrf.mxu1 }
 0x387   : > { %15782 = vmatprep.subr.bf16.mxu1 %v16282_v60  ;;  %v9936_v34 = vshll.u32 %v9669_v30, 16  ;;  %v19293_v36 = vcombine.low %v9867_v50, %v9877_v47  ;;  %v9908_v6 = vrot.slane %v9906_v19, 5  ;;  %v9914_v17 = vrot.slane %v9912_v0, 5 }
 0x388   : > { %v9918_v10 = vrot.slane %v9916_v26, 4  ;;  %v9891_v22 = vsel %vm16984_vm14, %v9886_v13, %v19241_v55  ;;  %v9901_v21 = vsel %vm16984_vm14, %v9896_v38, %v19271_v2  ;;  %v9929_v41 = vrot.slane %v9927_v11, 4  ;;  %v16286_v55 = vld [vmem:[#allocation10 + $0x190] sm:$0xff]   ;;  %v9672_v26 = vld [vmem:[#allocation3 + $0x94] sm:$0xf] }
 0x389   : > { %v9932_v31 = vrot.slane %v9930_v62, 5  ;;  %v9909_v7 = vor.u32 %v9908_v6, %v9905_v44  ;;  %v19304_v12 = vrot.slane %v9936_v34, 5  ;;  %v9940_v50 = vshrl.u32 %v9669_v30, 16  ;;  %v9674_v11 = vld [vmem:[#allocation3 + $0x9c] sm:$0xf]  ;;  %v19340_v62 = vpop.f32.mrf.mxu1 }
 0x38a   : > { %15783 = vmatpush3.bf16.msra.mxu1 %v16282_v60  ;;  %v9919_v9 = vor.u32 %v9918_v10, %v9914_v17  ;;  %v16281_v60 = vld [vmem:[#allocation10 + $0x1e8] sm:$0xff]   ;;  %v19312_v2 = vsel %vm16978_vm13, %v10598_v16, %v10599_v8  ;;  %v9924_v48 = vrot.slane %v9922_v15, 5  ;;  %v14230_v38 = vcombine.low %v9891_v22, %v9901_v21  ;;  %v9671_v8 = vld [vmem:[#allocation3 + $0x90] sm:$0xf]  ;;  %v9673_v21 = vld [vmem:[#allocation3 + $0x98] sm:$0x1] }
 0x38b   : > { %15745 = vmatmul.mubr.bf16.vlgmr.msra.gmra.mxu0 %v14263_v63  ;;  %15784 = vmatprep.subr.bf16.mxu1 %v16284_v43  ;;  %v9933_v4 = vor.u32 %v9932_v31, %v9929_v41  ;;  %v10603_v63 = vrot.slane %v10478_v29, 5  ;;  %v9910_v13 = vrot.slane %v9909_v7, 4  ;;  %v9942_v32 = vrot.slane %v9940_v50, 4  ;;  %v10482_v29 = vld [vmem:[#allocation3 + $0x74] sm:$0x1] }
 0x38c   : > { %15748 = vmatprep.mubr.bf16.mxu0 %v14264_v61  ;;  %15825 = vmatpush3.bf16.msra.mxu0 %v19120_v28  ;;  %v9920_v37 = vrot.slane %v9919_v9, 4  ;;  %v9946_v61 = vshll.u32 %v9670_v42, 16  ;;  %v10479_v28 = vld [vmem:[#allocation3 + $0x68] sm:$0x1]  ;;  %v14267_v30 = vcombine.low %v19278_v58, %v19286_v54  ;;  %v19326_v47 = vsel %vm16978_vm13, %v14252_v25, %v10596_v40 }
 0x38d   : > { %15705 = vmatmul.mubr.bf16.gmra.mxu1 %v19248_v27  ;;  %15826 = vmatprep.subr.bf16.mxu0 %v16279_v52  ;;  %v14253_v16 = vrot.slane %v10477_v45, 9  ;;  %v19328_v27 = vld [vmem:[#allocation3 + $0x6c] sm:$0xe]  ;;  %v19332_v19 = vrot.slane %v9933_v4, 4  ;;  %v10610_v0 = vrot.slane %v19314_v53, 5  ;;  %v14268_v40 = vcombine.low %v19326_v47, %v19312_v2  ;;  %v16291_v4 = vld [vmem:[#allocation10 + $0x180] sm:$0xff]  }
 0x38e   : > { %15708 = vmatprep.mubr.bf16.mxu1 %v19256_v3  ;;  %15785 = vmatpush3.bf16.msra.mxu1 %v16284_v43  ;;  %v9925_v44 = vsel %vm16984_vm14, %v9920_v37, %v9924_v48  ;;  %v9943_v3 = vor.u32 %v9942_v32, %v19304_v12  ;;  %v9915_v25 = vsel %vm16984_vm14, %v9910_v13, %v9914_v17  ;;  %v10605_v43 = vrot.slane %v10603_v63, 4  ;;  %v9675_v45 = vld [vmem:[#allocation3 + $0xa0] sm:$0xf]  ;;  %v19367_v13 = vpop.f32.mrf.mxu1 }
 0x38f   : > { %15786 = vmatprep.subr.bf16.mxu1 %v16286_v55  ;;  %v10606_v15 = vrot.slane %v10479_v28, 5  ;;  %v19342_v34 = vcombine.low %v9915_v25, %v9925_v44  ;;  %v19344_v6 = vrot.slane %v9946_v61, 5  ;;  %v19348_v10 = vsel %vm16978_vm13, %v14253_v16, %v10603_v63  ;;  %v16285_v63 = vld [vmem:[#allocation10 + $0x1d8] sm:$0xff]  }
 0x390   : > { %15827 = vmatpush3.bf16.msra.mxu0 %v16279_v52  ;;  %v16283_v52 = vld [vmem:[#allocation10 + $0x1e0] sm:$0xff]   ;;  %v14254_v22 = vrot.slane %v19328_v27, 9  ;;  %v9951_v17 = vshrl.u32 %v9671_v8, 16  ;;  %v9954_v42 = vshll.u32 %v9671_v8, 16  ;;  %v9960_v41 = vshll.u32 %v9672_v26, 16 }
 0x391   : > { %15828 = vmatprep.subr.bf16.mxu0 %v16281_v60  ;;  %v9964_v31 = vshrl.u32 %v9672_v26, 16  ;;  %v9939_v7 = vsel %vm16984_vm14, %v19332_v19, %v19304_v12  ;;  %v9944_v9 = vrot.slane %v9943_v3, 4  ;;  %v10612_v50 = vrot.slane %v10610_v0, 4  ;;  %v10483_v19 = vld [vmem:[#allocation3 + $0x78] sm:$0xe]  ;;  %v19380_v3 = vld [vmem:[#allocation10 + $0x238] sm:$0xff]  }
 0x392   : > { %15787 = vmatpush3.bf16.msra.mxu1 %v16286_v55  ;;  %v9975_v48 = vshrl.u32 %v9674_v11, 16  ;;  %v19365_v1 = vsel %vm16978_vm13, %v10605_v43, %v10606_v15  ;;  %v10613_v35 = vrot.slane %v10482_v29, 5  ;;  %v9956_v12 = vrot.slane %v9954_v42, 5  ;;  %v9676_v55 = vld [vmem:[#allocation3 + $0xa4] sm:$0x1]  ;;  %v19386_v15 = vpop.f32.mrf.mxu1 }
 0x393   : > { %15749 = vmatmul.mubr.bf16.gmra.mxu0 %v14265_v24  ;;  %15788 = vmatprep.subr.bf16.mxu1 %v16288_v39  ;;  %v9953_v24 = vrot.slane %v9951_v17, 4  ;;  %v19370_v37 = vrot.slane %v9960_v41, 5  ;;  %v9966_v32 = vrot.slane %v9964_v31, 4  ;;  %v9970_v14 = vshll.u32 %v9673_v21, 16  ;;  %v19384_v43 = vld [vmem:[#allocation3 + $0x88] sm:$0xf] }
 0x394   : > { %15752 = vmatprep.mubr.bf16.mxu0 %v14266_v5  ;;  %15829 = vmatpush3.bf16.msra.mxu0 %v16281_v60  ;;  %v9977_v57 = vrot.slane %v9975_v48, 4  ;;  %v10484_v5 = vld [vmem:[#allocation3 + $0x7c] sm:$0xf]  ;;  %v9978_v61 = vshll.u32 %v9674_v11, 16  ;;  %v9984_v28 = vshll.u32 %v9675_v45, 16  ;;  %v9988_v16 = vshrl.u32 %v9675_v45, 16 }
 0x395   : > { %15709 = vmatmul.mubr.bf16.gmra.mxu1 %v19293_v36  ;;  %15830 = vmatprep.subr.bf16.mxu0 %v16283_v52  ;;  %v9957_v60 = vor.u32 %v9956_v12, %v9953_v24  ;;  %v9949_v27 = vsel %vm16984_vm14, %v9944_v9, %v19344_v6  ;;  %v19377_v36 = vsel %vm16978_vm13, %v10612_v50, %v10613_v35  ;;  %v9994_v44 = vshll.u32 %v9676_v55, 16  ;;  %v19396_v21 = vld [vmem:[#allocation3 + $0x80] sm:$0x1]  ;;  %v16287_v17 = vld [vmem:[#allocation10 + $0x1d0] sm:$0xff]   ;;  %v19399_v50 = vld [vmem:[#allocation3 + $0x84] sm:$0xe] }
 0x396   : > { %15712 = vmatprep.mubr.bf16.mxu1 %v14230_v38  ;;  %15789 = vmatpush3.bf16.msra.mxu1 %v16288_v39  ;;  %v9967_v8 = vor.u32 %v9966_v32, %v19370_v37  ;;  %v9980_v38 = vrot.slane %v9978_v61, 5  ;;  %v19382_v26 = vrot.slane %v9984_v28, 5  ;;  %v9990_v39 = vrot.slane %v9988_v16, 4  ;;  %v9677_v45 = vld [vmem:[#allocation3 + $0xa8] sm:$0xf] }
 0x397   : > { %15790 = vmatprep.subr.bf16.mxu1 %v16291_v4  ;;  %v10617_v25 = vrot.slane %v10484_v5, 5  ;;  %v14269_v11 = vcombine.low %v19348_v10, %v19365_v1  ;;  %v19394_v6 = vsel %vm16978_vm13, %v14254_v22, %v10610_v0  ;;  %v9958_v29 = vrot.slane %v9957_v60, 4  ;;  %v10488_v48 = vld [vmem:[#allocation3 + $0x8c] sm:$0x1]  ;;  %v9680_v32 = vld [vmem:[#allocation3 + $0xb4] sm:$0xf] }
 0x398   : > { %15831 = vmatpush3.bf16.msra.mxu0 %v16283_v52  ;;  %v9968_v52 = vrot.slane %v9967_v8, 4  ;;  %v9972_v42 = vrot.slane %v9970_v14, 5  ;;  %v9981_v41 = vor.u32 %v9980_v38, %v9977_v57  ;;  %v9991_v31 = vor.u32 %v9990_v39, %v19382_v26  ;;  %v9678_v24 = vld [vmem:[#allocation3 + $0xac] sm:$0xf]  ;;  %v16290_v14 = vld [vmem:[#allocation10 + $0x1c8] sm:$0xff]  }
 0x399   : > { %15832 = vmatprep.subr.bf16.mxu0 %v16285_v63  ;;  %v14255_v9 = vrot.slane %v10483_v19, 9  ;;  %v14232_v53 = vcombine.low %v9939_v7, %v9949_v27  ;;  %v14270_v0 = vcombine.low %v19394_v6, %v19377_v36  ;;  %v9996_v22 = vrot.slane %v9994_v44, 5  ;;  %v19417_v7 = vpop.f32.mrf.mxu1  ;;  %v9681_v61 = vld [vmem:[#allocation3 + $0xb8] sm:$0xf]  ;;  %v9682_v27 = vld [vmem:[#allocation3 + $0xbc] sm:$0x1] }
 0x39a   : > { %15791 = vmatpush3.bf16.msra.mxu1 %v16291_v4  ;;  %v10624_v35 = vrot.slane %v19384_v43, 5  ;;  %v9973_v4 = vsel %vm16984_vm14, %v9968_v52, %v9972_v42  ;;  %v9982_v58 = vrot.slane %v9981_v41, 4  ;;  %v9992_v54 = vrot.slane %v9991_v31, 4  ;;  %v16294_v52 = vld [vmem:[#allocation10 + $0x1c0] sm:$0xff]  }
 0x39b   : > { %15753 = vmatmul.mubr.bf16.gmra.mxu0 %v14267_v30  ;;  %15872 = vmatprep.subr.bf16.mxu1 %v19380_v3  ;;  %v19415_v30 = vsel %vm16978_vm13, %v14255_v9, %v10617_v25  ;;  %v9963_v12 = vsel %vm16984_vm14, %v9958_v29, %v19370_v37  ;;  %v10619_v2 = vrot.slane %v10617_v25, 4  ;;  %v10620_v47 = vrot.slane %v19396_v21, 5  ;;  %v19434_v38 = vpop.f32.mrf.mxu1 }
 0x39c   : > { %15756 = vmatprep.mubr.bf16.mxu0 %v14268_v40  ;;  %15833 = vmatpush3.bf16.msra.mxu0 %v16285_v63  ;;  %v9679_v40 = vld [vmem:[#allocation3 + $0xb0] sm:$0x1]  ;;  %v9999_v55 = vshrl.u32 %v9677_v45, 16  ;;  %v14256_v57 = vrot.slane %v19399_v50, 9  ;;  %v10627_v63 = vrot.slane %v10488_v48, 5  ;;  %v10002_v5 = vshll.u32 %v9677_v45, 16 }
 0x39d   : > { %15713 = vmatmul.mubr.bf16.gmra.mxu1 %v19342_v34  ;;  %15834 = vmatprep.subr.bf16.mxu0 %v16287_v17  ;;  %v10008_v60 = vshll.u32 %v9678_v24, 16  ;;  %v14233_v34 = vcombine.low %v9963_v12, %v9973_v4  ;;  %v10626_v28 = vrot.slane %v10624_v35, 4  ;;  %v10012_v16 = vshrl.u32 %v9678_v24, 16  ;;  %v19450_v10 = vpop.f32.mrf.mxu1  ;;  %v10491_v12 = vld [vmem:[#allocation3 + $0x98] sm:$0x1] }
 0x39e   : > { %15716 = vmatprep.mubr.bf16.mxu1 %v14232_v53  ;;  %v10001_v37 = vrot.slane %v9999_v55, 4  ;;  %v9987_v36 = vsel %vm16984_vm14, %v9982_v58, %v19382_v26  ;;  %v9997_v8 = vsel %vm16984_vm14, %v9992_v54, %v9996_v22  ;;  %v10004_v44 = vrot.slane %v10002_v5, 5  ;;  %v19436_v26 = vld [vmem:[#allocation3 + $0x94] sm:$0xf]  ;;  %v19442_v53 = vld [vmem:[#allocation3 + $0xa0] sm:$0xf] }
 0x39f   : > { %v19432_v19 = vrot.slane %v10008_v60, 5  ;;  %v10014_v39 = vrot.slane %v10012_v16, 4  ;;  %v10023_v25 = vshrl.u32 %v9680_v32, 16  ;;  %v10026_v6 = vshll.u32 %v9680_v32, 16  ;;  %v19448_v58 = vld [vmem:[#allocation3 + $0x90] sm:$0xe] }
 0x3a0   : > { %15835 = vmatpush3.bf16.msra.mxu0 %v16287_v17  ;;  %v10032_v29 = vshll.u32 %v9681_v61, 16  ;;  %v10005_v21 = vor.u32 %v10004_v44, %v10001_v37  ;;  %v10018_v42 = vshll.u32 %v9679_v40, 16  ;;  %v10036_v41 = vshrl.u32 %v9681_v61, 16  ;;  %v19453_v40 = vld [vmem:[#allocation11 + $0x38] sm:$0xff]   ;;  %v10492_v32 = vld [vmem:[#allocation3 + $0x9c] sm:$0xe] }
 0x3a1   : > { %15836 = vmatprep.subr.bf16.mxu0 %v16290_v14  ;;  %v10042_v31 = vshll.u32 %v9682_v27, 16  ;;  %v10015_v17 = vor.u32 %v10014_v39, %v19432_v19  ;;  %v10025_v9 = vrot.slane %v10023_v25, 4  ;;  %v10028_v50 = vrot.slane %v10026_v6, 5  ;;  %v9685_v44 = vld [vmem:[#allocation3 + $0xc8] sm:$0x1] }
 0x3a2   : > { %v10034_v45 = vrot.slane %v10032_v29, 5  ;;  %v14234_v22 = vcombine.low %v9987_v36, %v9997_v8  ;;  %v10621_v48 = vsel %vm16978_vm13, %v10619_v2, %v10620_v47  ;;  %v10628_v24 = vsel %vm16978_vm13, %v10626_v28, %v10627_v63  ;;  %v9683_v63 = vld [vmem:[#allocation3 + $0xc0] sm:$0xf]  ;;  %v9684_v28 = vld [vmem:[#allocation3 + $0xc4] sm:$0xf] }
 0x3a3   : > { %15757 = vmatmul.mubr.bf16.gmra.mxu0 %v14269_v11  ;;  %v10038_v4 = vrot.slane %v10036_v41, 4  ;;  %v10006_v1 = vrot.slane %v10005_v21, 4  ;;  %v10016_v11 = vrot.slane %v10015_v17, 4  ;;  %v10029_v54 = vor.u32 %v10028_v50, %v10025_v9 }
 0x3a4   : > { %15760 = vmatprep.mubr.bf16.mxu0 %v14270_v0  ;;  %15837 = vmatpush3.bf16.msra.mxu0 %v16290_v14  ;;  %v10631_v0 = vrot.slane %v19436_v26, 5  ;;  %v10625_v2 = vsel %vm16978_vm13, %v14256_v57, %v10624_v35  ;;  %v10020_v47 = vrot.slane %v10018_v42, 5  ;;  %v10638_v14 = vrot.slane %v19442_v53, 5  ;;  %v10494_v35 = vld [vmem:[#allocation3 + $0xa4] sm:$0x1]  ;;  %v19464_v57 = vpop.f32.mrf.mxu1 }
 0x3a5   : > { %15717 = vmatmul.mubr.bf16.gmra.mxu1 %v14233_v34  ;;  %15838 = vmatprep.subr.bf16.mxu0 %v16294_v52  ;;  %v10039_v55 = vor.u32 %v10038_v4, %v10034_v45  ;;  %v14271_v5 = vcombine.low %v19415_v30, %v10621_v48  ;;  %v14272_v60 = vcombine.low %v10625_v2, %v10628_v24  ;;  %v10030_v61 = vrot.slane %v10029_v54, 4  ;;  %v10496_v42 = vld [vmem:[#allocation3 + $0xac] sm:$0xf]  ;;  %v10499_v26 = vld [vmem:[#allocation3 + $0xb8] sm:$0xf]  ;;  %v19474_v48 = vpop.f32.mrf.mxu0 }
 0x3a6   : > { %15720 = vmatprep.mubr.bf16.mxu1 %v14234_v22  ;;  %v10044_v34 = vrot.slane %v10042_v31, 5  ;;  %v10021_v37 = vsel %vm16984_vm14, %v10016_v11, %v10020_v47  ;;  %v14257_v43 = vrot.slane %v19448_v58, 9  ;;  %v10634_v27 = vrot.slane %v10491_v12, 5  ;;  %v10495_v22 = vld [vmem:[#allocation3 + $0xa8] sm:$0xe]  ;;  %v19476_v24 = vpop.f32.mrf.mxu1 }
 0x3a7   : > { %v10040_v16 = vrot.slane %v10039_v55, 4  ;;  %v10011_v36 = vsel %vm16984_vm14, %v10006_v1, %v19432_v19  ;;  %v10633_v30 = vrot.slane %v10631_v0, 4  ;;  %v14258_v8 = vrot.slane %v10492_v32, 9  ;;  %v10498_v2 = vld [vmem:[#allocation3 + $0xb4] sm:$0xe] }
 0x3a8   : > { %15839 = vmatpush3.bf16.msra.mxu0 %v16294_v52  ;;  %v10047_v39 = vshrl.u32 %v9683_v63, 16  ;;  %v10640_v6 = vrot.slane %v10638_v14, 4  ;;  %v10050_v29 = vshll.u32 %v9683_v63, 16  ;;  %v10056_v21 = vshll.u32 %v9684_v28, 16 }
 0x3a9   : > { %15920 = vmatprep.subr.bf16.mxu0 %v19453_v40  ;;  %v10045_v25 = vsel %vm16984_vm14, %v10040_v16, %v10044_v34  ;;  %v14235_v52 = vcombine.low %v10011_v36, %v10021_v37  ;;  %v10035_v41 = vsel %vm16984_vm14, %v10030_v61, %v10034_v45  ;;  %v10060_v19 = vshrl.u32 %v9684_v28, 16  ;;  %v10497_v45 = vld [vmem:[#allocation3 + $0xb0] sm:$0x1]  ;;  %v11501_v61 = vld [vmem:[#allocation3 + $0x18] sm:$0xf]  ;;  %v19490_v36 = vpop.f32.mrf.mxu1 }
 0x3aa   : > { %v10049_v31 = vrot.slane %v10047_v39, 4  ;;  %v14236_v17 = vcombine.low %v10035_v41, %v10045_v25  ;;  %v10641_v9 = vrot.slane %v10494_v35, 5  ;;  %v10052_v50 = vrot.slane %v10050_v29, 5  ;;  %v19488_v35 = vpop.f32.mrf.mxu0  ;;  %v11502_v39 = vld [vmem:[#allocation3 + $0x1c] sm:$0xf] }
 0x3ab   : > { %15761 = vmatmul.mubr.bf16.gmra.mxu0 %v14271_v5  ;;  %v10058_v53 = vrot.slane %v10056_v21, 5  ;;  %v10635_v4 = vsel %vm16978_vm13, %v10633_v30, %v10634_v27  ;;  %v10062_v58 = vrot.slane %v10060_v19, 4  ;;  %v10066_v1 = vshll.u32 %v9685_v44, 16  ;;  %v19486_v27 = vld [vmem:[#allocation3 + $0xc4] sm:$0xf] }
 0x3ac   : > { %15764 = vmatprep.mubr.bf16.mxu0 %v14272_v60  ;;  %v10645_v11 = vrot.slane %v10496_v42, 5  ;;  %v10642_v54 = vsel %vm16978_vm13, %v10640_v6, %v10641_v9  ;;  %v10053_v12 = vor.u32 %v10052_v50, %v10049_v31  ;;  %v10652_v47 = vrot.slane %v10499_v26, 5  ;;  %v10500_v60 = vld [vmem:[#allocation3 + $0xbc] sm:$0x1]  ;;  %v19496_v6 = vld [vmem:[#allocation3 + $0xc0] sm:$0xe] }
 0x3ad   : > { %15721 = vmatmul.mubr.bf16.gmra.mxu1 %v14235_v52  ;;  %v10632_v55 = vsel %vm16978_vm13, %v14257_v43, %v10631_v0  ;;  %v10639_v32 = vsel %vm16978_vm13, %v14258_v8, %v10638_v14  ;;  %v10063_v63 = vor.u32 %v10062_v58, %v10058_v53  ;;  %v14259_v37 = vrot.slane %v10495_v22, 9  ;;  %v11504_v31 = vld [vmem:[#allocation3 + $0x24] sm:$0xf]  ;;  %v16289_v26 = vld [vmem:[#allocation3 + $0x18] sm:$0xff]   ;;  %v11505_v22 = vld [vmem:[#allocation3 + $0x28] sm:$0xf]  ;;  %v19505_v58 = vpop.f32.mrf.mxu1 }
 0x3ae   : > { %15724 = vmatprep.mubr.bf16.mxu1 %v14236_v17  ;;  %v10647_v5 = vrot.slane %v10645_v11, 4  ;;  %v14273_v34 = vcombine.low %v10632_v55, %v10635_v4  ;;  %v10054_v28 = vrot.slane %v10053_v12, 4  ;;  %v10648_v16 = vrot.slane %v10497_v45, 5  ;;  %v19503_v4 = vpop.f32.mrf.mxu0  ;;  %v10503_v45 = vld [vmem:[#allocation3 + $0xc8] sm:$0x1] }
 0x3af   : > { %v14274_v30 = vcombine.low %v10639_v32, %v10642_v54  ;;  %v10064_v44 = vrot.slane %v10063_v63, 4  ;;  %v10068_v0 = vrot.slane %v10066_v1, 5  ;;  %v14260_v43 = vrot.slane %v10498_v2, 9  ;;  %v11503_v54 = vld [vmem:[#allocation3 + $0x20] sm:$0x1] }
 0x3b0   : > { %v10646_v14 = vsel %vm16978_vm13, %v14259_v37, %v10645_v11  ;;  %v10649_v8 = vsel %vm16978_vm13, %v10647_v5, %v10648_v16  ;;  %v10654_v25 = vrot.slane %v10652_v47, 4  ;;  %v11550_v29 = vshrl.u32 %v11501_v61, 16  ;;  %v11507_v5 = vld [vmem:[#allocation3 + $0x30] sm:$0xf] }
 0x3b1   : > { %v10059_v21 = vsel %vm16984_vm14, %v10054_v28, %v10058_v53  ;;  %v10069_v42 = vsel %vm16984_vm14, %v10064_v44, %v10068_v0  ;;  %v10655_v52 = vrot.slane %v10500_v60, 5  ;;  %v10659_v41 = vrot.slane %v19486_v27, 5  ;;  %v11508_v0 = vld [vmem:[#allocation3 + $0x34] sm:$0xf]  ;;  %v11511_v27 = vld [vmem:[#allocation3 + $0x40] sm:$0xf] }
 0x3b2   : > { %v14237_v19 = vcombine.low %v10059_v21, %v10069_v42  ;;  %v11552_v17 = vrot.slane %v11550_v29, 4  ;;  %v11553_v9 = vshll.u32 %v11501_v61, 16  ;;  %v11559_v50 = vshll.u32 %v11502_v39, 16 }
 0x3b3   : > { %15765 = vmatmul.mubr.bf16.gmra.mxu0 %v14273_v34  ;;  %v14275_v1 = vcombine.low %v10646_v14, %v10649_v8  ;;  %v10653_v53 = vsel %vm16978_vm13, %v14260_v43, %v10652_v47  ;;  %v14261_v11 = vrot.slane %v19496_v6, 9  ;;  %v11563_v12 = vshrl.u32 %v11502_v39, 16  ;;  %v11506_v47 = vld [vmem:[#allocation3 + $0x2c] sm:$0x1]  ;;  %v19516_v43 = vpop.f32.mrf.mxu0  ;;  %v19518_v39 = vpop.f32.mrf.mxu1 }
 0x3b4   : > { %15768 = vmatprep.mubr.bf16.mxu0 %v14274_v30  ;;  %v10656_v2 = vsel %vm16978_vm13, %v10654_v25, %v10655_v52  ;;  %v11555_v55 = vrot.slane %v11553_v9, 5  ;;  %v19512_v32 = vrot.slane %v11559_v50, 5  ;;  %v11574_v63 = vshrl.u32 %v11504_v31, 16  ;;  %20856 = vst [vmem:[#allocation46_spill] sm:$0xff] %v19518_v39  ;;  %v16292_v9 = vld [vmem:[#allocation3 + $0x24] sm:$0xff]  }
 0x3b5   : > { %15725 = vmatmul.mubr.bf16.gmra.mxu1 %v14237_v19  ;;  %v10661_v60 = vrot.slane %v10659_v41, 4  ;;  %v11565_v61 = vrot.slane %v11563_v12, 4  ;;  %v11577_v34 = vshll.u32 %v11504_v31, 16  ;;  %v11583_v28 = vshll.u32 %v11505_v22, 16 }
 0x3b6   : > { %15792 = vmatprep.mubr.bf16.mxu1 %v16289_v26  ;;  %v11556_v37 = vor.u32 %v11555_v55, %v11552_v17  ;;  %v11569_v16 = vshll.u32 %v11503_v54, 16  ;;  %v11576_v30 = vrot.slane %v11574_v63, 4  ;;  %v11587_v44 = vshrl.u32 %v11505_v22, 16  ;;  %v16293_v22 = vld [vmem:[#allocation3 + $0x30] sm:$0xff]   ;;  %v16299_v63 = vld [vmem:[#allocation10 + $0x230] sm:$0xff]  }
 0x3b7   : > { %v11566_v14 = vor.u32 %v11565_v61, %v19512_v32  ;;  %v11579_v8 = vrot.slane %v11577_v34, 5  ;;  %v19521_v25 = vrot.slane %v11583_v28, 5  ;;  %v11598_v6 = vshrl.u32 %v11507_v5, 16 }
 0x3b8   : > { %v14276_v29 = vcombine.low %v10653_v53, %v10656_v2  ;;  %v10662_v21 = vrot.slane %v10503_v45, 5  ;;  %v11589_v42 = vrot.slane %v11587_v44, 4  ;;  %v11601_v52 = vshll.u32 %v11507_v5, 16  ;;  %v15558_v53 = vpop.f32.mrf.mxu0  ;;  %v19526_v45 = vpop.f32.mrf.mxu1 }
 0x3b9   : > { %v11567_v31 = vrot.slane %v11566_v14, 4  ;;  %v11580_v19 = vor.u32 %v11579_v8, %v11576_v30  ;;  %v11593_v26 = vshll.u32 %v11506_v47, 16  ;;  %v11607_v17 = vshll.u32 %v11508_v0, 16 }
 0x3ba   : > { %v10663_v50 = vsel %vm16978_vm13, %v10661_v60, %v10662_v21  ;;  %v11557_v54 = vrot.slane %v11556_v37, 4  ;;  %v11590_v12 = vor.u32 %v11589_v42, %v19521_v25  ;;  %v11611_v55 = vshrl.u32 %v11508_v0, 16  ;;  %v11510_v37 = vld [vmem:[#allocation3 + $0x3c] sm:$0xf]  ;;  %v19551_v21 = vpop.f32.mrf.mxu1 }
 0x3bb   : > { %15769 = vmatmul.mubr.bf16.gmra.mxu0 %v14275_v1  ;;  %v11571_v2 = vrot.slane %v11569_v16, 5  ;;  %v11509_v1 = vld [vmem:[#allocation3 + $0x38] sm:$0x1]  ;;  %v11600_v5 = vrot.slane %v11598_v6, 4  ;;  %v11603_v61 = vrot.slane %v11601_v52, 5  ;;  %v19528_v47 = vrot.slane %v11607_v17, 5 }
 0x3bc   : > { %15772 = vmatprep.mubr.bf16.mxu0 %v14276_v29  ;;  %v10660_v60 = vsel %vm16978_vm13, %v14261_v11, %v10659_v41  ;;  %v19534_v34 = vrot.slane %v11580_v19, 4  ;;  %v11613_v28 = vrot.slane %v11611_v55, 4  ;;  %v19541_v44 = vadd.f32 %v19474_v48, %v19230_v33  ;;  %v11513_v6 = vld [vmem:[#allocation3 + $0x48] sm:$0xf]  ;;  %v19549_v29 = vpop.f32.mrf.mxu0  ;;  %v11512_v19 = vld [vmem:[#allocation3 + $0x44] sm:$0x1] }
 0x3bd   : > { %15793 = vmatmul.mubr.bf16.vlgmr.msra.gmra.mxu1 %v16292_v9  ;;  %v14277_v30 = vcombine.low %v10660_v60, %v10663_v50  ;;  %v11572_v16 = vsel %vm16984_vm14, %v11567_v31, %v11571_v2  ;;  %v19543_v0 = vrot.slane %v11593_v26, 5  ;;  %v11562_v41 = vsel %vm16984_vm14, %v11557_v54, %v19512_v32  ;;  %v11514_v54 = vld [vmem:[#allocation3 + $0x4c] sm:$0xf] }
 0x3be   : > { %15796 = vmatprep.mubr.bf16.mxu1 %v16293_v22  ;;  %15873 = vmatpush3.bf16.msra.mxu1 %v19380_v3  ;;  %v11591_v11 = vrot.slane %v11590_v12, 4  ;;  %v11614_v14 = vor.u32 %v11613_v28, %v19528_v47  ;;  %v11617_v8 = vshll.u32 %v11509_v1, 16  ;;  %v16303_v3 = vld [vmem:[#allocation10 + $0x228] sm:$0xff]   ;;  %v11604_v33 = vor.u32 %v11603_v61, %v11600_v5  ;;  %v19562_v5 = vpop.f32.mrf.mxu0  ;;  %v19564_v61 = vpop.f32.mrf.mxu1  ;;  %v16297_v60 = vld [vmem:[#allocation3 + $0x48] sm:$0xff]  }
 0x3bf   : > { %15874 = vmatprep.subr.bf16.mxu1 %v16299_v63  ;;  %v19554_v48 = vadd.f32 %v15558_v53, %v19316_v51  ;;  %v11622_v42 = vshrl.u32 %v11510_v37, 16  ;;  %v11625_v52 = vshll.u32 %v11510_v37, 16  ;;  %v14310_v31 = vcombine.low %v11562_v41, %v11572_v16  ;;  %v16296_v51 = vld [vmem:[#allocation3 + $0x3c] sm:$0xff]   ;;  %v11515_v37 = vld [vmem:[#allocation3 + $0x50] sm:$0x1] }
 0x3c0   : > { %v11586_v32 = vsel %vm16984_vm14, %v19534_v34, %v19521_v25  ;;  %v11631_v26 = vshll.u32 %v11511_v27, 16  ;;  %v11635_v17 = vshrl.u32 %v11511_v27, 16  ;;  %v11615_v9 = vrot.slane %v11614_v14, 4  ;;  %v16307_v25 = vld [vmem:[#allocation10 + $0x220] sm:$0xff]  }
 0x3c1   : > { %v11624_v50 = vrot.slane %v11622_v42, 4  ;;  %v11627_v22 = vrot.slane %v11625_v52, 5  ;;  %v11646_v12 = vshrl.u32 %v11513_v6, 16  ;;  %v11619_v55 = vrot.slane %v11617_v8, 5  ;;  %v11516_v8 = vld [vmem:[#allocation3 + $0x54] sm:$0xf] }
 0x3c2   : > { %15875 = vmatpush3.bf16.msra.mxu1 %v16299_v63  ;;  %v19560_v53 = vrot.slane %v11631_v26, 5  ;;  %v11637_v2 = vrot.slane %v11635_v17, 4  ;;  %v11649_v1 = vshll.u32 %v11513_v6, 16  ;;  %v11596_v63 = vsel %vm16984_vm14, %v11591_v11, %v19543_v0  ;;  %v19584_v17 = vpop.f32.mrf.mxu0 }
 0x3c3   : > { %15773 = vmatmul.mubr.bf16.gmra.mxu0 %v14277_v30  ;;  %15876 = vmatprep.subr.bf16.mxu1 %v16303_v3  ;;  %v11605_v34 = vrot.slane %v11604_v33, 4  ;;  %v11628_v28 = vor.u32 %v11627_v22, %v11624_v50  ;;  %v11648_v30 = vrot.slane %v11646_v12, 4  ;;  %v11655_v41 = vshll.u32 %v11514_v54, 16  ;;  %v11517_v50 = vld [vmem:[#allocation3 + $0x58] sm:$0xf] }
 0x3c4   : > { %15840 = vmatprep.mubr.bf16.mxu0 %v14310_v31  ;;  %v11638_v16 = vor.u32 %v11637_v2, %v19560_v53  ;;  %v11651_v27 = vrot.slane %v11649_v1, 5  ;;  %v11659_v14 = vshrl.u32 %v11514_v54, 16  ;;  %v11620_v6 = vsel %vm16984_vm14, %v11615_v9, %v11619_v55  ;;  %v19586_v9 = vpop.f32.mrf.mxu1  ;;  %v16300_v54 = vld [vmem:[#allocation3 + $0x54] sm:$0xff]   ;;  %v11519_v2 = vld [vmem:[#allocation3 + $0x60] sm:$0xf] }
 0x3c5   : > { %15797 = vmatmul.mubr.bf16.gmra.mxu1 %v16296_v51  ;;  %v19574_v42 = vadd.f32 %v19488_v35, %v19246_v56  ;;  %v19578_v0 = vadd.f32 %v19503_v4, %v19273_v46  ;;  %v11641_v11 = vshll.u32 %v11512_v19, 16  ;;  %v19580_v33 = vrot.slane %v11628_v28, 4  ;;  %20857 = vst [vmem:[#allocation32_spill] sm:$0xff] %v19586_v9  ;;  %v16302_v35 = vld [vmem:[#allocation11 + $0x30] sm:$0xff]   ;;  %v16311_v19 = vld [vmem:[#allocation10 + $0x218] sm:$0xff]   ;;  %v16301_v1 = vld [vmem:[#allocation3 + $0x60] sm:$0xff]  }
 0x3c6   : > { %15800 = vmatprep.mubr.bf16.mxu1 %v16297_v60  ;;  %15877 = vmatpush3.bf16.msra.mxu1 %v16303_v3  ;;  %v19582_v52 = vrot.slane %v11655_v41, 5  ;;  %v11661_v31 = vrot.slane %v11659_v14, 4  ;;  %v11665_v26 = vshll.u32 %v11515_v37, 16  ;;  %v14311_v56 = vcombine.low %v11586_v32, %v11596_v63  ;;  %v11518_v28 = vld [vmem:[#allocation3 + $0x5c] sm:$0x1]  ;;  %v19592_v41 = vld [vmem:[#allocation11 + $0x28] sm:$0xff]  }
 0x3c7   : > { %15878 = vmatprep.subr.bf16.mxu1 %v16307_v25  ;;  %v11610_v46 = vsel %vm16984_vm14, %v11605_v34, %v19528_v47  ;;  %v11652_v4 = vor.u32 %v11651_v27, %v11648_v30  ;;  %v11670_v3 = vshrl.u32 %v11516_v8, 16  ;;  %v11639_v12 = vrot.slane %v11638_v16, 4  ;;  %v11520_v14 = vld [vmem:[#allocation3 + $0x64] sm:$0xf] }
 0x3c8   : > { %v14312_v22 = vcombine.low %v11610_v46, %v11620_v6  ;;  %v11662_v51 = vor.u32 %v11661_v31, %v19582_v52  ;;  %v11673_v55 = vshll.u32 %v11516_v8, 16  ;;  %v11643_v60 = vrot.slane %v11641_v11, 5  ;;  %v19601_v8 = vpop.f32.mrf.mxu1  ;;  %v16315_v6 = vld [vmem:[#allocation10 + $0x210] sm:$0xff]  }
 0x3c9   : > { %v11672_v32 = vrot.slane %v11670_v3, 4  ;;  %v11679_v63 = vshll.u32 %v11517_v50, 16  ;;  %v11683_v37 = vshrl.u32 %v11517_v50, 16  ;;  %v11634_v47 = vsel %vm16984_vm14, %v19580_v33, %v19560_v53 }
 0x3ca   : > { %15879 = vmatpush3.bf16.msra.mxu1 %v16307_v25  ;;  %v11663_v34 = vrot.slane %v11662_v51, 4  ;;  %v11667_v30 = vrot.slane %v11665_v26, 5  ;;  %v11675_v27 = vrot.slane %v11673_v55, 5  ;;  %v11653_v11 = vrot.slane %v11652_v4, 4 }
 0x3cb   : > { %15841 = vmatmul.mubr.bf16.vlgmr.msra.gmra.mxu0 %v14311_v56  ;;  %v19603_v25 = vrot.slane %v11679_v63, 5  ;;  %v11685_v31 = vrot.slane %v11683_v37, 4  ;;  %v11694_v50 = vshrl.u32 %v11519_v2, 16  ;;  %15880 = vmatprep.subr.bf16.mxu1 %v16311_v19  ;;  %v11644_v53 = vsel %vm16984_vm14, %v11639_v12, %v11643_v60  ;;  %v11522_v60 = vld [vmem:[#allocation3 + $0x6c] sm:$0xf] }
 0x3cc   : > { %15844 = vmatprep.mubr.bf16.mxu0 %v14312_v22  ;;  %15921 = vmatpush3.bf16.msra.mxu0 %v19453_v40  ;;  %v19599_v16 = vpop.f32.mrf.mxu0  ;;  %v11521_v40 = vld [vmem:[#allocation3 + $0x68] sm:$0x1]  ;;  %v11676_v33 = vor.u32 %v11675_v27, %v11672_v32  ;;  %v11689_v26 = vshll.u32 %v11518_v28, 16  ;;  %v11697_v56 = vshll.u32 %v11519_v2, 16  ;;  %v11668_v3 = vsel %vm16984_vm14, %v11663_v34, %v11667_v30  ;;  %v19614_v28 = vpop.f32.mrf.mxu1  ;;  %v16319_v34 = vld [vmem:[#allocation10 + $0x208] sm:$0xff]  }
 0x3cd   : > { %15922 = vmatprep.subr.bf16.mxu0 %v16302_v35  ;;  %15801 = vmatmul.mubr.bf16.gmra.mxu1 %v16300_v54  ;;  %v11686_v4 = vor.u32 %v11685_v31, %v19603_v25  ;;  %v11696_v22 = vrot.slane %v11694_v50, 4  ;;  %v11703_v51 = vshll.u32 %v11520_v14, 16  ;;  %v11707_v63 = vshrl.u32 %v11520_v14, 16 }
 0x3ce   : > { %v19607_v46 = vpop.f32.mrf.mxu0  ;;  %15804 = vmatprep.mubr.bf16.mxu1 %v16301_v1  ;;  %15881 = vmatpush3.bf16.msra.mxu1 %v16311_v19  ;;  %v19612_v55 = vrot.slane %v11676_v33, 4  ;;  %v11699_v54 = vrot.slane %v11697_v56, 5  ;;  %v11713_v12 = vshll.u32 %v11521_v40, 16  ;;  %v14313_v2 = vcombine.low %v11634_v47, %v11644_v53  ;;  %v11523_v19 = vld [vmem:[#allocation3 + $0x70] sm:$0xf] }
 0x3cf   : > { %15882 = vmatprep.subr.bf16.mxu1 %v16315_v6  ;;  %v11658_v1 = vsel %vm16984_vm14, %v11653_v11, %v19582_v52  ;;  %v11687_v32 = vrot.slane %v11686_v4, 4  ;;  %v11705_v37 = vrot.slane %v11703_v51, 5  ;;  %v19622_v30 = vadd.f32 %v19516_v43, %v19291_v20  ;;  %v19626_v47 = vld [vmem:[#allocation3 + $0x74] sm:$0x1]  ;;  %v11525_v33 = vld [vmem:[#allocation3 + $0x78] sm:$0xf]  ;;  %v19633_v51 = vpop.f32.mrf.mxu1 }
 0x3d0   : > { %15923 = vmatpush3.bf16.msra.mxu0 %v16302_v35  ;;  %v16310_v35 = vld [vmem:[#allocation11 + $0x20] sm:$0xff]   ;;  %v14314_v27 = vcombine.low %v11658_v1, %v11668_v3  ;;  %v11700_v14 = vor.u32 %v11699_v54, %v11696_v22  ;;  %v11709_v31 = vrot.slane %v11707_v63, 4  ;;  %v19624_v40 = vpop.f32.mrf.mxu0  ;;  %v11682_v52 = vsel %vm16984_vm14, %v19612_v55, %v19603_v25  ;;  %v16304_v20 = vld [vmem:[#allocation3 + $0x6c] sm:$0xff]  }
 0x3d1   : > { %15924 = vmatprep.subr.bf16.mxu0 %v19592_v41  ;;  %v11691_v11 = vrot.slane %v11689_v26, 5  ;;  %v11718_v50 = vshrl.u32 %v11522_v60, 16  ;;  %v11721_v53 = vshll.u32 %v11522_v60, 16  ;;  %v16305_v43 = vld [vmem:[#allocation3 + $0x78] sm:$0xff]   ;;  %v11715_v4 = vrot.slane %v11713_v12, 5  ;;  %v16314_v60 = vld [vmem:[#allocation11 + $0x18] sm:$0xff]   ;;  %v19646_v9 = vpop.f32.mrf.mxu1 }
 0x3d2   : > { %15883 = vmatpush3.bf16.msra.mxu1 %v16315_v6  ;;  %v11701_v56 = vrot.slane %v11700_v14, 4  ;;  %v11710_v3 = vor.u32 %v11709_v31, %v11705_v37  ;;  %v11727_v22 = vshll.u32 %v11523_v19, 16  ;;  %v16322_v54 = vld [vmem:[#allocation10 + $0x200] sm:$0xff]   ;;  %v11731_v63 = vshrl.u32 %v11523_v19, 16  ;;  %v19637_v1 = vpop.f32.mrf.mxu0  ;;  %v11527_v19 = vld [vmem:[#allocation3 + $0x80] sm:$0x1] }
 0x3d3   : > { %15845 = vmatmul.mubr.bf16.gmra.mxu0 %v14313_v2  ;;  %v11692_v25 = vsel %vm16984_vm14, %v11687_v32, %v11691_v11  ;;  %v11720_v26 = vrot.slane %v11718_v50, 4  ;;  %v11723_v55 = vrot.slane %v11721_v53, 5  ;;  %v11526_v6 = vld [vmem:[#allocation3 + $0x7c] sm:$0xf]  ;;  %15884 = vmatprep.subr.bf16.mxu1 %v16319_v34  ;;  %v11745_v11 = vshll.u32 %v11525_v33, 16  ;;  %v19657_v39 = vpop.f32.mrf.mxu1 }
 0x3d4   : > { %15848 = vmatprep.mubr.bf16.mxu0 %v14314_v27  ;;  %15925 = vmatpush3.bf16.msra.mxu0 %v19592_v41  ;;  %v11711_v2 = vrot.slane %v11710_v3, 4  ;;  %v19639_v12 = vrot.slane %v11727_v22, 5  ;;  %v11737_v41 = vshll.u32 %v19626_v47, 16  ;;  %v11742_v27 = vshrl.u32 %v11525_v33, 16  ;;  %v11528_v50 = vld [vmem:[#allocation3 + $0x84] sm:$0xf] }
 0x3d5   : > { %15926 = vmatprep.subr.bf16.mxu0 %v16310_v35  ;;  %15805 = vmatmul.mubr.bf16.gmra.mxu1 %v16304_v20  ;;  %v11706_v32 = vsel %vm16984_vm14, %v11701_v56, %v11705_v37  ;;  %v11724_v14 = vor.u32 %v11723_v55, %v11720_v26  ;;  %v11733_v31 = vrot.slane %v11731_v63, 4  ;;  %v11751_v3 = vshll.u32 %v11526_v6, 16  ;;  %v16318_v26 = vld [vmem:[#allocation11 + $0x10] sm:$0xff]  }
 0x3d6   : > { %15808 = vmatprep.mubr.bf16.mxu1 %v16305_v43  ;;  %15885 = vmatpush3.bf16.msra.mxu1 %v16319_v34  ;;  %v11716_v53 = vsel %vm16984_vm14, %v11711_v2, %v11715_v4  ;;  %v11744_v20 = vrot.slane %v11742_v27, 4  ;;  %v11755_v22 = vshrl.u32 %v11526_v6, 16  ;;  %v14315_v47 = vcombine.low %v11682_v52, %v11692_v25  ;;  %v11529_v4 = vld [vmem:[#allocation3 + $0x88] sm:$0xf] }
 0x3d7   : > { %15886 = vmatprep.subr.bf16.mxu1 %v16322_v54  ;;  %v14316_v43 = vcombine.low %v11706_v32, %v11716_v53  ;;  %v11734_v37 = vor.u32 %v11733_v31, %v19639_v12  ;;  %v11747_v56 = vrot.slane %v11745_v11, 5  ;;  %v11753_v34 = vrot.slane %v11751_v3, 5  ;;  %v16308_v6 = vld [vmem:[#allocation3 + $0x84] sm:$0xff]   ;;  %v16309_v32 = vld [vmem:[#allocation3 + $0x90] sm:$0xff]   ;;  %v11530_v3 = vld [vmem:[#allocation3 + $0x8c] sm:$0x1] }
 0x3d8   : > { %15927 = vmatpush3.bf16.msra.mxu0 %v16310_v35  ;;  %v11757_v55 = vrot.slane %v11755_v22, 4  ;;  %v11761_v63 = vshll.u32 %v11527_v19, 16  ;;  %v11766_v2 = vshrl.u32 %v11528_v50, 16  ;;  %v19653_v35 = vadd.f32 %v19549_v29, %v19340_v62 }
 0x3d9   : > { %15928 = vmatprep.subr.bf16.mxu0 %v16314_v60  ;;  %v11725_v52 = vrot.slane %v11724_v14, 4  ;;  %v11735_v25 = vrot.slane %v11734_v37, 4  ;;  %v11748_v27 = vor.u32 %v11747_v56, %v11744_v20  ;;  %v11739_v31 = vrot.slane %v11737_v41, 5 }
 0x3da   : > { %v19649_v33 = vpop.f32.mrf.mxu0  ;;  %15887 = vmatpush3.bf16.msra.mxu1 %v16322_v54  ;;  %v11758_v11 = vor.u32 %v11757_v55, %v11753_v34  ;;  %v11768_v19 = vrot.slane %v11766_v2, 4  ;;  %v11769_v22 = vshll.u32 %v11528_v50, 16  ;;  %v19661_v62 = vadd.f32 %v19562_v5, %v19367_v13  ;;  %v11531_v54 = vld [vmem:[#allocation3 + $0x90] sm:$0xf] }
 0x3db   : > { %15849 = vmatmul.mubr.bf16.gmra.mxu0 %v14315_v47  ;;  %v11749_v29 = vrot.slane %v11748_v27, 4  ;;  %v11763_v14 = vrot.slane %v11761_v63, 5  ;;  %v11775_v20 = vshll.u32 %v11529_v4, 16  ;;  %v16321_v47 = vld [vmem:[#allocation11 + $0x8] sm:$0xff]   ;;  %v11740_v41 = vsel %vm16984_vm14, %v11735_v25, %v11739_v31  ;;  %v11532_v63 = vld [vmem:[#allocation3 + $0x94] sm:$0xf] }
 0x3dc   : > { %15852 = vmatprep.mubr.bf16.mxu0 %v14316_v43  ;;  %v19655_v53 = vpop.f32.mrf.mxu0  ;;  %15929 = vmatpush3.bf16.msra.mxu0 %v16314_v60  ;;  %v11759_v43 = vrot.slane %v11758_v11, 4  ;;  %v11771_v60 = vrot.slane %v11769_v22, 5  ;;  %v11779_v50 = vshrl.u32 %v11529_v4, 16  ;;  %v11730_v13 = vsel %vm16984_vm14, %v11725_v52, %v19639_v12  ;;  %v11533_v27 = vld [vmem:[#allocation3 + $0x98] sm:$0x1] }
 0x3dd   : > { %15930 = vmatprep.subr.bf16.mxu0 %v16318_v26  ;;  %15809 = vmatmul.mubr.bf16.gmra.mxu1 %v16308_v6  ;;  %v11754_v5 = vsel %vm16984_vm14, %v11749_v29, %v11753_v34  ;;  %v19672_v56 = vrot.slane %v11775_v20, 5  ;;  %v11785_v55 = vshll.u32 %v11530_v3, 16  ;;  %v11790_v31 = vshrl.u32 %v11531_v54, 16  ;;  %v11534_v4 = vld [vmem:[#allocation3 + $0x9c] sm:$0xf] }
 0x3de   : > { %v19665_v37 = vpop.f32.mrf.mxu0  ;;  %15812 = vmatprep.mubr.bf16.mxu1 %v16309_v32  ;;  %v11764_v2 = vsel %vm16984_vm14, %v11759_v43, %v11763_v14  ;;  %v11772_v6 = vor.u32 %v11771_v60, %v11768_v19  ;;  %v11781_v25 = vrot.slane %v11779_v50, 4  ;;  %v19676_v32 = vpop.f32.mrf.mxu1  ;;  %v19680_v12 = vadd.f32 %v19584_v17, %v19386_v15  ;;  %v16323_v22 = vld [vmem:[#allocation11] sm:$0xff]   ;;  %v11535_v50 = vld [vmem:[#allocation3 + $0xa0] sm:$0xf] }
 0x3df   : > { %20858 = vst [vmem:[#allocation49_spill] sm:$0xff] %v19665_v37  ;;  %v14317_v34 = vcombine.low %v11730_v13, %v11740_v41  ;;  %v14318_v52 = vcombine.low %v11754_v5, %v11764_v2  ;;  %v11793_v3 = vshll.u32 %v11531_v54, 16  ;;  %v11792_v14 = vrot.slane %v11790_v31, 4  ;;  %v16312_v15 = vld [vmem:[#allocation3 + $0x9c] sm:$0xff]  }
 0x3e0   : > { %15931 = vmatpush3.bf16.msra.mxu0 %v16318_v26  ;;  %v19682_v11 = vpop.f32.mrf.mxu0  ;;  %v11773_v29 = vrot.slane %v11772_v6, 4  ;;  %v11782_v19 = vor.u32 %v11781_v25, %v19672_v56  ;;  %v11799_v20 = vshll.u32 %v11532_v63, 16  ;;  %v11803_v60 = vshrl.u32 %v11532_v63, 16  ;;  %v19685_v54 = vpop.f32.mrf.mxu1  ;;  %v16313_v6 = vld [vmem:[#allocation3 + $0xa8] sm:$0xff]  }
 0x3e1   : > { %20859 = vst [vmem:[#allocation37_spill] sm:$0xff] %v19682_v11  ;;  %15932 = vmatprep.subr.bf16.mxu0 %v16321_v47  ;;  %v11795_v43 = vrot.slane %v11793_v3, 5  ;;  %v11809_v26 = vshll.u32 %v11533_v27, 16  ;;  %v11814_v37 = vshrl.u32 %v11534_v4, 16  ;;  %v11787_v41 = vrot.slane %v11785_v55, 5 }
 0x3e2   : > { %v11783_v17 = vrot.slane %v11782_v19, 4  ;;  %v11801_v13 = vrot.slane %v11799_v20, 5  ;;  %v11817_v5 = vshll.u32 %v11534_v4, 16  ;;  %v11778_v25 = vsel %vm16984_vm14, %v11773_v29, %v19672_v56  ;;  %v11536_v27 = vld [vmem:[#allocation3 + $0xa4] sm:$0x1] }
 0x3e3   : > { %15853 = vmatmul.mubr.bf16.gmra.mxu0 %v14317_v34  ;;  %v11796_v31 = vor.u32 %v11795_v43, %v11792_v14  ;;  %v11805_v63 = vrot.slane %v11803_v60, 4  ;;  %v11816_v34 = vrot.slane %v11814_v37, 4  ;;  %v11537_v3 = vld [vmem:[#allocation3 + $0xa8] sm:$0xf]  ;;  %v11811_v11 = vrot.slane %v11809_v26, 5 }
 0x3e4   : > { %15856 = vmatprep.mubr.bf16.mxu0 %v14318_v52  ;;  %15933 = vmatpush3.bf16.msra.mxu0 %v16321_v47  ;;  %v11788_v55 = vsel %vm16984_vm14, %v11783_v17, %v11787_v41  ;;  %v11819_v4 = vrot.slane %v11817_v5, 5  ;;  %v11823_v47 = vshll.u32 %v11535_v50, 16  ;;  %v11827_v29 = vshrl.u32 %v11535_v50, 16 }
 0x3e5   : > { %v15570_v2 = vpop.f32.mrf.mxu0  ;;  %15934 = vmatprep.subr.bf16.mxu0 %v16323_v22  ;;  %15813 = vmatmul.mubr.bf16.gmra.mxu1 %v16312_v15  ;;  %v11797_v19 = vrot.slane %v11796_v31, 4  ;;  %v11806_v20 = vor.u32 %v11805_v63, %v11801_v13  ;;  %v11833_v60 = vshll.u32 %v11536_v27, 16  ;;  %v19698_v15 = vpop.f32.mrf.mxu1  ;;  %v14319_v17 = vcombine.low %v11778_v25, %v11788_v55  ;;  %v11539_v31 = vld [vmem:[#allocation3 + $0xb0] sm:$0x1] }
 0x3e6   : > { %v19691_v52 = vadd.f32 %v15570_v2, %v19526_v45  ;;  %15816 = vmatprep.mubr.bf16.mxu1 %v16313_v6  ;;  %v11820_v37 = vor.u32 %v11819_v4, %v11816_v34  ;;  %v11825_v43 = vrot.slane %v11823_v47, 5  ;;  %v11538_v45 = vld [vmem:[#allocation3 + $0xac] sm:$0xf]  ;;  %v11829_v2 = vrot.slane %v11827_v29, 4  ;;  %v11540_v47 = vld [vmem:[#allocation3 + $0xb4] sm:$0xf] }
 0x3e7   : > { %v8467_v56 = vpop.f32.mrf.mxu0  ;;  %v11807_v41 = vrot.slane %v11806_v20, 4  ;;  %v11838_v6 = vshrl.u32 %v11537_v3, 16  ;;  %v11802_v26 = vsel %vm16984_vm14, %v11797_v19, %v11801_v13  ;;  %v11841_v63 = vshll.u32 %v11537_v3, 16  ;;  %v478_v4 = vld [vmem:[#allocation3 + $0xcc] sm:$0x1]  ;;  %v19711_v29 = vpop.f32.mrf.mxu1  ;;  %v16317_v3 = vld [vmem:[#allocation3 + $0xc0] sm:$0xff]  }
 0x3e8   : > { %v19696_v14 = vadd.f32 %v8467_v56, %v19551_v21  ;;  %15935 = vmatpush3.bf16.msra.mxu0 %v16323_v22  ;;  %v11821_v21 = vrot.slane %v11820_v37, 4  ;;  %v11830_v22 = vor.u32 %v11829_v2, %v11825_v43  ;;  %v11847_v55 = vshll.u32 %v11538_v45, 16  ;;  %v16316_v56 = vld [vmem:[#allocation3 + $0xb4] sm:$0xff]  }
 0x3e9   : > { %v15571_v5 = vpop.f32.mrf.mxu0  ;;  %v11812_v27 = vsel %vm16984_vm14, %v11807_v41, %v11811_v11  ;;  %v11840_v25 = vrot.slane %v11838_v6, 4  ;;  %v11835_v13 = vrot.slane %v11833_v60, 5  ;;  %v11843_v19 = vrot.slane %v11841_v63, 5  ;;  %v12319_v63 = vld [vmem:[#allocation3 + $0x18] sm:$0xe] }
 0x3ea   : > { %v19703_v50 = vadd.f32 %v15571_v5, %v19564_v61  ;;  %v14320_v20 = vcombine.low %v11802_v26, %v11812_v27  ;;  %v11826_v61 = vsel %vm16984_vm14, %v11821_v21, %v11825_v43  ;;  %v11831_v37 = vrot.slane %v11830_v22, 4  ;;  %v11541_v26 = vld [vmem:[#allocation3 + $0xb8] sm:$0xf] }
 0x3eb   : > { %15857 = vmatmul.mubr.bf16.gmra.mxu0 %v14319_v17  ;;  %v19707_v34 = vpop.f32.mrf.mxu0  ;;  %v11849_v17 = vrot.slane %v11847_v55, 5  ;;  %v11851_v11 = vshrl.u32 %v11538_v45, 16  ;;  %v11857_v41 = vshll.u32 %v11539_v31, 16  ;;  %v11844_v2 = vor.u32 %v11843_v19, %v11840_v25  ;;  %v11542_v31 = vld [vmem:[#allocation3 + $0xbc] sm:$0x1] }
 0x3ec   : > { %20860 = vst [vmem:[#allocation51_spill] sm:$0xff] %v19703_v50  ;;  %15860 = vmatprep.mubr.bf16.mxu0 %v14320_v20  ;;  %v479_v6 = vsel %vm16769_vm3, 0, %v478_v4  ;;  %v11862_v27 = vshrl.u32 %v11540_v47, 16  ;;  %v11865_v50 = vshll.u32 %v11540_v47, 16  ;;  %v11836_v60 = vsel %vm16984_vm14, %v11831_v37, %v11835_v13  ;;  %v19720_v20 = vpop.f32.mrf.mxu1  ;;  %v12321_v13 = vld [vmem:[#allocation3 + $0x20] sm:$0x1] }
 0x3ed   : > { %15817 = vmatmul.mubr.bf16.gmra.mxu1 %v16316_v56  ;;  %v11853_v21 = vrot.slane %v11851_v11, 4  ;;  %v11859_v45 = vrot.slane %v11857_v41, 5  ;;  %480 = vst [vmem:[#allocation3 + $0xcc] sm:$0x1] %v479_v6  ;;  %v14321_v22 = vcombine.low %v11826_v61, %v11836_v60  ;;  %v11845_v25 = vrot.slane %v11844_v2, 4 }
 0x3ee   : > { %v15574_v5 = vpop.f32.mrf.mxu0  ;;  %15820 = vmatprep.mubr.bf16.mxu1 %v16317_v3  ;;  %v11864_v49 = vrot.slane %v11862_v27, 4  ;;  %v11867_v4 = vrot.slane %v11865_v50, 5  ;;  %v11871_v56 = vshll.u32 %v11541_v26, 16  ;;  %v11875_v19 = vshrl.u32 %v11541_v26, 16  ;;  %v12320_v3 = vld [vmem:[#allocation3 + $0x1c] sm:$0xf] }
 0x3ef   : > { %v19716_v43 = vadd.f32 %v15574_v5, %v19601_v8  ;;  %v11854_v47 = vor.u32 %v11853_v21, %v11849_v17  ;;  %v11850_v37 = vsel %vm16984_vm14, %v11845_v25, %v11849_v17  ;;  %v11881_v61 = vshll.u32 %v11542_v31, 16  ;;  %v11543_v2 = vld [vmem:[#allocation3 + $0xc0] sm:$0xf]  ;;  %v11545_v25 = vld [vmem:[#allocation3 + $0xc8] sm:$0x1] }
 0x3f0   : > { %v8483_v55 = vpop.f32.mrf.mxu0  ;;  %v11868_v41 = vor.u32 %v11867_v4, %v11864_v49  ;;  %v14334_v5 = vrot.slane %v12319_v63, 9  ;;  %v11873_v27 = vrot.slane %v11871_v56, 5 }
 0x3f1   : > { %20861 = vst [vmem:[#allocation26_spill] sm:$0xff] %v19716_v43  ;;  %v19723_v8 = vadd.f32 %v8483_v55, %v19614_v28  ;;  %v11855_v50 = vrot.slane %v11854_v47, 4  ;;  %v11877_v28 = vrot.slane %v11875_v19, 4  ;;  %v11883_v26 = vrot.slane %v11881_v61, 5  ;;  %v19730_v43 = vpop.f32.mrf.mxu1  ;;  %v12323_v61 = vld [vmem:[#allocation3 + $0x28] sm:$0xf] }
 0x3f2   : > { %v15575_v11 = vpop.f32.mrf.mxu0  ;;  %v11869_v21 = vrot.slane %v11868_v41, 4  ;;  %v12417_v55 = vrot.slane %v12320_v3, 5  ;;  %v11889_v41 = vshll.u32 %v11543_v2, 16 }
 0x3f3   : > { %20862 = vst [vmem:[#allocation53_spill] sm:$0xff] %v19723_v8  ;;  %15861 = vmatmul.mubr.bf16.gmra.mxu0 %v14321_v22  ;;  %v19728_v6 = vadd.f32 %v15575_v11, %v19633_v51  ;;  %v12420_v8 = vrot.slane %v12321_v13, 5  ;;  %v11860_v17 = vsel %vm16984_vm14, %v11855_v50, %v11859_v45  ;;  %v11878_v63 = vor.u32 %v11877_v28, %v11873_v27  ;;  %v11544_v22 = vld [vmem:[#allocation3 + $0xc4] sm:$0xf] }
 0x3f4   : > { %v8486_v60 = vpop.f32.mrf.mxu0  ;;  %v11886_v51 = vshrl.u32 %v11543_v2, 16  ;;  %v14322_v49 = vcombine.low %v11850_v37, %v11860_v17  ;;  %v16320_v4 = vld [vmem:[#allocation3 + $0xcc] sm:$0xff]   ;;  %v11874_v56 = vsel %vm16984_vm14, %v11869_v21, %v11873_v27  ;;  %v12418_v19 = vsel %vm16978_vm13, %v14334_v5, %v12417_v55  ;;  %v12322_v13 = vld [vmem:[#allocation3 + $0x24] sm:$0xe]  ;;  %v19746_v21 = vpop.f32.mrf.mxu1 }
 0x3f5   : > { %v19735_v31 = vadd.f32 %v8486_v60, %v19646_v9  ;;  %v12419_v3 = vrot.slane %v12417_v55, 4  ;;  %v11879_v9 = vrot.slane %v11878_v63, 4  ;;  %15821 = vmatmul.mubr.bf16.gmra.mxu1 %v16320_v4  ;;  %v11895_v50 = vshll.u32 %v11544_v22, 16  ;;  %v12324_v5 = vld [vmem:[#allocation3 + $0x2c] sm:$0x1] }
 0x3f6   : > { %v15578_v47 = vpop.f32.mrf.mxu0  ;;  %v11888_v11 = vrot.slane %v11886_v51, 4  ;;  %15864 = vmatprep.mubr.bf16.mxu0 %v14322_v49  ;;  %v11899_v28 = vshrl.u32 %v11544_v22, 16  ;;  %v11905_v27 = vshll.u32 %v11545_v25, 16  ;;  %v11891_v17 = vrot.slane %v11889_v41, 5  ;;  %v532_v63 = vld [vmem:[#allocation3 + $0xd4] sm:$0x1] }
 0x3f7   : > { %20863 = vst [vmem:[#allocation29_spill] sm:$0xff] %v19735_v31  ;;  %v19742_v45 = vadd.f32 %v15578_v47, %v19657_v39  ;;  %v12421_v37 = vsel %vm16978_vm13, %v12419_v3, %v12420_v8  ;;  %v11884_v39 = vsel %vm16984_vm14, %v11879_v9, %v11883_v26  ;;  %v11546_v51 = vld [vmem:[#allocation3 + $0xcc] sm:$0xf]  ;;  %v11897_v4 = vrot.slane %v11895_v50, 5  ;;  %v11547_v26 = vld [vmem:[#allocation3 + $0xd0] sm:$0xf] }
 0x3f8   : > { %v8499_v60 = vpop.f32.mrf.mxu0  ;;  %v14350_v55 = vcombine.low %v12418_v19, %v12421_v37  ;;  %v14323_v49 = vcombine.low %v11874_v56, %v11884_v39  ;;  %v11901_v8 = vrot.slane %v11899_v28, 4  ;;  %v11907_v47 = vrot.slane %v11905_v27, 5  ;;  %v12325_v50 = vld [vmem:[#allocation3 + $0x30] sm:$0xe] }
 0x3f9   : > { %20864 = vst [vmem:[#allocation55_spill] sm:$0xff] %v19742_v45  ;;  %v19751_v2 = vadd.f32 %v8499_v60, %v19676_v32  ;;  %v11892_v25 = vor.u32 %v11891_v17, %v11888_v11  ;;  %v14335_v45 = vrot.slane %v12322_v13, 9  ;;  %v12424_v31 = vrot.slane %v12323_v61, 5  ;;  %v12326_v11 = vld [vmem:[#allocation3 + $0x34] sm:$0xf] }
 0x3fa   : > { %v15579_v22 = vpop.f32.mrf.mxu0  ;;  %15888 = vmatprep.mubr.bf16.mxu1 %v14350_v55  ;;  %v11902_v19 = vor.u32 %v11901_v8, %v11897_v4  ;;  %v12427_v41 = vrot.slane %v12324_v5, 5  ;;  %v533_v56 = vsel %vm16779_vm5, 0, %v532_v63  ;;  %v11910_v37 = vshrl.u32 %v11546_v51, 16 }
 0x3fb   : > { %v19754_v3 = vadd.f32 %v15579_v22, %v19685_v54  ;;  %15865 = vmatmul.mubr.bf16.gmra.mxu0 %v14323_v49  ;;  %v15602_v32 = vpop.f32.mrf.mxu1  ;;  %v11893_v28 = vrot.slane %v11892_v25, 4  ;;  %v12425_v13 = vsel %vm16978_vm13, %v14335_v45, %v12424_v31  ;;  %534 = vst [vmem:[#allocation3 + $0xd4] sm:$0x1] %v533_v56  ;;  %v12426_v60 = vrot.slane %v12424_v31, 4 }
 0x3fc   : > { %v8502_v9 = vpop.f32.mrf.mxu0  ;;  %v19762_v54 = vadd.f32 %v15602_v32, %v19541_v44  ;;  %v11903_v61 = vrot.slane %v11902_v19, 4  ;;  %v11912_v5 = vrot.slane %v11910_v37, 4  ;;  %v11913_v39 = vshll.u32 %v11546_v51, 16 }
 0x3fd   : > { %v19759_v27 = vadd.f32 %v8502_v9, %v19698_v15  ;;  %v8997_v18 = vpop.f32.mrf.mxu1  ;;  %v11898_v55 = vsel %vm16984_vm14, %v11893_v28, %v11897_v4  ;;  %v11919_v17 = vshll.u32 %v11547_v26, 16  ;;  %v11923_v63 = vshrl.u32 %v11547_v26, 16  ;;  %v12327_v15 = vld [vmem:[#allocation3 + $0x38] sm:$0x1] }
 0x3fe   : > { %v14336_v49 = vrot.slane %v12325_v50, 9  ;;  %v11908_v44 = vsel %vm16984_vm14, %v11903_v61, %v11907_v47  ;;  %v12428_v45 = vsel %vm16978_vm13, %v12426_v60, %v12427_v41  ;;  %v11915_v8 = vrot.slane %v11913_v39, 5  ;;  %v12328_v50 = vld [vmem:[#allocation3 + $0x3c] sm:$0xe]  ;;  %v12331_v61 = vld [vmem:[#allocation3 + $0x48] sm:$0xe] }
 0x3ff   : > { %v12431_v22 = vrot.slane %v12326_v11, 5  ;;  %v15603_v25 = vpop.f32.mrf.mxu1  ;;  %v14324_v31 = vcombine.low %v11898_v55, %v11908_v44  ;;  %v14351_v19 = vcombine.low %v12425_v13, %v12428_v45  ;;  %v11921_v51 = vrot.slane %v11919_v17, 5  ;;  %v12329_v13 = vld [vmem:[#allocation3 + $0x40] sm:$0xf]  ;;  %v12332_v60 = vld [vmem:[#allocation3 + $0x4c] sm:$0xf] }
 0x400   : > { %v11925_v9 = vrot.slane %v11923_v63, 4  ;;  %v11916_v32 = vor.u32 %v11915_v8, %v11912_v5  ;;  %v12434_v56 = vrot.slane %v12327_v15, 5  ;;  %v19775_v41 = vadd.f32 %v8997_v18, %v19574_v42  ;;  %v12330_v42 = vld [vmem:[#allocation3 + $0x44] sm:$0x1]  ;;  %v12333_v8 = vld [vmem:[#allocation3 + $0x50] sm:$0x1] }
 0x401   : > { %v12432_v4 = vsel %vm16978_vm13, %v14336_v49, %v12431_v22  ;;  %v12433_v26 = vrot.slane %v12431_v22, 4  ;;  %v9000_v37 = vpop.f32.mrf.mxu1  ;;  %15868 = vmatprep.mubr.bf16.mxu0 %v14324_v31  ;;  %15889 = vmatmul.mubr.bf16.vlgmr.msra.gmra.mxu1 %v14351_v19  ;;  %v19778_v11 = vadd.f32 %v15603_v25, %v19578_v0  ;;  %v14337_v25 = vrot.slane %v12328_v50, 9 }
 0x402   : > { %v11926_v28 = vor.u32 %v11925_v9, %v11921_v51  ;;  %v11548_v39 = vld [vmem:[#allocation3 + $0xd4] sm:$0x1]  ;;  %v11917_v55 = vrot.slane %v11916_v32, 4  ;;  %v19786_v63 = vadd.f32 %v9000_v37, %v19622_v30  ;;  %v12438_v31 = vrot.slane %v12329_v13, 5 }
 0x403   : > { %v15582_v47 = vpop.f32.mrf.mxu0  ;;  %v12435_v17 = vsel %vm16978_vm13, %v12433_v26, %v12434_v56  ;;  %v15606_v15 = vpop.f32.mrf.mxu1  ;;  %v11929_v49 = vshll.u32 %v11548_v39, 16  ;;  %v12441_v32 = vrot.slane %v12330_v42, 5  ;;  %v12445_v26 = vrot.slane %v12332_v60, 5  ;;  %v16324_v39 = vld [vmem:[%s16753_s7] sm:$0xff]  }
 0x404   : > { %v19781_v5 = vadd.f32 %v15582_v47, %v19711_v29  ;;  %v11927_v18 = vrot.slane %v11926_v28, 4  ;;  %v14352_v0 = vcombine.low %v12432_v4, %v12435_v17  ;;  %v19789_v45 = vadd.f32 %v15606_v15, %v19554_v48  ;;  %v12335_v47 = vld [vmem:[#allocation3 + $0x58] sm:$0xf]  ;;  %v12338_v15 = vld [vmem:[#allocation3 + $0x64] sm:$0xf] }
 0x405   : > { %v8515_v44 = vpop.f32.mrf.mxu0  ;;  %v11922_v29 = vsel %vm16984_vm14, %v11917_v55, %v11921_v51  ;;  %v9013_v30 = vpop.f32.mrf.mxu1  ;;  %v11931_v19 = vrot.slane %v11929_v49, 5  ;;  %v14338_v4 = vrot.slane %v12331_v61, 9  ;;  %v12440_v56 = vrot.slane %v12438_v31, 4 }
 0x406   : > { %v19794_v22 = vadd.f32 %v8515_v44, %v19720_v20  ;;  %15892 = vmatprep.mubr.bf16.mxu1 %v14352_v0  ;;  %v12448_v37 = vrot.slane %v12333_v8, 5  ;;  %v19800_v51 = vadd.f32 %v9013_v30, %v19653_v35  ;;  %v12439_v13 = vsel %vm16978_vm13, %v14337_v25, %v12438_v31  ;;  %v12336_v0 = vld [vmem:[#allocation3 + $0x5c] sm:$0x1]  ;;  %v12334_v25 = vld [vmem:[#allocation3 + $0x54] sm:$0xe] }
 0x407   : > { %v15583_v9 = vpop.f32.mrf.mxu0  ;;  %v15607_v20 = vpop.f32.mrf.mxu1  ;;  %v11932_v50 = vsel %vm16984_vm14, %v11927_v18, %v11931_v19  ;;  %v12447_v61 = vrot.slane %v12445_v26, 4  ;;  %v12442_v35 = vsel %vm16978_vm13, %v12440_v56, %v12441_v32  ;;  %v12446_v59 = vsel %vm16978_vm13, %v14338_v4, %v12445_v26  ;;  %v12339_v31 = vld [vmem:[#allocation3 + $0x68] sm:$0x1]  ;;  %v19827_v32 = vld [vmem:[#allocation3 + $0x70] sm:$0xf] }
 0x408   : > { %v19797_v48 = vadd.f32 %v15583_v9, %v19730_v43  ;;  %v19808_v60 = vadd.f32 %v15607_v20, %v19661_v62  ;;  %v14325_v43 = vcombine.low %v11922_v29, %v11932_v50  ;;  %v14353_v42 = vcombine.low %v12439_v13, %v12442_v35  ;;  %v12337_v26 = vld [vmem:[#allocation3 + $0x60] sm:$0xe]  ;;  %v19836_v56 = vld [vmem:[#allocation3 + $0x7c] sm:$0xf]  ;;  %v16326_v35 = vld [vmem:[%s16753_s7 + $0x10] sm:$0xff]  }
 0x409   : > { %v8518_v28 = vpop.f32.mrf.mxu0  ;;  %v9016_v17 = vpop.f32.mrf.mxu1  ;;  %v12449_v49 = vsel %vm16978_vm13, %v12447_v61, %v12448_v37  ;;  %v12452_v44 = vrot.slane %v12335_v47, 5  ;;  %v8538_v4 = vadd.f32 %v19607_v46, %v19434_v38  ;;  %v8541_v37 = vadd.f32 %v19624_v40, %v19450_v10  ;;  %v16325_v38 = vld [vmem:[%s16753_s7 + $0x8] sm:$0xff]  }
 0x40a   : > { %v19811_v55 = vadd.f32 %v8518_v28, %v19746_v21  ;;  %v19820_v62 = vadd.f32 %v9016_v17, %v19680_v12  ;;  %v8540_v21 = vadd.f32 %v19599_v16, %v19417_v7  ;;  %15869 = vmatmul.mubr.bf16.gmra.mxu0 %v14325_v43  ;;  %v14354_v29 = vcombine.low %v12446_v59, %v12449_v49 }
 0x40b   : > { %v15650_v18 = vpop.f32.mrf.mxu0  ;;  %15893 = vmatmul.mubr.bf16.gmra.mxu1 %v14353_v42  ;;  %15936 = vmatprep.mubr.bf16.mxu0 %v16324_v39  ;;  %v15610_v19 = vpop.f32.mrf.mxu1  ;;  %v12454_v9 = vrot.slane %v12452_v44, 4  ;;  %v12459_v12 = vrot.slane %v12338_v15, 5  ;;  %v14339_v47 = vrot.slane %v12334_v25, 9  ;;  %v12462_v28 = vrot.slane %v12339_v31, 5  ;;  %v12342_v31 = vld [vmem:[#allocation3 + $0x74] sm:$0x1] }
 0x40c   : > { %v19825_v8 = vadd.f32 %v15650_v18, %v19762_v54  ;;  %15896 = vmatprep.mubr.bf16.mxu1 %v14354_v29  ;;  %v19834_v16 = vadd.f32 %v15610_v19, %v8540_v21  ;;  %v12455_v54 = vrot.slane %v12336_v0, 5  ;;  %v12466_v61 = vrot.slane %v19827_v32, 5  ;;  %v12345_v19 = vld [vmem:[#allocation3 + $0x80] sm:$0x1]  ;;  %v19871_v32 = vld [vmem:[#allocation3 + $0x88] sm:$0xf] }
 0x40d   : > { %v9447_v30 = vpop.f32.mrf.mxu0  ;;  %v12461_v50 = vrot.slane %v12459_v12, 4  ;;  %v9029_v13 = vpop.f32.mrf.mxu1  ;;  %v14340_v59 = vrot.slane %v12337_v26, 9  ;;  %v12473_v17 = vrot.slane %v19836_v56, 5  ;;  %v12453_v42 = vsel %vm16978_vm13, %v14339_v47, %v12452_v44  ;;  %v12340_v44 = vld [vmem:[#allocation3 + $0x6c] sm:$0xe] }
 0x40e   : > { %v19832_v7 = vadd.f32 %v9447_v30, %v19775_v41  ;;  %v12456_v41 = vsel %vm16978_vm13, %v12454_v9, %v12455_v54  ;;  %v19846_v39 = vadd.f32 %v9029_v13, %v8538_v4  ;;  %v8544_v49 = vadd.f32 %v19649_v33, %v19476_v24  ;;  %v12343_v26 = vld [vmem:[#allocation3 + $0x78] sm:$0xe]  ;;  %v19880_v56 = vld [vmem:[#allocation3 + $0x94] sm:$0xf] }
 0x40f   : > { %v15651_v20 = vpop.f32.mrf.mxu0  ;;  %v12463_v10 = vsel %vm16978_vm13, %v12461_v50, %v12462_v28  ;;  %v15611_v40 = vpop.f32.mrf.mxu1  ;;  %v14355_v0 = vcombine.low %v12453_v42, %v12456_v41  ;;  %v12460_v29 = vsel %vm16978_vm13, %v14340_v59, %v12459_v12  ;;  %v12468_v30 = vrot.slane %v12466_v61, 4  ;;  %v20867_v42 = vld [vmem:[#allocation37_spill] sm:$0xff] }
 0x410   : > { %v19842_v46 = vadd.f32 %v15651_v20, %v19778_v11  ;;  %v8539_v11 = vadd.f32 %v19637_v1, %v19464_v57  ;;  %v19860_v18 = vadd.f32 %v15611_v40, %v8541_v37  ;;  %v14356_v1 = vcombine.low %v12460_v29, %v12463_v10  ;;  %v20865_v37 = vld [vmem:[#allocation49_spill] sm:$0xff] }
 0x411   : > { %v9450_v43 = vpop.f32.mrf.mxu0  ;;  %v9032_v25 = vpop.f32.mrf.mxu1  ;;  %v12475_v9 = vrot.slane %v12473_v17, 4  ;;  %v8542_v12 = vadd.f32 %v19655_v53, %v19490_v36  ;;  %v12469_v54 = vrot.slane %v12342_v31, 5  ;;  %v8545_v20 = vadd.f32 %v20865_v37, %v19505_v58  ;;  %v19921_v37 = vld [vmem:[#allocation3 + $0xac] sm:$0xf] }
 0x412   : > { %v19856_v15 = vadd.f32 %v9450_v43, %v19786_v63  ;;  %15937 = vmatmul.mubr.bf16.vlgmr.msra.gmra.mxu0 %v16325_v38  ;;  %v19869_v63 = vadd.f32 %v9032_v25, %v8539_v11  ;;  %v14341_v50 = vrot.slane %v12340_v44, 9  ;;  %v12476_v28 = vrot.slane %v12345_v19, 5  ;;  %v16327_v38 = vld [vmem:[%s16753_s7 + $0x18] sm:$0xff]   ;;  %v20866_v11 = vld [vmem:[#allocation46_spill] sm:$0xff]  ;;  %v12348_v44 = vld [vmem:[#allocation3 + $0x8c] sm:$0x1] }
 0x413   : > { %v15654_v21 = vpop.f32.mrf.mxu0  ;;  %15897 = vmatmul.mubr.bf16.gmra.mxu1 %v14355_v0  ;;  %15940 = vmatprep.mubr.bf16.mxu0 %v16326_v35  ;;  %v12470_v53 = vsel %vm16978_vm13, %v12468_v30, %v12469_v54  ;;  %v12480_v41 = vrot.slane %v19871_v32, 5  ;;  %v16328_v35 = vld [vmem:[%s16753_s7 + $0x20] sm:$0xff]   ;;  %v14342_v59 = vrot.slane %v12343_v26, 9  ;;  %v12487_v40 = vrot.slane %v19880_v56, 5  ;;  %v19913_v54 = vld [vmem:[#allocation3 + $0xa0] sm:$0xf] }
 0x414   : > { %v19867_v57 = vadd.f32 %v15654_v21, %v19789_v45  ;;  %15900 = vmatprep.mubr.bf16.mxu1 %v14356_v1  ;;  %v12477_v58 = vsel %vm16978_vm13, %v12475_v9, %v12476_v28  ;;  %v12467_v0 = vsel %vm16978_vm13, %v14341_v50, %v12466_v61  ;;  %v12351_v9 = vld [vmem:[#allocation3 + $0x98] sm:$0x1]  ;;  %v12483_v26 = vrot.slane %v12348_v44, 5  ;;  %v12349_v56 = vld [vmem:[#allocation3 + $0x90] sm:$0xe] }
 0x415   : > { %v9463_v24 = vpop.f32.mrf.mxu0  ;;  %v15614_v33 = vpop.f32.mrf.mxu1  ;;  %v14357_v29 = vcombine.low %v12467_v0, %v12470_v53  ;;  %v12474_v31 = vsel %vm16978_vm13, %v14342_v59, %v12473_v17  ;;  %v12490_v50 = vrot.slane %v12351_v9, 5  ;;  %v14344_v59 = vrot.slane %v12349_v56, 9  ;;  %v20869_v0 = vld [vmem:[#allocation51_spill] sm:$0xff] }
 0x416   : > { %v19876_v45 = vadd.f32 %v9463_v24, %v19800_v51  ;;  %v19878_v4 = vadd.f32 %v15614_v33, %v8544_v49  ;;  %v14358_v19 = vcombine.low %v12474_v31, %v12477_v58  ;;  %v12482_v33 = vrot.slane %v12480_v41, 4 }
 0x417   : > { %v15655_v47 = vpop.f32.mrf.mxu0  ;;  %v9045_v13 = vpop.f32.mrf.mxu1 }
 0x418   : > { %v19886_v36 = vadd.f32 %v15655_v47, %v19808_v60  ;;  %v19890_v51 = vadd.f32 %v9045_v13, %v8542_v12  ;;  %v8543_v60 = vadd.f32 %v20867_v42, %v20866_v11  ;;  %v12489_v12 = vrot.slane %v12487_v40, 4  ;;  %v16329_v13 = vld [vmem:[%s16753_s7 + $0x28] sm:$0xff]   ;;  %v20868_v42 = vld [vmem:[#allocation32_spill] sm:$0xff] }
 0x419   : > { %v9466_v43 = vpop.f32.mrf.mxu0  ;;  %v15615_v10 = vpop.f32.mrf.mxu1  ;;  %v12484_v53 = vsel %vm16978_vm13, %v12482_v33, %v12483_v26  ;;  %v12501_v11 = vrot.slane %v19921_v37, 5  ;;  %v12352_v33 = vld [vmem:[#allocation3 + $0x9c] sm:$0xe]  ;;  %v12355_v37 = vld [vmem:[#allocation3 + $0xa8] sm:$0xe] }
 0x41a   : > { %v19900_v49 = vadd.f32 %v9466_v43, %v19820_v62  ;;  %v19904_v21 = vadd.f32 %v15615_v10, %v8545_v20  ;;  %15941 = vmatmul.mubr.bf16.gmra.mxu0 %v16327_v38  ;;  %v12346_v62 = vld [vmem:[#allocation3 + $0x84] sm:$0xe]  ;;  %v12491_v58 = vsel %vm16978_vm13, %v12489_v12, %v12490_v50  ;;  %v14345_v50 = vrot.slane %v12352_v33, 9 }
 0x41b   : > { %v15658_v25 = vpop.f32.mrf.mxu0  ;;  %v9048_v1 = vpop.f32.mrf.mxu1  ;;  %15901 = vmatmul.mubr.bf16.gmra.mxu1 %v14357_v29  ;;  %15944 = vmatprep.mubr.bf16.mxu0 %v16328_v35  ;;  %v14343_v47 = vrot.slane %v12346_v62, 9  ;;  %v16330_v35 = vld [vmem:[%s16753_s7 + $0x30] sm:$0xff]   ;;  %v12503_v12 = vrot.slane %v12501_v11, 4 }
 0x41c   : > { %v19909_v30 = vadd.f32 %v15658_v25, %v19834_v16  ;;  %v19911_v24 = vadd.f32 %v9048_v1, %v8543_v60  ;;  %15904 = vmatprep.mubr.bf16.mxu1 %v14358_v19  ;;  %v12488_v1 = vsel %vm16978_vm13, %v14344_v59, %v12487_v40  ;;  %v12354_v19 = vld [vmem:[#allocation3 + $0xa4] sm:$0x1] }
 0x41d   : > { %v9479_v61 = vpop.f32.mrf.mxu0  ;;  %v15618_v32 = vpop.f32.mrf.mxu1  ;;  %v12497_v56 = vrot.slane %v12354_v19, 5 }
 0x41e   : > { %v19916_v17 = vadd.f32 %v9479_v61, %v19846_v39  ;;  %v19919_v16 = vadd.f32 %v15618_v32, %v19691_v52  ;;  %v12494_v52 = vrot.slane %v19913_v54, 5  ;;  %v12359_v54 = vld [vmem:[#allocation3 + $0xb8] sm:$0xf] }
 0x41f   : > { %v15659_v20 = vpop.f32.mrf.mxu0  ;;  %v9061_v28 = vpop.f32.mrf.mxu1 }
 0x420   : > { %v19925_v38 = vadd.f32 %v15659_v20, %v19860_v18  ;;  %v19930_v39 = vadd.f32 %v9061_v28, %v19696_v14  ;;  %v8547_v18 = vadd.f32 %v19707_v34, %v20868_v42  ;;  %v12481_v14 = vsel %vm16978_vm13, %v14343_v47, %v12480_v41  ;;  %v12357_v41 = vld [vmem:[#allocation3 + $0xb0] sm:$0x1]  ;;  %v19960_v20 = vld [vmem:[#allocation3 + $0xc4] sm:$0xf]  ;;  %v16332_v42 = vld [vmem:[%s16753_s7 + $0x40] sm:$0xff]  }
 0x421   : > { %v9482_v43 = vpop.f32.mrf.mxu0  ;;  %v15619_v10 = vpop.f32.mrf.mxu1  ;;  %v14359_v25 = vcombine.low %v12481_v14, %v12484_v53  ;;  %v14360_v34 = vcombine.low %v12488_v1, %v12491_v58  ;;  %v12496_v9 = vrot.slane %v12494_v52, 4  ;;  %v12504_v28 = vrot.slane %v12357_v41, 5  ;;  %v16331_v53 = vld [vmem:[%s16753_s7 + $0x38] sm:$0xff]  }
 0x422   : > { %v19940_v60 = vadd.f32 %v9482_v43, %v19869_v63  ;;  %v19945_v29 = vadd.f32 %v15619_v10, %v20869_v0  ;;  %15945 = vmatmul.mubr.bf16.gmra.mxu0 %v16329_v13  ;;  %v12508_v58 = vrot.slane %v12359_v54, 5  ;;  %v12365_v41 = vld [vmem:[#allocation3 + $0xd0] sm:$0xf]  ;;  %v12358_v54 = vld [vmem:[#allocation3 + $0xb4] sm:$0xe] }
 0x423   : > { %v15662_v31 = vpop.f32.mrf.mxu0  ;;  %v9064_v44 = vpop.f32.mrf.mxu1  ;;  %15905 = vmatmul.mubr.bf16.gmra.mxu1 %v14359_v25  ;;  %15948 = vmatprep.mubr.bf16.mxu0 %v16330_v35  ;;  %v12498_v35 = vsel %vm16978_vm13, %v12496_v9, %v12497_v56  ;;  %v12505_v14 = vsel %vm16978_vm13, %v12503_v12, %v12504_v28  ;;  %v12515_v25 = vrot.slane %v19960_v20, 5  ;;  %v12360_v9 = vld [vmem:[#allocation3 + $0xbc] sm:$0x1]  ;;  %v20873_v20 = vld [vmem:[#allocation55_spill] sm:$0xff]  ;;  %v12364_v28 = vld [vmem:[#allocation3 + $0xcc] sm:$0xe] }
 0x424   : > { %v19950_v62 = vadd.f32 %v15662_v31, %v19878_v4  ;;  %v19952_v63 = vadd.f32 %v9064_v44, %v8547_v18  ;;  %15908 = vmatprep.mubr.bf16.mxu1 %v14360_v34  ;;  %v20870_v4 = vld [vmem:[#allocation26_spill] sm:$0xff]  ;;  %v14346_v18 = vrot.slane %v12355_v37, 9 }
 0x425   : > { %v9495_v61 = vpop.f32.mrf.mxu0  ;;  %v15622_v32 = vpop.f32.mrf.mxu1  ;;  %v12517_v37 = vrot.slane %v12515_v25, 4 }
 0x426   : > { %v19955_v40 = vadd.f32 %v9495_v61, %v19890_v51  ;;  %v19958_v26 = vadd.f32 %v15622_v32, %v20870_v4  ;;  %v20871_v51 = vld [vmem:[#allocation53_spill] sm:$0xff]  ;;  %v12502_v34 = vsel %vm16978_vm13, %v14346_v18, %v12501_v11  ;;  %v12363_v4 = vld [vmem:[#allocation3 + $0xc8] sm:$0x1]  ;;  %v16333_v18 = vld [vmem:[%s16753_s7 + $0x48] sm:$0xff]  }
 0x427   : > { %v15663_v47 = vpop.f32.mrf.mxu0  ;;  %v9077_v13 = vpop.f32.mrf.mxu1  ;;  %v20872_v32 = vld [vmem:[#allocation29_spill] sm:$0xff] }
 0x428   : > { %v19964_v43 = vadd.f32 %v15663_v47, %v19904_v21  ;;  %v19969_v59 = vadd.f32 %v9077_v13, %v20871_v51  ;;  %v12495_v21 = vsel %vm16978_vm13, %v14345_v50, %v12494_v52  ;;  %v12510_v52 = vrot.slane %v12508_v58, 4  ;;  %v12361_v50 = vld [vmem:[#allocation3 + $0xc0] sm:$0xe] }
 0x429   : > { %v9498_v10 = vpop.f32.mrf.mxu0  ;;  %v15623_v0 = vpop.f32.mrf.mxu1  ;;  %v14361_v44 = vcombine.low %v12495_v21, %v12498_v35  ;;  %v12522_v13 = vrot.slane %v12365_v41, 5  ;;  %v14347_v35 = vrot.slane %v12358_v54, 9  ;;  %v12518_v51 = vrot.slane %v12363_v4, 5 }
 0x42a   : > { %v19976_v31 = vadd.f32 %v9498_v10, %v19911_v24  ;;  %v19981_v1 = vadd.f32 %v15623_v0, %v19728_v6  ;;  %15949 = vmatmul.mubr.bf16.gmra.mxu0 %v16331_v53  ;;  %v14362_v24 = vcombine.low %v12502_v34, %v12505_v14  ;;  %v14348_v34 = vrot.slane %v12361_v50, 9 }
 0x42b   : > { %v15666_v19 = vpop.f32.mrf.mxu0  ;;  %v9080_v33 = vpop.f32.mrf.mxu1  ;;  %15909 = vmatmul.mubr.bf16.gmra.mxu1 %v14361_v44  ;;  %15952 = vmatprep.mubr.bf16.mxu0 %v16332_v42  ;;  %v12366_v42 = vld [vmem:[#allocation3 + $0xd4] sm:$0x1]  ;;  %v12509_v44 = vsel %vm16978_vm13, %v14347_v35, %v12508_v58  ;;  %v14349_v41 = vrot.slane %v12364_v28, 9 }
 0x42c   : > { %v19986_v61 = vadd.f32 %v15666_v19, %v19919_v16  ;;  %v9145_v12 = vadd.f32 %v9080_v33, %v20872_v32  ;;  %15912 = vmatprep.mubr.bf16.mxu1 %v14362_v24  ;;  %v12511_v16 = vrot.slane %v12360_v9, 5  ;;  %v16334_v19 = vld [vmem:[%s16753_s7 + $0x50] sm:$0xff]   ;;  %v12519_v33 = vsel %vm16978_vm13, %v12517_v37, %v12518_v51 }
 0x42d   : > { %v9511_v6 = vpop.f32.mrf.mxu0  ;;  %v15626_v56 = vpop.f32.mrf.mxu1  ;;  %v12524_v32 = vrot.slane %v12522_v13, 4  ;;  %v12525_v54 = vrot.slane %v12366_v42, 5  ;;  %v12516_v4 = vsel %vm16978_vm13, %v14348_v34, %v12515_v25 }
 0x42e   : > { %v19990_v11 = vadd.f32 %v9511_v6, %v19930_v39  ;;  %v9150_v47 = vadd.f32 %v15626_v56, %v20873_v20  ;;  %v12512_v39 = vsel %vm16978_vm13, %v12510_v52, %v12511_v16  ;;  %v14364_v56 = vcombine.low %v12516_v4, %v12519_v33  ;;  %v16337_v33 = vld [vmem:[%s16753_s7 + $0x68] sm:$0xff]  }
 0x42f   : > { %v15667_v53 = vpop.f32.mrf.mxu0  ;;  %v9093_v10 = vpop.f32.mrf.mxu1  ;;  %v14363_v52 = vcombine.low %v12509_v44, %v12512_v39  ;;  %v12523_v16 = vsel %vm16978_vm13, %v14349_v41, %v12522_v13 }
 0x430   : > { %v19995_v14 = vadd.f32 %v15667_v53, %v19945_v29  ;;  %v9148_v0 = vadd.f32 %v9093_v10, %v19751_v2 }
 0x431   : > { %v9514_v21 = vpop.f32.mrf.mxu0  ;;  %v15627_v9 = vpop.f32.mrf.mxu1 }
 0x432   : > { %v20006_v24 = vadd.f32 %v9514_v21, %v19952_v63  ;;  %v9151_v29 = vadd.f32 %v15627_v9, %v19754_v3  ;;  %15953 = vmatmul.mubr.bf16.gmra.mxu0 %v16333_v18 }
 0x433   : > { %v15670_v2 = vpop.f32.mrf.mxu0  ;;  %v9096_v58 = vpop.f32.mrf.mxu1  ;;  %15913 = vmatmul.mubr.bf16.gmra.mxu1 %v14363_v52  ;;  %15956 = vmatprep.mubr.bf16.mxu0 %v16334_v19 }
 0x434   : > { %v20012_v6 = vadd.f32 %v15670_v2, %v19958_v26  ;;  %v9149_v37 = vadd.f32 %v9096_v58, %v19759_v27  ;;  %15916 = vmatprep.mubr.bf16.mxu1 %v14364_v56  ;;  %v12526_v26 = vsel %vm16978_vm13, %v12524_v32, %v12525_v54  ;;  %v16335_v27 = vld [vmem:[%s16753_s7 + $0x58] sm:$0xff]  }
 0x435   : > { %v9527_v3 = vpop.f32.mrf.mxu0  ;;  %v15630_v63 = vpop.f32.mrf.mxu1  ;;  %v14365_v10 = vcombine.low %v12523_v16, %v12526_v26 }
 0x436   : > { %v20016_v20 = vadd.f32 %v9527_v3, %v19969_v59  ;;  %v9154_v25 = vadd.f32 %v15630_v63, %v19781_v5  ;;  %v16336_v59 = vld [vmem:[%s16753_s7 + $0x60] sm:$0xff]  }
 0x437   : > { %v15671_v50 = vpop.f32.mrf.mxu0  ;;  %v9109_v28 = vpop.f32.mrf.mxu1 }
 0x438   : > { %v20025_v53 = vadd.f32 %v15671_v50, %v19981_v1  ;;  %v9152_v35 = vadd.f32 %v9109_v28, %v19794_v22 }
 0x439   : > { %v9530_v51 = vpop.f32.mrf.mxu0  ;;  %v15631_v42 = vpop.f32.mrf.mxu1 }
 0x43a   : > { %v20029_v5 = vadd.f32 %v9530_v51, %v9145_v12  ;;  %v9155_v13 = vadd.f32 %v15631_v42, %v19797_v48  ;;  %15957 = vmatmul.mubr.bf16.gmra.mxu0 %v16335_v27 }
 0x43b   : > { %v15674_v18 = vpop.f32.mrf.mxu0  ;;  %v9112_v23 = vpop.f32.mrf.mxu1  ;;  %15917 = vmatmul.mubr.bf16.gmra.mxu1 %v14365_v10  ;;  %15960 = vmatprep.mubr.bf16.mxu0 %v16336_v59 }
 0x43c   : > { %v20032_v39 = vadd.f32 %v15674_v18, %v9150_v47  ;;  %v9153_v1 = vadd.f32 %v9112_v23, %v19811_v55  ;;  %v16338_v47 = vld [vmem:[%s16753_s7 + $0x70] sm:$0xff]  }
 0x43d   : > { %v9543_v22 = vpop.f32.mrf.mxu0  ;;  %v15698_v21 = vpop.f32.mrf.mxu1 }
 0x43e   : > { %v20035_v44 = vadd.f32 %v9543_v22, %v9148_v0  ;;  %v10394_v19 = vadd.f32 %v15698_v21, %v19825_v8 }
 0x43f   : > { %v15675_v12 = vpop.f32.mrf.mxu0  ;;  %v10265_v34 = vpop.f32.mrf.mxu1 }
 0x440   : > { %v20039_v48 = vadd.f32 %v15675_v12, %v9151_v29  ;;  %v10392_v9 = vadd.f32 %v10265_v34, %v19832_v7 }
 0x441   : > { %v9546_v41 = vpop.f32.mrf.mxu0  ;;  %v15699_v32 = vpop.f32.mrf.mxu1 }
 0x442   : > { %v20043_v55 = vadd.f32 %v9546_v41, %v9149_v37  ;;  %v10395_v54 = vadd.f32 %v15699_v32, %v19842_v46  ;;  %15961 = vmatmul.mubr.bf16.gmra.mxu0 %v16337_v33  ;;  %v16339_v37 = vld [vmem:[%s16753_s7 + $0x78] sm:$0xff]  }
 0x443   : > { %v15678_v52 = vpop.f32.mrf.mxu0  ;;  %v10268_v0 = vpop.f32.mrf.mxu1  ;;  %15964 = vmatprep.mubr.bf16.mxu0 %v16338_v47 }
 0x444   : > { %v20046_v2 = vadd.f32 %v15678_v52, %v9154_v25  ;;  %v10393_v8 = vadd.f32 %v10268_v0, %v19856_v15 }
 0x445   : > { %v9559_v29 = vpop.f32.mrf.mxu0  ;;  %v15702_v4 = vpop.f32.mrf.mxu1 }
 0x446   : > { %v20049_v58 = vadd.f32 %v9559_v29, %v9152_v35  ;;  %v10398_v7 = vadd.f32 %v15702_v4, %v19867_v57 }
 0x447   : > { %v15679_v56 = vpop.f32.mrf.mxu0  ;;  %v10281_v3 = vpop.f32.mrf.mxu1 }
 0x448   : > { %v20053_v63 = vadd.f32 %v15679_v56, %v9155_v13  ;;  %v10396_v46 = vadd.f32 %v10281_v3, %v19876_v45 }
 0x449   : > { %v9562_v16 = vpop.f32.mrf.mxu0  ;;  %v15703_v26 = vpop.f32.mrf.mxu1 }
 0x44a   : > { %v20056_v25 = vadd.f32 %v9562_v16, %v9153_v1  ;;  %v10399_v15 = vadd.f32 %v15703_v26, %v19886_v36  ;;  %15965 = vmatmul.mubr.bf16.gmra.mxu0 %v16339_v37 }
 0x44b   : > { %v15746_v50 = vpop.f32.mrf.mxu0  ;;  %v10284_v28 = vpop.f32.mrf.mxu1 }
 0x44c   : > { %v20059_v27 = vadd.f32 %v15746_v50, %v10394_v19  ;;  %v10397_v57 = vadd.f32 %v10284_v28, %v19900_v49 }
 0x44d   : > { %v10859_v35 = vpop.f32.mrf.mxu0  ;;  %v15706_v51 = vpop.f32.mrf.mxu1 }
 0x44e   : > { %v20062_v10 = vadd.f32 %v10859_v35, %v10392_v9  ;;  %v10402_v59 = vadd.f32 %v15706_v51, %v19909_v30 }
 0x44f   : > { %v15747_v45 = vpop.f32.mrf.mxu0  ;;  %v10297_v42 = vpop.f32.mrf.mxu1 }
 0x450   : > { %v20065_v13 = vadd.f32 %v15747_v45, %v10395_v54  ;;  %v10400_v18 = vadd.f32 %v10297_v42, %v19916_v17 }
 0x451   : > { %v10862_v36 = vpop.f32.mrf.mxu0  ;;  %v15707_v23 = vpop.f32.mrf.mxu1 }
 0x452   : > { %v20068_v1 = vadd.f32 %v10862_v36, %v10393_v8  ;;  %v10403_v22 = vadd.f32 %v15707_v23, %v19925_v38 }
 0x453   : > { %v15750_v21 = vpop.f32.mrf.mxu0  ;;  %v10300_v49 = vpop.f32.mrf.mxu1 }
 0x454   : > { %v20071_v19 = vadd.f32 %v15750_v21, %v10398_v7  ;;  %v10401_v12 = vadd.f32 %v10300_v49, %v19940_v60 }
 0x455   : > { %v10875_v34 = vpop.f32.mrf.mxu0  ;;  %v15710_v30 = vpop.f32.mrf.mxu1 }
 0x456   : > { %v20074_v33 = vadd.f32 %v10875_v34, %v10396_v46  ;;  %v10406_v9 = vadd.f32 %v15710_v30, %v19950_v62 }
 0x457   : > { %v15751_v41 = vpop.f32.mrf.mxu0  ;;  %v10313_v17 = vpop.f32.mrf.mxu1 }
 0x458   : > { %v20077_v47 = vadd.f32 %v15751_v41, %v10399_v15  ;;  %v10404_v32 = vadd.f32 %v10313_v17, %v19955_v40 }
 0x459   : > { %v10878_v54 = vpop.f32.mrf.mxu0  ;;  %v15711_v38 = vpop.f32.mrf.mxu1 }
 0x45a   : > { %v20080_v52 = vadd.f32 %v10878_v54, %v10397_v57  ;;  %v10407_v0 = vadd.f32 %v15711_v38, %v19964_v43 }
 0x45b   : > { %v15754_v8 = vpop.f32.mrf.mxu0  ;;  %v10316_v60 = vpop.f32.mrf.mxu1 }
 0x45c   : > { %v20083_v29 = vadd.f32 %v15754_v8, %v10402_v59  ;;  %v10405_v4 = vadd.f32 %v10316_v60, %v19976_v31 }
 0x45d   : > { %v10891_v7 = vpop.f32.mrf.mxu0  ;;  %v15714_v62 = vpop.f32.mrf.mxu1 }
 0x45e   : > { %v20086_v56 = vadd.f32 %v10891_v7, %v10400_v18  ;;  %v10410_v3 = vadd.f32 %v15714_v62, %v19986_v61 }
 0x45f   : > { %v15755_v37 = vpop.f32.mrf.mxu0  ;;  %v10329_v40 = vpop.f32.mrf.mxu1 }
 0x460   : > { %v20089_v46 = vadd.f32 %v15755_v37, %v10403_v22  ;;  %v10408_v16 = vadd.f32 %v10329_v40, %v19990_v11 }
 0x461   : > { %v10894_v26 = vpop.f32.mrf.mxu0  ;;  %v15715_v43 = vpop.f32.mrf.mxu1 }
 0x462   : > { %v20092_v15 = vadd.f32 %v10894_v26, %v10401_v12  ;;  %v10411_v50 = vadd.f32 %v15715_v43, %v19995_v14 }
 0x463   : > { %v15758_v28 = vpop.f32.mrf.mxu0  ;;  %v10332_v31 = vpop.f32.mrf.mxu1 }
 0x464   : > { %v20095_v57 = vadd.f32 %v15758_v28, %v10406_v9  ;;  %v10409_v35 = vadd.f32 %v10332_v31, %v20006_v24 }
 0x465   : > { %v10907_v51 = vpop.f32.mrf.mxu0  ;;  %v15718_v61 = vpop.f32.mrf.mxu1 }
 0x466   : > { %v20098_v59 = vadd.f32 %v10907_v51, %v10404_v32  ;;  %v10414_v45 = vadd.f32 %v15718_v61, %v20012_v6 }
 0x467   : > { %v15759_v42 = vpop.f32.mrf.mxu0  ;;  %v10345_v11 = vpop.f32.mrf.mxu1 }
 0x468   : > { %v20101_v18 = vadd.f32 %v15759_v42, %v10407_v0  ;;  %v10412_v36 = vadd.f32 %v10345_v11, %v20016_v20 }
 0x469   : > { %v10910_v23 = vpop.f32.mrf.mxu0  ;;  %v15719_v14 = vpop.f32.mrf.mxu1 }
 0x46a   : > { %v20104_v22 = vadd.f32 %v10910_v23, %v10405_v4  ;;  %v10415_v21 = vadd.f32 %v15719_v14, %v20025_v53 }
 0x46b   : > { %v15762_v49 = vpop.f32.mrf.mxu0  ;;  %v10348_v24 = vpop.f32.mrf.mxu1 }
 0x46c   : > { %v20107_v12 = vadd.f32 %v15762_v49, %v10410_v3  ;;  %v10413_v34 = vadd.f32 %v10348_v24, %v20029_v5 }
 0x46d   : > { %v10923_v30 = vpop.f32.mrf.mxu0  ;;  %v15722_v6 = vpop.f32.mrf.mxu1 }
 0x46e   : > { %v20110_v9 = vadd.f32 %v10923_v30, %v10408_v16  ;;  %v10418_v41 = vadd.f32 %v15722_v6, %v20032_v39 }
 0x46f   : > { %v15763_v17 = vpop.f32.mrf.mxu0  ;;  %v10361_v20 = vpop.f32.mrf.mxu1 }
 0x470   : > { %v20113_v32 = vadd.f32 %v15763_v17, %v10411_v50  ;;  %v10416_v54 = vadd.f32 %v10361_v20, %v20035_v44 }
 0x471   : > { %v10926_v38 = vpop.f32.mrf.mxu0  ;;  %v15723_v53 = vpop.f32.mrf.mxu1 }
 0x472   : > { %v20116_v0 = vadd.f32 %v10926_v38, %v10409_v35  ;;  %v10419_v8 = vadd.f32 %v15723_v53, %v20039_v48 }
 0x473   : > { %v15766_v60 = vpop.f32.mrf.mxu0  ;;  %v10364_v5 = vpop.f32.mrf.mxu1 }
 0x474   : > { %v20119_v4 = vadd.f32 %v15766_v60, %v10414_v45  ;;  %v10417_v7 = vadd.f32 %v10364_v5, %v20043_v55 }
 0x475   : > { %v10939_v62 = vpop.f32.mrf.mxu0  ;;  %v15726_v3 = vpop.f32.mrf.mxu1 }
 0x476   : > { %v20122_v39 = vadd.f32 %v10939_v62, %v10412_v36  ;;  %v10422_v40 = vadd.f32 %v15726_v3, %v20046_v2 }
 0x477   : > { %v15767_v37 = vpop.f32.mrf.mxu0  ;;  %v10377_v16 = vpop.f32.mrf.mxu1 }
 0x478   : > { %v20125_v44 = vadd.f32 %v15767_v37, %v10415_v21  ;;  %v10420_v43 = vadd.f32 %v10377_v16, %v20049_v58 }
 0x479   : > { %v10942_v26 = vpop.f32.mrf.mxu0  ;;  %v15727_v50 = vpop.f32.mrf.mxu1 }
 0x47a   : > { %v20128_v48 = vadd.f32 %v10942_v26, %v10413_v34  ;;  %v10423_v31 = vadd.f32 %v15727_v50, %v20053_v63 }
 0x47b   : > { %v15770_v28 = vpop.f32.mrf.mxu0  ;;  %v10380_v35 = vpop.f32.mrf.mxu1 }
 0x47c   : > { %20874 = vst [vmem:[#allocation34_spill] sm:$0xff] %v20128_v48  ;;  %v20131_v55 = vadd.f32 %v15770_v28, %v10418_v41  ;;  %v10421_v61 = vadd.f32 %v10380_v35, %v20056_v25 }
 0x47d   : > { %v10955_v51 = vpop.f32.mrf.mxu0  ;;  %v15794_v2 = vpop.f32.mrf.mxu1 }
 0x47e   : > { %v20134_v45 = vadd.f32 %v10955_v51, %v10416_v54  ;;  %v20137_v11 = vadd.f32 %v15794_v2, %v20059_v27 }
 0x47f   : > { %v15771_v42 = vpop.f32.mrf.mxu0  ;;  %v11310_v36 = vpop.f32.mrf.mxu1 }
 0x480   : > { %v20139_v58 = vadd.f32 %v15771_v42, %v10419_v8  ;;  %v20142_v14 = vadd.f32 %v11310_v36, %v20062_v10 }
 0x481   : > { %v10958_v23 = vpop.f32.mrf.mxu0  ;;  %v20146_v21 = vpop.f32.mrf.mxu1 }
 0x482   : > { %20875 = vst [vmem:[#allocation57_spill] sm:$0xff] %v20139_v58  ;;  %v20144_v63 = vadd.f32 %v10958_v23, %v10417_v7 }
 0x483   : > { %v15774_v49 = vpop.f32.mrf.mxu0  ;;  %v20150_v24 = vpop.f32.mrf.mxu1 }
 0x484   : > { %20876 = vst [vmem:[#allocation39_spill] sm:$0xff] %v20144_v63  ;;  %v20148_v25 = vadd.f32 %v15774_v49, %v10422_v40 }
 0x485   : > { %v10971_v34 = vpop.f32.mrf.mxu0  ;;  %v15798_v27 = vpop.f32.mrf.mxu1 }
 0x486   : > { %v20152_v30 = vadd.f32 %v10971_v34, %v10420_v43  ;;  %v20155_v41 = vadd.f32 %v15798_v27, %v20071_v19 }
 0x487   : > { %v15775_v6 = vpop.f32.mrf.mxu0  ;;  %v11326_v10 = vpop.f32.mrf.mxu1 }
 0x488   : > { %v20157_v17 = vadd.f32 %v15775_v6, %v10423_v31  ;;  %v20160_v54 = vadd.f32 %v11326_v10, %v20074_v33 }
 0x489   : > { %v10974_v20 = vpop.f32.mrf.mxu0  ;;  %v20164_v53 = vpop.f32.mrf.mxu1 }
 0x48a   : > { %20877 = vst [vmem:[#allocation59_spill] sm:$0xff] %v20157_v17  ;;  %v20162_v38 = vadd.f32 %v10974_v20, %v10421_v61 }
 0x48b   : > { %v20166_v8 = vpop.f32.mrf.mxu0  ;;  %v20168_v60 = vpop.f32.mrf.mxu1 }
 0x48c   : > { %20878 = vst [vmem:[#allocation61_spill] sm:$0xff] %v20162_v38 }
 0x48d   : > { %v20170_v5 = vpop.f32.mrf.mxu0  ;;  %v15802_v7 = vpop.f32.mrf.mxu1 }
 0x48e   : > { %v20175_v62 = vadd.f32 %v15802_v7, %v20083_v29 }
 0x48f   : > { %v20172_v19 = vpop.f32.mrf.mxu0  ;;  %v11342_v3 = vpop.f32.mrf.mxu1 }
 0x490   : > { %v20180_v33 = vadd.f32 %v11342_v3, %v20086_v56 }
 0x491   : > { %v20177_v37 = vpop.f32.mrf.mxu0  ;;  %v20182_v40 = vpop.f32.mrf.mxu1 }
 0x493   : > { %v20184_v16 = vpop.f32.mrf.mxu0  ;;  %v20186_v26 = vpop.f32.mrf.mxu1 }
 0x495   : > { %v20188_v43 = vpop.f32.mrf.mxu0  ;;  %v15806_v50 = vpop.f32.mrf.mxu1 }
 0x496   : > { %v20193_v29 = vadd.f32 %v15806_v50, %v20095_v57 }
 0x497   : > { %v20190_v28 = vpop.f32.mrf.mxu0  ;;  %v11358_v31 = vpop.f32.mrf.mxu1 }
 0x498   : > { %v20198_v56 = vadd.f32 %v11358_v31, %v20098_v59 }
 0x499   : > { %v20195_v35 = vpop.f32.mrf.mxu0  ;;  %v20200_v51 = vpop.f32.mrf.mxu1 }
 0x49b   : > { %v20202_v61 = vpop.f32.mrf.mxu0  ;;  %v20204_v2 = vpop.f32.mrf.mxu1 }
 0x49d   : > { %v20206_v42 = vpop.f32.mrf.mxu0  ;;  %v15810_v36 = vpop.f32.mrf.mxu1 }
 0x49e   : > { %v20211_v57 = vadd.f32 %v15810_v36, %v20107_v12 }
 0x49f   : > { %v20208_v23 = vpop.f32.mrf.mxu0  ;;  %v11374_v49 = vpop.f32.mrf.mxu1 }
 0x4a0   : > { %v20216_v59 = vadd.f32 %v11374_v49, %v20110_v9 }
 0x4a1   : > { %v20213_v34 = vpop.f32.mrf.mxu0  ;;  %v20218_v27 = vpop.f32.mrf.mxu1 }
 0x4a2   : > { %20879 = vst [vmem:[#allocation63_spill] sm:$0xff] %v20216_v59 }
 0x4a3   : > { %v20220_v6 = vpop.f32.mrf.mxu0  ;;  %v20222_v10 = vpop.f32.mrf.mxu1 }
 0x4a5   : > { %v20224_v20 = vpop.f32.mrf.mxu0  ;;  %v15814_v7 = vpop.f32.mrf.mxu1 }
 0x4a6   : > { %v20229_v12 = vadd.f32 %v15814_v7, %v20119_v4 }
 0x4a7   : > { %v20226_v3 = vpop.f32.mrf.mxu0  ;;  %v11390_v50 = vpop.f32.mrf.mxu1 }
 0x4a8   : > { %20880 = vst [vmem:[#allocation48_spill] sm:$0xff] %v20229_v12  ;;  %v20234_v9 = vadd.f32 %v11390_v50, %v20122_v39 }
 0x4a9   : > { %v20231_v31 = vpop.f32.mrf.mxu0  ;;  %v20236_v36 = vpop.f32.mrf.mxu1 }
 0x4aa   : > { %20881 = vst [vmem:[#allocation50_spill] sm:$0xff] %v20234_v9 }
 0x4ab   : > { %v20238_v49 = vpop.f32.mrf.mxu0  ;;  %v20240_v38 = vpop.f32.mrf.mxu1 }
 0x4ac   : > { %20882 = vst [vmem:[#allocation52_spill] sm:$0xff] %v20240_v38 }
 0x4ad   : > { %v20242_v17 = vpop.f32.mrf.mxu0  ;;  %v15818_v63 = vpop.f32.mrf.mxu1 }
 0x4ae   : > { %20883 = vst [vmem:[#allocation54_spill] sm:$0xff] %v20242_v17  ;;  %v20247_v4 = vadd.f32 %v15818_v63, %v20131_v55 }
 0x4af   : > { %v20244_v58 = vpop.f32.mrf.mxu0  ;;  %v11406_v7 = vpop.f32.mrf.mxu1 }
 0x4b0   : > { %20884 = vst [vmem:[#allocation56_spill] sm:$0xff] %v20244_v58  ;;  %20885 = vst [vmem:[#allocation28_spill] sm:$0xff] %v20247_v4  ;;  %v20252_v39 = vadd.f32 %v11406_v7, %v20134_v45 }
 0x4b1   : > { %v20249_v12 = vpop.f32.mrf.mxu0  ;;  %v20254_v50 = vpop.f32.mrf.mxu1 }
 0x4b2   : > { %20886 = vst [vmem:[#allocation60_spill] sm:$0xff] %v20252_v39  ;;  %20887 = vst [vmem:[#allocation62_spill] sm:$0xff] %v20254_v50 }
 0x4b3   : > { %v20256_v9 = vpop.f32.mrf.mxu0  ;;  %v20258_v48 = vpop.f32.mrf.mxu1 }
 0x4b4   : > { %20888 = vst [vmem:[#allocation20_spill] sm:$0xff] %v20256_v9  ;;  %20889 = vst [vmem:[#allocation36_spill] sm:$0xff] %v20258_v48 }
 0x4b5   : > { %v20260_v38 = vpop.f32.mrf.mxu0  ;;  %v15822_v58 = vpop.f32.mrf.mxu1 }
 0x4b6   : > { %20890 = vst [vmem:[#allocation69_spill] sm:$0xff] %v20260_v38  ;;  %v20267_v55 = vadd.f32 %v15822_v58, %v20148_v25  ;;  %v12257_v25 = vadd.f32 %v20166_v8, %v20137_v11  ;;  %v11442_v11 = vadd.f32 %v20168_v60, %v20080_v52  ;;  %v12259_v52 = vadd.f32 %v20188_v43, %v20160_v54 }
 0x4b7   : > { %v20262_v17 = vpop.f32.mrf.mxu0  ;;  %v11422_v63 = vpop.f32.mrf.mxu1  ;;  %v20325_v54 = vadd.f32 %v20206_v42, %v20180_v33  ;;  %v11454_v33 = vadd.f32 %v20222_v10, %v20116_v0  ;;  %v11460_v42 = vadd.f32 %v20236_v36, %v20125_v44 }
 0x4b8   : > { %20891 = vst [vmem:[#allocation27_spill] sm:$0xff] %v20262_v17  ;;  %20893 = vst [vmem:[#allocation33_spill] sm:$0xff] %v20267_v55  ;;  %v20270_v45 = vadd.f32 %v11422_v63, %v20152_v30  ;;  %v11440_v30 = vadd.f32 %v20146_v21, %v20065_v13  ;;  %v11438_v63 = vadd.f32 %v20150_v24, %v20068_v1  ;;  %v20300_v21 = vld [vmem:[#allocation13 + $0x2] ss:$0 sm:$0xff] }
 0x4b9   : > { %v20264_v59 = vpop.f32.mrf.mxu0  ;;  %v20274_v39 = vpop.f32.mrf.mxu1  ;;  %v12255_v55 = vadd.f32 %v20170_v5, %v20142_v14  ;;  %v12261_v24 = vadd.f32 %v20184_v16, %v20155_v41  ;;  %v11448_v14 = vadd.f32 %v20182_v40, %v20089_v46  ;;  %v12260_v60 = vadd.f32 %v20195_v35, %v11442_v11 }
 0x4ba   : > { %20892 = vst [vmem:[#allocation19_spill] sm:$0xff] %v20264_v59  ;;  %20894 = vst [vmem:[#allocation66_spill] sm:$0xff] %v20270_v45  ;;  %v12256_v13 = vadd.f32 %v20177_v37, %v11438_v63  ;;  %v11452_v5 = vadd.f32 %v20200_v51, %v20101_v18  ;;  %v12265_v46 = vadd.f32 %v20202_v61, %v20175_v62  ;;  %v20905_v63 = vld [vmem:[#allocation62_spill] sm:$0xff] }
 0x4bb   : > { %v20272_v7 = vpop.f32.mrf.mxu0  ;;  %v20276_v4 = vpop.f32.mrf.mxu1  ;;  %v20328_v16 = vadd.f32 %v20208_v23, %v11448_v14  ;;  %v11456_v62 = vadd.f32 %v20218_v27, %v20113_v32  ;;  %v20350_v32 = vadd.f32 %v20224_v20, %v20198_v56  ;;  %v20365_v56 = vadd.f32 %v20238_v49, %v20211_v57  ;;  %v20899_v27 = vld [vmem:[#allocation63_spill] sm:$0xff]  ;;  %v20901_v20 = vld [vmem:[#allocation34_spill] sm:$0xff] }
 0x4bc   : > { %20895 = vst [vmem:[#allocation71_spill] sm:$0xff] %v20276_v4  ;;  %v20353_v51 = vadd.f32 %v20226_v3, %v11452_v5  ;;  %v20902_v3 = vld [vmem:[#allocation52_spill] sm:$0xff]  ;;  %v20380_v49 = vadd.f32 %v20249_v12, %v11454_v33 }
 0x4bd   : > { %v20278_v48 = vpop.f32.mrf.mxu0 }
 0x4be   : > { %20896 = vst [vmem:[#allocation43_spill] sm:$0xff] %v20278_v48  ;;  %v12258_v48 = vadd.f32 %v20172_v19, %v11440_v30  ;;  %v20904_v30 = vld [vmem:[#allocation57_spill] sm:$0xff] }
 0x4bf   : > { %v20280_v17 = vpop.f32.mrf.mxu0  ;;  %v20384_v11 = vadd.f32 %v20905_v63, %v20904_v30 }
 0x4c0   : > { %20897 = vst [vmem:[#allocation38_spill] sm:$0xff] %v20280_v17 }
 0x4c1   : > { %v15890_v38 = vpop.f32.mrf.mxu1  ;;  %v20282_v50 = vpop.f32.mrf.mxu0 }
 0x4c2   : > { %20898 = vst [vmem:[#allocation40_spill] sm:$0xff] %v20282_v50  ;;  %v12851_v17 = vadd.f32 %v15890_v38, %v12257_v25  ;;  %v11444_v50 = vadd.f32 %v20164_v53, %v20077_v47  ;;  %v11446_v47 = vadd.f32 %v20186_v26, %v20092_v15  ;;  %v11450_v15 = vadd.f32 %v20204_v2, %v20104_v22  ;;  %v20337_v22 = vld [vmem:[#allocation13 + $0x3] ss:$0 sm:$0xff]  ;;  %v20903_v25 = vld [vmem:[#allocation56_spill] sm:$0xff] }
 0x4c3   : > { %v12722_v9 = vpop.f32.mrf.mxu1  ;;  %v20377_v57 = vadd.f32 %v20903_v25, %v11456_v62 }
 0x4c4   : > { %v12849_v38 = vadd.f32 %v12722_v9, %v12255_v55  ;;  %v12262_v8 = vadd.f32 %v20190_v28, %v11444_v50  ;;  %v13305_v41 = vmul.f32 %v20300_v21, %v12851_v17  ;;  %v20331_v18 = vadd.f32 %v20213_v34, %v11446_v47  ;;  %v20339_v17 = vld [vmem:[#allocation13 + $0x4] ss:$0 sm:$0xff]  ;;  %v20906_v47 = vld [vmem:[#allocation48_spill] sm:$0xff] }
 0x4c5   : > { %v15891_v59 = vpop.f32.mrf.mxu1  ;;  %v20356_v61 = vadd.f32 %v20231_v31, %v11450_v15  ;;  %v11458_v31 = vadd.f32 %v20902_v3, %v20901_v20  ;;  %v20911_v20 = vld [vmem:[#allocation69_spill] sm:$0xff] }
 0x4c6   : > { %v12852_v37 = vadd.f32 %v15891_v59, %v12258_v48  ;;  %v20343_v48 = vadd.f32 %v20220_v6, %v20193_v29  ;;  %v13303_v43 = vmul.f32 %v20300_v21, %v12849_v38  ;;  %v13342_v23 = vadd.f32 %v20337_v22, %v13305_v41  ;;  %v20900_v6 = vld [vmem:[#allocation54_spill] sm:$0xff]  ;;  %v20907_v38 = vld [vmem:[#allocation20_spill] sm:$0xff]  ;;  %v20908_v41 = vld [vmem:[#allocation39_spill] sm:$0xff] }
 0x4c7   : > { %v12725_v58 = vpop.f32.mrf.mxu1  ;;  %v20369_v10 = vadd.f32 %v20900_v6, %v20899_v27  ;;  %v20910_v6 = vld [vmem:[#allocation50_spill] sm:$0xff] }
 0x4c8   : > { %v12850_v28 = vadd.f32 %v12725_v58, %v12256_v13  ;;  %v13306_v0 = vmul.f32 %v20300_v21, %v12852_v37  ;;  %v13340_v50 = vadd.f32 %v20337_v22, %v13303_v43  ;;  %v20909_v37 = vld [vmem:[#allocation36_spill] sm:$0xff]  ;;  %v20405_v3 = vadd.f32 %v20911_v20, %v20910_v6 }
 0x4c9   : > { %v20397_v62 = vadd.f32 %v20909_v37, %v20908_v41 }
 0x4ca   : > { %v20290_v45 = vpop.f32.mrf.mxu0  ;;  %v13304_v36 = vmul.f32 %v20300_v21, %v12850_v28  ;;  %v13343_v5 = vadd.f32 %v20337_v22, %v13306_v0 }
 0x4cb   : > { %v15894_v4 = vpop.f32.mrf.mxu1 }
 0x4cc   : > { %v20302_v1 = vpop.f32.mrf.mxu0  ;;  %v12855_v2 = vadd.f32 %v15894_v4, %v12261_v24  ;;  %v20387_v24 = vld [vmem:[#allocation13 + $0x5] ss:$0 sm:$0xff] }
 0x4cd   : > { %v12738_v53 = vpop.f32.mrf.mxu1 }
 0x4ce   : > { %v20316_v19 = vpop.f32.mrf.mxu0  ;;  %v12853_v9 = vadd.f32 %v12738_v53, %v12259_v52  ;;  %v13309_v13 = vmul.f32 %v20300_v21, %v12855_v2  ;;  %v20391_v53 = vadd.f32 %v20907_v38, %v20906_v47 }
 0x4cf   : > { %v15895_v40 = vpop.f32.mrf.mxu1 }
 0x4d0   : > { %v20335_v26 = vpop.f32.mrf.mxu0  ;;  %v13307_v33 = vmul.f32 %v20300_v21, %v12853_v9  ;;  %v12856_v43 = vadd.f32 %v15895_v40, %v12262_v8  ;;  %v13346_v8 = vadd.f32 %v20337_v22, %v13309_v13 }
 0x4d1   : > { %v12741_v35 = vpop.f32.mrf.mxu1 }
 0x4d2   : > { %v15938_v29 = vpop.f32.mrf.mxu0  ;;  %v12854_v28 = vadd.f32 %v12741_v35, %v12260_v60  ;;  %v13310_v25 = vmul.f32 %v20300_v21, %v12856_v43 }
 0x4d3   : > { %v13379_v34 = vmul.f32 %v15938_v29, %v20339_v17  ;;  %v15898_v59 = vpop.f32.mrf.mxu1 }
 0x4d4   : > { %v13139_v44 = vpop.f32.mrf.mxu0  ;;  %v13308_v30 = vmul.f32 %v20300_v21, %v12854_v28 }
 0x4d5   : > { %v13411_v4 = vadd.f32 %v13379_v34, %v13342_v23  ;;  %v13377_v55 = vmul.f32 %v20339_v17, %v13139_v44  ;;  %v12754_v58 = vpop.f32.mrf.mxu1  ;;  %v13341_v34 = vadd.f32 %v20337_v22, %v13304_v36  ;;  %v20912_v44 = vld [vmem:[#allocation27_spill] sm:$0xff] }
 0x4d6   : > { %v15939_v14 = vpop.f32.mrf.mxu0  ;;  %v12857_v63 = vadd.f32 %v12754_v58, %v20325_v54  ;;  %v13345_v20 = vadd.f32 %v20337_v22, %v13308_v30  ;;  %v20915_v30 = vld [vmem:[#allocation59_spill] sm:$0xff] }
 0x4d7   : > { %v13409_v52 = vadd.f32 %v13377_v55, %v13340_v50  ;;  %v13380_v15 = vmul.f32 %v15939_v14, %v20339_v17  ;;  %v15899_v12 = vpop.f32.mrf.mxu1  ;;  %v13448_v29 = vadd.f32 %v20387_v24, %v13411_v4  ;;  %v20408_v50 = vadd.f32 %v20912_v44, %v11460_v42 }
 0x4d8   : > { %v13142_v2 = vpop.f32.mrf.mxu0  ;;  %v12859_v55 = vadd.f32 %v15898_v59, %v12265_v46  ;;  %v13344_v46 = vadd.f32 %v20337_v22, %v13307_v33  ;;  %v12860_v37 = vadd.f32 %v15899_v12, %v20328_v16 }
 0x4d9   : > { %v13412_v23 = vadd.f32 %v13380_v15, %v13343_v5  ;;  %v13378_v27 = vmul.f32 %v20339_v17, %v13142_v2  ;;  %v12757_v0 = vpop.f32.mrf.mxu1  ;;  %v13446_v60 = vadd.f32 %v20387_v24, %v13409_v52  ;;  %v13480_v59 = vmax.f32 %v13448_v29, 0.0  ;;  %v20913_v52 = vld [vmem:[#allocation19_spill] sm:$0xff]  ;;  %v20914_v29 = vld [vmem:[#allocation28_spill] sm:$0xff] }
 0x4da   : > { %v15942_v9 = vpop.f32.mrf.mxu0  ;;  %v20421_v5 = vadd.f32 %v20913_v52, %v11458_v31  ;;  %v13313_v15 = vmul.f32 %v20300_v21, %v12859_v55  ;;  %v13347_v31 = vadd.f32 %v20337_v22, %v13310_v25  ;;  %v12858_v12 = vadd.f32 %v12757_v0, %v20331_v18 }
 0x4db   : > { %v13449_v40 = vadd.f32 %v20387_v24, %v13412_v23  ;;  %v13410_v35 = vadd.f32 %v13378_v27, %v13341_v34  ;;  %v13383_v36 = vmul.f32 %v15942_v9, %v20339_v17  ;;  %v15902_v4 = vpop.f32.mrf.mxu1  ;;  %v13478_v58 = vmax.f32 %v13446_v60, 0.0 }
 0x4dc   : > { %v13155_v42 = vpop.f32.mrf.mxu0  ;;  %v20427_v23 = vadd.f32 %v20272_v7, %v20914_v29  ;;  %v13311_v34 = vmul.f32 %v20300_v21, %v12857_v63  ;;  %v13314_v9 = vmul.f32 %v20300_v21, %v12860_v37  ;;  %v12863_v25 = vadd.f32 %v15902_v4, %v20343_v48 }
 0x4dd   : > { %v13481_v14 = vmax.f32 %v13449_v40, 0.0  ;;  %v13447_v13 = vadd.f32 %v20387_v24, %v13410_v35  ;;  %v13381_v47 = vmul.f32 %v20339_v17, %v13155_v42  ;;  %v12770_v38 = vpop.f32.mrf.mxu1  ;;  %v13415_v41 = vadd.f32 %v13383_v36, %v13346_v8 }
 0x4de   : > { %v15943_v54 = vpop.f32.mrf.mxu0  ;;  %v13350_v40 = vadd.f32 %v20337_v22, %v13313_v15  ;;  %v20449_v63 = vadd.f32 %v20274_v39, %v20915_v30 }
 0x4df   : > { %v14513_v43 = vpack.c.bf16 %v13481_v14, %v13480_v59  ;;  %v13479_v33 = vmax.f32 %v13447_v13, 0.0  ;;  %v13413_v28 = vadd.f32 %v13381_v47, %v13344_v46  ;;  %v15903_v2 = vpop.f32.mrf.mxu1  ;;  %v13384_v27 = vmul.f32 %v15943_v54, %v20339_v17 }
 0x4e0   : > { %v13158_v6 = vpop.f32.mrf.mxu0  ;;  %v13452_v55 = vadd.f32 %v20387_v24, %v13415_v41  ;;  %v12861_v46 = vadd.f32 %v12770_v38, %v20350_v32  ;;  %v13348_v14 = vadd.f32 %v20337_v22, %v13311_v34  ;;  %v13312_v13 = vmul.f32 %v20300_v21, %v12858_v12 }
 0x4e1   : > { %14585 = vst [vmem:[%s20434_s24 + $0x8] sm:$0xff] %v14513_v43   ;;  %v14508_v16 = vpack.c.bf16 %v13479_v33, %v13478_v58  ;;  %v13382_v7 = vmul.f32 %v20339_v17, %v13158_v6  ;;  %v12773_v44 = vpop.f32.mrf.mxu1  ;;  %v13416_v8 = vadd.f32 %v13384_v27, %v13347_v31  ;;  %v13450_v35 = vadd.f32 %v20387_v24, %v13413_v28 }
 0x4e2   : > { %v15946_v60 = vpop.f32.mrf.mxu0  ;;  %v13484_v15 = vmax.f32 %v13452_v55, 0.0  ;;  %v12864_v39 = vadd.f32 %v15903_v2, %v20353_v51  ;;  %v13351_v54 = vadd.f32 %v20337_v22, %v13314_v9  ;;  %v13317_v58 = vmul.f32 %v20300_v21, %v12863_v25  ;;  %v20916_v51 = vld [vmem:[#allocation60_spill] sm:$0xff]  ;;  %v20917_v2 = vld [vmem:[#allocation43_spill] sm:$0xff] }
 0x4e3   : > { %14509 = vst [vmem:[%s20434_s24] sm:$0xff] %v14508_v16   ;;  %v13414_v36 = vadd.f32 %v13382_v7, %v13345_v20  ;;  %v13387_v18 = vmul.f32 %v15946_v60, %v20339_v17  ;;  %v15906_v0 = vpop.f32.mrf.mxu1  ;;  %v13453_v42 = vadd.f32 %v20387_v24, %v13416_v8  ;;  %v13482_v32 = vmax.f32 %v13450_v35, 0.0 }
 0x4e4   : > { %v13171_v59 = vpop.f32.mrf.mxu0  ;;  %v13315_v29 = vmul.f32 %v20300_v21, %v12861_v46  ;;  %v12862_v31 = vadd.f32 %v12773_v44, %v20356_v61  ;;  %v20465_v6 = vadd.f32 %v20917_v2, %v20916_v51  ;;  %v13318_v55 = vmul.f32 %v20300_v21, %v12864_v39 }
 0x4e5   : > { %v13451_v47 = vadd.f32 %v20387_v24, %v13414_v36  ;;  %v13419_v52 = vadd.f32 %v13387_v18, %v13350_v40  ;;  %v13385_v48 = vmul.f32 %v20339_v17, %v13171_v59  ;;  %v12786_v4 = vpop.f32.mrf.mxu1  ;;  %v13485_v41 = vmax.f32 %v13453_v42, 0.0 }
 0x4e6   : > { %v15947_v37 = vpop.f32.mrf.mxu0  ;;  %v13349_v9 = vadd.f32 %v20337_v22, %v13312_v13  ;;  %v12867_v60 = vadd.f32 %v15906_v0, %v20365_v56  ;;  %v13354_v40 = vadd.f32 %v20337_v22, %v13317_v58  ;;  %v12865_v36 = vadd.f32 %v12786_v4, %v20369_v10 }
 0x4e7   : > { %v13483_v38 = vmax.f32 %v13451_v47, 0.0  ;;  %v13388_v43 = vmul.f32 %v15947_v37, %v20339_v17  ;;  %v15907_v33 = vpop.f32.mrf.mxu1  ;;  %v14523_v28 = vpack.c.bf16 %v13485_v41, %v13484_v15  ;;  %v13417_v34 = vadd.f32 %v13385_v48, %v13348_v14  ;;  %v20919_v48 = vld [vmem:[#allocation71_spill] sm:$0xff] }
 0x4e8   : > { %v13174_v27 = vpop.f32.mrf.mxu0  ;;  %v13456_v12 = vadd.f32 %v20387_v24, %v13419_v52  ;;  %v13316_v30 = vmul.f32 %v20300_v21, %v12862_v31  ;;  %v13352_v59 = vadd.f32 %v20337_v22, %v13315_v29  ;;  %v20918_v52 = vld [vmem:[#allocation61_spill] sm:$0xff]  ;;  %v13321_v4 = vmul.f32 %v20300_v21, %v12867_v60 }
 0x4e9   : > { %v14518_v16 = vpack.c.bf16 %v13483_v38, %v13482_v32  ;;  %v13420_v20 = vadd.f32 %v13388_v43, %v13351_v54  ;;  %v12789_v7 = vpop.f32.mrf.mxu1  ;;  %14587 = vst [vmem:[%s20434_s24 + $0x18] sm:$0xff] %v14523_v28   ;;  %v13386_v8 = vmul.f32 %v20339_v17, %v13174_v27  ;;  %v13454_v18 = vadd.f32 %v20387_v24, %v13417_v34 }
 0x4ea   : > { %v15950_v61 = vpop.f32.mrf.mxu0  ;;  %v13488_v56 = vmax.f32 %v13456_v12, 0.0  ;;  %v20484_v15 = vadd.f32 %v20919_v48, %v20918_v52  ;;  %v13355_v39 = vadd.f32 %v20337_v22, %v13318_v55  ;;  %v13319_v54 = vmul.f32 %v20300_v21, %v12865_v36 }
 0x4eb   : > { %14586 = vst [vmem:[%s20434_s24 + $0x10] sm:$0xff] %v14518_v16   ;;  %v13457_v44 = vadd.f32 %v20387_v24, %v13420_v20  ;;  %v13391_v35 = vmul.f32 %v15950_v61, %v20339_v17  ;;  %v15910_v25 = vpop.f32.mrf.mxu1  ;;  %v13418_v42 = vadd.f32 %v13386_v8, %v13349_v9  ;;  %v13486_v43 = vmax.f32 %v13454_v18, 0.0  ;;  %v20920_v20 = vld [vmem:[#allocation38_spill] sm:$0xff] }
 0x4ec   : > { %v13187_v46 = vpop.f32.mrf.mxu0  ;;  %v12868_v29 = vadd.f32 %v15907_v33, %v20377_v57  ;;  %v12866_v34 = vadd.f32 %v12789_v7, %v20380_v49  ;;  %v13353_v2 = vadd.f32 %v20337_v22, %v13316_v30  ;;  %v20499_v55 = vadd.f32 %v20920_v20, %v20384_v11  ;;  %v20923_v20 = vld [vmem:[#allocation66_spill] sm:$0xff] }
 0x4ed   : > { %v13489_v0 = vmax.f32 %v13457_v44, 0.0  ;;  %v13423_v14 = vadd.f32 %v13391_v35, %v13354_v40  ;;  %v13389_v13 = vmul.f32 %v20339_v17, %v13187_v46  ;;  %v12802_v47 = vpop.f32.mrf.mxu1  ;;  %v13455_v10 = vadd.f32 %v20387_v24, %v13418_v42 }
 0x4ee   : > { %v15951_v41 = vpop.f32.mrf.mxu0  ;;  %v12871_v57 = vadd.f32 %v15910_v25, %v20391_v53  ;;  %v13358_v49 = vadd.f32 %v20337_v22, %v13321_v4  ;;  %v13322_v40 = vmul.f32 %v20300_v21, %v12868_v29  ;;  %v13320_v11 = vmul.f32 %v20300_v21, %v12866_v34 }
 0x4ef   : > { %v14533_v37 = vpack.c.bf16 %v13489_v0, %v13488_v56  ;;  %v13421_v32 = vadd.f32 %v13389_v13, %v13352_v59  ;;  %v13392_v38 = vmul.f32 %v15951_v41, %v20339_v17  ;;  %v15911_v58 = vpop.f32.mrf.mxu1  ;;  %v13487_v28 = vmax.f32 %v13455_v10, 0.0  ;;  %v20921_v59 = vld [vmem:[#allocation40_spill] sm:$0xff]  ;;  %v20922_v41 = vld [vmem:[#allocation33_spill] sm:$0xff] }
 0x4f0   : > { %v13190_v31 = vpop.f32.mrf.mxu0  ;;  %v13460_v27 = vadd.f32 %v20387_v24, %v13423_v14  ;;  %v12869_v35 = vadd.f32 %v12802_v47, %v20405_v3  ;;  %v13356_v53 = vadd.f32 %v20337_v22, %v13319_v54  ;;  %v12280_v56 = vadd.f32 %v20921_v59, %v20397_v62 }
 0x4f1   : > { %14589 = vst [vmem:[%s20434_s24 + $0x28] sm:$0xff] %v14533_v37   ;;  %v13424_v51 = vadd.f32 %v13392_v38, %v13355_v39  ;;  %v13390_v16 = vmul.f32 %v20339_v17, %v13190_v31  ;;  %v12805_v12 = vpop.f32.mrf.mxu1  ;;  %v14528_v9 = vpack.c.bf16 %v13487_v28, %v13486_v43  ;;  %v13458_v7 = vadd.f32 %v20387_v24, %v13421_v32 }
 0x4f2   : > { %v15954_v33 = vpop.f32.mrf.mxu0  ;;  %v13492_v25 = vmax.f32 %v13460_v27, 0.0  ;;  %v13325_v0 = vmul.f32 %v20300_v21, %v12871_v57  ;;  %v12872_v13 = vadd.f32 %v15911_v58, %v20408_v50  ;;  %v12285_v39 = vadd.f32 %v20290_v45, %v20922_v41 }
 0x4f3   : > { %v13461_v8 = vadd.f32 %v20387_v24, %v13424_v51  ;;  %v13422_v60 = vadd.f32 %v13390_v16, %v13353_v2  ;;  %v13395_v61 = vmul.f32 %v15954_v33, %v20339_v17  ;;  %v15914_v44 = vpop.f32.mrf.mxu1  ;;  %14588 = vst [vmem:[%s20434_s24 + $0x20] sm:$0xff] %v14528_v9   ;;  %v13490_v47 = vmax.f32 %v13458_v7, 0.0 }
 0x4f4   : > { %v13203_v36 = vpop.f32.mrf.mxu0  ;;  %v13323_v37 = vmul.f32 %v20300_v21, %v12869_v35  ;;  %v13359_v54 = vadd.f32 %v20337_v22, %v13322_v40  ;;  %v12870_v50 = vadd.f32 %v12805_v12, %v20421_v5  ;;  %v13357_v58 = vadd.f32 %v20337_v22, %v13320_v11 }
 0x4f5   : > { %v13493_v18 = vmax.f32 %v13461_v8, 0.0  ;;  %v13459_v30 = vadd.f32 %v20387_v24, %v13422_v60  ;;  %v13393_v42 = vmul.f32 %v20339_v17, %v13203_v36  ;;  %v12818_v46 = vpop.f32.mrf.mxu1  ;;  %v13427_v14 = vadd.f32 %v13395_v61, %v13358_v49 }
 0x4f6   : > { %v15955_v3 = vpop.f32.mrf.mxu0  ;;  %v13326_v45 = vmul.f32 %v20300_v21, %v12872_v13  ;;  %v13362_v27 = vadd.f32 %v20337_v22, %v13325_v0  ;;  %v12875_v16 = vadd.f32 %v15914_v44, %v20427_v23  ;;  %v12283_v9 = vadd.f32 %v20302_v1, %v20923_v20 }
 0x4f7   : > { %v14543_v52 = vpack.c.bf16 %v13493_v18, %v13492_v25  ;;  %v13491_v48 = vmax.f32 %v13459_v30, 0.0  ;;  %v13425_v10 = vadd.f32 %v13393_v42, %v13356_v53  ;;  %v15915_v4 = vpop.f32.mrf.mxu1  ;;  %v13396_v62 = vmul.f32 %v15955_v3, %v20339_v17 }
 0x4f8   : > { %v13206_v32 = vpop.f32.mrf.mxu0  ;;  %v13464_v29 = vadd.f32 %v20387_v24, %v13427_v14  ;;  %v12873_v33 = vadd.f32 %v12818_v46, %v20465_v6  ;;  %v13360_v7 = vadd.f32 %v20337_v22, %v13323_v37  ;;  %v13324_v8 = vmul.f32 %v20300_v21, %v12870_v50 }
 0x4f9   : > { %14591 = vst [vmem:[%s20434_s24 + $0x38] sm:$0xff] %v14543_v52   ;;  %v14538_v38 = vpack.c.bf16 %v13491_v48, %v13490_v47  ;;  %v13394_v43 = vmul.f32 %v20339_v17, %v13206_v32  ;;  %v12821_v28 = vpop.f32.mrf.mxu1  ;;  %v13428_v34 = vadd.f32 %v13396_v62, %v13359_v54  ;;  %v13462_v51 = vadd.f32 %v20387_v24, %v13425_v10 }
 0x4fa   : > { %v15958_v31 = vpop.f32.mrf.mxu0  ;;  %v13496_v40 = vmax.f32 %v13464_v29, 0.0  ;;  %v12876_v35 = vadd.f32 %v15915_v4, %v20499_v55  ;;  %v13363_v36 = vadd.f32 %v20337_v22, %v13326_v45  ;;  %v13329_v25 = vmul.f32 %v20300_v21, %v12875_v16 }
 0x4fb   : > { %14590 = vst [vmem:[%s20434_s24 + $0x30] sm:$0xff] %v14538_v38   ;;  %v13426_v2 = vadd.f32 %v13394_v43, %v13357_v58  ;;  %v13399_v5 = vmul.f32 %v15958_v31, %v20339_v17  ;;  %v15918_v12 = vpop.f32.mrf.mxu1  ;;  %v13465_v57 = vadd.f32 %v20387_v24, %v13428_v34  ;;  %v13494_v6 = vmax.f32 %v13462_v51, 0.0 }
 0x4fc   : > { %v13219_v49 = vpop.f32.mrf.mxu0  ;;  %v13327_v42 = vmul.f32 %v20300_v21, %v12873_v33  ;;  %v12874_v59 = vadd.f32 %v12821_v28, %v12280_v56  ;;  %v12286_v55 = vadd.f32 %v20316_v19, %v20449_v63  ;;  %v13330_v52 = vmul.f32 %v20300_v21, %v12876_v35 }
 0x4fd   : > { %v13463_v60 = vadd.f32 %v20387_v24, %v13426_v2  ;;  %v13431_v61 = vadd.f32 %v13399_v5, %v13362_v27  ;;  %v13397_v23 = vmul.f32 %v20339_v17, %v13219_v49  ;;  %v12834_v44 = vpop.f32.mrf.mxu1  ;;  %v13497_v11 = vmax.f32 %v13465_v57, 0.0 }
 0x4fe   : > { %v15959_v1 = vpop.f32.mrf.mxu0  ;;  %v13361_v48 = vadd.f32 %v20337_v22, %v13324_v8  ;;  %v12879_v4 = vadd.f32 %v15918_v12, %v12285_v39  ;;  %v13366_v37 = vadd.f32 %v20337_v22, %v13329_v25  ;;  %v12877_v63 = vadd.f32 %v12834_v44, %v12283_v9 }
 0x4ff   : > { %v13495_v53 = vmax.f32 %v13463_v60, 0.0  ;;  %v13400_v18 = vmul.f32 %v15959_v1, %v20339_v17  ;;  %v14553_v30 = vpack.c.bf16 %v13497_v11, %v13496_v40  ;;  %v13429_v46 = vadd.f32 %v13397_v23, %v13360_v7  ;;  %v15919_v47 = vpop.f32.mrf.mxu1 }
 0x500   : > { %v13222_v0 = vpop.f32.mrf.mxu0  ;;  %v13468_v13 = vadd.f32 %v20387_v24, %v13431_v61  ;;  %v13328_v62 = vmul.f32 %v20300_v21, %v12874_v59  ;;  %v13364_v50 = vadd.f32 %v20337_v22, %v13327_v42  ;;  %v12284_v45 = vadd.f32 %v20335_v26, %v20484_v15 }
 0x501   : > { %v14548_v14 = vpack.c.bf16 %v13495_v53, %v13494_v6  ;;  %v13432_v3 = vadd.f32 %v13400_v18, %v13363_v36  ;;  %14593 = vst [vmem:[%s20434_s24 + $0x48] sm:$0xff] %v14553_v30   ;;  %v13398_v10 = vmul.f32 %v20339_v17, %v13222_v0  ;;  %v13466_v54 = vadd.f32 %v20387_v24, %v13429_v46  ;;  %v12837_v29 = vpop.f32.mrf.mxu1 }
 0x502   : > { %v15962_v41 = vpop.f32.mrf.mxu0  ;;  %v13500_v58 = vmax.f32 %v13468_v13, 0.0  ;;  %v13333_v31 = vmul.f32 %v20300_v21, %v12879_v4  ;;  %v13367_v51 = vadd.f32 %v20337_v22, %v13330_v52  ;;  %v13331_v16 = vmul.f32 %v20300_v21, %v12877_v63 }
 0x503   : > { %14592 = vst [vmem:[%s20434_s24 + $0x40] sm:$0xff] %v14548_v14   ;;  %v13469_v56 = vadd.f32 %v20387_v24, %v13432_v3  ;;  %v13403_v19 = vmul.f32 %v15962_v41, %v20339_v17  ;;  %v13430_v32 = vadd.f32 %v13398_v10, %v13361_v48  ;;  %v13498_v20 = vmax.f32 %v13466_v54, 0.0 }
 0x504   : > { %v13235_v38 = vpop.f32.mrf.mxu0  ;;  %v12880_v57 = vadd.f32 %v15919_v47, %v12286_v55  ;;  %v12878_v33 = vadd.f32 %v12837_v29, %v12284_v45  ;;  %v13365_v7 = vadd.f32 %v20337_v22, %v13328_v62  ;;  %v13370_v36 = vadd.f32 %v20337_v22, %v13333_v31 }
 0x505   : > { %v13501_v43 = vmax.f32 %v13469_v56, 0.0  ;;  %v13435_v39 = vadd.f32 %v13403_v19, %v13366_v37  ;;  %v13401_v28 = vmul.f32 %v20339_v17, %v13235_v38  ;;  %v13467_v34 = vadd.f32 %v20387_v24, %v13430_v32 }
 0x506   : > { %v15963_v27 = vpop.f32.mrf.mxu0  ;;  %v13334_v35 = vmul.f32 %v20300_v21, %v12880_v57  ;;  %v13332_v1 = vmul.f32 %v20300_v21, %v12878_v33  ;;  %v13368_v53 = vadd.f32 %v20337_v22, %v13331_v16 }
 0x507   : > { %v14563_v2 = vpack.c.bf16 %v13501_v43, %v13500_v58  ;;  %v13433_v5 = vadd.f32 %v13401_v28, %v13364_v50  ;;  %v13404_v12 = vmul.f32 %v15963_v27, %v20339_v17  ;;  %v13499_v9 = vmax.f32 %v13467_v34, 0.0 }
 0x508   : > { %v13238_v49 = vpop.f32.mrf.mxu0  ;;  %v13472_v26 = vadd.f32 %v20387_v24, %v13435_v39  ;;  %v13371_v13 = vadd.f32 %v20337_v22, %v13334_v35  ;;  %v13369_v48 = vadd.f32 %v20337_v22, %v13332_v1 }
 0x509   : > { %14595 = vst [vmem:[%s20434_s24 + $0x58] sm:$0xff] %v14563_v2   ;;  %v13436_v15 = vadd.f32 %v13404_v12, %v13367_v51  ;;  %v13402_v8 = vmul.f32 %v20339_v17, %v13238_v49  ;;  %v14558_v60 = vpack.c.bf16 %v13499_v9, %v13498_v20  ;;  %v13470_v23 = vadd.f32 %v20387_v24, %v13433_v5 }
 0x50a   : > { %v15966_v61 = vpop.f32.mrf.mxu0  ;;  %v13504_v25 = vmax.f32 %v13472_v26, 0.0 }
 0x50b   : > { %v13473_v44 = vadd.f32 %v20387_v24, %v13436_v15  ;;  %v13434_v40 = vadd.f32 %v13402_v8, %v13365_v7  ;;  %v13407_v11 = vmul.f32 %v15966_v61, %v20339_v17  ;;  %14594 = vst [vmem:[%s20434_s24 + $0x50] sm:$0xff] %v14558_v60   ;;  %v13502_v0 = vmax.f32 %v13470_v23, 0.0 }
 0x50c   : > { %v13251_v6 = vpop.f32.mrf.mxu0 }
 0x50d   : > { %v13505_v18 = vmax.f32 %v13473_v44, 0.0  ;;  %v13471_v30 = vadd.f32 %v20387_v24, %v13434_v40  ;;  %v13405_v42 = vmul.f32 %v20339_v17, %v13251_v6  ;;  %v13439_v46 = vadd.f32 %v13407_v11, %v13370_v36 }
 0x50e   : > { %v15967_v59 = vpop.f32.mrf.mxu0 }
 0x50f   : > { %v14573_v55 = vpack.c.bf16 %v13505_v18, %v13504_v25  ;;  %v13503_v14 = vmax.f32 %v13471_v30, 0.0  ;;  %v13437_v21 = vadd.f32 %v13405_v42, %v13368_v53  ;;  %v13408_v3 = vmul.f32 %v15967_v59, %v20339_v17 }
 0x510   : > { %v13254_v47 = vpop.f32.mrf.mxu0  ;;  %v13476_v4 = vadd.f32 %v20387_v24, %v13439_v46 }
 0x511   : > { %14597 = vst [vmem:[%s20434_s24 + $0x68] sm:$0xff] %v14573_v55   ;;  %v14568_v52 = vpack.c.bf16 %v13503_v14, %v13502_v0  ;;  %v13406_v10 = vmul.f32 %v20339_v17, %v13254_v47  ;;  %v13440_v41 = vadd.f32 %v13408_v3, %v13371_v13  ;;  %v13474_v56 = vadd.f32 %v20387_v24, %v13437_v21 }
 0x512   : > { %v13508_v22 = vmax.f32 %v13476_v4, 0.0 }
 0x513   : > { %14596 = vst [vmem:[%s20434_s24 + $0x60] sm:$0xff] %v14568_v52   ;;  %v13438_v37 = vadd.f32 %v13406_v10, %v13369_v48  ;;  %v13477_v19 = vadd.f32 %v20387_v24, %v13440_v41  ;;  %v13506_v17 = vmax.f32 %v13474_v56, 0.0 }
 0x515   : > { %v13475_v63 = vadd.f32 %v20387_v24, %v13438_v37  ;;  %v13509_v54 = vmax.f32 %v13477_v19, 0.0 }
 0x517   : > { %v13507_v62 = vmax.f32 %v13475_v63, 0.0  ;;  %v14583_v32 = vpack.c.bf16 %v13509_v54, %v13508_v22 }
 0x519   : > { %v14578_v38 = vpack.c.bf16 %v13507_v62, %v13506_v17  ;;  %14599 = vst [vmem:[%s20434_s24 + $0x78] sm:$0xff] %v14583_v32  }
 0x51b   : > { %14598 = vst [vmem:[%s20434_s24 + $0x70] sm:$0xff] %v14578_v38  }
 0x51c   : > { %16490 = shalt.err (!%p16487_p5)
}
 0x51d   : > { %s16491_s29 = scalar_lea.hbm %s20597_s9, 2048  ;;  %s16495_s16 = scalar_lea.hbm %s20649_s5, 4096 }
 0x51e   : > { %p16492_p6 = scmp.ne.s32.totalorder %s20597_s9, %s16491_s29  ;;  %p16496_p9 = scmp.lt.s32.totalorder %s20597_s9, %s20649_s5 }
 0x51f   : > { %p16497_p2 = scmp.lt.s32.totalorder %s16495_s16, %s16491_s29 }
 0x520   : > { %p16493_p4 = pnand %p16492_p6, %p20924_p12 }
 0x521   : > { %p16498_p3 = por %p16497_p2, %p16496_p9 }
 0x522   : > { %p16494_p8 = pneg %p16493_p4 }
 0x524   : > { %p16499_p10 = pnand %p16498_p3, %p16494_p8 }
 0x526   : > { %16502 = shalt.err (!%p16499_p10)
}
 0x527   : > { %s16560_s26 = smov 64   ;;  %s16561_s28 = smov 4  }
 0x528   : > { %16002 = dma.vmem_to_hbm [thread:$0]  (%p20924_p12), %s20599_s11, 2048, %s20597_s9, %s13671_s22, %s16560_s26, %s16560_s26, %s16561_s28  }
 0x529 PF: > { %s13699_s6 = sand.u32 1, %s16537_s18   ;;  %p20925_p7 = scmp.ne.s32.totalorder %s20670_s25, 0 }
 0x52a   : > { %p20926_p1 = scmp.ge.s32.totalorder %s16549_s21, 2  ;;  %s13700_s23 = scalar_lea.sflag [#allocation7], %s13699_s6 }
 0x52c   : > { %p16022_p13 = pnand %p20926_p1, %p20925_p7 }
 0x52e   : > { %p16023_p0 = pneg %p16022_p13 }
 0x530   : > { %16532 = dma.done.wait (%p16023_p0), %s13700_s23, 2048  }
 0x531   : > { %16534 = vsyncadd (%p16023_p0), %s13700_s23, 4294965248  ;;  %p20_p11 = scmp.ge.s32.totalorder %s16689_s8, 4   ;;  %s20927_s18 = smov %s16541_s19 }
 0x532   : > { %s20928_s19 = smov %s16545_s20  ;;  %s20929_s20 = smov %s16705_s14 }
 0x533   : > { %s20930_s21 = smov %s16689_s8  ;;  %22 = sbr.rel (!%p20_p11) target bundleno = 7 (0x7), region = 123 }
 0x538   :  { %13705 = vsyncpa [#allocation6], 1 }
 0x539   :  { %13707 = vsyncpa [#allocation6 + $0x1], 1 }
 0x53a   :  { %13708 = vsyncpa [#allocation9], 1 }
 0x53b   :  { %13709 = vsyncpa [#allocation12], 1 }
 0x53c   :  { %13710 = vsyncpa [#allocation7], 1 }
 0x53d   :  { %13712 = vsyncpa [#allocation7 + $0x1], 1 }

</bundles_post_ra>
